<compile_context>
chip_gen: v5e
topology: v5e:2x2
jax: 0.10.0
libtpu: 0.0.40
codegen_flags: <defaults>
</compile_context>

<pallas_src>
import functools

import jax
import jax.numpy as jnp
from jax import lax
from jax.experimental import pallas as pl
from jax.experimental.pallas import tpu as pltpu


# ----------------------------------------------------------------------------
# Fully fused MMD kernel (per batch element)
# ----------------------------------------------------------------------------
def _mmd_fused_kernel(H, W, x_ref, w1_ref, w2_ref, s_ref, wf_ref,
                      scale_ref, shift_ref, mask_ref, o_ref):
    HW = H * W
    C = x_ref.shape[-1]
    Cout = o_ref.shape[-1]
    x = x_ref[0]                                           # (HW, C) concat features

    # --- Channel attention (3 modalities fused via block-diagonal FC weights) ---
    avg = jnp.mean(x, axis=0, keepdims=True)               # (1, C)
    mx = jnp.max(x, axis=0, keepdims=True)                 # (1, C)
    pooled = jnp.concatenate([avg, mx], axis=0)            # (2, C)
    hid = jnp.maximum(
        jnp.dot(pooled, w1_ref[...], preferred_element_type=jnp.float32), 0.0)
    fc = jnp.dot(hid, w2_ref[...], preferred_element_type=jnp.float32)   # (2, C)
    gate_c = jax.nn.sigmoid(jnp.sum(fc, axis=0, keepdims=True))          # (1, C)
    xg = x * gate_c                                        # (HW, C)

    # --- Spatial attention: dense 7x7 stencil applied to explicit mean/max ---
    # logit[p] = sum_q S_mean[p,q]*mean_c(xg[q]) + S_max[p,q]*max_c(xg[q])
    cmean = jnp.mean(xg, axis=1, keepdims=True)            # (HW, 1)
    cmax = jnp.max(xg, axis=1, keepdims=True)              # (HW, 1)
    stats = jnp.concatenate([cmean, cmax], axis=0)         # (2*HW, 1)
    logit = jnp.dot(s_ref[...], stats,
                    preferred_element_type=jnp.float32)    # (HW, 1) mat-vec
    xsg = xg * jax.nn.sigmoid(logit)                       # (HW, C)

    # --- Fusion 3x3 conv: 9 accumulating (HW,C)x(C,Cout) bf16 matmuls, f32 acc ---
    acc = None
    for k in range(9):
        dh, dw = k // 3 - 1, k % 3 - 1
        off = dh * W + dw                                   # source offset (p + off)
        if off == 0:
            tap = xsg
        else:
            # XLU sublane rotate; wrapped rows are all zeroed by the border mask.
            tap = pltpu.roll(xsg, shift=(-off) % HW, axis=0)
            tap = tap * mask_ref[:, k:k + 1]                # host-built border mask
        part = jnp.dot(tap.astype(jnp.bfloat16),
                       wf_ref[k * C:(k + 1) * C, :],
                       preferred_element_type=jnp.float32)  # (HW, Cout)
        acc = part if acc is None else acc + part
    y = jnp.maximum(acc * scale_ref[...] + shift_ref[...], 0.0)   # bias+BN(eval)+ReLU
    o_ref[0] = y.astype(o_ref.dtype)


# ----------------------------------------------------------------------------
# Host-side prep helpers (run ONCE, outside the per-call jitted path)
# ----------------------------------------------------------------------------
def _block_diag(*mats):
    rows = sum(m.shape[0] for m in mats)
    cols = sum(m.shape[1] for m in mats)
    out = jnp.zeros((rows, cols), mats[0].dtype)
    r = c = 0
    for m in mats:
        out = out.at[r:r + m.shape[0], c:c + m.shape[1]].set(m)
        r += m.shape[0]
        c += m.shape[1]
    return out


def _build_spatial_matrix(sa_w, H, W):
    """Dense (HW, 2*HW) matrix encoding the 7x7 'SAME' conv over [mean; max] maps."""
    HW = H * W
    p = jnp.arange(HW)
    ph, pw = p // W, p % W
    dh = ph[None, :] - ph[:, None]          # source-row offset (q relative to p)
    dw = pw[None, :] - pw[:, None]          # source-col offset
    valid = (jnp.abs(dh) <= 3) & (jnp.abs(dw) <= 3)
    kh = jnp.clip(dh + 3, 0, 6)
    kw = jnp.clip(dw + 3, 0, 6)
    taps = sa_w[:, kh, kw]                  # (2, HW, HW)
    taps = jnp.where(valid[None], taps, 0.0)
    return jnp.concatenate([taps[0], taps[1]], axis=1)     # [S_mean | S_max]


def _build_tap_masks(H, W):
    """(HW, 9) f32 per-tap border masks for the 3x3 fusion conv (zero-padding)."""
    HW = H * W
    p = jnp.arange(HW)
    ph, pw = p // W, p % W
    cols = []
    for k in range(9):
        dh, dw = k // 3 - 1, k % 3 - 1
        valid = ((ph + dh >= 0) & (ph + dh < H) &
                 (pw + dw >= 0) & (pw + dw < W))
        cols.append(valid.astype(jnp.float32))
    return jnp.stack(cols, axis=1)


def prepare_params(params, H, W, eps=1e-5):
    """Precompute every static, shape-dependent operand once ('prepared params')."""
    Cin = params["fuse_w"].shape[2]
    Cout = params["fuse_w"].shape[3]
    w1bd = _block_diag(params["ca_d_w1"], params["ca_s_w1"], params["ca_v_w1"])  # (C, R)
    w2bd = _block_diag(params["ca_d_w2"], params["ca_s_w2"], params["ca_v_w2"])  # (R, C)
    s_mat = _build_spatial_matrix(params["sa_w"], H, W)                          # (HW, 2HW)
    wf = params["fuse_w"].reshape(9 * Cin, Cout).astype(jnp.bfloat16)            # (9C, Cout)
    # Fold conv bias + BatchNorm (inference mode) into per-channel scale/shift.
    scale = params["bn_gamma"] / jnp.sqrt(params["bn_var"] + eps)
    shift = params["bn_beta"] + (params["fuse_b"] - params["bn_mean"]) * scale
    tap_mask = _build_tap_masks(H, W)
    return {
        "w1bd": w1bd, "w2bd": w2bd, "s_mat": s_mat, "wf": wf,
        "scale": scale[None, :], "shift": shift[None, :], "tap_mask": tap_mask,
    }


# ----------------------------------------------------------------------------
# Jitted forward (only per-call work: layout + one pallas_call + final NCHW)
# ----------------------------------------------------------------------------
@jax.jit
def mmd_forward(prep, depth, seg, vec):
    B, _, H, W = depth.shape
    HW = H * W

    def to_flat_hwc(t):
        return jnp.transpose(t, (0, 2, 3, 1)).reshape(B, HW, t.shape[1])

    comb = jnp.concatenate(
        [to_flat_hwc(depth), to_flat_hwc(seg), to_flat_hwc(vec)], axis=-1)  # (B, HW, C)
    C = comb.shape[-1]
    Cout = prep["scale"].shape[-1]

    kernel = functools.partial(_mmd_fused_kernel, H, W)
    out = pl.pallas_call(
        kernel,
        out_shape=jax.ShapeDtypeStruct((B, HW, Cout), jnp.float32),
        grid=(B,),
        in_specs=[
            pl.BlockSpec((1, HW, C), lambda b: (b, 0, 0)),
            pl.BlockSpec(prep["w1bd"].shape, lambda b: (0, 0)),
            pl.BlockSpec(prep["w2bd"].shape, lambda b: (0, 0)),
            pl.BlockSpec((HW, 2 * HW), lambda b: (0, 0)),
            pl.BlockSpec((9 * C, Cout), lambda b: (0, 0)),
            pl.BlockSpec((1, Cout), lambda b: (0, 0)),
            pl.BlockSpec((1, Cout), lambda b: (0, 0)),
            pl.BlockSpec((HW, 9), lambda b: (0, 0)),
        ],
        out_specs=pl.BlockSpec((1, HW, Cout), lambda b: (b, 0, 0)),
        compiler_params=pltpu.CompilerParams(
            dimension_semantics=("parallel",),
            vmem_limit_bytes=32 * 1024 * 1024),
    )(comb, prep["w1bd"], prep["w2bd"], prep["s_mat"], prep["wf"],
      prep["scale"], prep["shift"], prep["tap_mask"])
    # (B, HW, Cout) -> NCHW (module contract)
    return jnp.transpose(out, (0, 2, 1)).reshape(B, Cout, H, W)


# ----------------------------------------------------------------------------
# Parameter init (deterministic, matches module shapes)
# ----------------------------------------------------------------------------
def init_params(key, dc, sc, vc, cout=256, reduction=16):
    ks = jax.random.split(key, 12)
    params = {}
    for name, C, k1, k2 in (("d", dc, ks[0], ks[1]),
                            ("s", sc, ks[2], ks[3]),
                            ("v", vc, ks[4], ks[5])):
        R = C // reduction
        # stored already transposed: y = x @ w1 ; relu ; @ w2
        params[f"ca_{name}_w1"] = jax.random.normal(k1, (C, R), jnp.float32) / jnp.sqrt(C)
        params[f"ca_{name}_w2"] = jax.random.normal(k2, (R, C), jnp.float32) / jnp.sqrt(R)
    params["sa_w"] = jax.random.normal(ks[6], (2, 7, 7), jnp.float32) * 0.1   # conv (1,2,7,7)
    Cin = dc + sc + vc
    params["fuse_w"] = jax.random.normal(ks[7], (3, 3, Cin, cout), jnp.float32) / jnp.sqrt(9 * Cin)
    params["fuse_b"] = jax.random.normal(ks[8], (cout,), jnp.float32) * 0.1
    params["bn_gamma"] = 1.0 + 0.1 * jax.random.normal(ks[9], (cout,), jnp.float32)
    params["bn_beta"] = 0.1 * jax.random.normal(ks[10], (cout,), jnp.float32)
    params["bn_mean"] = 0.1 * jax.random.normal(ks[11], (cout,), jnp.float32)
    params["bn_var"] = jnp.ones((cout,), jnp.float32)
    return params


# Pure-JAX reference (same math, XLA ops) for a sanity check.
def mmd_reference(params, depth, seg, vec, eps=1e-5):
    def ca(x, w1, w2):
        avg = x.mean(axis=(2, 3))
        mx = x.max(axis=(2, 3))
        def fc(t):
            return jnp.maximum(t @ w1, 0.0) @ w2
        return x * jax.nn.sigmoid(fc(avg) + fc(mx))[:, :, None, None]

    d = ca(depth, params["ca_d_w1"], params["ca_d_w2"])
    s = ca(seg, params["ca_s_w1"], params["ca_s_w2"])
    v = ca(vec, params["ca_v_w1"], params["ca_v_w2"])
    comb = jnp.concatenate([d, s, v], axis=1)
    maps = jnp.concatenate([comb.mean(axis=1, keepdims=True),
                            comb.max(axis=1, keepdims=True)], axis=1)
    sw = lax.conv_general_dilated(maps, params["sa_w"][None], (1, 1), "SAME",
                                  dimension_numbers=("NCHW", "OIHW", "NCHW"))
    comb = comb * jax.nn.sigmoid(sw)
    y = lax.conv_general_dilated(comb, params["fuse_w"], (1, 1), "SAME",
                                 dimension_numbers=("NCHW", "HWIO", "NCHW"))
    y = y + params["fuse_b"][None, :, None, None]
    y = (y - params["bn_mean"][None, :, None, None]) * (
        params["bn_gamma"] / jnp.sqrt(params["bn_var"] + eps))[None, :, None, None]
    y = y + params["bn_beta"][None, :, None, None]
    return jnp.maximum(y, 0.0)


if __name__ == "__main__":
    B, H, W = 2, 16, 16
    depth_c, seg_c, vec_c = 32, 32, 64

    key = jax.random.PRNGKey(0)
    kd, ks_, kv, kp = jax.random.split(key, 4)
    depth = jax.random.normal(kd, (B, depth_c, H, W), jnp.float32)
    seg = jax.random.normal(ks_, (B, seg_c, H, W), jnp.float32)
    vec = jax.random.normal(kv, (B, vec_c, H, W), jnp.float32)
    params = init_params(kp, depth_c, seg_c, vec_c)

    # Host-side prep done once, outside the jitted per-call path.
    prep = prepare_params(params, H, W)

    out = jax.block_until_ready(mmd_forward(prep, depth, seg, vec))
    assert out.shape == (B, 256, H, W), out.shape

    ref = jax.block_until_ready(mmd_reference(params, depth, seg, vec))
    max_err = float(jnp.max(jnp.abs(out - ref)))
    assert max_err < 5e-2, f"max abs error vs reference too large: {max_err}"

    print("KERNEL_OK")
</pallas_src>

<mosaic_0001>
module attributes {stable_mosaic.version = 11 : i64} {
  func.func @_mmd_fused_kernel(%arg0: i32, %arg1: memref<1x256x128xf32, #tpu.memory_space<vmem>>, %arg2: memref<128x8xf32, #tpu.memory_space<vmem>>, %arg3: memref<8x128xf32, #tpu.memory_space<vmem>>, %arg4: memref<256x512xf32, #tpu.memory_space<vmem>>, %arg5: memref<1152x256xbf16, #tpu.memory_space<vmem>>, %arg6: memref<1x256xf32, #tpu.memory_space<vmem>>, %arg7: memref<1x256xf32, #tpu.memory_space<vmem>>, %arg8: memref<256x9xf32, #tpu.memory_space<vmem>>, %arg9: memref<1x256x256xf32, #tpu.memory_space<vmem>>) attributes {dimension_semantics = [#tpu.dimension_semantics<parallel>], iteration_bounds = array<i64: 2>, scalar_prefetch = 0 : i64, scratch_operands = 0 : i64, tpu.core_type = #tpu.core_type<tc>, window_params = [{transform_indices = @transform_0, window_bounds = array<i64: 1, 256, 128>}, {pipeline_mode = #tpu.pipeline_mode<synchronous>, transform_indices = @transform_1, window_bounds = array<i64: 128, 8>}, {pipeline_mode = #tpu.pipeline_mode<synchronous>, transform_indices = @transform_2, window_bounds = array<i64: 8, 128>}, {pipeline_mode = #tpu.pipeline_mode<synchronous>, transform_indices = @transform_3, window_bounds = array<i64: 256, 512>}, {pipeline_mode = #tpu.pipeline_mode<synchronous>, transform_indices = @transform_4, window_bounds = array<i64: 1152, 256>}, {pipeline_mode = #tpu.pipeline_mode<synchronous>, transform_indices = @transform_5, window_bounds = array<i64: 1, 256>}, {pipeline_mode = #tpu.pipeline_mode<synchronous>, transform_indices = @transform_6, window_bounds = array<i64: 1, 256>}, {pipeline_mode = #tpu.pipeline_mode<synchronous>, transform_indices = @transform_7, window_bounds = array<i64: 256, 9>}, {transform_indices = @transform_8, window_bounds = array<i64: 1, 256, 256>}]} {
    %c0 = arith.constant 0 : index
    %c0_0 = arith.constant 0 : index
    %c0_1 = arith.constant 0 : index
    %0 = vector.load %arg1[%c0, %c0_0, %c0_1] : memref<1x256x128xf32, #tpu.memory_space<vmem>>, vector<1x256x128xf32>
    %1 = vector.shape_cast %0 : vector<1x256x128xf32> to vector<256x128xf32>
    %cst = arith.constant dense<0.000000e+00> : vector<128xf32>
    %2 = vector.multi_reduction <add>, %1, %cst [0] : vector<256x128xf32> to vector<128xf32>
    %3 = vector.shape_cast %2 : vector<128xf32> to vector<1x128xf32>
    %cst_2 = arith.constant 2.560000e+02 : f32
    %4 = vector.broadcast %cst_2 : f32 to vector<1x128xf32>
    %5 = arith.divf %3, %4 : vector<1x128xf32>
    %cst_3 = arith.constant dense<0xFF800000> : vector<128xf32>
    %6 = vector.multi_reduction <maximumf>, %1, %cst_3 [0] : vector<256x128xf32> to vector<128xf32>
    %7 = vector.shape_cast %6 : vector<128xf32> to vector<1x128xf32>
    %8 = tpu.concatenate %5, %7 in 0 : vector<1x128xf32>, vector<1x128xf32> -> vector<2x128xf32>
    %c0_4 = arith.constant 0 : index
    %c0_5 = arith.constant 0 : index
    %9 = vector.load %arg2[%c0_4, %c0_5] : memref<128x8xf32, #tpu.memory_space<vmem>>, vector<128x8xf32>
    %cst_6 = arith.constant dense<0.000000e+00> : vector<2x8xf32>
    %10 = tpu.matmul %8, %9, %cst_6 {dimension_numbers = #tpu.dot_dimension_numbers<[1], [0], [0], [1], [0, 0, 1, 1], [], []>} : vector<2x128xf32>, vector<128x8xf32>, vector<2x8xf32> -> vector<2x8xf32>
    %cst_7 = arith.constant 0.000000e+00 : f32
    %11 = vector.broadcast %cst_7 : f32 to vector<2x8xf32>
    %12 = arith.maximumf %10, %11 : vector<2x8xf32>
    %c0_8 = arith.constant 0 : index
    %c0_9 = arith.constant 0 : index
    %13 = vector.load %arg3[%c0_8, %c0_9] : memref<8x128xf32, #tpu.memory_space<vmem>>, vector<8x128xf32>
    %cst_10 = arith.constant dense<0.000000e+00> : vector<2x128xf32>
    %14 = tpu.matmul %12, %13, %cst_10 {dimension_numbers = #tpu.dot_dimension_numbers<[1], [0], [0], [1], [0, 0, 1, 1], [], []>} : vector<2x8xf32>, vector<8x128xf32>, vector<2x128xf32> -> vector<2x128xf32>
    %cst_11 = arith.constant dense<0.000000e+00> : vector<128xf32>
    %15 = vector.multi_reduction <add>, %14, %cst_11 [0] : vector<2x128xf32> to vector<128xf32>
    %16 = vector.shape_cast %15 : vector<128xf32> to vector<1x128xf32>
    %17 = arith.negf %16 : vector<1x128xf32>
    %18 = math.exp %17 : vector<1x128xf32>
    %cst_12 = arith.constant 1.000000e+00 : f32
    %19 = vector.broadcast %cst_12 : f32 to vector<1x128xf32>
    %20 = arith.addf %19, %18 : vector<1x128xf32>
    %21 = arith.divf %19, %20 : vector<1x128xf32>
    %22 = vector.broadcast %21 : vector<1x128xf32> to vector<256x128xf32>
    %23 = arith.mulf %1, %22 : vector<256x128xf32>
    %cst_13 = arith.constant dense<0.000000e+00> : vector<256xf32>
    %24 = vector.multi_reduction <add>, %23, %cst_13 [1] : vector<256x128xf32> to vector<256xf32>
    %25 = vector.shape_cast %24 : vector<256xf32> to vector<256x1xf32>
    %cst_14 = arith.constant 1.280000e+02 : f32
    %26 = vector.broadcast %cst_14 : f32 to vector<256x1xf32>
    %27 = arith.divf %25, %26 : vector<256x1xf32>
    %cst_15 = arith.constant dense<0xFF800000> : vector<256xf32>
    %28 = vector.multi_reduction <maximumf>, %23, %cst_15 [1] : vector<256x128xf32> to vector<256xf32>
    %29 = vector.shape_cast %28 : vector<256xf32> to vector<256x1xf32>
    %30 = tpu.concatenate %27, %29 in 0 : vector<256x1xf32>, vector<256x1xf32> -> vector<512x1xf32>
    %c0_16 = arith.constant 0 : index
    %c0_17 = arith.constant 0 : index
    %31 = vector.load %arg4[%c0_16, %c0_17] : memref<256x512xf32, #tpu.memory_space<vmem>>, vector<256x512xf32>
    %cst_18 = arith.constant dense<0.000000e+00> : vector<256x1xf32>
    %32 = tpu.matmul %31, %30, %cst_18 {dimension_numbers = #tpu.dot_dimension_numbers<[1], [0], [0], [1], [0, 0, 1, 1], [], []>} : vector<256x512xf32>, vector<512x1xf32>, vector<256x1xf32> -> vector<256x1xf32>
    %33 = arith.negf %32 : vector<256x1xf32>
    %34 = math.exp %33 : vector<256x1xf32>
    %cst_19 = arith.constant 1.000000e+00 : f32
    %35 = vector.broadcast %cst_19 : f32 to vector<256x1xf32>
    %36 = arith.addf %35, %34 : vector<256x1xf32>
    %37 = arith.divf %35, %36 : vector<256x1xf32>
    %38 = vector.broadcast %37 : vector<256x1xf32> to vector<256x128xf32>
    %39 = arith.mulf %23, %38 : vector<256x128xf32>
    %c17_i32 = arith.constant 17 : i32
    %40 = tpu.dynamic_rotate %39 by %c17_i32 dim 0 : vector<256x128xf32>, i32 -> vector<256x128xf32>
    %c0_20 = arith.constant 0 : index
    %c0_21 = arith.constant 0 : index
    %41 = vector.load %arg8[%c0_20, %c0_21] : memref<256x9xf32, #tpu.memory_space<vmem>>, vector<256x1xf32>
    %42 = vector.broadcast %41 : vector<256x1xf32> to vector<256x128xf32>
    %43 = arith.mulf %40, %42 : vector<256x128xf32>
    %44 = arith.truncf %43 : vector<256x128xf32> to vector<256x128xbf16>
    %c0_22 = arith.constant 0 : index
    %c0_23 = arith.constant 0 : index
    %45 = vector.load %arg5[%c0_22, %c0_23] : memref<1152x256xbf16, #tpu.memory_space<vmem>>, vector<128x256xbf16>
    %cst_24 = arith.constant dense<0.000000e+00> : vector<256x256xf32>
    %46 = tpu.matmul %44, %45, %cst_24 {dimension_numbers = #tpu.dot_dimension_numbers<[1], [0], [0], [1], [0, 0, 1, 1], [], []>} : vector<256x128xbf16>, vector<128x256xbf16>, vector<256x256xf32> -> vector<256x256xf32>
    %c16_i32 = arith.constant 16 : i32
    %47 = tpu.dynamic_rotate %39 by %c16_i32 dim 0 : vector<256x128xf32>, i32 -> vector<256x128xf32>
    %c0_25 = arith.constant 0 : index
    %c1 = arith.constant 1 : index
    %48 = vector.load %arg8[%c0_25, %c1] : memref<256x9xf32, #tpu.memory_space<vmem>>, vector<256x1xf32>
    %49 = vector.broadcast %48 : vector<256x1xf32> to vector<256x128xf32>
    %50 = arith.mulf %47, %49 : vector<256x128xf32>
    %51 = arith.truncf %50 : vector<256x128xf32> to vector<256x128xbf16>
    %c128 = arith.constant 128 : index
    %c0_26 = arith.constant 0 : index
    %52 = vector.load %arg5[%c128, %c0_26] : memref<1152x256xbf16, #tpu.memory_space<vmem>>, vector<128x256xbf16>
    %cst_27 = arith.constant dense<0.000000e+00> : vector<256x256xf32>
    %53 = tpu.matmul %51, %52, %cst_27 {dimension_numbers = #tpu.dot_dimension_numbers<[1], [0], [0], [1], [0, 0, 1, 1], [], []>} : vector<256x128xbf16>, vector<128x256xbf16>, vector<256x256xf32> -> vector<256x256xf32>
    %54 = arith.addf %46, %53 : vector<256x256xf32>
    %c15_i32 = arith.constant 15 : i32
    %55 = tpu.dynamic_rotate %39 by %c15_i32 dim 0 : vector<256x128xf32>, i32 -> vector<256x128xf32>
    %c0_28 = arith.constant 0 : index
    %c2 = arith.constant 2 : index
    %56 = vector.load %arg8[%c0_28, %c2] : memref<256x9xf32, #tpu.memory_space<vmem>>, vector<256x1xf32>
    %57 = vector.broadcast %56 : vector<256x1xf32> to vector<256x128xf32>
    %58 = arith.mulf %55, %57 : vector<256x128xf32>
    %59 = arith.truncf %58 : vector<256x128xf32> to vector<256x128xbf16>
    %c256 = arith.constant 256 : index
    %c0_29 = arith.constant 0 : index
    %60 = vector.load %arg5[%c256, %c0_29] : memref<1152x256xbf16, #tpu.memory_space<vmem>>, vector<128x256xbf16>
    %cst_30 = arith.constant dense<0.000000e+00> : vector<256x256xf32>
    %61 = tpu.matmul %59, %60, %cst_30 {dimension_numbers = #tpu.dot_dimension_numbers<[1], [0], [0], [1], [0, 0, 1, 1], [], []>} : vector<256x128xbf16>, vector<128x256xbf16>, vector<256x256xf32> -> vector<256x256xf32>
    %62 = arith.addf %54, %61 : vector<256x256xf32>
    %c1_i32 = arith.constant 1 : i32
    %63 = tpu.dynamic_rotate %39 by %c1_i32 dim 0 : vector<256x128xf32>, i32 -> vector<256x128xf32>
    %c0_31 = arith.constant 0 : index
    %c3 = arith.constant 3 : index
    %64 = vector.load %arg8[%c0_31, %c3] : memref<256x9xf32, #tpu.memory_space<vmem>>, vector<256x1xf32>
    %65 = vector.broadcast %64 : vector<256x1xf32> to vector<256x128xf32>
    %66 = arith.mulf %63, %65 : vector<256x128xf32>
    %67 = arith.truncf %66 : vector<256x128xf32> to vector<256x128xbf16>
    %c384 = arith.constant 384 : index
    %c0_32 = arith.constant 0 : index
    %68 = vector.load %arg5[%c384, %c0_32] : memref<1152x256xbf16, #tpu.memory_space<vmem>>, vector<128x256xbf16>
    %cst_33 = arith.constant dense<0.000000e+00> : vector<256x256xf32>
    %69 = tpu.matmul %67, %68, %cst_33 {dimension_numbers = #tpu.dot_dimension_numbers<[1], [0], [0], [1], [0, 0, 1, 1], [], []>} : vector<256x128xbf16>, vector<128x256xbf16>, vector<256x256xf32> -> vector<256x256xf32>
    %70 = arith.addf %62, %69 : vector<256x256xf32>
    %71 = arith.truncf %39 : vector<256x128xf32> to vector<256x128xbf16>
    %c512 = arith.constant 512 : index
    %c0_34 = arith.constant 0 : index
    %72 = vector.load %arg5[%c512, %c0_34] : memref<1152x256xbf16, #tpu.memory_space<vmem>>, vector<128x256xbf16>
    %cst_35 = arith.constant dense<0.000000e+00> : vector<256x256xf32>
    %73 = tpu.matmul %71, %72, %cst_35 {dimension_numbers = #tpu.dot_dimension_numbers<[1], [0], [0], [1], [0, 0, 1, 1], [], []>} : vector<256x128xbf16>, vector<128x256xbf16>, vector<256x256xf32> -> vector<256x256xf32>
    %74 = arith.addf %70, %73 : vector<256x256xf32>
    %c255_i32 = arith.constant 255 : i32
    %75 = tpu.dynamic_rotate %39 by %c255_i32 dim 0 : vector<256x128xf32>, i32 -> vector<256x128xf32>
    %c0_36 = arith.constant 0 : index
    %c5 = arith.constant 5 : index
    %76 = vector.load %arg8[%c0_36, %c5] : memref<256x9xf32, #tpu.memory_space<vmem>>, vector<256x1xf32>
    %77 = vector.broadcast %76 : vector<256x1xf32> to vector<256x128xf32>
    %78 = arith.mulf %75, %77 : vector<256x128xf32>
    %79 = arith.truncf %78 : vector<256x128xf32> to vector<256x128xbf16>
    %c640 = arith.constant 640 : index
    %c0_37 = arith.constant 0 : index
    %80 = vector.load %arg5[%c640, %c0_37] : memref<1152x256xbf16, #tpu.memory_space<vmem>>, vector<128x256xbf16>
    %cst_38 = arith.constant dense<0.000000e+00> : vector<256x256xf32>
    %81 = tpu.matmul %79, %80, %cst_38 {dimension_numbers = #tpu.dot_dimension_numbers<[1], [0], [0], [1], [0, 0, 1, 1], [], []>} : vector<256x128xbf16>, vector<128x256xbf16>, vector<256x256xf32> -> vector<256x256xf32>
    %82 = arith.addf %74, %81 : vector<256x256xf32>
    %c241_i32 = arith.constant 241 : i32
    %83 = tpu.dynamic_rotate %39 by %c241_i32 dim 0 : vector<256x128xf32>, i32 -> vector<256x128xf32>
    %c0_39 = arith.constant 0 : index
    %c6 = arith.constant 6 : index
    %84 = vector.load %arg8[%c0_39, %c6] : memref<256x9xf32, #tpu.memory_space<vmem>>, vector<256x1xf32>
    %85 = vector.broadcast %84 : vector<256x1xf32> to vector<256x128xf32>
    %86 = arith.mulf %83, %85 : vector<256x128xf32>
    %87 = arith.truncf %86 : vector<256x128xf32> to vector<256x128xbf16>
    %c768 = arith.constant 768 : index
    %c0_40 = arith.constant 0 : index
    %88 = vector.load %arg5[%c768, %c0_40] : memref<1152x256xbf16, #tpu.memory_space<vmem>>, vector<128x256xbf16>
    %cst_41 = arith.constant dense<0.000000e+00> : vector<256x256xf32>
    %89 = tpu.matmul %87, %88, %cst_41 {dimension_numbers = #tpu.dot_dimension_numbers<[1], [0], [0], [1], [0, 0, 1, 1], [], []>} : vector<256x128xbf16>, vector<128x256xbf16>, vector<256x256xf32> -> vector<256x256xf32>
    %90 = arith.addf %82, %89 : vector<256x256xf32>
    %c240_i32 = arith.constant 240 : i32
    %91 = tpu.dynamic_rotate %39 by %c240_i32 dim 0 : vector<256x128xf32>, i32 -> vector<256x128xf32>
    %c0_42 = arith.constant 0 : index
    %c7 = arith.constant 7 : index
    %92 = vector.load %arg8[%c0_42, %c7] : memref<256x9xf32, #tpu.memory_space<vmem>>, vector<256x1xf32>
    %93 = vector.broadcast %92 : vector<256x1xf32> to vector<256x128xf32>
    %94 = arith.mulf %91, %93 : vector<256x128xf32>
    %95 = arith.truncf %94 : vector<256x128xf32> to vector<256x128xbf16>
    %c896 = arith.constant 896 : index
    %c0_43 = arith.constant 0 : index
    %96 = vector.load %arg5[%c896, %c0_43] : memref<1152x256xbf16, #tpu.memory_space<vmem>>, vector<128x256xbf16>
    %cst_44 = arith.constant dense<0.000000e+00> : vector<256x256xf32>
    %97 = tpu.matmul %95, %96, %cst_44 {dimension_numbers = #tpu.dot_dimension_numbers<[1], [0], [0], [1], [0, 0, 1, 1], [], []>} : vector<256x128xbf16>, vector<128x256xbf16>, vector<256x256xf32> -> vector<256x256xf32>
    %98 = arith.addf %90, %97 : vector<256x256xf32>
    %c239_i32 = arith.constant 239 : i32
    %99 = tpu.dynamic_rotate %39 by %c239_i32 dim 0 : vector<256x128xf32>, i32 -> vector<256x128xf32>
    %c0_45 = arith.constant 0 : index
    %c8 = arith.constant 8 : index
    %100 = vector.load %arg8[%c0_45, %c8] : memref<256x9xf32, #tpu.memory_space<vmem>>, vector<256x1xf32>
    %101 = vector.broadcast %100 : vector<256x1xf32> to vector<256x128xf32>
    %102 = arith.mulf %99, %101 : vector<256x128xf32>
    %103 = arith.truncf %102 : vector<256x128xf32> to vector<256x128xbf16>
    %c1024 = arith.constant 1024 : index
    %c0_46 = arith.constant 0 : index
    %104 = vector.load %arg5[%c1024, %c0_46] : memref<1152x256xbf16, #tpu.memory_space<vmem>>, vector<128x256xbf16>
    %cst_47 = arith.constant dense<0.000000e+00> : vector<256x256xf32>
    %105 = tpu.matmul %103, %104, %cst_47 {dimension_numbers = #tpu.dot_dimension_numbers<[1], [0], [0], [1], [0, 0, 1, 1], [], []>} : vector<256x128xbf16>, vector<128x256xbf16>, vector<256x256xf32> -> vector<256x256xf32>
    %106 = arith.addf %98, %105 : vector<256x256xf32>
    %c0_48 = arith.constant 0 : index
    %c0_49 = arith.constant 0 : index
    %107 = vector.load %arg6[%c0_48, %c0_49] : memref<1x256xf32, #tpu.memory_space<vmem>>, vector<1x256xf32>
    %108 = vector.broadcast %107 : vector<1x256xf32> to vector<256x256xf32>
    %109 = arith.mulf %106, %108 : vector<256x256xf32>
    %c0_50 = arith.constant 0 : index
    %c0_51 = arith.constant 0 : index
    %110 = vector.load %arg7[%c0_50, %c0_51] : memref<1x256xf32, #tpu.memory_space<vmem>>, vector<1x256xf32>
    %111 = vector.broadcast %110 : vector<1x256xf32> to vector<256x256xf32>
    %112 = arith.addf %109, %111 : vector<256x256xf32>
    %cst_52 = arith.constant 0.000000e+00 : f32
    %113 = vector.broadcast %cst_52 : f32 to vector<256x256xf32>
    %114 = arith.maximumf %112, %113 : vector<256x256xf32>
    %c0_53 = arith.constant 0 : index
    %c0_54 = arith.constant 0 : index
    %c0_55 = arith.constant 0 : index
    %115 = vector.load %arg9[%c0_53, %c0_54, %c0_55] : memref<1x256x256xf32, #tpu.memory_space<vmem>>, vector<1x256x256xf32>
    %116 = vector.shape_cast %115 : vector<1x256x256xf32> to vector<256x256xf32>
    %117 = vector.shape_cast %114 : vector<256x256xf32> to vector<1x256x256xf32>
    tpu.vector_store %arg9[%c0_53, %c0_54, %c0_55], %117 {strides = array<i32>} : memref<1x256x256xf32, #tpu.memory_space<vmem>>, vector<1x256x256xf32>,
    return
  }
  func.func @transform_0(%arg0: i32) -> (i32, i32, i32) {
    %c0_i32 = arith.constant 0 : i32
    %c0_i32_0 = arith.constant 0 : i32
    %c0_i32_1 = arith.constant 0 : i32
    return %arg0, %c0_i32, %c0_i32_0 : i32, i32, i32
  }
  func.func @transform_1(%arg0: i32) -> (i32, i32) {
    %c0_i32 = arith.constant 0 : i32
    %c0_i32_0 = arith.constant 0 : i32
    %c0_i32_1 = arith.constant 0 : i32
    return %c0_i32, %c0_i32_0 : i32, i32
  }
  func.func @transform_2(%arg0: i32) -> (i32, i32) {
    %c0_i32 = arith.constant 0 : i32
    %c0_i32_0 = arith.constant 0 : i32
    %c0_i32_1 = arith.constant 0 : i32
    return %c0_i32, %c0_i32_0 : i32, i32
  }
  func.func @transform_3(%arg0: i32) -> (i32, i32) {
    %c0_i32 = arith.constant 0 : i32
    %c0_i32_0 = arith.constant 0 : i32
    %c0_i32_1 = arith.constant 0 : i32
    return %c0_i32, %c0_i32_0 : i32, i32
  }
  func.func @transform_4(%arg0: i32) -> (i32, i32) {
    %c0_i32 = arith.constant 0 : i32
    %c0_i32_0 = arith.constant 0 : i32
    %c0_i32_1 = arith.constant 0 : i32
    return %c0_i32, %c0_i32_0 : i32, i32
  }
  func.func @transform_5(%arg0: i32) -> (i32, i32) {
    %c0_i32 = arith.constant 0 : i32
    %c0_i32_0 = arith.constant 0 : i32
    %c0_i32_1 = arith.constant 0 : i32
    return %c0_i32, %c0_i32_0 : i32, i32
  }
  func.func @transform_6(%arg0: i32) -> (i32, i32) {
    %c0_i32 = arith.constant 0 : i32
    %c0_i32_0 = arith.constant 0 : i32
    %c0_i32_1 = arith.constant 0 : i32
    return %c0_i32, %c0_i32_0 : i32, i32
  }
  func.func @transform_7(%arg0: i32) -> (i32, i32) {
    %c0_i32 = arith.constant 0 : i32
    %c0_i32_0 = arith.constant 0 : i32
    %c0_i32_1 = arith.constant 0 : i32
    return %c0_i32, %c0_i32_0 : i32, i32
  }
  func.func @transform_8(%arg0: i32) -> (i32, i32, i32) {
    %c0_i32 = arith.constant 0 : i32
    %c0_i32_0 = arith.constant 0 : i32
    %c0_i32_1 = arith.constant 0 : i32
    return %arg0, %c0_i32, %c0_i32_0 : i32, i32, i32
  }
}

</mosaic_0001>

<bundles_post_ra>
// kernel: mmd_forward.1
= control target key start
LH: loop header
LB: loop body
LE: loop exit
PB: predicated region body
PF: predicated region fallthrough
CT: control target
= control target key end

     0   :  { %13 = vsyncpa [#allocation3], 0  ;;  %s14305_s0 = inlined_call_operand.vmem [shape: f32[2,256,128], index: 0, kind: input, shape index: {}]   ;;  %s14306_s1 = inlined_call_operand.vmem [shape: f32[128,8], index: 1, kind: input, shape index: {}]   ;;  %s14307_s2 = inlined_call_operand.vmem [shape: f32[8,128], index: 2, kind: input, shape index: {}]   ;;  %s14308_s3 = inlined_call_operand.vmem [shape: f32[256,512], index: 3, kind: input, shape index: {}]   ;;  %s14309_s4 = inlined_call_operand.vmem [shape: bf16[1152,256], index: 4, kind: input, shape index: {}]   ;;  %s14310_s5 = inlined_call_operand.vmem [shape: f32[1,256], index: 5, kind: input, shape index: {}]   ;;  %s14311_s6 = inlined_call_operand.vmem [shape: f32[1,256], index: 6, kind: input, shape index: {}]   ;;  %s14312_s7 = inlined_call_operand.vmem [shape: f32[256,9], index: 7, kind: input, shape index: {}]   ;;  %s14313_s8 = inlined_call_operand.hbm [shape: f32[2,256,256], index: 8, kind: output, shape index: {}]  }
   0x1   :  { %15 = vsyncpa [#allocation3 + $0x1], 0  ;;  %s8235_s27 = smov 0   ;;  %s8237_s28 = smov 0  }
   0x2   :  { %s8239_s29 = smov 0   ;;  %s8241_s30 = smov 0  }
   0x3 LB: > { %s8256_s9 = sadd.s32 4294967295, %s8176_s30   ;;  %s6968_s10 = sadd.s32 4294967294, %s8176_s30   ;;  %s8176_s30 = sphi %s8241_s30, %s15612_s30   ;;  %s8172_s29 = sphi %s8239_s29, %s15611_s29   ;;  %s8168_s28 = sphi %s8237_s28, %s15610_s28   ;;  %s8164_s27 = sphi %s8235_s27, %s15609_s27  }
   0x4   : > { %s8260_s11 = sadd.s32 1, %s8176_s30   ;;  %s201_s12 = sadd.s32 1, %s8172_s29 }
   0x5   : > { %s198_s13 = ssub.s32 %s8176_s30, %s8260_s11  ;;  %p211_p0 = scmp.ne.s32.totalorder %s8172_s29, %s8168_s28 }
   0x6   : > { %p199_p1 = scmp.eq.s32.totalorder %s198_s13, 0  ;;  %p212_p2 = scmp.eq.s32.totalorder %s8256_s9, 1 }
   0x7   : > { %p217_p3 = scmp.ne.s32.totalorder %s8168_s28, %s8164_s27  ;;  %p218_p4 = scmp.eq.s32.totalorder %s6968_s10, 1 }
   0x8   : > { %s8271_s14 = scalar_select %p199_p1, %s8172_s29, %s201_s12  }
   0x9   : > { %p8273_p5 = por %p212_p2, %p211_p0  ;;  %p8277_p6 = por %p218_p4, %p217_p3 }
   0xa   : > { %p6971_p7 = scmp.ge.s32.totalorder %s8176_s30, 1  ;;  %p265_p8 = scmp.lt.s32.totalorder %s8176_s30, 3 }
   0xc   : > { %p266_p9 = pnand %p6971_p7, %p265_p8 }
   0xe   : > { %269 = sbr.rel (%p266_p9) target bundleno = 2638 (0xa4e), region = 52 }
  0x13   : > { %v435_v0 = vld [vmem:[%s14306_s1 + $0x78] sm:$0xff]  ;;  %v434_v1 = vld [vmem:[%s14306_s1 + $0x70] sm:$0xff]  ;;  %p299_p10 = scmp.lt.s32.totalorder %s8256_s9, 1  ;;  %v433_v2 = vld [vmem:[%s14306_s1 + $0x68] sm:$0xff]  ;;  %vm418_vm1 = vcmask 1040384   ;;  %vm458_vm2 = vcmask 64512  }
  0x14   : > { %436 = vmatpush.msra.mxu0 %v435_v0  ;;  %v432_v3 = vld [vmem:[%s14306_s1 + $0x60] sm:$0xff]  ;;  %v431_v4 = vld [vmem:[%s14306_s1 + $0x58] sm:$0xff]  ;;  %v430_v9 = vld [vmem:[%s14306_s1 + $0x50] sm:$0xff]  ;;  %vm482_vm3 = vcmask 1041408   ;;  %s296_s19 = sand.u32 1, %s8168_s28   ;;  %s7735_s22 = sshll.u32 %s8256_s9, 9 }
  0x15   : > { %s300_s23 = scalar_select %p299_p10, %s8256_s9, 1  ;;  %v429_v15 = vld [vmem:[%s14306_s1 + $0x48] sm:$0xff]  ;;  %v428_v20 = vld [vmem:[%s14306_s1 + $0x40] sm:$0xff]  ;;  %v427_v25 = vld [vmem:[%s14306_s1 + $0x38] sm:$0xff] }
  0x16   : > { %437 = vmatpush.msra.mxu0 %v434_v1  ;;  %v426_v30 = vld [vmem:[%s14306_s1 + $0x30] sm:$0xff]  ;;  %v425_v35 = vld [vmem:[%s14306_s1 + $0x28] sm:$0xff]  ;;  %v424_v39 = vld [vmem:[%s14306_s1 + $0x20] sm:$0xff]  ;;  %s6972_s20 = sshll.u32 %s296_s19, 9  ;;  %s6902_s25 = scalar_lea.hbm %s14313_s8, %s7735_s22 }
  0x17   : > { %s7590_s26 = sshll.u32 %s300_s23, 8  ;;  %v423_v43 = vld [vmem:[%s14306_s1 + $0x18] sm:$0xff]  ;;  %v422_v47 = vld [vmem:[%s14306_s1 + $0x10] sm:$0xff]  ;;  %v421_v51 = vld [vmem:[%s14306_s1 + $0x8] sm:$0xff]  ;;  %s13906_s21 = scalar_lea.vmem [#allocation2], %s6972_s20 }
  0x18   : > { %438 = vmatpush.msra.mxu0 %v433_v2  ;;  %s8303_s18 = scalar_lea.vmem %s14305_s0, %s7590_s26  ;;  %v420_v55 = vld [vmem:[%s14306_s1] sm:$0xff]  ;;  %s6903_s26 = sshll.u32 %s13906_s21, 4  ;;  %s6904_s26 = int_to_ptr.vmem [resolvable:$true] %s6903_s26 }
  0x19   : > { %v8306_v5 = vld [vmem:[%s8303_s18] sm:$0xff]  ;;  %v8309_v6 = vld [vmem:[%s8303_s18 + $0x8] sm:$0xff]  ;;  %v8312_v7 = vld [vmem:[%s8303_s18 + $0x10] sm:$0xff]  ;;  %s6905_s10 = sshll.u32 %s6902_s25, 4  ;;  %s6891_s9 = scalar_lea.sflag [#allocation3], %s296_s19  ;;  %s6906_s10 = int_to_ptr.hbm [resolvable:$true] %s6905_s10 }
  0x1a   : > { %439 = vmatpush.msra.mxu0 %v432_v3  ;;  %v336_v8 = vadd.f32 %v8309_v6, %v8306_v5  ;;  %v8320_v10 = vld [vmem:[%s8303_s18 + $0x18] sm:$0xff]  ;;  %v8323_v11 = vld [vmem:[%s8303_s18 + $0x40] sm:$0xff]  ;;  %v8326_v12 = vld [vmem:[%s8303_s18 + $0x48] sm:$0xff]  ;;  %s8128_s12 = sshra.s32 %s6906_s10, 4  ;;  %s8134_s20 = scalar_lea.hbm %s14313_s8, 1024  ;;  %s8129_s12 = int_to_ptr.hbm [resolvable:$true] %s8128_s12 }
  0x1b   : > { %v8329_v13 = vld [vmem:[%s8303_s18 + $0x50] sm:$0xff]  ;;  %v8336_v16 = vld [vmem:[%s8303_s18 + $0x20] sm:$0xff]  ;;  %v385_v17 = vmax.f32 %v8326_v12, %v8323_v11  ;;  %v8341_v18 = vld [vmem:[%s8303_s18 + $0x58] sm:$0xff]  ;;  %p8135_p0 = scmp.lt.s32.totalorder %s8129_s12, %s14313_s8 }
  0x1c   : > { %440 = vmatpush.msra.mxu0 %v431_v4  ;;  %v337_v14 = vadd.f32 %v336_v8, %v8312_v7  ;;  %v8348_v21 = vld [vmem:[%s8303_s18 + $0x28] sm:$0xff]  ;;  %v8352_v23 = vld [vmem:[%s8303_s18 + $0x60] sm:$0xff]  ;;  %v8359_v26 = vld [vmem:[%s8303_s18 + $0x30] sm:$0xff] }
  0x1d   : > { %v386_v22 = vmax.f32 %v8329_v13, %v385_v17  ;;  %v8363_v28 = vld [vmem:[%s8303_s18 + $0x68] sm:$0xff]  ;;  %v8370_v31 = vld [vmem:[%s8303_s18 + $0x38] sm:$0xff]  ;;  %v8374_v33 = vld [vmem:[%s8303_s18 + $0x70] sm:$0xff] }
  0x1e   : > { %441 = vmatpush.msra.mxu0 %v430_v9  ;;  %v338_v19 = vadd.f32 %v337_v14, %v8320_v10  ;;  %v8382_v37 = vld [vmem:[%s8303_s18 + $0x78] sm:$0xff]  ;;  %v8390_v41 = vld [vmem:[%s8303_s18 + $0x80] sm:$0xff]  ;;  %v8398_v45 = vld [vmem:[%s8303_s18 + $0x88] sm:$0xff] }
  0x1f   : > { %v387_v27 = vmax.f32 %v8341_v18, %v386_v22  ;;  %v8406_v49 = vld [vmem:[%s8303_s18 + $0x90] sm:$0xff]  ;;  %v8414_v53 = vld [vmem:[%s8303_s18 + $0x98] sm:$0xff]  ;;  %v8422_v57 = vld [vmem:[%s8303_s18 + $0xa0] sm:$0xff] }
  0x20   : > { %442 = vmatpush.msra.mxu0 %v429_v15  ;;  %v339_v24 = vadd.f32 %v338_v19, %v8336_v16  ;;  %v8427_v60 = vld [vmem:[%s8303_s18 + $0xa8] sm:$0xff]  ;;  %v8432_v63 = vld [vmem:[%s8303_s18 + $0xb0] sm:$0xff]  ;;  %v8437_v2 = vld [vmem:[%s8303_s18 + $0xb8] sm:$0xff] }
  0x21   : > { %v388_v32 = vmax.f32 %v8352_v23, %v387_v27  ;;  %v8442_v8 = vld [vmem:[%s8303_s18 + $0xc0] sm:$0xff]  ;;  %v8447_v15 = vld [vmem:[%s8303_s18 + $0xc8] sm:$0xff] }
  0x22   : > { %443 = vmatpush.msra.mxu0 %v428_v20  ;;  %v340_v29 = vadd.f32 %v339_v24, %v8348_v21  ;;  %v8452_v20 = vld [vmem:[%s8303_s18 + $0xd0] sm:$0xff] }
  0x23   : > { %v389_v36 = vmax.f32 %v8363_v28, %v388_v32 }
  0x24   : > { %444 = vmatpush.msra.mxu0 %v427_v25  ;;  %v341_v34 = vadd.f32 %v340_v29, %v8359_v26  ;;  %v8457_v25 = vld [vmem:[%s8303_s18 + $0xd8] sm:$0xff] }
  0x25   : > { %v390_v40 = vmax.f32 %v8374_v33, %v389_v36 }
  0x26   : > { %445 = vmatpush.msra.mxu0 %v426_v30  ;;  %v342_v38 = vadd.f32 %v341_v34, %v8370_v31  ;;  %v8462_v30 = vld [vmem:[%s8303_s18 + $0xe0] sm:$0xff] }
  0x27   : > { %v391_v44 = vmax.f32 %v8382_v37, %v390_v40 }
  0x28   : > { %446 = vmatpush.msra.mxu0 %v425_v35  ;;  %v343_v42 = vadd.f32 %v342_v38, %v8323_v11  ;;  %v8467_v35 = vld [vmem:[%s8303_s18 + $0xe8] sm:$0xff] }
  0x29   : > { %v392_v48 = vmax.f32 %v8390_v41, %v391_v44 }
  0x2a   : > { %447 = vmatpush.msra.mxu0 %v424_v39  ;;  %v344_v46 = vadd.f32 %v343_v42, %v8326_v12  ;;  %v8472_v39 = vld [vmem:[%s8303_s18 + $0xf0] sm:$0xff] }
  0x2b   : > { %v393_v52 = vmax.f32 %v8398_v45, %v392_v48 }
  0x2c   : > { %448 = vmatpush.msra.mxu0 %v423_v43  ;;  %v345_v50 = vadd.f32 %v344_v46, %v8329_v13  ;;  %v8477_v43 = vld [vmem:[%s8303_s18 + $0xf8] sm:$0xff]  ;;  %s8130_s18 = scalar_lea.hbm %s8129_s12, 512 }
  0x2d   : > { %v394_v56 = vmax.f32 %v8406_v49, %v393_v52  ;;  %v382_v52 = vmax.f32 %v8309_v6, %v8348_v21  ;;  %p8131_p11 = scmp.ne.s32.totalorder %s8129_s12, %s8130_s18  ;;  %p8136_p1 = scmp.lt.s32.totalorder %s8134_s20, %s8130_s18 }
  0x2e   : > { %449 = vmatpush.msra.mxu0 %v422_v47  ;;  %v346_v54 = vadd.f32 %v345_v50, %v8341_v18  ;;  %v381_v47 = vmax.f32 %v8306_v5, %v8336_v16  ;;  %v8178_v50 = vmov 256.0  }
  0x2f   : > { %v395_v59 = vmax.f32 %v8414_v53, %v394_v56  ;;  %7901 = vrcp.f32 %v8178_v50  ;;  %v383_v56 = vmax.f32 %v8312_v7, %v8359_v26  ;;  %p8132_p12 = pnand %p8131_p11, %p8273_p5  ;;  %p8137_p2 = por %p8136_p1, %p8135_p0 }
  0x30   : > { %450 = vmatpush.msra.mxu0 %v421_v51  ;;  %v347_v58 = vadd.f32 %v346_v54, %v8352_v23 }
  0x31   : > { %v396_v62 = vmax.f32 %v8422_v57, %v395_v59  ;;  %p8133_p13 = pneg %p8132_p12 }
  0x32   : > { %451 = vmatpush.msra.mxu0 %v420_v55  ;;  %v348_v61 = vadd.f32 %v347_v58, %v8363_v28 }
  0x33   : > { %v397_v1 = vmax.f32 %v8427_v60, %v396_v62  ;;  %p8138_p3 = pnand %p8137_p2, %p8133_p13 }
  0x34   : > { %v349_v0 = vadd.f32 %v348_v61, %v8374_v33  ;;  %v384_v61 = vmax.f32 %v8320_v10, %v8370_v31 }
  0x35   : > { %v398_v4 = vmax.f32 %v8432_v63, %v397_v1  ;;  %v7902_v62 = vpop.eup %7901 }
  0x36   : > { %v350_v3 = vadd.f32 %v349_v0, %v8382_v37  ;;  %vm378_vm0 = vweird.f32 %v7902_v62 }
  0x37   : > { %v399_v14 = vmax.f32 %v8437_v2, %v398_v4  ;;  %v374_v4 = vmul.f32 256.0, %v7902_v62 }
  0x38   : > { %v351_v9 = vadd.f32 %v350_v3, %v8390_v41 }
  0x39   : > { %v400_v19 = vmax.f32 %v8442_v8, %v399_v14 }
  0x3a   : > { %v352_v17 = vadd.f32 %v351_v9, %v8398_v45 }
  0x3b   : > { %v401_v24 = vmax.f32 %v8447_v15, %v400_v19 }
  0x3c   : > { %v353_v22 = vadd.f32 %v352_v17, %v8406_v49 }
  0x3d   : > { %v402_v29 = vmax.f32 %v8452_v20, %v401_v24 }
  0x3e   : > { %v354_v27 = vadd.f32 %v353_v22, %v8414_v53  ;;  %v375_v22 = vsub.f32 1.0, %v374_v4 }
  0x3f   : > { %v403_v34 = vmax.f32 %v8457_v25, %v402_v29 }
  0x40   : > { %v355_v32 = vadd.f32 %v354_v27, %v8422_v57 }
  0x41   : > { %v404_v38 = vmax.f32 %v8462_v30, %v403_v34  ;;  %v376_v34 = vmul.f32 %v7902_v62, %v375_v22 }
  0x42   : > { %v356_v36 = vadd.f32 %v355_v32, %v8427_v60 }
  0x43   : > { %v405_v42 = vmax.f32 %v8467_v35, %v404_v38 }
  0x44   : > { %v357_v40 = vadd.f32 %v356_v36, %v8432_v63 }
  0x45   : > { %v406_v46 = vmax.f32 %v8472_v39, %v405_v42  ;;  %v377_v42 = vadd.f32 %v7902_v62, %v376_v34 }
  0x46   : > { %v358_v44 = vadd.f32 %v357_v40, %v8437_v2 }
  0x47   : > { %v407_v51 = vmax.f32 %v8477_v43, %v406_v46 }
  0x48   : > { %v359_v48 = vadd.f32 %v358_v44, %v8442_v8 }
  0x49   : > { %v408_v55 = vmax.f32 %v381_v47, %v407_v51 }
  0x4a   : > { %v360_v54 = vadd.f32 %v359_v48, %v8447_v15  ;;  %v379_v48 = vsel %vm378_vm0, %v7902_v62, %v377_v42 }
  0x4b   : > { %v409_v59 = vmax.f32 %v382_v52, %v408_v55  ;;  %v457_v55 = vld [vmem:[%s14307_s2] sm:$0xff] }
  0x4c   : > { %v361_v58 = vadd.f32 %v360_v54, %v8452_v20  ;;  %477 = vmatpush.msra.mxu1 %v457_v55 }
  0x4d   : > { %v410_v1 = vmax.f32 %v383_v56, %v409_v59 }
  0x4e   : > { %v362_v0 = vadd.f32 %v361_v58, %v8457_v25 }
  0x4f   : > { %v411_v9 = vmax.f32 %v384_v61, %v410_v1 }
  0x50   : > { %v363_v3 = vadd.f32 %v362_v0, %v8462_v30 }
  0x51   : > { %v412_v17 = vrot.slane %v411_v9, 4 }
  0x52   : > { %v364_v14 = vadd.f32 %v363_v3, %v8467_v35 }
  0x53   : > { %v413_v24 = vmax.f32 %v411_v9, %v412_v17 }
  0x54   : > { %v365_v19 = vadd.f32 %v364_v14, %v8472_v39 }
  0x55   : > { %v414_v29 = vrot.slane %v413_v24, 2 }
  0x56   : > { %v366_v27 = vadd.f32 %v365_v19, %v8477_v43 }
  0x57   : > { %v415_v38 = vmax.f32 %v413_v24, %v414_v29 }
  0x58   : > { %v367_v32 = vrot.slane %v366_v27, 4 }
  0x59   : > { %v416_v46 = vrot.slane %v415_v38, 1 }
  0x5a   : > { %v368_v36 = vadd.f32 %v367_v32, %v366_v27 }
  0x5b   : > { %v417_v51 = vmax.f32 %v415_v38, %v416_v46 }
  0x5c   : > { %v369_v40 = vrot.slane %v368_v36, 2 }
  0x5e   : > { %v370_v44 = vadd.f32 %v369_v40, %v368_v36 }
  0x60   : > { %v371_v47 = vrot.slane %v370_v44, 1 }
  0x62   : > { %v372_v50 = vadd.f32 %v371_v47, %v370_v44 }
  0x64   : > { %v380_v52 = vmul.f32 %v379_v48, %v372_v50 }
  0x66   : > { %v419_v54 = vsel %vm418_vm1, %v380_v52, %v417_v51 }
  0x67   : > { %452 = vmatmul.f32.vlgmr.msra.gmra.mxu0 %v419_v54 }
  0xe4   : > { %v453_v56 = vpop.f32.mrf.mxu0 }
  0xe5   : > { %v456_v58 = vmax.f32 %v453_v56, 0.0 }
  0xe7   : > { %6975 = vmatmul.msk.f32.vlgmr.msra.gmra.mxu1 %vm458_vm2, %v456_v58 }
 0x164   : > { %v479_v59 = vpop.f32.mrf.mxu1 }
 0x165   : > { %v483_v61 = vsel %vm482_vm3, %v479_v59, 0.0 }
 0x166   : > { %v484_v0 = vrot.slane %v483_v61, 4 }
 0x168   : > { %v485_v62 = vadd.f32 %v484_v0, %v483_v61 }
 0x16a   : > { %v486_v1 = vrot.slane %v485_v62, 2 }
 0x16c   : > { %v487_v3 = vadd.f32 %v486_v1, %v485_v62 }
 0x16e   : > { %v488_v4 = vrot.slane %v487_v3, 1 }
 0x170   : > { %v489_v9 = vadd.f32 %v488_v4, %v487_v3 }
 0x172   : > { %v6976_v14 = vmul.f32 -1.442695, %v489_v9 }
 0x174   : > { %7903 = vpow2.f32 %v6976_v14 }
 0x17a   : > { %v7904_v17 = vpop.eup %7903 }
 0x17b   : > { %v493_v19 = vadd.f32 1.0, %v7904_v17 }
 0x17d   : > { %7905 = vrcp.f32 %v493_v19  ;;  %v505_v29 = vand.u32 2147483648, %v493_v19  ;;  %v503_v34 = vand.u32 2147483647, %v493_v19  ;;  %vm499_vm5 = vweird.f32 %v493_v19 }
 0x17f   : > { %v506_v38 = vor.u32 1.1754944e-38, %v505_v29  ;;  %vm504_vm7 = vcmp.eq.f32.partialorder %v503_v34, 8.507059e+37 }
 0x183   : > { %v7906_v22 = vpop.eup %7905 }
 0x184   : > { %v495_v24 = vmul.f32 %v7906_v22, %v493_v19  ;;  %vm500_vm4 = vweird.f32 %v7906_v22 }
 0x185   : > { %vm501_vm6 = vmor %vm499_vm5, %vm500_vm4 }
 0x186   : > { %v496_v27 = vsub.f32 1.0, %v495_v24 }
 0x188   : > { %v497_v32 = vmul.f32 %v7906_v22, %v496_v27 }
 0x18a   : > { %v498_v36 = vadd.f32 %v7906_v22, %v497_v32 }
 0x18c   : > { %v502_v40 = vsel %vm501_vm6, %v7906_v22, %v498_v36 }
 0x18d   : > { %v8501_v42 = vsel %vm504_vm7, %v506_v38, %v502_v40 }
 0x18e   : > { %v8505_v44 = vmul.f32 %v8501_v42, %v8382_v37  ;;  %v8509_v46 = vmul.f32 %v8501_v42, %v8363_v28  ;;  %v8513_v47 = vmul.f32 %v8501_v42, %v8341_v18  ;;  %v8520_v48 = vmul.f32 %v8501_v42, %v8374_v33 }
 0x18f   : > { %v8524_v37 = vmul.f32 %v8501_v42, %v8352_v23  ;;  %v8528_v28 = vmul.f32 %v8501_v42, %v8329_v13  ;;  %v8535_v18 = vmul.f32 %v8501_v42, %v8326_v12  ;;  %v8539_v33 = vmul.f32 %v8501_v42, %v8323_v11 }
 0x190   : > { %14626 = vst [vmem:[#allocation5_spill] sm:$0xff] %v8505_v44  ;;  %571 = vadd.xlane.f32.xlu0 %v8505_v44  ;;  %567 = vadd.xlane.f32.xlu1 %v8509_v46  ;;  %v8543_v23 = vmul.f32 %v8501_v42, %v8370_v31  ;;  %v8550_v13 = vmul.f32 %v8501_v42, %v8359_v26 }
 0x191   : > { %14627 = vst [vmem:[#allocation6_spill] sm:$0xff] %v8513_v47  ;;  %563 = vadd.xlane.f32.xlu2 %v8513_v47  ;;  %v8554_v12 = vmul.f32 %v8501_v42, %v8348_v21  ;;  %v8558_v11 = vmul.f32 %v8501_v42, %v8336_v16  ;;  %v8565_v31 = vmul.f32 %v8501_v42, %v8320_v10 }
 0x192   : > { %14628 = vst [vmem:[#allocation7_spill] sm:$0xff] %v8520_v48  ;;  %v8569_v26 = vmul.f32 %v8501_v42, %v8312_v7  ;;  %v8573_v21 = vmul.f32 %v8501_v42, %v8309_v6  ;;  %v8580_v16 = vmul.f32 %v8501_v42, %v8477_v43  ;;  %v8584_v10 = vmul.f32 %v8501_v42, %v8306_v5 }
 0x193   : > { %14629 = vst [vmem:[#allocation8_spill] sm:$0xff] %v8528_v28  ;;  %v8588_v7 = vmul.f32 %v8501_v42, %v8472_v39  ;;  %v8595_v6 = vmul.f32 %v8501_v42, %v8462_v30  ;;  %v8599_v43 = vmul.f32 %v8501_v42, %v8467_v35  ;;  %v8603_v5 = vmul.f32 %v8501_v42, %v8457_v25 }
 0x194   : > { %14630 = vst [vmem:[#allocation9_spill] sm:$0xff] %v8535_v18  ;;  %v8610_v39 = vmul.f32 %v8501_v42, %v8452_v20  ;;  %v8614_v30 = vmul.f32 %v8501_v42, %v8447_v15  ;;  %v8621_v25 = vmul.f32 %v8501_v42, %v8442_v8  ;;  %v8628_v15 = vmul.f32 %v8501_v42, %v8437_v2 }
 0x195   : > { %14631 = vst [vmem:[#allocation10_spill] sm:$0xff] %v8595_v6  ;;  %v8635_v8 = vmul.f32 %v8501_v42, %v8432_v63  ;;  %v8642_v2 = vmul.f32 %v8501_v42, %v8427_v60  ;;  %v8179_v20 = vmov 128.0   ;;  %v8649_v35 = vmul.f32 %v8501_v42, %v8422_v57 }
 0x196   : > { %14632 = vst [vmem:[#allocation11_spill] sm:$0xff] %v8603_v5  ;;  %7907 = vrcp.f32 %v8179_v20  ;;  %v8656_v51 = vmul.f32 %v8501_v42, %v8414_v53  ;;  %v8663_v54 = vmul.f32 %v8501_v42, %v8406_v49  ;;  %v8673_v61 = vmul.f32 %v8501_v42, %v8398_v45 }
 0x197   : > { %14633 = vst [vmem:[#allocation12_spill] sm:$0xff] %v8610_v39  ;;  %v8682_v4 = vmul.f32 %v8501_v42, %v8390_v41 }
 0x198   : > { %569 = vadd.xlane.f32.xlu0 %v8520_v48  ;;  %565 = vadd.xlane.f32.xlu1 %v8524_v37  ;;  %14634 = vst [vmem:[#allocation13_spill] sm:$0xff] %v8614_v30 }
 0x199   : > { %561 = vadd.xlane.f32.xlu2 %v8528_v28  ;;  %14635 = vst [vmem:[#allocation14_spill] sm:$0xff] %v8621_v25 }
 0x19a   : > { %14636 = vst [vmem:[#allocation15_spill] sm:$0xff] %v8628_v15 }
 0x19b   : > { %14637 = vst [vmem:[#allocation16_spill] sm:$0xff] %v8635_v8 }
 0x19c   : > { %14638 = vst [vmem:[#allocation17_spill] sm:$0xff] %v8642_v2  ;;  %v7908_v63 = vpop.eup %7907 }
 0x19d   : > { %14639 = vst [vmem:[#allocation18_spill] sm:$0xff] %v8649_v35  ;;  %v606_v60 = vmul.f32 128.0, %v7908_v63  ;;  %vm610_vm8 = vweird.f32 %v7908_v63 }
 0x19e   : > { %14640 = vst [vmem:[#allocation19_spill] sm:$0xff] %v8656_v51 }
 0x19f   : > { %v607_v50 = vsub.f32 1.0, %v606_v60  ;;  %14641 = vst [vmem:[#allocation20_spill] sm:$0xff] %v8663_v54 }
 0x1a0   : > { %559 = vadd.xlane.f32.xlu0 %v8535_v18  ;;  %557 = vadd.xlane.f32.xlu1 %v8539_v33  ;;  %14642 = vst [vmem:[#allocation21_spill] sm:$0xff] %v8673_v61 }
 0x1a1   : > { %555 = vadd.xlane.f32.xlu2 %v8543_v23  ;;  %v608_v57 = vmul.f32 %v7908_v63, %v607_v50  ;;  %14643 = vst [vmem:[#allocation22_spill] sm:$0xff] %v8682_v4 }
 0x1a3   : > { %v609_v52 = vadd.f32 %v7908_v63, %v608_v57 }
 0x1a5   : > { %v8668_v53 = vsel %vm610_vm8, %v7908_v63, %v609_v52 }
 0x1a8   : > { %553 = vadd.xlane.f32.xlu0 %v8550_v13  ;;  %551 = vadd.xlane.f32.xlu1 %v8554_v12 }
 0x1a9   : > { %549 = vadd.xlane.f32.xlu2 %v8558_v11 }
 0x1b0   : > { %547 = vadd.xlane.f32.xlu0 %v8565_v31  ;;  %545 = vadd.xlane.f32.xlu1 %v8569_v26 }
 0x1b1   : > { %543 = vadd.xlane.f32.xlu2 %v8573_v21 }
 0x1b8   : > { %603 = vadd.xlane.f32.xlu1 %v8580_v16  ;;  %541 = vadd.xlane.f32.xlu0 %v8584_v10 }
 0x1b9   : > { %601 = vadd.xlane.f32.xlu2 %v8588_v7 }
 0x1c0   : > { %597 = vadd.xlane.f32.xlu1 %v8595_v6  ;;  %599 = vadd.xlane.f32.xlu0 %v8599_v43 }
 0x1c1   : > { %595 = vadd.xlane.f32.xlu2 %v8603_v5 }
 0x1c8   : > { %674 = vmax.xlane.f32.xlu1 %v8505_v44  ;;  %593 = vadd.xlane.f32.xlu0 %v8610_v39 }
 0x1c9   : > { %591 = vadd.xlane.f32.xlu2 %v8614_v30 }
 0x1d0   : > { %706 = vmax.xlane.f32.xlu1 %v8580_v16  ;;  %672 = vmax.xlane.f32.xlu0 %v8520_v48  ;;  %v9689_v48 = vld [vmem:[%s14312_s7 + $0x98] sm:$0xff] }
 0x1d1   : > { %589 = vadd.xlane.f32.xlu2 %v8621_v25  ;;  %14670 = vst [vmem:[#allocation47_spill] sm:$0xff] %v9689_v48 }
 0x1d8   : > { %704 = vmax.xlane.f32.xlu1 %v8588_v7  ;;  %670 = vmax.xlane.f32.xlu0 %v8509_v46 }
 0x1d9   : > { %587 = vadd.xlane.f32.xlu2 %v8628_v15 }
 0x1e0   : > { %702 = vmax.xlane.f32.xlu1 %v8599_v43  ;;  %668 = vmax.xlane.f32.xlu0 %v8524_v37 }
 0x1e1   : > { %585 = vadd.xlane.f32.xlu2 %v8635_v8 }
 0x1e8   : > { %700 = vmax.xlane.f32.xlu1 %v8595_v6  ;;  %666 = vmax.xlane.f32.xlu0 %v8513_v47  ;;  %v790_v6 = vld [vmem:[%s14308_s3 + $0x290] sm:$0xff]  ;;  %v7107_v47 = vld [vmem:[%s14309_s4 + $0x40] sm:$0xf] }
 0x1e9   : > { %583 = vadd.xlane.f32.xlu2 %v8642_v2 }
 0x1f0   : > { %698 = vmax.xlane.f32.xlu1 %v8603_v5  ;;  %664 = vmax.xlane.f32.xlu0 %v8528_v28 }
 0x1f1   : > { %581 = vadd.xlane.f32.xlu2 %v8649_v35 }
 0x1f8   : > { %696 = vmax.xlane.f32.xlu1 %v8610_v39  ;;  %662 = vmax.xlane.f32.xlu0 %v8535_v18 }
 0x1f9   : > { %579 = vadd.xlane.f32.xlu2 %v8656_v51 }
 0x200   : > { %694 = vmax.xlane.f32.xlu1 %v8614_v30  ;;  %660 = vmax.xlane.f32.xlu0 %v8539_v33  ;;  %v7614_v30 = vld [vmem:[%s14309_s4 + $0xb4] sm:$0xf0] }
 0x201   : > { %577 = vadd.xlane.f32.xlu2 %v8663_v54 }
 0x203   : > { %v572_v55 = vpop.xlane.xlu0 %571  ;;  %v568_v56 = vpop.xlane.xlu1 %567 }
 0x204   : > { %v564_v58 = vpop.xlane.xlu2 %563  ;;  %v627_v59 = vmul.f32 %v8668_v53, %v572_v55  ;;  %v625_v3 = vmul.f32 %v8668_v53, %v568_v56 }
 0x205   : > { %v623_v9 = vmul.f32 %v8668_v53, %v564_v58 }
 0x206   : > { %836 = vmatpush.msrb.mxu1 %v627_v59  ;;  %7736 = vmatpush.msra.mxu2 %v627_v59 }
 0x208   : > { %692 = vmax.xlane.f32.xlu1 %v8621_v25  ;;  %658 = vmax.xlane.f32.xlu0 %v8543_v23  ;;  %v8043_v25 = vld [vmem:[%s14312_s7 + $0x30] sm:$0xff] }
 0x209   : > { %575 = vadd.xlane.f32.xlu2 %v8673_v61 }
 0x20b   : > { %v570_v49 = vpop.xlane.xlu0 %569  ;;  %v566_v0 = vpop.xlane.xlu1 %565 }
 0x20c   : > { %v562_v62 = vpop.xlane.xlu2 %561  ;;  %v626_v1 = vmul.f32 %v8668_v53, %v570_v49  ;;  %v624_v45 = vmul.f32 %v8668_v53, %v566_v0  ;;  %v708_v49 = vld [vmem:[%s14308_s3] sm:$0xff] }
 0x20d   : > { %v622_v41 = vmul.f32 %v8668_v53, %v562_v62 }
 0x20e   : > { %837 = vmatpush.msrb.mxu1 %v626_v1  ;;  %7737 = vmatpush.msra.mxu2 %v626_v1 }
 0x210   : > { %838 = vmatpush.msrb.mxu1 %v625_v3  ;;  %7738 = vmatpush.msra.mxu2 %v625_v3 }
 0x211   : > { %690 = vmax.xlane.f32.xlu1 %v8628_v15  ;;  %573 = vadd.xlane.f32.xlu2 %v8682_v4  ;;  %v9545_v15 = vld [vmem:[%s14312_s7 + $0x50] sm:$0xff] }
 0x212   : > { %656 = vmax.xlane.f32.xlu0 %v8550_v13  ;;  %839 = vmatpush.msrb.mxu1 %v624_v45 }
 0x213   : > { %7739 = vmatpush.msra.mxu2 %v624_v45  ;;  %v560_v14 = vpop.xlane.xlu0 %559  ;;  %v558_v17 = vpop.xlane.xlu1 %557 }
 0x214   : > { %v556_v19 = vpop.xlane.xlu2 %555  ;;  %840 = vmatpush.msrb.mxu1 %v623_v9  ;;  %v621_v22 = vmul.f32 %v8668_v53, %v560_v14  ;;  %v620_v24 = vmul.f32 %v8668_v53, %v558_v17 }
 0x215   : > { %7740 = vmatpush.msra.mxu2 %v623_v9  ;;  %v619_v32 = vmul.f32 %v8668_v53, %v556_v19  ;;  %v712_v9 = vld [vmem:[%s14308_s3 + $0x20] sm:$0xff] }
 0x216   : > { %841 = vmatpush.msrb.mxu1 %v622_v41 }
 0x217   : > { %7741 = vmatpush.msra.mxu2 %v622_v41 }
 0x218   : > { %842 = vmatpush.msrb.mxu1 %v621_v22 }
 0x219   : > { %7742 = vmatpush.msra.mxu2 %v621_v22  ;;  %688 = vmax.xlane.f32.xlu1 %v8635_v8 }
 0x21a   : > { %652 = vmax.xlane.f32.xlu2 %v8558_v11  ;;  %654 = vmax.xlane.f32.xlu0 %v8554_v12 }
 0x21b   : > { %843 = vmatpush.msrb.mxu1 %v620_v24  ;;  %7743 = vmatpush.msra.mxu2 %v620_v24  ;;  %v554_v27 = vpop.xlane.xlu0 %553  ;;  %v552_v29 = vpop.xlane.xlu1 %551 }
 0x21c   : > { %v550_v34 = vpop.xlane.xlu2 %549  ;;  %v618_v36 = vmul.f32 %v8668_v53, %v554_v27  ;;  %v617_v38 = vmul.f32 %v8668_v53, %v552_v29  ;;  %v716_v27 = vld [vmem:[%s14308_s3 + $0x40] sm:$0xff] }
 0x21d   : > { %844 = vmatpush.msrb.mxu1 %v619_v32  ;;  %7744 = vmatpush.msra.mxu2 %v619_v32  ;;  %v616_v40 = vmul.f32 %v8668_v53, %v550_v34 }
 0x21f   : > { %845 = vmatpush.msrb.mxu1 %v618_v36  ;;  %7745 = vmatpush.msra.mxu2 %v618_v36 }
 0x221   : > { %846 = vmatpush.msrb.mxu1 %v617_v38  ;;  %7746 = vmatpush.msra.mxu2 %v617_v38  ;;  %v720_v38 = vld [vmem:[%s14308_s3 + $0x60] sm:$0xff] }
 0x222   : > { %650 = vmax.xlane.f32.xlu1 %v8565_v31  ;;  %684 = vmax.xlane.f32.xlu2 %v8649_v35 }
 0x223   : > { %686 = vmax.xlane.f32.xlu0 %v8642_v2  ;;  %847 = vmatpush.msrb.mxu1 %v616_v40  ;;  %v548_v42 = vpop.xlane.xlu0 %547  ;;  %v546_v20 = vpop.xlane.xlu1 %545 }
 0x224   : > { %7747 = vmatpush.msra.mxu2 %v616_v40  ;;  %v544_v63 = vpop.xlane.xlu2 %543  ;;  %v615_v60 = vmul.f32 %v8668_v53, %v548_v42  ;;  %v614_v50 = vmul.f32 %v8668_v53, %v546_v20 }
 0x225   : > { %v613_v57 = vmul.f32 %v8668_v53, %v544_v63 }
 0x226   : > { %848 = vmatpush.msrb.mxu1 %v615_v60  ;;  %7748 = vmatpush.msra.mxu2 %v615_v60  ;;  %v724_v60 = vld [vmem:[%s14308_s3 + $0x80] sm:$0xff] }
 0x228   : > { %849 = vmatpush.msrb.mxu1 %v614_v50  ;;  %7749 = vmatpush.msra.mxu2 %v614_v50 }
 0x22a   : > { %682 = vmax.xlane.f32.xlu1 %v8656_v51  ;;  %646 = vmax.xlane.f32.xlu2 %v8573_v21 }
 0x22b   : > { %648 = vmax.xlane.f32.xlu0 %v8569_v26  ;;  %850 = vmatpush.msrb.mxu1 %v613_v57  ;;  %v604_v52 = vpop.xlane.xlu1 %603  ;;  %v542_v55 = vpop.xlane.xlu0 %541 }
 0x22c   : > { %7750 = vmatpush.msra.mxu2 %v613_v57  ;;  %v602_v56 = vpop.xlane.xlu2 %601  ;;  %v612_v58 = vmul.f32 %v8668_v53, %v542_v55  ;;  %v643_v59 = vmul.f32 %v8668_v53, %v604_v52 }
 0x22d   : > { %v642_v0 = vmul.f32 %v8668_v53, %v602_v56  ;;  %v728_v56 = vld [vmem:[%s14308_s3 + $0xa0] sm:$0xff] }
 0x22e   : > { %851 = vmatpush.msrb.mxu1 %v612_v58  ;;  %7751 = vmatpush.msra.mxu2 %v612_v58 }
 0x22f   : > { %949 = vmatpush.msra.mxu3 %v643_v59  ;;  %852 = vmatmul.f32.vlgmr.msrb.gmra.mxu1 %v708_v49 }
 0x231   : > { %950 = vmatpush.msra.mxu3 %v642_v0 }
 0x232   : > { %678 = vmax.xlane.f32.xlu2 %v8673_v61  ;;  %644 = vmax.xlane.f32.xlu1 %v8584_v10 }
 0x233   : > { %680 = vmax.xlane.f32.xlu0 %v8663_v54  ;;  %v598_v62 = vpop.xlane.xlu1 %597  ;;  %v600_v1 = vpop.xlane.xlu0 %599 }
 0x234   : > { %v596_v3 = vpop.xlane.xlu2 %595  ;;  %v641_v45 = vmul.f32 %v8668_v53, %v600_v1  ;;  %v640_v14 = vmul.f32 %v8668_v53, %v598_v62  ;;  %v732_v62 = vld [vmem:[%s14308_s3 + $0xc0] sm:$0xff] }
 0x235   : > { %v639_v17 = vmul.f32 %v8668_v53, %v596_v3 }
 0x236   : > { %951 = vmatpush.msra.mxu3 %v641_v45 }
 0x237   : > { %855 = vmatmul.f32.gmra.mxu1 %v712_v9 }
 0x238   : > { %952 = vmatpush.msra.mxu3 %v640_v14  ;;  %v736_v14 = vld [vmem:[%s14308_s3 + $0xe0] sm:$0xff] }
 0x23a   : > { %953 = vmatpush.msra.mxu3 %v639_v17 }
 0x23b   : > { %676 = vmax.xlane.f32.xlu0 %v8682_v4  ;;  %v675_v19 = vpop.xlane.xlu1 %674  ;;  %v594_v41 = vpop.xlane.xlu0 %593 }
 0x23c   : > { %v592_v22 = vpop.xlane.xlu2 %591  ;;  %1062 = vmatpush.msra.mxu1 %v675_v19  ;;  %v638_v24 = vmul.f32 %v8668_v53, %v594_v41 }
 0x23d   : > { %v637_v29 = vmul.f32 %v8668_v53, %v592_v22 }
 0x23e   : > { %954 = vmatpush.msra.mxu3 %v638_v24  ;;  %v740_v24 = vld [vmem:[%s14308_s3 + $0x100] sm:$0xff] }
 0x23f   : > { %858 = vmatmul.f32.gmra.mxu1 %v716_v27 }
 0x240   : > { %955 = vmatpush.msra.mxu3 %v637_v29 }
 0x243   : > { %v707_v32 = vpop.xlane.xlu1 %706  ;;  %v673_v34 = vpop.xlane.xlu0 %672 }
 0x244   : > { %v590_v36 = vpop.xlane.xlu2 %589  ;;  %1063 = vmatpush.msra.mxu1 %v673_v34  ;;  %1175 = vmatpush.msrb.mxu0 %v707_v32 }
 0x245   : > { %v636_v40 = vmul.f32 %v8668_v53, %v590_v36  ;;  %v744_v36 = vld [vmem:[%s14308_s3 + $0x120] sm:$0xff] }
 0x247   : > { %956 = vmatpush.msra.mxu3 %v636_v40  ;;  %861 = vmatmul.f32.gmra.mxu1 %v720_v38 }
 0x24b   : > { %v705_v42 = vpop.xlane.xlu1 %704  ;;  %v671_v20 = vpop.xlane.xlu0 %670 }
 0x24c   : > { %v588_v63 = vpop.xlane.xlu2 %587  ;;  %1064 = vmatpush.msra.mxu1 %v671_v20  ;;  %1176 = vmatpush.msrb.mxu0 %v705_v42 }
 0x24d   : > { %v635_v50 = vmul.f32 %v8668_v53, %v588_v63  ;;  %v748_v63 = vld [vmem:[%s14308_s3 + $0x140] sm:$0xff] }
 0x24f   : > { %957 = vmatpush.msra.mxu3 %v635_v50  ;;  %864 = vmatmul.f32.gmra.mxu1 %v724_v60 }
 0x253   : > { %v703_v57 = vpop.xlane.xlu1 %702  ;;  %v669_v52 = vpop.xlane.xlu0 %668 }
 0x254   : > { %v586_v55 = vpop.xlane.xlu2 %585  ;;  %1065 = vmatpush.msra.mxu1 %v669_v52  ;;  %1177 = vmatpush.msrb.mxu0 %v703_v57  ;;  %v752_v52 = vld [vmem:[%s14308_s3 + $0x160] sm:$0xff] }
 0x255   : > { %v634_v58 = vmul.f32 %v8668_v53, %v586_v55 }
 0x257   : > { %958 = vmatpush.msra.mxu3 %v634_v58  ;;  %867 = vmatmul.f32.gmra.mxu1 %v728_v56  ;;  %v709_v58 = vld [vmem:[%s14308_s3 + $0x8] sm:$0xff] }
 0x25b   : > { %v701_v59 = vpop.xlane.xlu1 %700  ;;  %v667_v49 = vpop.xlane.xlu0 %666 }
 0x25c   : > { %v584_v0 = vpop.xlane.xlu2 %583  ;;  %1066 = vmatpush.msra.mxu1 %v667_v49  ;;  %1178 = vmatpush.msrb.mxu0 %v701_v59  ;;  %v756_v49 = vld [vmem:[%s14308_s3 + $0x180] sm:$0xff] }
 0x25d   : > { %v633_v1 = vmul.f32 %v8668_v53, %v584_v0 }
 0x25f   : > { %959 = vmatpush.msra.mxu3 %v633_v1  ;;  %870 = vmatmul.f32.gmra.mxu1 %v732_v62  ;;  %v760_v1 = vld [vmem:[%s14308_s3 + $0x1a0] sm:$0xff] }
 0x263   : > { %v699_v3 = vpop.xlane.xlu1 %698  ;;  %v665_v45 = vpop.xlane.xlu0 %664 }
 0x264   : > { %v582_v9 = vpop.xlane.xlu2 %581  ;;  %1067 = vmatpush.msra.mxu1 %v665_v45  ;;  %1179 = vmatpush.msrb.mxu0 %v699_v3 }
 0x265   : > { %v632_v17 = vmul.f32 %v8668_v53, %v582_v9  ;;  %v717_v9 = vld [vmem:[%s14308_s3 + $0x48] sm:$0xff] }
 0x267   : > { %960 = vmatpush.msra.mxu3 %v632_v17  ;;  %873 = vmatmul.f32.gmra.mxu1 %v736_v14 }
 0x26b   : > { %v697_v19 = vpop.xlane.xlu1 %696  ;;  %v663_v41 = vpop.xlane.xlu0 %662 }
 0x26c   : > { %v580_v22 = vpop.xlane.xlu2 %579  ;;  %1068 = vmatpush.msra.mxu1 %v663_v41  ;;  %1180 = vmatpush.msrb.mxu0 %v697_v19  ;;  %v764_v19 = vld [vmem:[%s14308_s3 + $0x1c0] sm:$0xff]  ;;  %v721_v41 = vld [vmem:[%s14308_s3 + $0x68] sm:$0xff] }
 0x26d   : > { %v631_v27 = vmul.f32 %v8668_v53, %v580_v22 }
 0x26f   : > { %961 = vmatpush.msra.mxu3 %v631_v27  ;;  %876 = vmatmul.f32.gmra.mxu1 %v740_v24 }
 0x273   : > { %v695_v29 = vpop.xlane.xlu1 %694  ;;  %v661_v32 = vpop.xlane.xlu0 %660 }
 0x274   : > { %v578_v34 = vpop.xlane.xlu2 %577  ;;  %1069 = vmatpush.msra.mxu1 %v661_v32  ;;  %1181 = vmatpush.msrb.mxu0 %v695_v29  ;;  %v725_v29 = vld [vmem:[%s14308_s3 + $0x88] sm:$0xff]  ;;  %v710_v32 = vld [vmem:[%s14308_s3 + $0x10] sm:$0xff] }
 0x275   : > { %v630_v38 = vmul.f32 %v8668_v53, %v578_v34 }
 0x277   : > { %962 = vmatpush.msra.mxu3 %v630_v38  ;;  %879 = vmatmul.f32.gmra.mxu1 %v744_v36 }
 0x27b   : > { %v693_v40 = vpop.xlane.xlu1 %692  ;;  %v659_v42 = vpop.xlane.xlu0 %658 }
 0x27c   : > { %v576_v20 = vpop.xlane.xlu2 %575  ;;  %1070 = vmatpush.msra.mxu1 %v659_v42  ;;  %1182 = vmatpush.msrb.mxu0 %v693_v40  ;;  %v711_v40 = vld [vmem:[%s14308_s3 + $0x18] sm:$0xff]  ;;  %v729_v42 = vld [vmem:[%s14308_s3 + $0xa8] sm:$0xff] }
 0x27d   : > { %v629_v60 = vmul.f32 %v8668_v53, %v576_v20 }
 0x27f   : > { %963 = vmatpush.msra.mxu3 %v629_v60  ;;  %882 = vmatmul.f32.gmra.mxu1 %v748_v63  ;;  %v714_v63 = vld [vmem:[%s14308_s3 + $0x30] sm:$0xff] }
 0x284   : > { %v691_v50 = vpop.xlane.xlu1 %690  ;;  %v574_v57 = vpop.xlane.xlu2 %573 }
 0x285   : > { %v657_v55 = vpop.xlane.xlu0 %656  ;;  %1183 = vmatpush.msrb.mxu0 %v691_v50  ;;  %v628_v56 = vmul.f32 %v8668_v53, %v574_v57  ;;  %v713_v53 = vld [vmem:[%s14308_s3 + $0x28] sm:$0xff]  ;;  %v715_v50 = vld [vmem:[%s14308_s3 + $0x38] sm:$0xff] }
 0x286   : > { %1071 = vmatpush.msra.mxu1 %v657_v55  ;;  %v733_v57 = vld [vmem:[%s14308_s3 + $0xc8] sm:$0xff] }
 0x287   : > { %964 = vmatpush.msra.mxu3 %v628_v56  ;;  %885 = vmatmul.f32.gmra.mxu1 %v752_v52  ;;  %v718_v52 = vld [vmem:[%s14308_s3 + $0x50] sm:$0xff]  ;;  %v719_v56 = vld [vmem:[%s14308_s3 + $0x58] sm:$0xff] }
 0x288   : > { %965 = vmatmul.f32.vlgmr.msra.gmra.mxu3 %v709_v58  ;;  %v737_v58 = vld [vmem:[%s14308_s3 + $0xe8] sm:$0xff] }
 0x28c   : > { %v689_v59 = vpop.xlane.xlu1 %688 }
 0x28d   : > { %v653_v0 = vpop.xlane.xlu2 %652  ;;  %v655_v62 = vpop.xlane.xlu0 %654  ;;  %1184 = vmatpush.msrb.mxu0 %v689_v59  ;;  %v722_v59 = vld [vmem:[%s14308_s3 + $0x70] sm:$0xff] }
 0x28e   : > { %1072 = vmatpush.msra.mxu1 %v655_v62  ;;  %v741_v62 = vld [vmem:[%s14308_s3 + $0x108] sm:$0xff] }
 0x28f   : > { %888 = vmatmul.f32.gmra.mxu1 %v756_v49 }
 0x290   : > { %1073 = vmatpush.msra.mxu1 %v653_v0  ;;  %968 = vmatmul.f32.gmra.mxu3 %v713_v53  ;;  %v723_v0 = vld [vmem:[%s14308_s3 + $0x78] sm:$0xff]  ;;  %v726_v53 = vld [vmem:[%s14308_s3 + $0x90] sm:$0xff] }
 0x295   : > { %v651_v3 = vpop.xlane.xlu1 %650  ;;  %v685_v45 = vpop.xlane.xlu2 %684 }
 0x296   : > { %v687_v14 = vpop.xlane.xlu0 %686  ;;  %1074 = vmatpush.msra.mxu1 %v651_v3  ;;  %v727_v3 = vld [vmem:[%s14308_s3 + $0x98] sm:$0xff] }
 0x297   : > { %1185 = vmatpush.msrb.mxu0 %v687_v14  ;;  %891 = vmatmul.f32.gmra.mxu1 %v760_v1 }
 0x298   : > { %971 = vmatmul.f32.gmra.mxu3 %v717_v9  ;;  %v730_v9 = vld [vmem:[%s14308_s3 + $0xb0] sm:$0xff] }
 0x299   : > { %1186 = vmatpush.msrb.mxu0 %v685_v45  ;;  %v745_v45 = vld [vmem:[%s14308_s3 + $0x128] sm:$0xff] }
 0x29d   : > { %v683_v17 = vpop.xlane.xlu1 %682  ;;  %v647_v22 = vpop.xlane.xlu2 %646 }
 0x29e   : > { %v649_v24 = vpop.xlane.xlu0 %648  ;;  %1187 = vmatpush.msrb.mxu0 %v683_v17  ;;  %v731_v17 = vld [vmem:[%s14308_s3 + $0xb8] sm:$0xff] }
 0x29f   : > { %1075 = vmatpush.msra.mxu1 %v649_v24  ;;  %v735_v24 = vld [vmem:[%s14308_s3 + $0xd8] sm:$0xff] }
 0x2a0   : > { %894 = vmatmul.f32.gmra.mxu1 %v764_v19  ;;  %974 = vmatmul.f32.gmra.mxu3 %v721_v41  ;;  %v749_v19 = vld [vmem:[%s14308_s3 + $0x148] sm:$0xff]  ;;  %v734_v41 = vld [vmem:[%s14308_s3 + $0xd0] sm:$0xff] }
 0x2a1   : > { %1076 = vmatpush.msra.mxu1 %v647_v22 }
 0x2a5   : > { %v645_v27 = vpop.xlane.xlu1 %644  ;;  %v679_v36 = vpop.xlane.xlu2 %678 }
 0x2a6   : > { %v681_v34 = vpop.xlane.xlu0 %680  ;;  %1077 = vmatpush.msra.mxu1 %v645_v27  ;;  %v753_v27 = vld [vmem:[%s14308_s3 + $0x168] sm:$0xff] }
 0x2a7   : > { %1188 = vmatpush.msrb.mxu0 %v681_v34  ;;  %v739_v34 = vld [vmem:[%s14308_s3 + $0xf8] sm:$0xff] }
 0x2a8   : > { %977 = vmatmul.f32.gmra.mxu3 %v725_v29  ;;  %1078 = vmatmul.f32.vlgmr.msra.gmra.mxu1 %v710_v32  ;;  %v738_v29 = vld [vmem:[%s14308_s3 + $0xf0] sm:$0xff] }
 0x2a9   : > { %1189 = vmatpush.msrb.mxu0 %v679_v36  ;;  %v757_v36 = vld [vmem:[%s14308_s3 + $0x188] sm:$0xff] }
 0x2ac   : > { %v8792_v38 = vpop.f32.mrf.mxu1 }
 0x2ae   : > { %v677_v20 = vpop.xlane.xlu0 %676 }
 0x2af   : > { %1190 = vmatpush.msrb.mxu0 %v677_v20  ;;  %v743_v20 = vld [vmem:[%s14308_s3 + $0x118] sm:$0xff] }
 0x2b0   : > { %1191 = vmatmul.f32.vlgmr.msrb.gmra.mxu0 %v711_v40  ;;  %980 = vmatmul.f32.gmra.mxu3 %v729_v42  ;;  %v742_v40 = vld [vmem:[%s14308_s3 + $0x110] sm:$0xff] }
 0x2b1   : > { %1081 = vmatmul.f32.gmra.mxu1 %v714_v63  ;;  %v761_v63 = vld [vmem:[%s14308_s3 + $0x1a8] sm:$0xff] }
 0x2b4   : > { %v8803_v60 = vpop.f32.mrf.mxu1 }
 0x2b8   : > { %1194 = vmatmul.f32.gmra.mxu0 %v715_v50  ;;  %983 = vmatmul.f32.gmra.mxu3 %v733_v57  ;;  %v746_v50 = vld [vmem:[%s14308_s3 + $0x130] sm:$0xff] }
 0x2b9   : > { %1084 = vmatmul.f32.gmra.mxu1 %v718_v52  ;;  %v747_v52 = vld [vmem:[%s14308_s3 + $0x138] sm:$0xff] }
 0x2bc   : > { %v8814_v55 = vpop.f32.mrf.mxu1 }
 0x2c0   : > { %1197 = vmatmul.f32.gmra.mxu0 %v719_v56  ;;  %986 = vmatmul.f32.gmra.mxu3 %v737_v58  ;;  %v765_v56 = vld [vmem:[%s14308_s3 + $0x1c8] sm:$0xff]  ;;  %v750_v58 = vld [vmem:[%s14308_s3 + $0x150] sm:$0xff] }
 0x2c1   : > { %1087 = vmatmul.f32.gmra.mxu1 %v722_v59 }
 0x2c4   : > { %v8825_v49 = vpop.f32.mrf.mxu1 }
 0x2c8   : > { %1200 = vmatmul.f32.gmra.mxu0 %v723_v0  ;;  %989 = vmatmul.f32.gmra.mxu3 %v741_v62  ;;  %v768_v0 = vld [vmem:[%s14308_s3 + $0x1e0] sm:$0xff]  ;;  %v751_v62 = vld [vmem:[%s14308_s3 + $0x158] sm:$0xff] }
 0x2c9   : > { %1090 = vmatmul.f32.gmra.mxu1 %v726_v53  ;;  %897 = vmatmul.f32.vlgmr.msra.gmra.mxu2 %v768_v0  ;;  %v769_v53 = vld [vmem:[%s14308_s3 + $0x1e8] sm:$0xff]  ;;  %v780_v0 = vld [vmem:[%s14308_s3 + $0x240] sm:$0xff] }
 0x2cc   : > { %v8836_v1 = vpop.f32.mrf.mxu1 }
 0x2d0   : > { %1203 = vmatmul.f32.gmra.mxu0 %v727_v3  ;;  %992 = vmatmul.f32.gmra.mxu3 %v745_v45  ;;  %v754_v3 = vld [vmem:[%s14308_s3 + $0x170] sm:$0xff] }
 0x2d1   : > { %1093 = vmatmul.f32.gmra.mxu1 %v730_v9  ;;  %v772_v9 = vld [vmem:[%s14308_s3 + $0x200] sm:$0xff] }
 0x2d2   : > { %900 = vmatmul.f32.gmra.mxu2 %v772_v9  ;;  %v767_v9 = vld [vmem:[%s14308_s3 + $0x1d8] sm:$0xff] }
 0x2d4   : > { %v8847_v14 = vpop.f32.mrf.mxu1 }
 0x2d8   : > { %1206 = vmatmul.f32.gmra.mxu0 %v731_v17  ;;  %995 = vmatmul.f32.gmra.mxu3 %v749_v19  ;;  %v755_v17 = vld [vmem:[%s14308_s3 + $0x178] sm:$0xff]  ;;  %v773_v19 = vld [vmem:[%s14308_s3 + $0x208] sm:$0xff] }
 0x2d9   : > { %1096 = vmatmul.f32.gmra.mxu1 %v734_v41  ;;  %v758_v41 = vld [vmem:[%s14308_s3 + $0x190] sm:$0xff] }
 0x2dc   : > { %v8858_v22 = vpop.f32.mrf.mxu1 }
 0x2e0   : > { %1209 = vmatmul.f32.gmra.mxu0 %v735_v24  ;;  %998 = vmatmul.f32.gmra.mxu3 %v753_v27 }
 0x2e1   : > { %1099 = vmatmul.f32.gmra.mxu1 %v738_v29  ;;  %v759_v29 = vld [vmem:[%s14308_s3 + $0x198] sm:$0xff] }
 0x2e4   : > { %v8869_v32 = vpop.f32.mrf.mxu1 }
 0x2e8   : > { %1212 = vmatmul.f32.gmra.mxu0 %v739_v34  ;;  %1001 = vmatmul.f32.gmra.mxu3 %v757_v36  ;;  %v762_v34 = vld [vmem:[%s14308_s3 + $0x1b0] sm:$0xff]  ;;  %v776_v36 = vld [vmem:[%s14308_s3 + $0x220] sm:$0xff] }
 0x2e9   : > { %1102 = vmatmul.f32.gmra.mxu1 %v742_v40  ;;  %v777_v40 = vld [vmem:[%s14308_s3 + $0x228] sm:$0xff]  ;;  %903 = vmatmul.f32.gmra.mxu2 %v776_v36 }
 0x2ec   : > { %v8880_v42 = vpop.f32.mrf.mxu1 }
 0x2f0   : > { %1215 = vmatmul.f32.gmra.mxu0 %v743_v20  ;;  %1004 = vmatmul.f32.gmra.mxu3 %v761_v63 }
 0x2f1   : > { %1105 = vmatmul.f32.gmra.mxu1 %v746_v50  ;;  %v763_v50 = vld [vmem:[%s14308_s3 + $0x1b8] sm:$0xff]  ;;  %906 = vmatmul.f32.gmra.mxu2 %v780_v0 }
 0x2f4   : > { %v8891_v57 = vpop.f32.mrf.mxu1 }
 0x2f8   : > { %1218 = vmatmul.f32.gmra.mxu0 %v747_v52  ;;  %1007 = vmatmul.f32.gmra.mxu3 %v765_v56  ;;  %v766_v52 = vld [vmem:[%s14308_s3 + $0x1d0] sm:$0xff]  ;;  %v14314_v56 = vmov 0  }
 0x2f9   : > { %1108 = vmatmul.f32.gmra.mxu1 %v750_v58  ;;  %7811 = vset.pattern.permute.xlu1 %v14314_v56  ;;  %v2155_v58 = vld [vmem:[%s14312_s7] sm:$0xff] }
 0x2fa   : > { %2189 = vperm.xlu1 %7811, %v2155_v58   ;;  %7813 = vset.pattern.permute.xlu2 %v14314_v56  ;;  %v2161_v58 = vld [vmem:[%s14312_s7 + $0x30] sm:$0xff] }
 0x2fb   : > { %7812 = vset.pattern.permute.xlu0 %v14314_v56 }
 0x2fc   : > { %v8902_v59 = vpop.f32.mrf.mxu1 }
 0x300   : > { %1221 = vmatmul.f32.gmra.mxu0 %v751_v62  ;;  %1010 = vmatmul.f32.gmra.mxu3 %v769_v53  ;;  %v781_v62 = vld [vmem:[%s14308_s3 + $0x248] sm:$0xff] }
 0x301   : > { %1111 = vmatmul.f32.gmra.mxu1 %v754_v3 }
 0x304   : > { %v8916_v45 = vpop.f32.mrf.mxu1 }
 0x308   : > { %1224 = vmatmul.f32.gmra.mxu0 %v755_v17  ;;  %1013 = vmatmul.f32.gmra.mxu3 %v773_v19  ;;  %v770_v17 = vld [vmem:[%s14308_s3 + $0x1f0] sm:$0xff]  ;;  %v2158_v19 = vld [vmem:[%s14312_s7 + $0x18] sm:$0xff] }
 0x309   : > { %1114 = vmatmul.f32.gmra.mxu1 %v758_v41  ;;  %2204 = vperm.xlu1 %7811, %v2158_v19   ;;  %v784_v41 = vld [vmem:[%s14308_s3 + $0x260] sm:$0xff] }
 0x30a   : > { %909 = vmatmul.f32.gmra.mxu2 %v784_v41 }
 0x30b   : > { %v966_v24 = vpop.f32.mrf.mxu3 }
 0x30c   : > { %v8930_v27 = vpop.f32.mrf.mxu1  ;;  %v967_v0 = vadd.f32 %v966_v24, %v8792_v38 }
 0x310   : > { %1227 = vmatmul.f32.gmra.mxu0 %v759_v29  ;;  %1016 = vmatmul.f32.gmra.mxu3 %v777_v40  ;;  %v785_v29 = vld [vmem:[%s14308_s3 + $0x268] sm:$0xff]  ;;  %v771_v40 = vld [vmem:[%s14308_s3 + $0x1f8] sm:$0xff] }
 0x311   : > { %1117 = vmatmul.f32.gmra.mxu1 %v762_v34  ;;  %2219 = vperm.xlu1 %7811, %v2161_v58  }
 0x313   : > { %v969_v20 = vpop.f32.mrf.mxu3 }
 0x314   : > { %v8944_v63 = vpop.f32.mrf.mxu1  ;;  %v970_v58 = vadd.f32 %v969_v20, %v8803_v60  ;;  %v779_v60 = vld [vmem:[%s14308_s3 + $0x238] sm:$0xff] }
 0x318   : > { %1230 = vmatmul.f32.gmra.mxu0 %v763_v50  ;;  %1019 = vmatmul.f32.gmra.mxu3 %v781_v62  ;;  %v774_v50 = vld [vmem:[%s14308_s3 + $0x210] sm:$0xff]  ;;  %v788_v62 = vld [vmem:[%s14308_s3 + $0x280] sm:$0xff] }
 0x319   : > { %1120 = vmatmul.f32.gmra.mxu1 %v766_v52  ;;  %v2157_v52 = vld [vmem:[%s14312_s7 + $0x10] sm:$0xff]  ;;  %912 = vmatmul.f32.gmra.mxu2 %v788_v62  ;;  %v793_v62 = vld [vmem:[%s14308_s3 + $0x2a8] sm:$0xff] }
 0x31a   : > { %2199 = vperm.xlu2 %7813, %v2157_v52   ;;  %v2160_v52 = vld [vmem:[%s14312_s7 + $0x28] sm:$0xff] }
 0x31b   : > { %v972_v53 = vpop.f32.mrf.mxu3 }
 0x31d   : > { %v8964_v3 = vpop.f32.mrf.mxu1 }
 0x320   : > { %1233 = vmatmul.f32.gmra.mxu0 %v767_v9  ;;  %1022 = vmatmul.f32.gmra.mxu3 %v785_v29  ;;  %v789_v9 = vld [vmem:[%s14308_s3 + $0x288] sm:$0xff]  ;;  %v775_v29 = vld [vmem:[%s14308_s3 + $0x218] sm:$0xff] }
 0x321   : > { %1123 = vmatmul.f32.gmra.mxu1 %v770_v17 }
 0x322   : > { %2214 = vperm.xlu2 %7813, %v2160_v52   ;;  %v2159_v52 = vld [vmem:[%s14312_s7 + $0x20] sm:$0xff] }
 0x323   : > { %v8981_v34 = vpop.f32.mrf.mxu3 }
 0x325   : > { %v1079_v36 = vpop.f32.mrf.mxu1 }
 0x326   : > { %v1080_v19 = vadd.f32 %v1079_v36, %v967_v0  ;;  %v2156_v36 = vld [vmem:[%s14312_s7 + $0x8] sm:$0xff]  ;;  %v792_v0 = vld [vmem:[%s14308_s3 + $0x2a0] sm:$0xff] }
 0x327   : > { %2194 = vperm.xlu0 %7812, %v2156_v36   ;;  %915 = vmatmul.f32.gmra.mxu2 %v792_v0  ;;  %v797_v0 = vld [vmem:[%s14308_s3 + $0x2c8] sm:$0xff] }
 0x328   : > { %1236 = vmatmul.f32.gmra.mxu0 %v771_v40  ;;  %1025 = vmatmul.f32.gmra.mxu3 %v789_v9  ;;  %v778_v40 = vld [vmem:[%s14308_s3 + $0x230] sm:$0xff] }
 0x329   : > { %1126 = vmatmul.f32.gmra.mxu1 %v774_v50 }
 0x32b   : > { %v9002_v17 = vpop.f32.mrf.mxu3 }
 0x32d   : > { %v1192_v41 = vpop.f32.mrf.mxu0 }
 0x32e   : > { %v1193_v38 = vadd.f32 %v1192_v41, %v1080_v19  ;;  %v1082_v24 = vpop.f32.mrf.mxu1 }
 0x32f   : > { %v1083_v19 = vadd.f32 %v1082_v24, %v970_v58  ;;  %v973_v24 = vadd.f32 %v972_v53, %v8814_v55  ;;  %2209 = vperm.xlu0 %7812, %v2159_v52   ;;  %v796_v58 = vld [vmem:[%s14308_s3 + $0x2c0] sm:$0xff]  ;;  %v783_v55 = vld [vmem:[%s14308_s3 + $0x258] sm:$0xff] }
 0x330   : > { %v6977_v50 = vmul.f32 -1.442695, %v1193_v38  ;;  %1239 = vmatmul.f32.gmra.mxu0 %v775_v29  ;;  %1028 = vmatmul.f32.gmra.mxu3 %v793_v62  ;;  %v782_v38 = vld [vmem:[%s14308_s3 + $0x250] sm:$0xff] }
 0x331   : > { %1129 = vmatmul.f32.gmra.mxu1 %v778_v40  ;;  %918 = vmatmul.f32.gmra.mxu2 %v796_v58  ;;  %v800_v58 = vld [vmem:[%s14308_s3 + $0x2e0] sm:$0xff] }
 0x332   : > { %7909 = vpow2.f32 %v6977_v50 }
 0x333   : > { %v9023_v9 = vpop.f32.mrf.mxu3 }
 0x335   : > { %v1195_v41 = vpop.f32.mrf.mxu0 }
 0x336   : > { %v1196_v20 = vadd.f32 %v1195_v41, %v1083_v19  ;;  %v1085_v29 = vpop.f32.mrf.mxu1 }
 0x337   : > { %v1086_v19 = vadd.f32 %v1085_v29, %v973_v24  ;;  %v976_v29 = vadd.f32 %v8981_v34, %v8825_v49  ;;  %v787_v49 = vld [vmem:[%s14308_s3 + $0x278] sm:$0xff] }
 0x338   : > { %v7910_v40 = vpop.eup %7909  ;;  %v6978_v50 = vmul.f32 -1.442695, %v1196_v20  ;;  %1242 = vmatmul.f32.gmra.mxu0 %v779_v60  ;;  %1031 = vmatmul.f32.gmra.mxu3 %v797_v0  ;;  %v786_v20 = vld [vmem:[%s14308_s3 + $0x270] sm:$0xff]  ;;  %v801_v0 = vld [vmem:[%s14308_s3 + $0x2e8] sm:$0xff] }
 0x339   : > { %v1384_v36 = vadd.f32 1.0, %v7910_v40  ;;  %1132 = vmatmul.f32.gmra.mxu1 %v782_v38  ;;  %921 = vmatmul.f32.gmra.mxu2 %v800_v58 }
 0x33a   : > { %7911 = vpow2.f32 %v6978_v50 }
 0x33b   : > { %7913 = vrcp.f32 %v1384_v36  ;;  %v9041_v62 = vpop.f32.mrf.mxu3  ;;  %v1427_v34 = vand.u32 2147483648, %v1384_v36  ;;  %v1425_v56 = vand.u32 2147483647, %v1384_v36  ;;  %vm1421_vm10 = vweird.f32 %v1384_v36 }
 0x33d   : > { %v1198_v41 = vpop.f32.mrf.mxu0  ;;  %vm1426_vm12 = vcmp.eq.f32.partialorder %v1425_v56, 8.507059e+37 }
 0x33e   : > { %v1199_v53 = vadd.f32 %v1198_v41, %v1086_v19  ;;  %v1088_v60 = vpop.f32.mrf.mxu1 }
 0x33f   : > { %v1089_v41 = vadd.f32 %v1088_v60, %v976_v29 }
 0x340   : > { %v7912_v38 = vpop.eup %7911  ;;  %v6979_v40 = vmul.f32 -1.442695, %v1199_v53  ;;  %1245 = vmatmul.f32.gmra.mxu0 %v783_v55  ;;  %1034 = vmatmul.f32.gmra.mxu3 %v801_v0 }
 0x341   : > { %v7914_v50 = vpop.eup %7913  ;;  %v9049_v52 = vadd.f32 1.0, %v7912_v38  ;;  %1135 = vmatmul.f32.gmra.mxu1 %v786_v20 }
 0x342   : > { %7915 = vpow2.f32 %v6979_v40  ;;  %v1417_v24 = vmul.f32 %v7914_v50, %v1384_v36  ;;  %vm1422_vm9 = vweird.f32 %v7914_v50  ;;  %v805_v36 = vld [vmem:[%s14308_s3 + $0x308] sm:$0xff] }
 0x343   : > { %7917 = vrcp.f32 %v9049_v52  ;;  %v9060_v19 = vpop.f32.mrf.mxu3  ;;  %vm1423_vm11 = vmor %vm1421_vm10, %vm1422_vm9  ;;  %vm1436_vm14 = vweird.f32 %v9049_v52 }
 0x344   : > { %v1418_v55 = vsub.f32 1.0, %v1417_v24  ;;  %v979_v24 = vadd.f32 %v9002_v17, %v8836_v1 }
 0x345   : > { %v1201_v53 = vpop.f32.mrf.mxu0 }
 0x346   : > { %v1202_v20 = vadd.f32 %v1201_v53, %v1089_v41  ;;  %v1091_v38 = vpop.f32.mrf.mxu1  ;;  %v1419_v40 = vmul.f32 %v7914_v50, %v1418_v55  ;;  %v1428_v41 = vor.u32 1.1754944e-38, %v1427_v34  ;;  %v1442_v34 = vand.u32 2147483648, %v9049_v52 }
 0x348   : > { %v7916_v39 = vpop.eup %7915  ;;  %v6980_v58 = vmul.f32 -1.442695, %v1202_v20  ;;  %1248 = vmatmul.f32.gmra.mxu0 %v787_v49  ;;  %v1420_v60 = vadd.f32 %v7914_v50, %v1419_v40  ;;  %v804_v49 = vld [vmem:[%s14308_s3 + $0x300] sm:$0xff]  ;;  %1037 = vmatmul.f32.gmra.mxu3 %v805_v36 }
 0x349   : > { %v7918_v29 = vpop.eup %7917  ;;  %v9070_v0 = vadd.f32 1.0, %v7916_v39  ;;  %1138 = vmatmul.f32.gmra.mxu1 %v790_v6  ;;  %924 = vmatmul.f32.gmra.mxu2 %v804_v49  ;;  %v1092_v6 = vadd.f32 %v1091_v38, %v979_v24  ;;  %v982_v49 = vadd.f32 %v9023_v9, %v8847_v14 }
 0x34a   : > { %7919 = vpow2.f32 %v6980_v58  ;;  %v1424_v55 = vsel %vm1423_vm11, %v7914_v50, %v1420_v60  ;;  %v1432_v53 = vmul.f32 %v7918_v29, %v9049_v52  ;;  %v791_v50 = vld [vmem:[%s14308_s3 + $0x298] sm:$0xff]  ;;  %vm1437_vm13 = vweird.f32 %v7918_v29 }
 0x34b   : > { %7921 = vrcp.f32 %v9070_v0  ;;  %v1429_v39 = vsel %vm1426_vm12, %v1428_v41, %v1424_v55  ;;  %v9080_v1 = vpop.f32.mrf.mxu3  ;;  %v1440_v60 = vand.u32 2147483647, %v9049_v52  ;;  %v794_v41 = vld [vmem:[%s14308_s3 + $0x2b0] sm:$0xff]  ;;  %vm1438_vm15 = vmor %vm1436_vm14, %vm1437_vm13  ;;  %v809_v52 = vld [vmem:[%s14308_s3 + $0x328] sm:$0xff]  ;;  %vm1451_vm2 = vweird.f32 %v9070_v0 }
 0x34c   : > { %1898 = vperm.xlu1 %7811, %v1429_v39   ;;  %v1433_v56 = vsub.f32 1.0, %v1432_v53  ;;  %v1443_v39 = vor.u32 1.1754944e-38, %v1442_v34 }
 0x34d   : > { %v1204_v17 = vpop.f32.mrf.mxu0  ;;  %vm1441_vm0 = vcmp.eq.f32.partialorder %v1440_v60, 8.507059e+37 }
 0x34e   : > { %v1205_v20 = vadd.f32 %v1204_v17, %v1092_v6  ;;  %v1094_v40 = vpop.f32.mrf.mxu1  ;;  %v1434_v58 = vmul.f32 %v7918_v29, %v1433_v56  ;;  %v808_v17 = vld [vmem:[%s14308_s3 + $0x320] sm:$0xff] }
 0x350   : > { %v7920_v38 = vpop.eup %7919  ;;  %v6981_v24 = vmul.f32 -1.442695, %v1205_v20  ;;  %1251 = vmatmul.f32.gmra.mxu0 %v791_v50  ;;  %v1435_v55 = vadd.f32 %v7918_v29, %v1434_v58  ;;  %1040 = vmatmul.f32.gmra.mxu3 %v809_v52  ;;  %v1095_v50 = vadd.f32 %v1094_v40, %v982_v49  ;;  %v795_v20 = vld [vmem:[%s14308_s3 + $0x2b8] sm:$0xff]  ;;  %v1457_v58 = vand.u32 2147483648, %v9070_v0 }
 0x351   : > { %v7922_v53 = vpop.eup %7921  ;;  %v9093_v36 = vadd.f32 1.0, %v7920_v38  ;;  %1141 = vmatmul.f32.gmra.mxu1 %v794_v41  ;;  %927 = vmatmul.f32.gmra.mxu2 %v808_v17 }
 0x352   : > { %7923 = vpow2.f32 %v6981_v24  ;;  %v1439_v6 = vsel %vm1438_vm15, %v7918_v29, %v1435_v55  ;;  %v1447_v56 = vmul.f32 %v7922_v53, %v9070_v0  ;;  %vm1452_vm1 = vweird.f32 %v7922_v53  ;;  %v798_v55 = vld [vmem:[%s14308_s3 + $0x2d0] sm:$0xff] }
 0x353   : > { %7925 = vrcp.f32 %v9093_v36  ;;  %v1444_v14 = vsel %vm1441_vm0, %v1443_v39, %v1439_v6  ;;  %v9103_v9 = vpop.f32.mrf.mxu3  ;;  %v1455_v24 = vand.u32 2147483647, %v9070_v0  ;;  %vm1453_vm3 = vmor %vm1451_vm2, %vm1452_vm1  ;;  %v1458_v52 = vor.u32 1.1754944e-38, %v1457_v58  ;;  %v813_v0 = vld [vmem:[%s14308_s3 + $0x348] sm:$0xff]  ;;  %v799_v58 = vld [vmem:[%s14308_s3 + $0x2d8] sm:$0xff] }
 0x354   : > { %1903 = vperm.xlu2 %7813, %v1444_v14   ;;  %v1448_v29 = vsub.f32 1.0, %v1447_v56  ;;  %v985_v56 = vadd.f32 %v9041_v62, %v8858_v22  ;;  %vm1466_vm6 = vweird.f32 %v9093_v36 }
 0x355   : > { %v1207_v34 = vpop.f32.mrf.mxu0  ;;  %vm1456_vm4 = vcmp.eq.f32.partialorder %v1455_v24, 8.507059e+37 }
 0x356   : > { %v1208_v60 = vadd.f32 %v1207_v34, %v1095_v50  ;;  %v1097_v41 = vpop.f32.mrf.mxu1  ;;  %v1449_v38 = vmul.f32 %v7922_v53, %v1448_v29  ;;  %v812_v29 = vld [vmem:[%s14308_s3 + $0x340] sm:$0xff] }
 0x357   : > { %v1098_v34 = vadd.f32 %v1097_v41, %v985_v56 }
 0x358   : > { %v7924_v40 = vpop.eup %7923  ;;  %v6982_v49 = vmul.f32 -1.442695, %v1208_v60  ;;  %1254 = vmatmul.f32.gmra.mxu0 %v795_v20  ;;  %v1450_v39 = vadd.f32 %v7922_v53, %v1449_v38  ;;  %1043 = vmatmul.f32.gmra.mxu3 %v813_v0  ;;  %v1472_v60 = vand.u32 2147483648, %v9093_v36 }
 0x359   : > { %v7926_v6 = vpop.eup %7925  ;;  %v9116_v17 = vadd.f32 1.0, %v7924_v40  ;;  %1144 = vmatmul.f32.gmra.mxu1 %v798_v55  ;;  %930 = vmatmul.f32.gmra.mxu2 %v812_v29  ;;  %v1470_v40 = vand.u32 2147483647, %v9093_v36 }
 0x35a   : > { %7927 = vpow2.f32 %v6982_v49  ;;  %v1454_v14 = vsel %vm1453_vm3, %v7922_v53, %v1450_v39  ;;  %v1462_v50 = vmul.f32 %v7926_v6, %v9093_v36  ;;  %vm1467_vm5 = vweird.f32 %v7926_v6  ;;  %v802_v49 = vld [vmem:[%s14308_s3 + $0x2f0] sm:$0xff]  ;;  %v817_v36 = vld [vmem:[%s14308_s3 + $0x368] sm:$0xff] }
 0x35b   : > { %7929 = vrcp.f32 %v9116_v17  ;;  %v1459_v22 = vsel %vm1456_vm4, %v1458_v52, %v1454_v14  ;;  %v9126_v62 = vpop.f32.mrf.mxu3  ;;  %v988_v14 = vadd.f32 %v9060_v19, %v8869_v32  ;;  %vm1468_vm7 = vmor %vm1466_vm6, %vm1467_vm5  ;;  %v1473_v29 = vor.u32 1.1754944e-38, %v1472_v60 }
 0x35c   : > { %1908 = vperm.xlu0 %7812, %v1459_v22   ;;  %v1463_v53 = vsub.f32 1.0, %v1462_v50  ;;  %vm1471_vm8 = vcmp.eq.f32.partialorder %v1470_v40, 8.507059e+37  ;;  %v1487_v60 = vand.u32 2147483648, %v9116_v17  ;;  %vm1481_vm10 = vweird.f32 %v9116_v17 }
 0x35d   : > { %v1210_v20 = vpop.f32.mrf.mxu0 }
 0x35e   : > { %v1211_v38 = vadd.f32 %v1210_v20, %v1098_v34  ;;  %v1100_v24 = vpop.f32.mrf.mxu1  ;;  %v1464_v55 = vmul.f32 %v7926_v6, %v1463_v53  ;;  %v816_v34 = vld [vmem:[%s14308_s3 + $0x360] sm:$0xff] }
 0x35f   : > { %v1101_v53 = vadd.f32 %v1100_v24, %v988_v14 }
 0x360   : > { %v7928_v41 = vpop.eup %7927  ;;  %v6983_v39 = vmul.f32 -1.442695, %v1211_v38  ;;  %1257 = vmatmul.f32.gmra.mxu0 %v799_v58  ;;  %v1465_v56 = vadd.f32 %v7926_v6, %v1464_v55  ;;  %1046 = vmatmul.f32.gmra.mxu3 %v817_v36  ;;  %v803_v58 = vld [vmem:[%s14308_s3 + $0x2f8] sm:$0xff] }
 0x361   : > { %v7930_v52 = vpop.eup %7929  ;;  %v9139_v50 = vadd.f32 1.0, %v7928_v41  ;;  %1147 = vmatmul.f32.gmra.mxu1 %v802_v49  ;;  %933 = vmatmul.f32.gmra.mxu2 %v816_v34  ;;  %v1485_v49 = vand.u32 2147483647, %v9116_v17  ;;  %v806_v41 = vld [vmem:[%s14308_s3 + $0x310] sm:$0xff] }
 0x362   : > { %7931 = vpow2.f32 %v6983_v39  ;;  %v1469_v0 = vsel %vm1468_vm7, %v7926_v6, %v1465_v56  ;;  %v1477_v22 = vmul.f32 %v7930_v52, %v9116_v17  ;;  %vm1482_vm9 = vweird.f32 %v7930_v52  ;;  %v821_v17 = vld [vmem:[%s14308_s3 + $0x388] sm:$0xff] }
 0x363   : > { %7933 = vrcp.f32 %v9139_v50  ;;  %v1474_v32 = vsel %vm1471_vm8, %v1473_v29, %v1469_v0  ;;  %v9149_v19 = vpop.f32.mrf.mxu3  ;;  %v991_v29 = vadd.f32 %v9080_v1, %v8880_v42  ;;  %vm1483_vm11 = vmor %vm1481_vm10, %vm1482_vm9  ;;  %vm1486_vm12 = vcmp.eq.f32.partialorder %v1485_v49, 8.507059e+37 }
 0x364   : > { %1913 = vperm.xlu2 %7813, %v1474_v32   ;;  %v1478_v6 = vsub.f32 1.0, %v1477_v22  ;;  %v1488_v22 = vor.u32 1.1754944e-38, %v1487_v60  ;;  %v820_v32 = vld [vmem:[%s14308_s3 + $0x380] sm:$0xff]  ;;  %v1500_v49 = vand.u32 2147483647, %v9139_v50  ;;  %vm1496_vm14 = vweird.f32 %v9139_v50 }
 0x365   : > { %v1213_v20 = vpop.f32.mrf.mxu0 }
 0x366   : > { %v1214_v38 = vadd.f32 %v1213_v20, %v1101_v53  ;;  %v1103_v55 = vpop.f32.mrf.mxu1  ;;  %v1479_v40 = vmul.f32 %v7930_v52, %v1478_v6  ;;  %v807_v20 = vld [vmem:[%s14308_s3 + $0x318] sm:$0xff]  ;;  %vm1501_vm0 = vcmp.eq.f32.partialorder %v1500_v49, 8.507059e+37 }
 0x367   : > { %v1104_v53 = vadd.f32 %v1103_v55, %v991_v29  ;;  %v994_v29 = vadd.f32 %v9103_v9, %v8891_v57 }
 0x368   : > { %v7932_v24 = vpop.eup %7931  ;;  %v6984_v39 = vmul.f32 -1.442695, %v1214_v38  ;;  %1260 = vmatmul.f32.gmra.mxu0 %v803_v58  ;;  %v1480_v56 = vadd.f32 %v7930_v52, %v1479_v40  ;;  %1049 = vmatmul.f32.gmra.mxu3 %v821_v17  ;;  %v1502_v58 = vand.u32 2147483648, %v9139_v50  ;;  %v824_v17 = vld [vmem:[%s14308_s3 + $0x3a0] sm:$0xff] }
 0x369   : > { %v7934_v14 = vpop.eup %7933  ;;  %v9162_v0 = vadd.f32 1.0, %v7932_v24  ;;  %1150 = vmatmul.f32.gmra.mxu1 %v806_v41  ;;  %936 = vmatmul.f32.gmra.mxu2 %v820_v32  ;;  %v810_v41 = vld [vmem:[%s14308_s3 + $0x330] sm:$0xff] }
 0x36a   : > { %7935 = vpow2.f32 %v6984_v39  ;;  %v1484_v34 = vsel %vm1483_vm11, %v7930_v52, %v1480_v56  ;;  %v1492_v36 = vmul.f32 %v7934_v14, %v9139_v50  ;;  %vm1497_vm13 = vweird.f32 %v7934_v14  ;;  %v825_v50 = vld [vmem:[%s14308_s3 + $0x3a8] sm:$0xff] }
 0x36b   : > { %7937 = vrcp.f32 %v9162_v0  ;;  %v1489_v42 = vsel %vm1486_vm12, %v1488_v22, %v1484_v34  ;;  %v9172_v1 = vpop.f32.mrf.mxu3  ;;  %vm1498_vm15 = vmor %vm1496_vm14, %vm1497_vm13  ;;  %v1503_v34 = vor.u32 1.1754944e-38, %v1502_v58  ;;  %vm1511_vm2 = vweird.f32 %v9162_v0 }
 0x36c   : > { %1918 = vperm.xlu1 %7811, %v1489_v42   ;;  %v1493_v52 = vsub.f32 1.0, %v1492_v36 }
 0x36d   : > { %v1216_v6 = vpop.f32.mrf.mxu0 }
 0x36e   : > { %v1217_v60 = vadd.f32 %v1216_v6, %v1104_v53  ;;  %v1106_v38 = vpop.f32.mrf.mxu1  ;;  %v1494_v40 = vmul.f32 %v7934_v14, %v1493_v52  ;;  %v811_v52 = vld [vmem:[%s14308_s3 + $0x338] sm:$0xff]  ;;  %v1517_v6 = vand.u32 2147483648, %v9162_v0 }
 0x36f   : > { %v1107_v9 = vadd.f32 %v1106_v38, %v994_v29  ;;  %v814_v38 = vld [vmem:[%s14308_s3 + $0x350] sm:$0xff] }
 0x370   : > { %v7936_v55 = vpop.eup %7935  ;;  %v6985_v24 = vmul.f32 -1.442695, %v1217_v60  ;;  %1263 = vmatmul.f32.gmra.mxu0 %v807_v20  ;;  %v1495_v39 = vadd.f32 %v7934_v14, %v1494_v40  ;;  %1052 = vmatmul.f32.gmra.mxu3 %v825_v50  ;;  %v1515_v40 = vand.u32 2147483647, %v9162_v0 }
 0x371   : > { %v7938_v56 = vpop.eup %7937  ;;  %v9185_v22 = vadd.f32 1.0, %v7936_v55  ;;  %1153 = vmatmul.f32.gmra.mxu1 %v810_v41  ;;  %939 = vmatmul.f32.gmra.mxu2 %v824_v17  ;;  %v828_v17 = vld [vmem:[%s14308_s3 + $0x3c0] sm:$0xff] }
 0x372   : > { %7939 = vpow2.f32 %v6985_v24  ;;  %v1499_v36 = vsel %vm1498_vm15, %v7934_v14, %v1495_v39  ;;  %v1507_v32 = vmul.f32 %v7938_v56, %v9162_v0  ;;  %vm1512_vm1 = vweird.f32 %v7938_v56  ;;  %v829_v0 = vld [vmem:[%s14308_s3 + $0x3c8] sm:$0xff] }
 0x373   : > { %7941 = vrcp.f32 %v9185_v22  ;;  %v1504_v57 = vsel %vm1501_vm0, %v1503_v34, %v1499_v36  ;;  %v9195_v14 = vpop.f32.mrf.mxu3  ;;  %v997_v39 = vadd.f32 %v9126_v62, %v8902_v59  ;;  %vm1513_vm3 = vmor %vm1511_vm2, %vm1512_vm1  ;;  %v1518_v34 = vor.u32 1.1754944e-38, %v1517_v6 }
 0x374   : > { %1923 = vperm.xlu2 %7813, %v1504_v57   ;;  %v1508_v42 = vsub.f32 1.0, %v1507_v32  ;;  %vm1516_vm4 = vcmp.eq.f32.partialorder %v1515_v40, 8.507059e+37  ;;  %v815_v57 = vld [vmem:[%s14308_s3 + $0x358] sm:$0xff]  ;;  %v1530_v6 = vand.u32 2147483647, %v9185_v22  ;;  %vm1526_vm6 = vweird.f32 %v9185_v22 }
 0x375   : > { %v1219_v53 = vpop.f32.mrf.mxu0 }
 0x376   : > { %v1220_v20 = vadd.f32 %v1219_v53, %v1107_v9  ;;  %v1109_v58 = vpop.f32.mrf.mxu1  ;;  %v1509_v60 = vmul.f32 %v7938_v56, %v1508_v42  ;;  %v1532_v9 = vand.u32 2147483648, %v9185_v22  ;;  %vm1531_vm8 = vcmp.eq.f32.partialorder %v1530_v6, 8.507059e+37 }
 0x377   : > { %v1110_v62 = vadd.f32 %v1109_v58, %v997_v39 }
 0x378   : > { %v7940_v49 = vpop.eup %7939  ;;  %v6986_v41 = vmul.f32 -1.442695, %v1220_v20  ;;  %1266 = vmatmul.f32.gmra.mxu0 %v811_v52  ;;  %v1510_v55 = vadd.f32 %v7938_v56, %v1509_v60  ;;  %1055 = vmatmul.f32.gmra.mxu3 %v829_v0  ;;  %v818_v20 = vld [vmem:[%s14308_s3 + $0x370] sm:$0xff]  ;;  %v1533_v39 = vor.u32 1.1754944e-38, %v1532_v9  ;;  %v819_v0 = vld [vmem:[%s14308_s3 + $0x378] sm:$0xff] }
 0x379   : > { %v7942_v24 = vpop.eup %7941  ;;  %v9208_v29 = vadd.f32 1.0, %v7940_v49  ;;  %1156 = vmatmul.f32.gmra.mxu1 %v814_v38  ;;  %942 = vmatmul.f32.gmra.mxu2 %v828_v17  ;;  %v822_v9 = vld [vmem:[%s14308_s3 + $0x390] sm:$0xff] }
 0x37a   : > { %7943 = vpow2.f32 %v6986_v41  ;;  %v1514_v36 = vsel %vm1513_vm3, %v7938_v56, %v1510_v55  ;;  %v1522_v32 = vmul.f32 %v7942_v24, %v9185_v22  ;;  %vm1527_vm5 = vweird.f32 %v7942_v24  ;;  %v833_v22 = vld [vmem:[%s14308_s3 + $0x3e8] sm:$0xff] }
 0x37b   : > { %7945 = vrcp.f32 %v9208_v29  ;;  %v1519_v59 = vsel %vm1516_vm4, %v1518_v34, %v1514_v36  ;;  %v9226_v58 = vpop.f32.mrf.mxu3  ;;  %v1000_v41 = vadd.f32 %v9149_v19, %v8916_v45  ;;  %vm1528_vm7 = vmor %vm1526_vm6, %vm1527_vm5  ;;  %vm1541_vm10 = vweird.f32 %v9208_v29 }
 0x37c   : > { %1928 = vperm.xlu1 %7811, %v1519_v59   ;;  %v1523_v50 = vsub.f32 1.0, %v1522_v32  ;;  %v832_v32 = vld [vmem:[%s14308_s3 + $0x3e0] sm:$0xff]  ;;  %v1547_v59 = vand.u32 2147483648, %v9208_v29 }
 0x37d   : > { %v1222_v56 = vpop.f32.mrf.mxu0 }
 0x37e   : > { %v1223_v42 = vadd.f32 %v1222_v56, %v1110_v62  ;;  %v1112_v53 = vpop.f32.mrf.mxu1  ;;  %v1524_v52 = vmul.f32 %v7942_v24, %v1523_v50 }
 0x37f   : > { %v1113_v19 = vadd.f32 %v1112_v53, %v1000_v41  ;;  %v1548_v41 = vor.u32 1.1754944e-38, %v1547_v59 }
 0x380   : > { %v7944_v60 = vpop.eup %7943  ;;  %v6987_v40 = vmul.f32 -1.442695, %v1223_v42  ;;  %1269 = vmatmul.f32.gmra.mxu0 %v815_v57  ;;  %v1525_v38 = vadd.f32 %v7942_v24, %v1524_v52  ;;  %1058 = vmatmul.f32.gmra.mxu3 %v833_v22  ;;  %v1545_v57 = vand.u32 2147483647, %v9208_v29  ;;  %v9249_v42 = vpop.f32.mrf.mxu2 }
 0x381   : > { %v7946_v49 = vpop.eup %7945  ;;  %v9231_v55 = vadd.f32 1.0, %v7944_v60  ;;  %1159 = vmatmul.f32.gmra.mxu1 %v818_v20  ;;  %945 = vmatmul.f32.gmra.mxu2 %v832_v32 }
 0x382   : > { %7947 = vpow2.f32 %v6987_v40  ;;  %v1529_v34 = vsel %vm1528_vm7, %v7942_v24, %v1525_v38  ;;  %v1537_v36 = vmul.f32 %v7946_v49, %v9208_v29  ;;  %vm1542_vm9 = vweird.f32 %v7946_v49 }
 0x383   : > { %7949 = vrcp.f32 %v9231_v55  ;;  %v1534_v45 = vsel %vm1531_vm8, %v1533_v39, %v1529_v34  ;;  %v9251_v53 = vpop.f32.mrf.mxu3  ;;  %v1003_v40 = vadd.f32 %v9172_v1, %v8930_v27  ;;  %vm1543_vm11 = vmor %vm1541_vm10, %vm1542_vm9  ;;  %vm1546_vm12 = vcmp.eq.f32.partialorder %v1545_v57, 8.507059e+37  ;;  %v823_v27 = vld [vmem:[%s14308_s3 + $0x398] sm:$0xff] }
 0x384   : > { %1933 = vperm.xlu2 %7813, %v1534_v45   ;;  %v1538_v17 = vsub.f32 1.0, %v1537_v36  ;;  %v1562_v1 = vand.u32 2147483648, %v9231_v55  ;;  %vm1556_vm14 = vweird.f32 %v9231_v55 }
 0x385   : > { %v1225_v24 = vpop.f32.mrf.mxu0 }
 0x386   : > { %v1226_v62 = vadd.f32 %v1225_v24, %v1113_v19  ;;  %v1115_v50 = vpop.f32.mrf.mxu1  ;;  %v1539_v56 = vmul.f32 %v7946_v49, %v1538_v17  ;;  %v826_v24 = vld [vmem:[%s14308_s3 + $0x3b0] sm:$0xff] }
 0x387   : > { %v1116_v32 = vadd.f32 %v1115_v50, %v1003_v40 }
 0x388   : > { %v7948_v52 = vpop.eup %7947  ;;  %v6988_v6 = vmul.f32 -1.442695, %v1226_v62  ;;  %1272 = vmatmul.f32.gmra.mxu0 %v819_v0  ;;  %v1540_v20 = vadd.f32 %v7946_v49, %v1539_v56  ;;  %v9268_v0 = vpop.f32.mrf.mxu2 }
 0x389   : > { %v7950_v60 = vpop.eup %7949  ;;  %v9256_v38 = vadd.f32 1.0, %v7948_v52  ;;  %1162 = vmatmul.f32.gmra.mxu1 %v822_v9  ;;  %v1006_v9 = vadd.f32 %v9195_v14, %v8944_v63  ;;  %v827_v63 = vld [vmem:[%s14308_s3 + $0x3b8] sm:$0xff] }
 0x38a   : > { %7951 = vpow2.f32 %v6988_v6  ;;  %v1544_v39 = vsel %vm1543_vm11, %v7946_v49, %v1540_v20  ;;  %v1552_v34 = vmul.f32 %v7950_v60, %v9231_v55  ;;  %vm1557_vm13 = vweird.f32 %v7950_v60 }
 0x38b   : > { %7953 = vrcp.f32 %v9256_v38  ;;  %v1549_v36 = vsel %vm1546_vm12, %v1548_v41, %v1544_v39  ;;  %v1560_v49 = vand.u32 2147483647, %v9231_v55  ;;  %v9270_v59 = vpop.f32.mrf.mxu3  ;;  %vm1558_vm15 = vmor %vm1556_vm14, %vm1557_vm13  ;;  %v1563_v6 = vor.u32 1.1754944e-38, %v1562_v1 }
 0x38c   : > { %1938 = vperm.xlu1 %7811, %v1549_v36   ;;  %v1553_v29 = vsub.f32 1.0, %v1552_v34  ;;  %v1577_v14 = vand.u32 2147483648, %v9256_v38  ;;  %vm1571_vm2 = vweird.f32 %v9256_v38 }
 0x38d   : > { %v1228_v22 = vpop.f32.mrf.mxu0  ;;  %vm1561_vm0 = vcmp.eq.f32.partialorder %v1560_v49, 8.507059e+37 }
 0x38e   : > { %v1229_v45 = vadd.f32 %v1228_v22, %v1116_v32  ;;  %v1118_v19 = vpop.f32.mrf.mxu1  ;;  %v1554_v17 = vmul.f32 %v7950_v60, %v1553_v29  ;;  %v830_v22 = vld [vmem:[%s14308_s3 + $0x3d0] sm:$0xff] }
 0x38f   : > { %v1119_v39 = vadd.f32 %v1118_v19, %v1006_v9 }
 0x390   : > { %v7952_v62 = vpop.eup %7951  ;;  %v6989_v50 = vmul.f32 -1.442695, %v1229_v45  ;;  %1275 = vmatmul.f32.gmra.mxu0 %v823_v27  ;;  %v1555_v56 = vadd.f32 %v7950_v60, %v1554_v17  ;;  %v9287_v27 = vpop.f32.mrf.mxu2 }
 0x391   : > { %v7954_v57 = vpop.eup %7953  ;;  %v9275_v52 = vadd.f32 1.0, %v7952_v62  ;;  %1165 = vmatmul.f32.gmra.mxu1 %v826_v24  ;;  %v1009_v24 = vadd.f32 %v9226_v58, %v8964_v3  ;;  %v831_v3 = vld [vmem:[%s14308_s3 + $0x3d8] sm:$0xff] }
 0x392   : > { %7955 = vpow2.f32 %v6989_v50  ;;  %v1559_v20 = vsel %vm1558_vm15, %v7950_v60, %v1555_v56  ;;  %v1567_v40 = vmul.f32 %v7954_v57, %v9256_v38  ;;  %vm1572_vm1 = vweird.f32 %v7954_v57 }
 0x393   : > { %7957 = vrcp.f32 %v9275_v52  ;;  %v1564_v41 = vsel %vm1561_vm0, %v1563_v6, %v1559_v20  ;;  %v1575_v60 = vand.u32 2147483647, %v9256_v38  ;;  %v9289_v1 = vpop.f32.mrf.mxu3  ;;  %vm1573_vm3 = vmor %vm1571_vm2, %vm1572_vm1  ;;  %v1578_v50 = vor.u32 1.1754944e-38, %v1577_v14 }
 0x394   : > { %1943 = vperm.xlu0 %7812, %v1564_v41   ;;  %v1568_v55 = vsub.f32 1.0, %v1567_v40  ;;  %v1590_v58 = vand.u32 2147483647, %v9275_v52  ;;  %v1592_v41 = vand.u32 2147483648, %v9275_v52  ;;  %vm1586_vm6 = vweird.f32 %v9275_v52 }
 0x395   : > { %v1231_v34 = vpop.f32.mrf.mxu0  ;;  %vm1576_vm4 = vcmp.eq.f32.partialorder %v1575_v60, 8.507059e+37 }
 0x396   : > { %v1232_v36 = vadd.f32 %v1231_v34, %v1119_v39  ;;  %v1121_v32 = vpop.f32.mrf.mxu1  ;;  %v1569_v29 = vmul.f32 %v7954_v57, %v1568_v55  ;;  %vm1591_vm8 = vcmp.eq.f32.partialorder %v1590_v58, 8.507059e+37 }
 0x397   : > { %v1122_v20 = vadd.f32 %v1121_v32, %v1009_v24 }
 0x398   : > { %v7956_v45 = vpop.eup %7955  ;;  %v6990_v19 = vmul.f32 -1.442695, %v1232_v36  ;;  %1278 = vmatmul.f32.gmra.mxu0 %v827_v63  ;;  %v1570_v17 = vadd.f32 %v7954_v57, %v1569_v29  ;;  %v834_v63 = vld [vmem:[%s14308_s3 + $0x3f0] sm:$0xff]  ;;  %v9308_v14 = vpop.f32.mrf.mxu2 }
 0x399   : > { %v7958_v49 = vpop.eup %7957  ;;  %v9294_v62 = vadd.f32 1.0, %v7956_v45  ;;  %1168 = vmatmul.f32.gmra.mxu1 %v830_v22 }
 0x39a   : > { %7959 = vpow2.f32 %v6990_v19  ;;  %v1574_v56 = vsel %vm1573_vm3, %v7954_v57, %v1570_v17  ;;  %v1582_v9 = vmul.f32 %v7958_v49, %v9275_v52  ;;  %v1012_v57 = vadd.f32 %v9251_v53, %v9249_v42  ;;  %v835_v52 = vld [vmem:[%s14308_s3 + $0x3f8] sm:$0xff] }
 0x39b   : > { %7961 = vrcp.f32 %v9294_v62  ;;  %v1579_v6 = vsel %vm1576_vm4, %v1578_v50, %v1574_v56  ;;  %vm1587_vm5 = vweird.f32 %v7958_v49  ;;  %v9310_v36 = vpop.f32.mrf.mxu3  ;;  %v1593_v42 = vor.u32 1.1754944e-38, %v1592_v41 }
 0x39c   : > { %1948 = vperm.xlu2 %7813, %v1579_v6   ;;  %v1583_v38 = vsub.f32 1.0, %v1582_v9  ;;  %vm1588_vm7 = vmor %vm1586_vm6, %vm1587_vm5  ;;  %v1605_v9 = vand.u32 2147483647, %v9294_v62  ;;  %v1607_v6 = vand.u32 2147483648, %v9294_v62  ;;  %vm1601_vm10 = vweird.f32 %v9294_v62 }
 0x39d   : > { %v1234_v40 = vpop.f32.mrf.mxu0 }
 0x39e   : > { %v1235_v39 = vadd.f32 %v1234_v40, %v1122_v20  ;;  %v1124_v55 = vpop.f32.mrf.mxu1  ;;  %v1584_v34 = vmul.f32 %v7958_v49, %v1583_v38  ;;  %v1015_v38 = vadd.f32 %v9270_v59, %v9268_v0  ;;  %vm1606_vm12 = vcmp.eq.f32.partialorder %v1605_v9, 8.507059e+37 }
 0x39f   : > { %v1125_v53 = vadd.f32 %v1124_v55, %v1012_v57 }
 0x3a0   : > { %v7960_v32 = vpop.eup %7959  ;;  %v6991_v29 = vmul.f32 -1.442695, %v1235_v39  ;;  %1281 = vmatmul.f32.gmra.mxu0 %v831_v3  ;;  %v1585_v60 = vadd.f32 %v7958_v49, %v1584_v34  ;;  %v9321_v3 = vpop.f32.mrf.mxu2 }
 0x3a1   : > { %v7962_v22 = vpop.eup %7961  ;;  %v1397_v45 = vadd.f32 1.0, %v7960_v32  ;;  %1171 = vmatmul.f32.gmra.mxu1 %v834_v63  ;;  %v1608_v63 = vor.u32 1.1754944e-38, %v1607_v6 }
 0x3a2   : > { %7963 = vpow2.f32 %v6991_v29  ;;  %v1589_v19 = vsel %vm1588_vm7, %v7958_v49, %v1585_v60  ;;  %v1597_v17 = vmul.f32 %v7962_v22, %v9294_v62  ;;  %vm1602_vm9 = vweird.f32 %v7962_v22 }
 0x3a3   : > { %7965 = vrcp.f32 %v1397_v45  ;;  %v1594_v24 = vsel %vm1591_vm8, %v1593_v42, %v1589_v19  ;;  %v9323_v58 = vpop.f32.mrf.mxu3  ;;  %vm1603_vm11 = vmor %vm1601_vm10, %vm1602_vm9  ;;  %v1622_v19 = vand.u32 2147483648, %v1397_v45  ;;  %v1018_v62 = vadd.f32 %v9289_v1, %v9287_v27 }
 0x3a4   : > { %1953 = vperm.xlu1 %7811, %v1594_v24   ;;  %v1598_v50 = vsub.f32 1.0, %v1597_v17  ;;  %vm1616_vm14 = vweird.f32 %v1397_v45 }
 0x3a5   : > { %v1237_v56 = vpop.f32.mrf.mxu0 }
 0x3a6   : > { %v1238_v20 = vadd.f32 %v1237_v56, %v1125_v53  ;;  %v1127_v49 = vpop.f32.mrf.mxu1  ;;  %v1599_v40 = vmul.f32 %v7962_v22, %v1598_v50  ;;  %v1620_v53 = vand.u32 2147483647, %v1397_v45 }
 0x3a7   : > { %v1128_v0 = vadd.f32 %v1127_v49, %v1015_v38  ;;  %v1623_v49 = vor.u32 1.1754944e-38, %v1622_v19 }
 0x3a8   : > { %v7964_v41 = vpop.eup %7963  ;;  %v6992_v39 = vmul.f32 -1.442695, %v1238_v20  ;;  %1284 = vmatmul.f32.gmra.mxu0 %v835_v52  ;;  %v1600_v57 = vadd.f32 %v7962_v22, %v1599_v40  ;;  %v9328_v56 = vpop.f32.mrf.mxu2  ;;  %vm1621_vm0 = vcmp.eq.f32.partialorder %v1620_v53, 8.507059e+37 }
 0x3a9   : > { %v7966_v55 = vpop.eup %7965  ;;  %v1398_v34 = vadd.f32 1.0, %v7964_v41 }
 0x3aa   : > { %7967 = vpow2.f32 %v6992_v39  ;;  %v1604_v59 = vsel %vm1603_vm11, %v7962_v22, %v1600_v57  ;;  %v1612_v32 = vmul.f32 %v7966_v55, %v1397_v45  ;;  %vm1617_vm13 = vweird.f32 %v7966_v55 }
 0x3ab   : > { %7969 = vrcp.f32 %v1398_v34  ;;  %v1609_v29 = vsel %vm1606_vm12, %v1608_v63, %v1604_v59  ;;  %v9330_v52 = vpop.f32.mrf.mxu3  ;;  %vm1618_vm15 = vmor %vm1616_vm14, %vm1617_vm13  ;;  %v1635_v63 = vand.u32 2147483647, %v1398_v34  ;;  %v1021_v45 = vadd.f32 %v9310_v36, %v9308_v14 }
 0x3ac   : > { %1958 = vperm.xlu0 %7812, %v1609_v29   ;;  %v1613_v60 = vsub.f32 1.0, %v1612_v32  ;;  %vm1631_vm2 = vweird.f32 %v1398_v34 }
 0x3ad   : > { %v1240_v42 = vpop.f32.mrf.mxu0  ;;  %vm1636_vm4 = vcmp.eq.f32.partialorder %v1635_v63, 8.507059e+37 }
 0x3ae   : > { %v1241_v17 = vadd.f32 %v1240_v42, %v1128_v0  ;;  %v1130_v24 = vpop.f32.mrf.mxu1  ;;  %v1614_v50 = vmul.f32 %v7966_v55, %v1613_v60  ;;  %v1637_v0 = vand.u32 2147483648, %v1398_v34 }
 0x3af   : > { %v1131_v40 = vadd.f32 %v1130_v24, %v1018_v62 }
 0x3b0   : > { %v7968_v22 = vpop.eup %7967  ;;  %v6993_v9 = vmul.f32 -1.442695, %v1241_v17  ;;  %v1615_v6 = vadd.f32 %v7966_v55, %v1614_v50  ;;  %v9334_v60 = vpop.f32.mrf.mxu2  ;;  %v1638_v24 = vor.u32 1.1754944e-38, %v1637_v0 }
 0x3b1   : > { %v7970_v20 = vpop.eup %7969  ;;  %v1399_v38 = vadd.f32 1.0, %v7968_v22 }
 0x3b2   : > { %7971 = vpow2.f32 %v6993_v9  ;;  %v1619_v41 = vsel %vm1618_vm15, %v7966_v55, %v1615_v6  ;;  %v1627_v27 = vmul.f32 %v7970_v20, %v1398_v34  ;;  %vm1632_vm1 = vweird.f32 %v7970_v20 }
 0x3b3   : > { %7973 = vrcp.f32 %v1399_v38  ;;  %v1624_v1 = vsel %vm1621_vm0, %v1623_v49, %v1619_v41  ;;  %v9336_v42 = vpop.f32.mrf.mxu3  ;;  %vm1633_vm3 = vmor %vm1631_vm2, %vm1632_vm1  ;;  %v1650_v49 = vand.u32 2147483647, %v1399_v38  ;;  %v1024_v34 = vadd.f32 %v9323_v58, %v9321_v3 }
 0x3b4   : > { %1963 = vperm.xlu2 %7813, %v1624_v1   ;;  %v1628_v39 = vsub.f32 1.0, %v1627_v27  ;;  %vm1646_vm6 = vweird.f32 %v1399_v38 }
 0x3b5   : > { %v1243_v57 = vpop.f32.mrf.mxu0  ;;  %vm1651_vm8 = vcmp.eq.f32.partialorder %v1650_v49, 8.507059e+37 }
 0x3b6   : > { %v1244_v59 = vadd.f32 %v1243_v57, %v1131_v40  ;;  %v1133_v32 = vpop.f32.mrf.mxu1  ;;  %v1629_v29 = vmul.f32 %v7970_v20, %v1628_v39  ;;  %v1652_v40 = vand.u32 2147483648, %v1399_v38 }
 0x3b7   : > { %v1134_v50 = vadd.f32 %v1133_v32, %v1021_v45 }
 0x3b8   : > { %v7972_v55 = vpop.eup %7971  ;;  %v6994_v53 = vmul.f32 -1.442695, %v1244_v59  ;;  %v1630_v19 = vadd.f32 %v7970_v20, %v1629_v29  ;;  %v1653_v45 = vor.u32 1.1754944e-38, %v1652_v40 }
 0x3b9   : > { %v7974_v17 = vpop.eup %7973  ;;  %v1400_v62 = vadd.f32 1.0, %v7972_v55 }
 0x3ba   : > { %7975 = vpow2.f32 %v6994_v53  ;;  %v1634_v22 = vsel %vm1633_vm3, %v7970_v20, %v1630_v19  ;;  %v1642_v14 = vmul.f32 %v7974_v17, %v1399_v38  ;;  %vm1647_vm5 = vweird.f32 %v7974_v17  ;;  %v9340_v20 = vpop.f32.mrf.mxu2 }
 0x3bb   : > { %7977 = vrcp.f32 %v1400_v62  ;;  %v1639_v36 = vsel %vm1636_vm4, %v1638_v24, %v1634_v22  ;;  %vm1648_vm7 = vmor %vm1646_vm6, %vm1647_vm5  ;;  %v9342_v32 = vpop.f32.mrf.mxu3  ;;  %v1665_v24 = vand.u32 2147483647, %v1400_v62  ;;  %v1667_v38 = vand.u32 2147483648, %v1400_v62 }
 0x3bc   : > { %1968 = vperm.xlu1 %7811, %v1639_v36   ;;  %v1643_v9 = vsub.f32 1.0, %v1642_v14  ;;  %v1027_v22 = vadd.f32 %v9330_v52, %v9328_v56  ;;  %vm1661_vm10 = vweird.f32 %v1400_v62 }
 0x3bd   : > { %v1246_v6 = vpop.f32.mrf.mxu0  ;;  %vm1666_vm12 = vcmp.eq.f32.partialorder %v1665_v24, 8.507059e+37 }
 0x3be   : > { %v1247_v41 = vadd.f32 %v1246_v6, %v1134_v50  ;;  %v1644_v27 = vmul.f32 %v7974_v17, %v1643_v9  ;;  %v1136_v1 = vpop.f32.mrf.mxu1 }
 0x3bf   : > { %v1137_v29 = vadd.f32 %v1136_v1, %v1024_v34 }
 0x3c0   : > { %v7976_v39 = vpop.eup %7975  ;;  %v6995_v57 = vmul.f32 -1.442695, %v1247_v41  ;;  %v1645_v63 = vadd.f32 %v7974_v17, %v1644_v27  ;;  %v1668_v41 = vor.u32 1.1754944e-38, %v1667_v38 }
 0x3c1   : > { %v7978_v0 = vpop.eup %7977  ;;  %v1401_v59 = vadd.f32 1.0, %v7976_v39 }
 0x3c2   : > { %7979 = vpow2.f32 %v6995_v57  ;;  %v1649_v55 = vsel %vm1648_vm7, %v7974_v17, %v1645_v63  ;;  %v1657_v3 = vmul.f32 %v7978_v0, %v1400_v62  ;;  %vm1662_vm9 = vweird.f32 %v7978_v0  ;;  %v922_v39 = vpop.f32.mrf.mxu2 }
 0x3c3   : > { %7981 = vrcp.f32 %v1401_v59  ;;  %v1654_v58 = vsel %vm1651_vm8, %v1653_v45, %v1649_v55  ;;  %vm1663_vm11 = vmor %vm1661_vm10, %vm1662_vm9  ;;  %v1035_v56 = vpop.f32.mrf.mxu3  ;;  %v1680_v45 = vand.u32 2147483647, %v1401_v59  ;;  %v1030_v62 = vadd.f32 %v9336_v42, %v9334_v60 }
 0x3c4   : > { %1973 = vperm.xlu0 %7812, %v1654_v58   ;;  %v1658_v53 = vsub.f32 1.0, %v1657_v3  ;;  %vm1676_vm14 = vweird.f32 %v1401_v59 }
 0x3c5   : > { %v1249_v19 = vpop.f32.mrf.mxu0  ;;  %vm1681_vm0 = vcmp.eq.f32.partialorder %v1680_v45, 8.507059e+37 }
 0x3c6   : > { %v1250_v50 = vadd.f32 %v1249_v19, %v1137_v29  ;;  %v1659_v14 = vmul.f32 %v7978_v0, %v1658_v53  ;;  %v1139_v36 = vpop.f32.mrf.mxu1  ;;  %v1682_v29 = vand.u32 2147483648, %v1401_v59 }
 0x3c7   : > { %v1140_v34 = vadd.f32 %v1139_v36, %v1027_v22 }
 0x3c8   : > { %v7980_v9 = vpop.eup %7979  ;;  %v6996_v6 = vmul.f32 -1.442695, %v1250_v50  ;;  %v1660_v49 = vadd.f32 %v7978_v0, %v1659_v14  ;;  %v1683_v50 = vor.u32 1.1754944e-38, %v1682_v29 }
 0x3c9   : > { %v7982_v17 = vpop.eup %7981  ;;  %v1402_v40 = vadd.f32 1.0, %v7980_v9 }
 0x3ca   : > { %7983 = vpow2.f32 %v6996_v6  ;;  %v1664_v27 = vsel %vm1663_vm11, %v7978_v0, %v1660_v49  ;;  %v1672_v1 = vmul.f32 %v7982_v17, %v1401_v59  ;;  %vm1677_vm13 = vweird.f32 %v7982_v17 }
 0x3cb   : > { %7985 = vrcp.f32 %v1402_v40  ;;  %v1669_v57 = vsel %vm1666_vm12, %v1668_v41, %v1664_v27  ;;  %vm1678_vm15 = vmor %vm1676_vm14, %vm1677_vm13  ;;  %v1695_v49 = vand.u32 2147483647, %v1402_v40  ;;  %v1697_v41 = vand.u32 2147483648, %v1402_v40 }
 0x3cc   : > { %1978 = vperm.xlu2 %7813, %v1669_v57   ;;  %v1673_v52 = vsub.f32 1.0, %v1672_v1  ;;  %v925_v42 = vpop.f32.mrf.mxu2  ;;  %v1033_v59 = vadd.f32 %v9342_v32, %v9340_v20  ;;  %vm1691_vm2 = vweird.f32 %v1402_v40 }
 0x3cd   : > { %v1252_v63 = vpop.f32.mrf.mxu0  ;;  %vm1696_vm4 = vcmp.eq.f32.partialorder %v1695_v49, 8.507059e+37 }
 0x3ce   : > { %v1253_v55 = vadd.f32 %v1252_v63, %v1140_v34  ;;  %v1674_v3 = vmul.f32 %v7982_v17, %v1673_v52  ;;  %v1142_v58 = vpop.f32.mrf.mxu1  ;;  %v1038_v34 = vpop.f32.mrf.mxu3 }
 0x3cf   : > { %v1143_v22 = vadd.f32 %v1142_v58, %v1030_v62 }
 0x3d0   : > { %v7984_v53 = vpop.eup %7983  ;;  %v6997_v19 = vmul.f32 -1.442695, %v1253_v55  ;;  %v1675_v0 = vadd.f32 %v7982_v17, %v1674_v3  ;;  %v1698_v55 = vor.u32 1.1754944e-38, %v1697_v41 }
 0x3d1   : > { %v7986_v24 = vpop.eup %7985  ;;  %v1403_v38 = vadd.f32 1.0, %v7984_v53 }
 0x3d2   : > { %7987 = vpow2.f32 %v6997_v19  ;;  %v1679_v14 = vsel %vm1678_vm15, %v7982_v17, %v1675_v0  ;;  %v1687_v36 = vmul.f32 %v7986_v24, %v1402_v40  ;;  %vm1692_vm1 = vweird.f32 %v7986_v24 }
 0x3d3   : > { %7989 = vrcp.f32 %v1403_v38  ;;  %v1684_v9 = vsel %vm1681_vm0, %v1683_v50, %v1679_v14  ;;  %vm1693_vm3 = vmor %vm1691_vm2, %vm1692_vm1  ;;  %v1710_v19 = vand.u32 2147483647, %v1403_v38  ;;  %v1712_v0 = vand.u32 2147483648, %v1403_v38 }
 0x3d4   : > { %1983 = vperm.xlu1 %7811, %v1684_v9   ;;  %v1688_v60 = vsub.f32 1.0, %v1687_v36  ;;  %v928_v40 = vpop.f32.mrf.mxu2  ;;  %vm1706_vm6 = vweird.f32 %v1403_v38 }
 0x3d5   : > { %v1255_v6 = vpop.f32.mrf.mxu0  ;;  %vm1711_vm8 = vcmp.eq.f32.partialorder %v1710_v19, 8.507059e+37 }
 0x3d6   : > { %v1256_v27 = vadd.f32 %v1255_v6, %v1143_v22  ;;  %v1689_v1 = vmul.f32 %v7986_v24, %v1688_v60  ;;  %v1145_v57 = vpop.f32.mrf.mxu1  ;;  %v1036_v22 = vadd.f32 %v1035_v56, %v922_v39  ;;  %v1041_v9 = vpop.f32.mrf.mxu3 }
 0x3d7   : > { %v1146_v62 = vadd.f32 %v1145_v57, %v1033_v59 }
 0x3d8   : > { %v7988_v52 = vpop.eup %7987  ;;  %v6998_v63 = vmul.f32 -1.442695, %v1256_v27  ;;  %v1690_v17 = vadd.f32 %v7986_v24, %v1689_v1  ;;  %v1713_v27 = vor.u32 1.1754944e-38, %v1712_v0 }
 0x3d9   : > { %v7990_v45 = vpop.eup %7989  ;;  %v1404_v29 = vadd.f32 1.0, %v7988_v52 }
 0x3da   : > { %7991 = vpow2.f32 %v6998_v63  ;;  %v1694_v3 = vsel %vm1693_vm3, %v7986_v24, %v1690_v17  ;;  %v1702_v58 = vmul.f32 %v7990_v45, %v1403_v38  ;;  %vm1707_vm5 = vweird.f32 %v7990_v45 }
 0x3db   : > { %7993 = vrcp.f32 %v1404_v29  ;;  %v1699_v53 = vsel %vm1696_vm4, %v1698_v55, %v1694_v3  ;;  %vm1708_vm7 = vmor %vm1706_vm6, %vm1707_vm5  ;;  %v1725_v63 = vand.u32 2147483647, %v1404_v29  ;;  %v1727_v17 = vand.u32 2147483648, %v1404_v29 }
 0x3dc   : > { %1988 = vperm.xlu0 %7812, %v1699_v53   ;;  %v1703_v20 = vsub.f32 1.0, %v1702_v58  ;;  %vm1721_vm10 = vweird.f32 %v1404_v29 }
 0x3dd   : > { %v1258_v32 = vpop.f32.mrf.mxu0  ;;  %vm1726_vm12 = vcmp.eq.f32.partialorder %v1725_v63, 8.507059e+37  ;;  %v1728_v0 = vor.u32 1.1754944e-38, %v1727_v17 }
 0x3de   : > { %v1259_v50 = vadd.f32 %v1258_v32, %v1146_v62  ;;  %v1704_v14 = vmul.f32 %v7990_v45, %v1703_v20  ;;  %v1148_v36 = vpop.f32.mrf.mxu1  ;;  %v1039_v62 = vadd.f32 %v1038_v34, %v925_v42  ;;  %v931_v32 = vpop.f32.mrf.mxu2 }
 0x3df   : > { %v1149_v59 = vadd.f32 %v1148_v36, %v1036_v22 }
 0x3e0   : > { %v7992_v60 = vpop.eup %7991  ;;  %v6999_v6 = vmul.f32 -1.442695, %v1259_v50  ;;  %v1705_v49 = vadd.f32 %v7990_v45, %v1704_v14  ;;  %v1044_v50 = vpop.f32.mrf.mxu3 }
 0x3e1   : > { %v7994_v24 = vpop.eup %7993  ;;  %v1405_v41 = vadd.f32 1.0, %v7992_v60 }
 0x3e2   : > { %7995 = vpow2.f32 %v6999_v6  ;;  %v1709_v1 = vsel %vm1708_vm7, %v7990_v45, %v1705_v49  ;;  %v1717_v57 = vmul.f32 %v7994_v24, %v1404_v29  ;;  %vm1722_vm9 = vweird.f32 %v7994_v24 }
 0x3e3   : > { %7997 = vrcp.f32 %v1405_v41  ;;  %v1714_v39 = vsel %vm1711_vm8, %v1713_v27, %v1709_v1  ;;  %vm1723_vm11 = vmor %vm1721_vm10, %vm1722_vm9  ;;  %v1740_v6 = vand.u32 2147483647, %v1405_v41  ;;  %v1742_v49 = vand.u32 2147483648, %v1405_v41 }
 0x3e4   : > { %1993 = vperm.xlu2 %7813, %v1714_v39   ;;  %v1718_v56 = vsub.f32 1.0, %v1717_v57  ;;  %v1042_v29 = vadd.f32 %v1041_v9, %v928_v40  ;;  %vm1736_vm14 = vweird.f32 %v1405_v41 }
 0x3e5   : > { %v1261_v52 = vpop.f32.mrf.mxu0  ;;  %vm1741_vm0 = vcmp.eq.f32.partialorder %v1740_v6, 8.507059e+37 }
 0x3e6   : > { %v1262_v55 = vadd.f32 %v1261_v52, %v1149_v59  ;;  %v1719_v3 = vmul.f32 %v7994_v24, %v1718_v56  ;;  %v1151_v38 = vpop.f32.mrf.mxu1 }
 0x3e7   : > { %v1152_v22 = vadd.f32 %v1151_v38, %v1039_v62 }
 0x3e8   : > { %v7996_v58 = vpop.eup %7995  ;;  %v7000_v53 = vmul.f32 -1.442695, %v1262_v55  ;;  %v1720_v20 = vadd.f32 %v7994_v24, %v1719_v3  ;;  %v934_v3 = vpop.f32.mrf.mxu2 }
 0x3e9   : > { %v7998_v19 = vpop.eup %7997  ;;  %v1406_v45 = vadd.f32 1.0, %v7996_v58  ;;  %v1047_v40 = vpop.f32.mrf.mxu3 }
 0x3ea   : > { %7999 = vpow2.f32 %v7000_v53  ;;  %v1724_v14 = vsel %vm1723_vm11, %v7994_v24, %v1720_v20  ;;  %v1732_v36 = vmul.f32 %v7998_v19, %v1405_v41  ;;  %vm1737_vm13 = vweird.f32 %v7998_v19 }
 0x3eb   : > { %8001 = vrcp.f32 %v1406_v45  ;;  %v1729_v42 = vsel %vm1726_vm12, %v1728_v0, %v1724_v14  ;;  %vm1738_vm15 = vmor %vm1736_vm14, %vm1737_vm13  ;;  %v1743_v24 = vor.u32 1.1754944e-38, %v1742_v49  ;;  %v1755_v53 = vand.u32 2147483647, %v1406_v45 }
 0x3ec   : > { %1998 = vperm.xlu1 %7811, %v1729_v42   ;;  %v1733_v34 = vsub.f32 1.0, %v1732_v36  ;;  %v1757_v20 = vand.u32 2147483648, %v1406_v45  ;;  %v1045_v41 = vadd.f32 %v1044_v50, %v931_v32  ;;  %vm1751_vm2 = vweird.f32 %v1406_v45 }
 0x3ed   : > { %v1264_v60 = vpop.f32.mrf.mxu0  ;;  %vm1756_vm4 = vcmp.eq.f32.partialorder %v1755_v53, 8.507059e+37 }
 0x3ee   : > { %v1265_v27 = vadd.f32 %v1264_v60, %v1152_v22  ;;  %v1734_v59 = vmul.f32 %v7998_v19, %v1733_v34  ;;  %v1154_v1 = vpop.f32.mrf.mxu1  ;;  %v1758_v6 = vor.u32 1.1754944e-38, %v1757_v20 }
 0x3ef   : > { %v1155_v17 = vadd.f32 %v1154_v1, %v1042_v29 }
 0x3f0   : > { %v8000_v57 = vpop.eup %7999  ;;  %v7001_v39 = vmul.f32 -1.442695, %v1265_v27  ;;  %v1735_v56 = vadd.f32 %v7998_v19, %v1734_v59  ;;  %v937_v50 = vpop.f32.mrf.mxu2 }
 0x3f1   : > { %v8002_v52 = vpop.eup %8001  ;;  %v1407_v63 = vadd.f32 1.0, %v8000_v57 }
 0x3f2   : > { %8003 = vpow2.f32 %v7001_v39  ;;  %v1739_v55 = vsel %vm1738_vm15, %v7998_v19, %v1735_v56  ;;  %v1747_v62 = vmul.f32 %v8002_v52, %v1406_v45  ;;  %vm1752_vm1 = vweird.f32 %v8002_v52  ;;  %v1050_v56 = vpop.f32.mrf.mxu3 }
 0x3f3   : > { %8005 = vrcp.f32 %v1407_v63  ;;  %v1744_v38 = vsel %vm1741_vm0, %v1743_v24, %v1739_v55  ;;  %vm1753_vm3 = vmor %vm1751_vm2, %vm1752_vm1  ;;  %v1770_v57 = vand.u32 2147483647, %v1407_v63  ;;  %v1772_v39 = vand.u32 2147483648, %v1407_v63 }
 0x3f4   : > { %2003 = vperm.xlu0 %7812, %v1744_v38   ;;  %v1748_v9 = vsub.f32 1.0, %v1747_v62  ;;  %v1048_v45 = vadd.f32 %v1047_v40, %v934_v3  ;;  %vm1766_vm6 = vweird.f32 %v1407_v63 }
 0x3f5   : > { %v1267_v58 = vpop.f32.mrf.mxu0  ;;  %vm1771_vm8 = vcmp.eq.f32.partialorder %v1770_v57, 8.507059e+37  ;;  %v1773_v53 = vor.u32 1.1754944e-38, %v1772_v39 }
 0x3f6   : > { %v1268_v0 = vadd.f32 %v1267_v58, %v1155_v17  ;;  %v1749_v22 = vmul.f32 %v8002_v52, %v1748_v9  ;;  %v1157_v14 = vpop.f32.mrf.mxu1 }
 0x3f7   : > { %v1158_v49 = vadd.f32 %v1157_v14, %v1045_v41 }
 0x3f8   : > { %v8004_v36 = vpop.eup %8003  ;;  %v7002_v42 = vmul.f32 -1.442695, %v1268_v0  ;;  %v1750_v34 = vadd.f32 %v8002_v52, %v1749_v22 }
 0x3f9   : > { %v8006_v19 = vpop.eup %8005  ;;  %v1408_v60 = vadd.f32 1.0, %v8004_v36 }
 0x3fa   : > { %8007 = vpow2.f32 %v7002_v42  ;;  %v1754_v27 = vsel %vm1753_vm3, %v8002_v52, %v1750_v34  ;;  %v1762_v29 = vmul.f32 %v8006_v19, %v1407_v63  ;;  %vm1767_vm5 = vweird.f32 %v8006_v19  ;;  %v940_v63 = vpop.f32.mrf.mxu2 }
 0x3fb   : > { %8009 = vrcp.f32 %v1408_v60  ;;  %v1759_v59 = vsel %vm1756_vm4, %v1758_v6, %v1754_v27  ;;  %vm1768_vm7 = vmor %vm1766_vm6, %vm1767_vm5  ;;  %v1785_v14 = vand.u32 2147483647, %v1408_v60  ;;  %v1787_v36 = vand.u32 2147483648, %v1408_v60  ;;  %v1053_v27 = vpop.f32.mrf.mxu3 }
 0x3fc   : > { %2008 = vperm.xlu2 %7813, %v1759_v59   ;;  %v1763_v32 = vsub.f32 1.0, %v1762_v29  ;;  %v1051_v34 = vadd.f32 %v1050_v56, %v937_v50  ;;  %vm1781_vm10 = vweird.f32 %v1408_v60 }
 0x3fd   : > { %v1270_v1 = vpop.f32.mrf.mxu0  ;;  %vm1786_vm12 = vcmp.eq.f32.partialorder %v1785_v14, 8.507059e+37  ;;  %v1788_v57 = vor.u32 1.1754944e-38, %v1787_v36 }
 0x3fe   : > { %v1271_v24 = vadd.f32 %v1270_v1, %v1158_v49  ;;  %v1764_v17 = vmul.f32 %v8006_v19, %v1763_v32  ;;  %v1160_v55 = vpop.f32.mrf.mxu1 }
 0x3ff   : > { %v1161_v20 = vadd.f32 %v1160_v55, %v1048_v45 }
 0x400   : > { %v8008_v62 = vpop.eup %8007  ;;  %v7003_v38 = vmul.f32 -1.442695, %v1271_v24  ;;  %v1765_v9 = vadd.f32 %v8006_v19, %v1764_v17 }
 0x401   : > { %v8010_v52 = vpop.eup %8009  ;;  %v1409_v58 = vadd.f32 1.0, %v8008_v62 }
 0x402   : > { %8011 = vpow2.f32 %v7003_v38  ;;  %v1769_v0 = vsel %vm1768_vm7, %v8006_v19, %v1765_v9  ;;  %v1777_v41 = vmul.f32 %v8010_v52, %v1408_v60  ;;  %vm1782_vm9 = vweird.f32 %v8010_v52 }
 0x403   : > { %8013 = vrcp.f32 %v1409_v58  ;;  %v1774_v22 = vsel %vm1771_vm8, %v1773_v53, %v1769_v0  ;;  %vm1783_vm11 = vmor %vm1781_vm10, %vm1782_vm9  ;;  %v1800_v55 = vand.u32 2147483647, %v1409_v58  ;;  %v1802_v62 = vand.u32 2147483648, %v1409_v58  ;;  %v1056_v14 = vpop.f32.mrf.mxu3 }
 0x404   : > { %2013 = vperm.xlu1 %7811, %v1774_v22   ;;  %v1778_v3 = vsub.f32 1.0, %v1777_v41  ;;  %v1054_v9 = vadd.f32 %v1053_v27, %v940_v63  ;;  %vm1796_vm14 = vweird.f32 %v1409_v58 }
 0x405   : > { %v1273_v40 = vpop.f32.mrf.mxu0  ;;  %vm1801_vm0 = vcmp.eq.f32.partialorder %v1800_v55, 8.507059e+37 }
 0x406   : > { %v1274_v42 = vadd.f32 %v1273_v40, %v1161_v20  ;;  %v1779_v6 = vmul.f32 %v8010_v52, %v1778_v3  ;;  %v1163_v49 = vpop.f32.mrf.mxu1  ;;  %v943_v40 = vpop.f32.mrf.mxu2 }
 0x407   : > { %v1164_v39 = vadd.f32 %v1163_v49, %v1051_v34 }
 0x408   : > { %v8012_v29 = vpop.eup %8011  ;;  %v7004_v59 = vmul.f32 -1.442695, %v1274_v42  ;;  %v1780_v32 = vadd.f32 %v8010_v52, %v1779_v6 }
 0x409   : > { %v8014_v19 = vpop.eup %8013  ;;  %v1410_v1 = vadd.f32 1.0, %v8012_v29 }
 0x40a   : > { %8015 = vpow2.f32 %v7004_v59  ;;  %v1784_v24 = vsel %vm1783_vm11, %v8010_v52, %v1780_v32  ;;  %v1792_v45 = vmul.f32 %v8014_v19, %v1409_v58  ;;  %vm1797_vm13 = vweird.f32 %v8014_v19 }
 0x40b   : > { %8017 = vrcp.f32 %v1410_v1  ;;  %v1789_v50 = vsel %vm1786_vm12, %v1788_v57, %v1784_v24  ;;  %vm1798_vm15 = vmor %vm1796_vm14, %vm1797_vm13  ;;  %v1803_v52 = vor.u32 1.1754944e-38, %v1802_v62  ;;  %v1815_v27 = vand.u32 2147483647, %v1410_v1 }
 0x40c   : > { %2018 = vperm.xlu0 %7812, %v1789_v50   ;;  %v1793_v56 = vsub.f32 1.0, %v1792_v45  ;;  %v1817_v29 = vand.u32 2147483648, %v1410_v1  ;;  %v1057_v58 = vadd.f32 %v1056_v14, %v943_v40  ;;  %vm1811_vm2 = vweird.f32 %v1410_v1 }
 0x40d   : > { %v1276_v17 = vpop.f32.mrf.mxu0  ;;  %vm1816_vm4 = vcmp.eq.f32.partialorder %v1815_v27, 8.507059e+37 }
 0x40e   : > { %v1277_v38 = vadd.f32 %v1276_v17, %v1164_v39  ;;  %v1794_v53 = vmul.f32 %v8014_v19, %v1793_v56  ;;  %v1166_v60 = vpop.f32.mrf.mxu1 }
 0x40f   : > { %v1167_v36 = vadd.f32 %v1166_v60, %v1054_v9  ;;  %v946_v9 = vpop.f32.mrf.mxu2 }
 0x410   : > { %v8016_v20 = vpop.eup %8015  ;;  %v7005_v0 = vmul.f32 -1.442695, %v1277_v38  ;;  %v1795_v41 = vadd.f32 %v8014_v19, %v1794_v53  ;;  %v1059_v53 = vpop.f32.mrf.mxu3 }
 0x411   : > { %v8018_v22 = vpop.eup %8017  ;;  %v1411_v3 = vadd.f32 1.0, %v8016_v20 }
 0x412   : > { %8019 = vpow2.f32 %v7005_v0  ;;  %v1799_v42 = vsel %vm1798_vm15, %v8014_v19, %v1795_v41  ;;  %v1807_v34 = vmul.f32 %v8018_v22, %v1410_v1  ;;  %vm1812_vm1 = vweird.f32 %v8018_v22 }
 0x413   : > { %8021 = vrcp.f32 %v1411_v3  ;;  %v1804_v6 = vsel %vm1801_vm0, %v1803_v52, %v1799_v42  ;;  %vm1813_vm3 = vmor %vm1811_vm2, %vm1812_vm1  ;;  %v1818_v19 = vor.u32 1.1754944e-38, %v1817_v29  ;;  %v1830_v0 = vand.u32 2147483647, %v1411_v3 }
 0x414   : > { %2023 = vperm.xlu2 %7813, %v1804_v6   ;;  %v1808_v63 = vsub.f32 1.0, %v1807_v34  ;;  %v1832_v1 = vand.u32 2147483648, %v1411_v3  ;;  %v1060_v52 = vadd.f32 %v1059_v53, %v946_v9  ;;  %vm1826_vm6 = vweird.f32 %v1411_v3 }
 0x415   : > { %v1279_v49 = vpop.f32.mrf.mxu0  ;;  %vm1831_vm8 = vcmp.eq.f32.partialorder %v1830_v0, 8.507059e+37 }
 0x416   : > { %v1280_v59 = vadd.f32 %v1279_v49, %v1167_v36  ;;  %v1809_v32 = vmul.f32 %v8018_v22, %v1808_v63  ;;  %v1169_v57 = vpop.f32.mrf.mxu1  ;;  %v7069_v36 = vld [vmem:[%s14309_s4 + $0xf8] sm:$0xf0]  ;;  %v1833_v29 = vor.u32 1.1754944e-38, %v1832_v1 }
 0x417   : > { %v1170_v17 = vadd.f32 %v1169_v57, %v1057_v58 }
 0x418   : > { %v8020_v39 = vpop.eup %8019  ;;  %v7006_v24 = vmul.f32 -1.442695, %v1280_v59  ;;  %v1810_v45 = vadd.f32 %v8018_v22, %v1809_v32  ;;  %v9359_v59 = vpop.permute.xlu2 %2199 }
 0x419   : > { %v8022_v50 = vpop.eup %8021  ;;  %v9350_v56 = vadd.f32 1.0, %v8020_v39 }
 0x41a   : > { %8023 = vpow2.f32 %v7006_v24  ;;  %v1814_v55 = vsel %vm1813_vm3, %v8018_v22, %v1810_v45  ;;  %v1822_v62 = vmul.f32 %v8022_v50, %v1411_v3  ;;  %vm1827_vm5 = vweird.f32 %v8022_v50  ;;  %v7621_v22 = vld [vmem:[%s14309_s4 + $0xf4] sm:$0xf] }
 0x41b   : > { %8025 = vrcp.f32 %v9350_v56  ;;  %v1819_v38 = vsel %vm1816_vm4, %v1818_v19, %v1814_v55  ;;  %v7072_v63 = vor.u32 %v7621_v22, %v7069_v36  ;;  %vm1828_vm7 = vmor %vm1826_vm6, %vm1827_vm5  ;;  %v1847_v45 = vand.u32 2147483648, %v9350_v56 }
 0x41c   : > { %2028 = vperm.xlu1 %7811, %v1819_v38   ;;  %v1823_v60 = vsub.f32 1.0, %v1822_v62  ;;  %v1845_v55 = vand.u32 2147483647, %v9350_v56  ;;  %v7622_v62 = vld [vmem:[%s14309_s4 + $0xf4] sm:$0xf0]  ;;  %vm1841_vm10 = vweird.f32 %v9350_v56 }
 0x41d   : > { %v1282_v20 = vpop.f32.mrf.mxu0  ;;  %7752 = vmatpush.bf16.msrb.mxu3 %v7072_v63  ;;  %2772 = vmatpush.bf16.msra.mxu0 %v7072_v63  ;;  %v1848_v1 = vor.u32 1.1754944e-38, %v1847_v45 }
 0x41e   : > { %v1283_v41 = vadd.f32 %v1282_v20, %v1170_v17  ;;  %v1824_v40 = vmul.f32 %v8022_v50, %v1823_v60  ;;  %v1172_v14 = vpop.f32.mrf.mxu1  ;;  %vm1846_vm12 = vcmp.eq.f32.partialorder %v1845_v55, 8.507059e+37  ;;  %v7059_v55 = vld [vmem:[%s14309_s4 + $0xe0] sm:$0xf] }
 0x41f   : > { %v1173_v58 = vadd.f32 %v1172_v14, %v1060_v52 }
 0x420   : > { %v8024_v42 = vpop.eup %8023  ;;  %v7007_v34 = vmul.f32 -1.442695, %v1283_v41  ;;  %v1825_v6 = vadd.f32 %v8022_v50, %v1824_v40  ;;  %v9371_v14 = vpop.permute.xlu2 %2214 }
 0x421   : > { %v8026_v49 = vpop.eup %8025  ;;  %v1413_v27 = vadd.f32 1.0, %v8024_v42 }
 0x422   : > { %8027 = vpow2.f32 %v7007_v34  ;;  %v1829_v32 = vsel %vm1828_vm7, %v8022_v50, %v1825_v6  ;;  %v1837_v57 = vmul.f32 %v8026_v49, %v9350_v56  ;;  %vm1842_vm9 = vweird.f32 %v8026_v49  ;;  %v7067_v50 = vld [vmem:[%s14309_s4 + $0xf0] sm:$0xf] }
 0x423   : > { %8029 = vrcp.f32 %v1413_v27  ;;  %v1834_v39 = vsel %vm1831_vm8, %v1833_v29, %v1829_v32  ;;  %v7068_v60 = vor.u32 %v7622_v62, %v7067_v50  ;;  %vm1843_vm11 = vmor %vm1841_vm10, %vm1842_vm9  ;;  %v1862_v36 = vand.u32 2147483648, %v1413_v27  ;;  %v7620_v50 = vld [vmem:[%s14309_s4 + $0xe4] sm:$0xf0]  ;;  %v9387_v62 = vpop.permute.xlu1 %2189 }
 0x424   : > { %2033 = vperm.xlu0 %7812, %v1834_v39   ;;  %v1838_v24 = vsub.f32 1.0, %v1837_v57  ;;  %v1860_v56 = vand.u32 2147483647, %v1413_v27  ;;  %vm1856_vm14 = vweird.f32 %v1413_v27 }
 0x425   : > { %v1285_v3 = vpop.f32.mrf.mxu0  ;;  %2683 = vmatpush.bf16.msrb.mxu2 %v7068_v60  ;;  %v9392_v60 = vld [vmem:[%s14312_s7 + $0x58] sm:$0xff] }
 0x426   : > { %v1286_v19 = vadd.f32 %v1285_v3, %v1173_v58  ;;  %v1839_v17 = vmul.f32 %v8026_v49, %v1838_v24  ;;  %v1863_v58 = vor.u32 1.1754944e-38, %v1862_v36  ;;  %vm1861_vm0 = vcmp.eq.f32.partialorder %v1860_v56, 8.507059e+37  ;;  %14644 = vst [vmem:[#allocation23_spill] sm:$0xff] %v9392_v60 }
 0x428   : > { %v8028_v38 = vpop.eup %8027  ;;  %v7008_v9 = vmul.f32 -1.442695, %v1286_v19  ;;  %v1840_v53 = vadd.f32 %v8026_v49, %v1839_v17  ;;  %v9379_v45 = vpop.permute.xlu2 %1903 }
 0x429   : > { %v8030_v20 = vpop.eup %8029  ;;  %v1414_v0 = vadd.f32 1.0, %v8028_v38 }
 0x42a   : > { %8031 = vpow2.f32 %v7008_v9  ;;  %v1844_v41 = vsel %vm1843_vm11, %v8026_v49, %v1840_v53  ;;  %v1852_v52 = vmul.f32 %v8030_v20, %v1413_v27  ;;  %vm1857_vm13 = vweird.f32 %v8030_v20  ;;  %v9376_v49 = vld [vmem:[%s14312_s7 + $0x40] sm:$0xff] }
 0x42b   : > { %8033 = vrcp.f32 %v1414_v0  ;;  %v1849_v40 = vsel %vm1846_vm12, %v1848_v1, %v1844_v41  ;;  %vm1858_vm15 = vmor %vm1856_vm14, %vm1857_vm13  ;;  %v1877_v24 = vand.u32 2147483648, %v1414_v0  ;;  %vm1871_vm1 = vweird.f32 %v1414_v0 }
 0x42c   : > { %2038 = vperm.xlu2 %7813, %v1849_v40   ;;  %v1853_v22 = vsub.f32 1.0, %v1852_v52  ;;  %v1875_v27 = vand.u32 2147483647, %v1414_v0  ;;  %v7060_v9 = vor.u32 %v7620_v50, %v7059_v55  ;;  %v14318_v50 = vmov 1  }
 0x42d   : > { %v1878_v17 = vor.u32 1.1754944e-38, %v1877_v24 }
 0x42e   : > { %v1854_v42 = vmul.f32 %v8030_v20, %v1853_v22  ;;  %vm1876_vm4 = vcmp.eq.f32.partialorder %v1875_v27, 8.507059e+37  ;;  %2684 = vmatpush.bf16.msrb.mxu2 %v7060_v9  ;;  %v7051_v27 = vld [vmem:[%s14309_s4 + $0xd0] sm:$0xf] }
 0x430   : > { %v8032_v34 = vpop.eup %8031  ;;  %v1855_v6 = vadd.f32 %v8030_v20, %v1854_v42  ;;  %v9401_v36 = vpop.permute.xlu2 %1913 }
 0x431   : > { %v8034_v63 = vpop.eup %8033  ;;  %v1415_v29 = vadd.f32 1.0, %v8032_v34 }
 0x432   : > { %v1859_v32 = vsel %vm1858_vm15, %v8030_v20, %v1855_v6  ;;  %v1867_v57 = vmul.f32 %v8034_v63, %v1414_v0  ;;  %vm1872_vm2 = vweird.f32 %v8034_v63  ;;  %v9397_v0 = vld [vmem:[%s14312_s7 + $0x48] sm:$0xff]  ;;  %v7619_v6 = vld [vmem:[%s14309_s4 + $0xe4] sm:$0xf] }
 0x433   : > { %8035 = vrcp.f32 %v1415_v29  ;;  %v1864_v39 = vsel %vm1861_vm0, %v1863_v58, %v1859_v32  ;;  %vm1873_vm3 = vmor %vm1871_vm1, %vm1872_vm2  ;;  %v1892_v52 = vand.u32 2147483648, %v1415_v29  ;;  %vm1886_vm5 = vweird.f32 %v1415_v29  ;;  %v9414_v32 = vpop.permute.xlu1 %2204 }
 0x434   : > { %2229 = vperm.xlu2 %7813, %v9376_v49   ;;  %2043 = vperm.xlu1 %7811, %v1864_v39   ;;  %v1868_v3 = vsub.f32 1.0, %v1867_v57  ;;  %v1890_v22 = vand.u32 2147483647, %v1415_v29  ;;  %v9419_v39 = vld [vmem:[%s14312_s7 + $0x60] sm:$0xff] }
 0x435   : > { %v1893_v56 = vor.u32 1.1754944e-38, %v1892_v52  ;;  %14645 = vst [vmem:[#allocation24_spill] sm:$0xff] %v9419_v39 }
 0x436   : > { %v1869_v19 = vmul.f32 %v8034_v63, %v1868_v3  ;;  %vm1891_vm8 = vcmp.eq.f32.partialorder %v1890_v22, 8.507059e+37  ;;  %v14648_v22 = vmov 0  }
 0x438   : > { %v1870_v38 = vadd.f32 %v8034_v63, %v1869_v19  ;;  %v9423_v3 = vpop.permute.xlu2 %1923  ;;  %v7618_v19 = vld [vmem:[%s14309_s4 + $0xd4] sm:$0xf0] }
 0x439   : > { %v8036_v53 = vpop.eup %8035 }
 0x43a   : > { %v1874_v20 = vsel %vm1873_vm3, %v8034_v63, %v1870_v38  ;;  %v1882_v1 = vmul.f32 %v8036_v53, %v1415_v29  ;;  %vm1887_vm6 = vweird.f32 %v8036_v53  ;;  %v7061_v63 = vld [vmem:[%s14309_s4 + $0xe8] sm:$0xf0]  ;;  %v9412_v29 = vld [vmem:[%s14312_s7 + $0x38] sm:$0xff]  ;;  %v9439_v38 = vld [vmem:[%s14312_s7 + $0x10] sm:$0xff] }
 0x43b   : > { %v1879_v41 = vsel %vm1876_vm4, %v1878_v17, %v1874_v20  ;;  %vm1888_vm7 = vmor %vm1886_vm5, %vm1887_vm6  ;;  %v7064_v58 = vor.u32 %v7619_v6, %v7061_v63  ;;  %v7052_v17 = vor.u32 %v7618_v19, %v7051_v27  ;;  %v9431_v55 = vpop.permute.xlu1 %2219  ;;  %v9453_v20 = vld [vmem:[%s14312_s7 + $0x8] sm:$0xff]  ;;  %v9485_v63 = vld [vmem:[%s14312_s7 + $0xd0] sm:$0xff] }
 0x43c   : > { %2048 = vperm.xlu0 %7812, %v1879_v41   ;;  %2244 = vperm.xlu2 %7813, %v9392_v60   ;;  %v1883_v40 = vsub.f32 1.0, %v1882_v1  ;;  %v9459_v1 = vld [vmem:[%s14312_s7 + $0x70] sm:$0xff]  ;;  %v9502_v27 = vld [vmem:[%s14312_s7 + $0x28] sm:$0xff] }
 0x43d   : > { %2234 = vperm.xlu1 %7811, %v9397_v0   ;;  %7753 = vmatpush.bf16.msrb.mxu3 %v7064_v58  ;;  %14646 = vst [vmem:[#allocation25_spill] sm:$0xff] %v9459_v1  ;;  %v7617_v19 = vld [vmem:[%s14309_s4 + $0xd4] sm:$0xf] }
 0x43e   : > { %v1884_v42 = vmul.f32 %v8036_v53, %v1883_v40  ;;  %2773 = vmatpush.bf16.msra.mxu0 %v7064_v58  ;;  %2685 = vmatpush.bf16.msrb.mxu2 %v7052_v17  ;;  %v9469_v40 = vld [vmem:[%s14312_s7 + $0x18] sm:$0xff] }
 0x43f   : > { %v7053_v17 = vld [vmem:[%s14309_s4 + $0xd8] sm:$0xf0] }
 0x440   : > { %v1885_v34 = vadd.f32 %v8036_v53, %v1884_v42  ;;  %v9442_v9 = vpop.permute.xlu2 %1933  ;;  %v7043_v42 = vld [vmem:[%s14309_s4 + $0xc0] sm:$0xf] }
 0x442   : > { %v1889_v57 = vsel %vm1888_vm7, %v8036_v53, %v1885_v34  ;;  %v9447_v53 = vld [vmem:[%s14312_s7] sm:$0xff]  ;;  %v9480_v34 = vpop.permute.xlu0 %2194 }
 0x443   : > { %v1894_v24 = vsel %vm1891_vm8, %v1893_v56, %v1889_v57  ;;  %v9462_v41 = vpop.permute.xlu1 %1898  ;;  %v7616_v56 = vld [vmem:[%s14309_s4 + $0xc4] sm:$0xf0] }
 0x444   : > { %2224 = vperm.xlu0 %7812, %v9412_v29   ;;  %2053 = vperm.xlu2 %7813, %v1894_v24   ;;  %v7044_v6 = vor.u32 %v7616_v56, %v7043_v42  ;;  %v9495_v24 = vld [vmem:[%s14312_s7 + $0x20] sm:$0xff]  ;;  %v7056_v42 = vor.u32 %v7617_v19, %v7053_v17  ;;  %v9525_v19 = vld [vmem:[%s14312_s7 + $0x90] sm:$0xff] }
 0x445   : > { %2249 = vperm.xlu1 %7811, %v9419_v39  }
 0x446   : > { %2686 = vmatpush.bf16.msrb.mxu2 %v7044_v6  ;;  %7754 = vmatpush.bf16.msrb.mxu3 %v7056_v42  ;;  %v14322_v6 = vmov 2  }
 0x447   : > { %2774 = vmatpush.bf16.msra.mxu0 %v7056_v42 }
 0x448   : > { %v9464_v52 = vpop.permute.xlu2 %1948 }
 0x449   : > { %14647 = vst [vmem:[#allocation26_spill] sm:$0xff] %v9464_v52  ;;  %v7615_v52 = vld [vmem:[%s14309_s4 + $0xc4] sm:$0xf] }
 0x44a   : > { %v9511_v56 = vpop.permute.xlu0 %2209 }
 0x44b   : > { %v9488_v58 = vpop.permute.xlu1 %1918 }
 0x44c   : > { %7816 = vset.pattern.permute.xlu0 %v14318_v50  ;;  %7814 = vset.pattern.permute.xlu2 %v14318_v50 }
 0x44d   : > { %7815 = vset.pattern.permute.xlu1 %v14318_v50  ;;  %2420 = vperm.xlu0 %7816, %v9439_v38  }
 0x44e   : > { %2412 = vperm.xlu2 %7814, %v9447_v53   ;;  %2416 = vperm.xlu1 %7815, %v9453_v20  }
 0x450   : > { %v9490_v57 = vpop.permute.xlu2 %1963 }
 0x452   : > { %v9527_v17 = vpop.permute.xlu0 %1908 }
 0x455   : > { %2468 = vperm.xlu0 %7816, %v9459_v1  }
 0x456   : > { %2424 = vperm.xlu2 %7814, %v9469_v40   ;;  %7817 = vset.pattern.permute.xlu1 %v14648_v22 }
 0x457   : > { %2259 = vperm.xlu1 %7817, %v9459_v1  }
 0x458   : > { %v9516_v5 = vpop.permute.xlu2 %1978 }
 0x459   : > { %14649 = vst [vmem:[#allocation27_spill] sm:$0xff] %v9516_v5  ;;  %v9572_v5 = vld [vmem:[%s14312_s7 + $0x68] sm:$0xff] }
 0x45a   : > { %v9547_v35 = vpop.permute.xlu0 %1943  ;;  %14655 = vst [vmem:[#allocation33_spill] sm:$0xff] %v9572_v5 }
 0x45b   : > { %14652 = vst [vmem:[#allocation30_spill] sm:$0xff] %v9547_v35 }
 0x45d   : > { %2516 = vperm.xlu0 %7816, %v9485_v63  }
 0x45e   : > { %2428 = vperm.xlu2 %7814, %v9495_v24  }
 0x45f   : > { %7818 = vset.pattern.permute.xlu1 %v14318_v50  ;;  %v9514_v50 = vpop.permute.xlu1 %1928 }
 0x460   : > { %2432 = vperm.xlu1 %7818, %v9502_v27  }
 0x462   : > { %v9574_v4 = vpop.permute.xlu0 %1958 }
 0x465   : > { %7825 = vset.pattern.permute.xlu0 %v14322_v6  ;;  %v9531_v6 = vpop.permute.xlu2 %1993 }
 0x466   : > { %2436 = vperm.xlu2 %7814, %v8043_v25   ;;  %3209 = vperm.xlu0 %7825, %v8043_v25   ;;  %14651 = vst [vmem:[#allocation29_spill] sm:$0xff] %v9531_v6  ;;  %v7035_v25 = vld [vmem:[%s14309_s4 + $0xb0] sm:$0xf]  ;;  %v7604_v6 = vld [vmem:[%s14309_s4 + $0x64] sm:$0xf0] }
 0x467   : > { %v9529_v42 = vpop.permute.xlu1 %1938  ;;  %v7036_v8 = vor.u32 %v7614_v30, %v7035_v25  ;;  %v7131_v30 = vld [vmem:[%s14309_s4 + $0x70] sm:$0xf] }
 0x468   : > { %2440 = vperm.xlu1 %7818, %v9412_v29   ;;  %14650 = vst [vmem:[#allocation28_spill] sm:$0xff] %v9529_v42 }
 0x469   : > { %2687 = vmatpush.bf16.msrb.mxu2 %v7036_v8  ;;  %v7606_v8 = vld [vmem:[%s14309_s4 + $0x74] sm:$0xf0] }
 0x46a   : > { %v7132_v25 = vor.u32 %v7606_v8, %v7131_v30  ;;  %v7115_v8 = vld [vmem:[%s14309_s4 + $0x50] sm:$0xf] }
 0x46c   : > { %2941 = vmatpush.bf16.msrb.mxu1 %v7132_v25 }
 0x46d   : > { %v9551_v54 = vpop.permute.xlu2 %2008 }
 0x46e   : > { %2444 = vperm.xlu2 %7814, %v9376_v49   ;;  %3257 = vperm.xlu0 %7825, %v9525_v19   ;;  %14654 = vst [vmem:[#allocation32_spill] sm:$0xff] %v9551_v54  ;;  %v7123_v54 = vld [vmem:[%s14309_s4 + $0x60] sm:$0xf] }
 0x46f   : > { %v9549_v2 = vpop.permute.xlu1 %1953  ;;  %v7124_v51 = vor.u32 %v7604_v6, %v7123_v54  ;;  %v7027_v54 = vld [vmem:[%s14309_s4 + $0xa0] sm:$0xf]  ;;  %v7612_v6 = vld [vmem:[%s14309_s4 + $0xa4] sm:$0xf0] }
 0x470   : > { %2448 = vperm.xlu1 %7818, %v9397_v0   ;;  %14653 = vst [vmem:[#allocation31_spill] sm:$0xff] %v9549_v2  ;;  %v7028_v25 = vor.u32 %v7612_v6, %v7027_v54  ;;  %v7045_v2 = vld [vmem:[%s14309_s4 + $0xc8] sm:$0xf0]  ;;  %v7600_v54 = vld [vmem:[%s14309_s4 + $0x44] sm:$0xf0] }
 0x471   : > { %2942 = vmatpush.bf16.msrb.mxu1 %v7124_v51  ;;  %v9595_v51 = vld [vmem:[%s14312_s7 + $0x78] sm:$0xff]  ;;  %v7048_v6 = vor.u32 %v7615_v52, %v7045_v2  ;;  %v7108_v1 = vor.u32 %v7600_v54, %v7107_v47  ;;  %v7091_v52 = vld [vmem:[%s14309_s4 + $0x20] sm:$0xf] }
 0x472   : > { %14658 = vst [vmem:[#allocation36_spill] sm:$0xff] %v9595_v51  ;;  %2688 = vmatpush.bf16.msrb.mxu2 %v7028_v25  ;;  %v7598_v47 = vld [vmem:[%s14309_s4 + $0x34] sm:$0xf0] }
 0x473   : > { %7755 = vmatpush.bf16.msrb.mxu3 %v7048_v6  ;;  %2775 = vmatpush.bf16.msra.mxu0 %v7048_v6 }
 0x475   : > { %v9578_v30 = vpop.permute.xlu2 %2023 }
 0x476   : > { %2452 = vperm.xlu2 %7814, %v9545_v15   ;;  %7828 = vset.pattern.permute.xlu0 %v14648_v22  ;;  %14657 = vst [vmem:[#allocation35_spill] sm:$0xff] %v9578_v30  ;;  %v7602_v30 = vld [vmem:[%s14309_s4 + $0x54] sm:$0xf0] }
 0x477   : > { %2239 = vperm.xlu0 %7828, %v9545_v15   ;;  %v9576_v61 = vpop.permute.xlu1 %1968  ;;  %v7116_v28 = vor.u32 %v7602_v30, %v7115_v8  ;;  %v7596_v8 = vld [vmem:[%s14309_s4 + $0x24] sm:$0xf0] }
 0x478   : > { %2456 = vperm.xlu1 %7818, %v9392_v60   ;;  %14656 = vst [vmem:[#allocation34_spill] sm:$0xff] %v9576_v61  ;;  %v7092_v54 = vor.u32 %v7596_v8, %v7091_v52  ;;  %v7610_v52 = vld [vmem:[%s14309_s4 + $0x94] sm:$0xf0]  ;;  %v7083_v8 = vld [vmem:[%s14309_s4 + $0x10] sm:$0xf] }
 0x479   : > { %2943 = vmatpush.bf16.msrb.mxu1 %v7116_v28  ;;  %v7099_v28 = vld [vmem:[%s14309_s4 + $0x30] sm:$0xf] }
 0x47a   : > { %v7100_v2 = vor.u32 %v7598_v47, %v7099_v28  ;;  %v9650_v47 = vld [vmem:[%s14312_s7 + $0x88] sm:$0xff]  ;;  %v7195_v60 = vld [vmem:[%s14309_s4 + $0x170] sm:$0xf] }
 0x47b   : > { %14665 = vst [vmem:[#allocation43_spill] sm:$0xff] %v9650_v47 }
 0x47d   : > { %2944 = vmatpush.bf16.msrb.mxu1 %v7108_v1  ;;  %v9637_v1 = vld [vmem:[%s14312_s7 + $0x80] sm:$0xff] }
 0x47e   : > { %2460 = vperm.xlu2 %7814, %v9419_v39   ;;  %14662 = vst [vmem:[#allocation40_spill] sm:$0xff] %v9637_v1  ;;  %v7638_v39 = vld [vmem:[%s14309_s4 + $0x174] sm:$0xf0] }
 0x47f   : > { %2254 = vperm.xlu0 %7828, %v9572_v5   ;;  %v9614_v44 = vpop.permute.xlu1 %1983  ;;  %v7196_v42 = vor.u32 %v7638_v39, %v7195_v60  ;;  %v9821_v60 = vmul.f32 %v9379_v45, %v8573_v21 }
 0x480   : > { %2464 = vperm.xlu1 %7818, %v9572_v5   ;;  %v9612_v5 = vpop.permute.xlu0 %1973  ;;  %14660 = vst [vmem:[#allocation38_spill] sm:$0xff] %v9614_v44 }
 0x481   : > { %14659 = vst [vmem:[#allocation37_spill] sm:$0xff] %v9612_v5  ;;  %2945 = vmatpush.bf16.msrb.mxu1 %v7100_v2  ;;  %v7019_v2 = vld [vmem:[%s14309_s4 + $0x90] sm:$0xf] }
 0x482   : > { %14683 = vst [vmem:[#allocation60_spill] sm:$0xff] %v9821_v60 }
 0x485   : > { %2946 = vmatpush.bf16.msrb.mxu1 %v7092_v54  ;;  %v7613_v54 = vld [vmem:[%s14309_s4 + $0xb4] sm:$0xf] }
 0x486   : > { %2472 = vperm.xlu2 %7814, %v9595_v51   ;;  %v9617_v30 = vpop.permute.xlu2 %2038 }
 0x487   : > { %14661 = vst [vmem:[#allocation39_spill] sm:$0xff] %v9617_v30  ;;  %2264 = vperm.xlu0 %7828, %v9595_v51   ;;  %v9641_v6 = vpop.permute.xlu1 %1998  ;;  %v14666_v30 = vmov 1   ;;  %v7037_v51 = vld [vmem:[%s14309_s4 + $0xb8] sm:$0xf0] }
 0x488   : > { %7819 = vset.pattern.permute.xlu1 %v14648_v22  ;;  %v9639_v25 = vpop.permute.xlu0 %1988  ;;  %14664 = vst [vmem:[#allocation42_spill] sm:$0xff] %v9641_v6  ;;  %v7020_v6 = vor.u32 %v7610_v52, %v7019_v2  ;;  %v7592_v2 = vld [vmem:[%s14309_s4 + $0x4] sm:$0xf0]  ;;  %v7040_v5 = vor.u32 %v7613_v54, %v7037_v51  ;;  %v7611_v51 = vld [vmem:[%s14309_s4 + $0xa4] sm:$0xf] }
 0x489   : > { %2279 = vperm.xlu1 %7819, %v9525_v19   ;;  %14663 = vst [vmem:[#allocation41_spill] sm:$0xff] %v9639_v25  ;;  %v7594_v25 = vld [vmem:[%s14309_s4 + $0x14] sm:$0xf0] }
 0x48a   : > { %v7084_v44 = vor.u32 %v7594_v25, %v7083_v8  ;;  %2689 = vmatpush.bf16.msrb.mxu2 %v7020_v6  ;;  %2776 = vmatpush.bf16.msra.mxu0 %v7040_v5  ;;  %v7021_v6 = vld [vmem:[%s14309_s4 + $0x98] sm:$0xf0] }
 0x48b   : > { %7756 = vmatpush.bf16.msrb.mxu3 %v7040_v5  ;;  %v7609_v5 = vld [vmem:[%s14309_s4 + $0x94] sm:$0xf] }
 0x48c   : > { %2947 = vmatpush.bf16.msrb.mxu1 %v7084_v44  ;;  %v7024_v54 = vor.u32 %v7609_v5, %v7021_v6  ;;  %v7011_v5 = vld [vmem:[%s14309_s4 + $0x80] sm:$0xf]  ;;  %v7608_v6 = vld [vmem:[%s14309_s4 + $0x84] sm:$0xf0] }
 0x48e   : > { %2476 = vperm.xlu2 %7814, %v9637_v1   ;;  %v9644_v28 = vpop.permute.xlu2 %2229 }
 0x48f   : > { %2269 = vperm.xlu0 %7828, %v9637_v1   ;;  %v7075_v1 = vld [vmem:[%s14309_s4] sm:$0xf]  ;;  %v9680_v61 = vpop.permute.xlu1 %2013 }
 0x490   : > { %v9678_v52 = vpop.permute.xlu0 %2003  ;;  %14668 = vst [vmem:[#allocation45_spill] sm:$0xff] %v9680_v61  ;;  %v7076_v8 = vor.u32 %v7592_v2, %v7075_v1  ;;  %v9701_v1 = vld [vmem:[%s14312_s7 + $0xa0] sm:$0xff] }
 0x491   : > { %7820 = vset.pattern.permute.xlu1 %v14666_v30  ;;  %14667 = vst [vmem:[#allocation44_spill] sm:$0xff] %v9678_v52 }
 0x492   : > { %2480 = vperm.xlu1 %7820, %v9650_v47   ;;  %2948 = vmatpush.bf16.msrb.mxu1 %v7076_v8  ;;  %14671 = vst [vmem:[#allocation48_spill] sm:$0xff] %v9701_v1 }
 0x496   : > { %2484 = vperm.xlu2 %7814, %v9525_v19   ;;  %v9683_v25 = vpop.permute.xlu2 %2244  ;;  %v7029_v19 = vld [vmem:[%s14309_s4 + $0xa8] sm:$0xf0] }
 0x497   : > { %14669 = vst [vmem:[#allocation46_spill] sm:$0xff] %v9683_v25  ;;  %2274 = vperm.xlu0 %7828, %v9650_v47   ;;  %v7032_v44 = vor.u32 %v7611_v51, %v7029_v19  ;;  %v9711_v8 = vpop.permute.xlu1 %2028  ;;  %v9718_v19 = vld [vmem:[%s14312_s7 + $0xa8] sm:$0xff] }
 0x498   : > { %v9709_v2 = vpop.permute.xlu0 %2018  ;;  %14673 = vst [vmem:[#allocation50_spill] sm:$0xff] %v9711_v8  ;;  %v7607_v8 = vld [vmem:[%s14309_s4 + $0x84] sm:$0xf] }
 0x499   : > { %2777 = vmatpush.bf16.msra.mxu0 %v7032_v44  ;;  %7757 = vmatpush.bf16.msrb.mxu3 %v7032_v44  ;;  %14672 = vst [vmem:[#allocation49_spill] sm:$0xff] %v9709_v2  ;;  %v9724_v44 = vld [vmem:[%s14312_s7 + $0xb0] sm:$0xff]  ;;  %v7013_v2 = vld [vmem:[%s14309_s4 + $0x88] sm:$0xf0] }
 0x49a   : > { %2488 = vperm.xlu1 %7820, %v9689_v48   ;;  %14674 = vst [vmem:[#allocation51_spill] sm:$0xff] %v9718_v19  ;;  %v7016_v61 = vor.u32 %v7607_v8, %v7013_v2  ;;  %v9751_v2 = vld [vmem:[%s14312_s7 + $0xc0] sm:$0xff] }
 0x49d   : > { %2778 = vmatpush.bf16.msra.mxu0 %v7024_v54  ;;  %7758 = vmatpush.bf16.msrb.mxu3 %v7024_v54  ;;  %v7012_v54 = vor.u32 %v7608_v6, %v7011_v5  ;;  %v2120_v6 = vlaneseq }
 0x49e   : > { %2492 = vperm.xlu2 %7814, %v9701_v1   ;;  %v2054_v51 = vpop.permute.xlu2 %2053 }
 0x49f   : > { %2284 = vperm.xlu0 %7828, %v9689_v48   ;;  %2690 = vmatpush.bf16.msrb.mxu2 %v7012_v54  ;;  %v9745_v48 = vld [vmem:[%s14312_s7 + $0xb8] sm:$0xff]  ;;  %v9754_v8 = vmul.f32 %v2054_v51, %v8580_v16  ;;  %v9771_v16 = vld [vmem:[%s14312_s7 + $0xc8] sm:$0xff] }
 0x4a0   : > { %v9738_v52 = vpop.permute.xlu0 %2033 }
 0x4a1   : > { %14675 = vst [vmem:[#allocation52_spill] sm:$0xff] %v9738_v52  ;;  %2779 = vmatpush.bf16.msra.mxu0 %v7016_v61  ;;  %7759 = vmatpush.bf16.msrb.mxu3 %v7016_v61  ;;  %v9759_v52 = vshrl.u32 %v2120_v6, 7 }
 0x4a2   : > { %2496 = vperm.xlu1 %7820, %v9718_v19   ;;  %14676 = vst [vmem:[#allocation53_spill] sm:$0xff] %v9754_v8 }
 0x4a3   : > { %vm2122_vm9 = vcmp.lt.s32.totalorder %v9759_v52, 1  ;;  %3456 = vmatpush.bf16.msra.mxu2 %v7196_v42  ;;  %vm3151_vm10 = vcmp.lt.s32.totalorder %v9759_v52, 7  ;;  %v7275_v52 = vld [vmem:[%s14309_s4 + $0x210] sm:$0xf] }
 0x4a6   : > { %2500 = vperm.xlu2 %7814, %v9724_v44   ;;  %v2044_v47 = vpop.permute.xlu1 %2043 }
 0x4a7   : > { %2289 = vperm.xlu0 %7828, %v9701_v1   ;;  %v9757_v54 = vmul.f32 %v2044_v47, %v8599_v43  ;;  %v2119_v43 = vrot.slane %v9754_v8, 7 }
 0x4a8   : > { %v2413_v5 = vpop.permute.xlu2 %2412 }
 0x4a9   : > { %14677 = vst [vmem:[#allocation54_spill] sm:$0xff] %v9757_v54  ;;  %v14353_v47 = vrot.slane %v9757_v54, 7 }
 0x4aa   : > { %2504 = vperm.xlu1 %7820, %v9745_v48  }
 0x4ae   : > { %2508 = vperm.xlu2 %7814, %v9751_v2   ;;  %v2049_v1 = vpop.permute.xlu0 %2048 }
 0x4af   : > { %v9762_v61 = vpop.permute.xlu1 %2234  ;;  %v9765_v25 = vmul.f32 %v2049_v1, %v8588_v7  ;;  %2294 = vperm.xlu0 %7828, %v9718_v19   ;;  %v9783_v7 = vld [vmem:[%s14312_s7 + $0xd8] sm:$0xff] }
 0x4b0   : > { %v9773_v51 = vpop.permute.xlu2 %2424 }
 0x4b1   : > { %14678 = vst [vmem:[#allocation55_spill] sm:$0xff] %v9765_v25  ;;  %v2118_v6 = vrot.slane %v9765_v25, 7 }
 0x4b2   : > { %2512 = vperm.xlu1 %7820, %v9771_v16  }
 0x4b3   : > { %v9787_v1 = vsel %vm2122_vm9, %v2118_v6, %v2119_v43  ;;  %v9793_v19 = vsel %vm2122_vm9, %v14353_v47, %v2118_v6 }
 0x4b4   : > { %14679 = vst [vmem:[#allocation56_spill] sm:$0xff] %v9787_v1  ;;  %v2347_v35 = vmul.f32 %v9387_v62, %v9793_v19  ;;  %v2348_v18 = vmul.f32 %v9480_v34, %v9787_v1  ;;  %v9816_v62 = vmul.f32 %v9462_v41, %v8584_v10  ;;  %v2089_v10 = vrot.slane %v9821_v60, 7  ;;  %v9846_v1 = vld [vmem:[%s14312_s7 + $0xe8] sm:$0xff] }
 0x4b5   : > { %14680 = vst [vmem:[#allocation57_spill] sm:$0xff] %v9793_v19  ;;  %v2539_v34 = vmul.f32 %v2413_v5, %v9765_v25  ;;  %v9858_v5 = vld [vmem:[%s14312_s7 + $0xf0] sm:$0xff] }
 0x4b6   : > { %2520 = vperm.xlu2 %7814, %v9783_v7   ;;  %v9806_v54 = vpack.c.bf16 %v2348_v18, %v2347_v35  ;;  %14682 = vst [vmem:[#allocation59_spill] sm:$0xff] %v9816_v62  ;;  %v9823_v18 = vpop.permute.xlu0 %2224  ;;  %v9829_v35 = vld [vmem:[%s14312_s7 + $0xe0] sm:$0xff]  ;;  %v2088_v39 = vrot.slane %v9816_v62, 7 }
 0x4b7   : > { %v9808_v6 = vpop.permute.xlu1 %2249  ;;  %2304 = vperm.xlu0 %7828, %v9745_v48  }
 0x4b8   : > { %14681 = vst [vmem:[#allocation58_spill] sm:$0xff] %v9806_v54  ;;  %v9811_v47 = vpop.permute.xlu2 %2428  ;;  %2949 = vmatmul.bf16.vlgmr.msrb.gmra.mxu1 %v9806_v54  ;;  %v9837_v21 = vsel %vm2122_vm9, %v2119_v43, %v2088_v39  ;;  %v9850_v19 = vsel %vm2122_vm9, %v2088_v39, %v2089_v10 }
 0x4b9   : > { %14684 = vst [vmem:[#allocation61_spill] sm:$0xff] %v9837_v21  ;;  %v2349_v43 = vmul.f32 %v9359_v59, %v9837_v21  ;;  %v9868_v59 = vmul.f32 %v9527_v17, %v8569_v26  ;;  %v2542_v21 = vmul.f32 %v9773_v51, %v9821_v60  ;;  %v7636_v51 = vld [vmem:[%s14309_s4 + $0x164] sm:$0xf0] }
 0x4ba   : > { %7821 = vset.pattern.permute.xlu1 %v14648_v22  ;;  %14685 = vst [vmem:[#allocation62_spill] sm:$0xff] %v9850_v19 }
 0x4bb   : > { %2299 = vperm.xlu1 %7821, %v9724_v44   ;;  %14686 = vst [vmem:[#allocation63_spill] sm:$0xff] %v9868_v59  ;;  %v2090_v26 = vrot.slane %v9868_v59, 7 }
 0x4be   : > { %2524 = vperm.xlu2 %7814, %v9829_v35  }
 0x4bf   : > { %2309 = vperm.xlu0 %7828, %v9751_v2   ;;  %v2421_v25 = vpop.permute.xlu0 %2420 }
 0x4c0   : > { %v9839_v45 = vpop.permute.xlu2 %2436  ;;  %v2417_v41 = vpop.permute.xlu1 %2416 }
 0x4c1   : > { %v2540_v42 = vmul.f32 %v2417_v41, %v9754_v8  ;;  %v2350_v41 = vmul.f32 %v9414_v32, %v9850_v19  ;;  %v9876_v32 = vmul.f32 %v9401_v36, %v8565_v31  ;;  %v9898_v36 = vsel %vm2122_vm9, %v2089_v10, %v2090_v26  ;;  %v7187_v10 = vld [vmem:[%s14309_s4 + $0x160] sm:$0xf] }
 0x4c2   : > { %14690 = vst [vmem:[#allocation66_spill] sm:$0xff] %v9898_v36 }
 0x4c3   : > { %v2571_v54 = vpack.c.bf16 %v2540_v42, %v2539_v34  ;;  %7822 = vset.pattern.permute.xlu1 %v14666_v30  ;;  %v9864_v39 = vpack.c.bf16 %v2350_v41, %v2349_v43  ;;  %14687 = vst [vmem:[#allocation64_spill] sm:$0xff] %v9876_v32  ;;  %v2091_v17 = vrot.slane %v9876_v32, 7  ;;  %v14688_v42 = vmov 2  }
 0x4c4   : > { %2528 = vperm.xlu1 %7822, %v9846_v1   ;;  %v2541_v43 = vmul.f32 %v2421_v25, %v9816_v62  ;;  %v2351_v25 = vmul.f32 %v9511_v56, %v9898_v36  ;;  %v7188_v56 = vor.u32 %v7636_v51, %v7187_v10  ;;  %v14719_v36 = vld [vmem:[#allocation46_spill] sm:$0xff] }
 0x4c5   : > { %2691 = vmatmul.bf16.vlgmr.msrb.gmra.mxu2 %v2571_v54  ;;  %2780 = vmatmul.bf16.vlgmr.msra.gmra.mxu0 %v2571_v54  ;;  %v9883_v54 = vld [vmem:[%s14312_s7 + $0xf8] sm:$0xff]  ;;  %v9894_v31 = vsel %vm2122_vm9, %v2090_v26, %v2091_v17 }
 0x4c6   : > { %2532 = vperm.xlu2 %7814, %v9858_v5   ;;  %14689 = vst [vmem:[#allocation65_spill] sm:$0xff] %v9894_v31  ;;  %v2572_v62 = vpack.c.bf16 %v2542_v21, %v2541_v43  ;;  %3457 = vmatpush.bf16.msra.mxu2 %v7188_v56 }
 0x4c7   : > { %2314 = vperm.xlu0 %7828, %v9771_v16   ;;  %v2469_v41 = vpop.permute.xlu0 %2468 }
 0x4c8   : > { %v9871_v30 = vpop.permute.xlu2 %2444  ;;  %2954 = vmatmul.bf16.gmra.mxu1 %v9864_v39 }
 0x4c9   : > { %v9878_v34 = vpop.permute.xlu1 %2259 }
 0x4cc   : > { %2536 = vperm.xlu1 %7822, %v9883_v54  }
 0x4ce   : > { %7823 = vset.pattern.permute.xlu2 %v14688_v42 }
 0x4cf   : > { %3185 = vperm.xlu2 %7823, %v9447_v53   ;;  %2324 = vperm.xlu0 %7828, %v9783_v7   ;;  %v2352_v53 = vmul.f32 %v9371_v14, %v9894_v31  ;;  %v9922_v14 = vmul.f32 %v9488_v58, %v8558_v11  ;;  %v9927_v21 = vpop.permute.xlu0 %2516  ;;  %v9938_v11 = vmul.f32 %v9490_v57, %v8509_v46 }
 0x4d0   : > { %v9900_v19 = vpop.permute.xlu2 %2452  ;;  %v9942_v58 = vmul.f32 %v9574_v4, %v8524_v37  ;;  %v2543_v46 = vmul.f32 %v9811_v47, %v9868_v59 }
 0x4d1   : > { %v9916_v26 = vpack.c.bf16 %v2352_v53, %v2351_v25  ;;  %14691 = vst [vmem:[#allocation67_spill] sm:$0xff] %v9922_v14  ;;  %v2092_v25 = vrot.slane %v9922_v14, 7 }
 0x4d2   : > { %v2433_v8 = vpop.permute.xlu1 %2432  ;;  %14693 = vst [vmem:[#allocation69_spill] sm:$0xff] %v9938_v11  ;;  %v2553_v37 = vmul.f32 %v2469_v41, %v9942_v58  ;;  %v9978_v41 = vmul.f32 %v9514_v50, %v8550_v13  ;;  %v2545_v50 = vmul.f32 %v9839_v45, %v9922_v14  ;;  %v7634_v45 = vld [vmem:[%s14309_s4 + $0x154] sm:$0xf0] }
 0x4d3   : > { %14694 = vst [vmem:[#allocation70_spill] sm:$0xff] %v9942_v58  ;;  %v2544_v10 = vmul.f32 %v2433_v8, %v9876_v32 }
 0x4d4   : > { %7824 = vset.pattern.permute.xlu1 %v14688_v42  ;;  %14698 = vst [vmem:[#allocation74_spill] sm:$0xff] %v9978_v41 }
 0x4d5   : > { %3189 = vperm.xlu1 %7824, %v9453_v20   ;;  %2696 = vmatmul.bf16.gmra.mxu2 %v2572_v62  ;;  %v2573_v56 = vpack.c.bf16 %v2544_v10, %v2543_v46 }
 0x4d6   : > { %2785 = vmatmul.bf16.gmra.mxu0 %v2572_v62  ;;  %v9931_v62 = vmul.f32 %v9423_v3, %v8554_v12 }
 0x4d7   : > { %3193 = vperm.xlu2 %7823, %v9439_v38   ;;  %2329 = vperm.xlu0 %7828, %v9829_v35  }
 0x4d8   : > { %v9924_v20 = vpop.permute.xlu2 %2460  ;;  %2959 = vmatmul.bf16.gmra.mxu1 %v9916_v26  ;;  %14692 = vst [vmem:[#allocation68_spill] sm:$0xff] %v9931_v62  ;;  %v2093_v53 = vrot.slane %v9931_v62, 7  ;;  %v9961_v8 = vpop.permute.xlu0 %3209 }
 0x4d9   : > { %14697 = vst [vmem:[#allocation73_spill] sm:$0xff] %v9961_v8 }
 0x4da   : > { %v2441_v43 = vpop.permute.xlu1 %2440  ;;  %v9949_v12 = vsel %vm2122_vm9, %v2092_v25, %v2093_v53 }
 0x4db   : > { %14695 = vst [vmem:[#allocation71_spill] sm:$0xff] %v9949_v12  ;;  %v2354_v57 = vmul.f32 %v9823_v18, %v9949_v12  ;;  %v2546_v46 = vmul.f32 %v2441_v43, %v9931_v62  ;;  %v7632_v62 = vld [vmem:[%s14309_s4 + $0x144] sm:$0xf0] }
 0x4dd   : > { %3197 = vperm.xlu1 %7824, %v9469_v40   ;;  %v9953_v40 = vsel %vm2122_vm9, %v2091_v17, %v2092_v25  ;;  %v2094_v25 = vrot.slane %v9978_v41, 7  ;;  %v2574_v43 = vpack.c.bf16 %v2546_v46, %v2545_v50  ;;  %v14703_v46 = vld [vmem:[#allocation28_spill] sm:$0xff] }
 0x4de   : > { %14696 = vst [vmem:[#allocation72_spill] sm:$0xff] %v9953_v40  ;;  %v2353_v17 = vmul.f32 %v9431_v55, %v9953_v40  ;;  %v10037_v50 = vmul.f32 %v14703_v46, %v8539_v33  ;;  %v14708_v46 = vld [vmem:[#allocation24_spill] sm:$0xff] }
 0x4df   : > { %3201 = vperm.xlu2 %7823, %v9495_v24   ;;  %2334 = vperm.xlu0 %7828, %v9846_v1  }
 0x4e0   : > { %v2473_v3 = vpop.permute.xlu2 %2472  ;;  %v9968_v47 = vpack.c.bf16 %v2354_v57, %v2353_v17  ;;  %v9987_v10 = vpop.permute.xlu0 %3257  ;;  %14704 = vst [vmem:[#allocation28_spill] sm:$0xff] %v10037_v50  ;;  %v2096_v33 = vrot.slane %v10037_v50, 7 }
 0x4e1   : > { %v2554_v4 = vmul.f32 %v2473_v3, %v9938_v11  ;;  %14700 = vst [vmem:[#allocation76_spill] sm:$0xff] %v9987_v10  ;;  %v14709_v10 = vld [vmem:[#allocation23_spill] sm:$0xff] }
 0x4e2   : > { %v2449_v24 = vpop.permute.xlu1 %2448 }
 0x4e3   : > { %v9963_v51 = vpack.c.bf16 %v2554_v4, %v2553_v37  ;;  %v7179_v4 = vld [vmem:[%s14309_s4 + $0x150] sm:$0xf] }
 0x4e5   : > { %3205 = vperm.xlu1 %7824, %v9502_v27   ;;  %2701 = vmatmul.bf16.gmra.mxu2 %v2573_v56  ;;  %v9984_v27 = vmul.f32 %v9442_v9, %v8543_v23 }
 0x4e6   : > { %2790 = vmatmul.bf16.gmra.mxu0 %v2573_v56  ;;  %2815 = vmatmul.bf16.vlgmr.msrb.gmra.mxu3 %v9963_v51  ;;  %v7133_v56 = vld [vmem:[%s14309_s4 + $0x78] sm:$0xf0] }
 0x4e7   : > { %3213 = vperm.xlu2 %7823, %v9412_v29   ;;  %2344 = vperm.xlu0 %7828, %v9883_v54   ;;  %14699 = vst [vmem:[#allocation75_spill] sm:$0xff] %v9984_v27  ;;  %v2095_v3 = vrot.slane %v9984_v27, 7 }
 0x4e8   : > { %v9973_v18 = vpop.permute.xlu2 %2476  ;;  %2964 = vmatmul.bf16.gmra.mxu1 %v9968_v47 }
 0x4e9   : > { %v10000_v23 = vsel %vm2122_vm9, %v2094_v25, %v2095_v3 }
 0x4ea   : > { %v9980_v55 = vpop.permute.xlu1 %2456  ;;  %14701 = vst [vmem:[#allocation77_spill] sm:$0xff] %v10000_v23  ;;  %v2356_v9 = vmul.f32 %v9762_v61, %v10000_v23  ;;  %v7180_v61 = vor.u32 %v7634_v45, %v7179_v4  ;;  %v14706_v4 = vld [vmem:[#allocation30_spill] sm:$0xff]  ;;  %v14715_v23 = vld [vmem:[#allocation37_spill] sm:$0xff] }
 0x4ec   : > { %3458 = vmatpush.bf16.msra.mxu2 %v7180_v61  ;;  %v7109_v61 = vld [vmem:[%s14309_s4 + $0x48] sm:$0xf0] }
 0x4ed   : > { %7826 = vset.pattern.permute.xlu1 %v14648_v22 }
 0x4ee   : > { %2319 = vperm.xlu1 %7826, %v9485_v63  }
 0x4ef   : > { %3217 = vperm.xlu2 %7823, %v9376_v49   ;;  %7831 = vset.pattern.permute.xlu0 %v14688_v42  ;;  %v10010_v49 = vsel %vm2122_vm9, %v2093_v53, %v2094_v25  ;;  %v2240_v53 = vpop.permute.xlu0 %2239 }
 0x4f0   : > { %v9995_v13 = vpop.permute.xlu2 %2484  ;;  %3289 = vperm.xlu0 %7831, %v9485_v63   ;;  %14702 = vst [vmem:[#allocation78_spill] sm:$0xff] %v10010_v49  ;;  %v2355_v63 = vmul.f32 %v9644_v28, %v10010_v49  ;;  %v7605_v28 = vld [vmem:[%s14309_s4 + $0x74] sm:$0xf] }
 0x4f1   : > { %v7136_v25 = vor.u32 %v7605_v28, %v7133_v56  ;;  %v2548_v56 = vmul.f32 %v2449_v24, %v9984_v27  ;;  %v2547_v24 = vmul.f32 %v9871_v30, %v9978_v41  ;;  %v14712_v30 = vld [vmem:[#allocation34_spill] sm:$0xff] }
 0x4f2   : > { %v10006_v37 = vpop.permute.xlu1 %2464  ;;  %v10020_v57 = vpack.c.bf16 %v2356_v9, %v2355_v63  ;;  %v7125_v9 = vld [vmem:[%s14309_s4 + $0x68] sm:$0xf0]  ;;  %v14705_v63 = vld [vmem:[#allocation9_spill] sm:$0xff] }
 0x4f3   : > { %3030 = vmatpush.bf16.msrb.mxu0 %v7136_v25  ;;  %v10047_v45 = vmul.f32 %v14706_v4, %v14705_v63  ;;  %v7601_v25 = vld [vmem:[%s14309_s4 + $0x54] sm:$0xf]  ;;  %v14369_v63 = vmov 3   ;;  %v2575_v40 = vpack.c.bf16 %v2548_v56, %v2547_v24 }
 0x4f4   : > { %v14723_v56 = vld [vmem:[#allocation31_spill] sm:$0xff] }
 0x4f5   : > { %2706 = vmatmul.bf16.gmra.mxu2 %v2574_v43  ;;  %14707 = vst [vmem:[#allocation9_spill] sm:$0xff] %v10047_v45 }
 0x4f6   : > { %2795 = vmatmul.bf16.gmra.mxu0 %v2574_v43  ;;  %7827 = vset.pattern.permute.xlu1 %v14688_v42 }
 0x4f7   : > { %3225 = vperm.xlu2 %7823, %v9545_v15   ;;  %3221 = vperm.xlu1 %7827, %v9397_v0   ;;  %v7603_v0 = vld [vmem:[%s14309_s4 + $0x64] sm:$0xf]  ;;  %v2255_v4 = vpop.permute.xlu0 %2254 }
 0x4f8   : > { %v10031_v17 = vpop.permute.xlu2 %2492  ;;  %3309 = vperm.xlu0 %7831, %v9883_v54   ;;  %2969 = vmatmul.bf16.gmra.mxu1 %v10020_v57  ;;  %v7128_v43 = vor.u32 %v7603_v0, %v7125_v9  ;;  %v7117_v0 = vld [vmem:[%s14309_s4 + $0x58] sm:$0xf0] }
 0x4fa   : > { %3031 = vmatpush.bf16.msrb.mxu0 %v7128_v43  ;;  %v7120_v43 = vor.u32 %v7601_v25, %v7117_v0  ;;  %v14711_v0 = vld [vmem:[#allocation7_spill] sm:$0xff] }
 0x4fb   : > { %v10049_v28 = vpop.permute.xlu1 %2279 }
 0x4fe   : > { %3032 = vmatpush.bf16.msrb.mxu0 %v7120_v43 }
 0x4ff   : > { %3233 = vperm.xlu2 %7823, %v14708_v46   ;;  %3229 = vperm.xlu1 %7827, %v14709_v10   ;;  %v10069_v10 = vsel %vm2122_vm9, %v2095_v3, %v2096_v33  ;;  %v7599_v46 = vld [vmem:[%s14309_s4 + $0x44] sm:$0xf] }
 0x500   : > { %v10062_v9 = vpop.permute.xlu2 %2500  ;;  %7834 = vset.pattern.permute.xlu0 %v14369_v63  ;;  %14710 = vst [vmem:[#allocation30_spill] sm:$0xff] %v10069_v10  ;;  %v2357_v25 = vmul.f32 %v2240_v53, %v10069_v10  ;;  %v10081_v63 = vmul.f32 %v14712_v30, %v14711_v0  ;;  %v14714_v3 = vld [vmem:[#allocation5_spill] sm:$0xff]  ;;  %v7112_v43 = vor.u32 %v7599_v46, %v7109_v61  ;;  %v7093_v46 = vld [vmem:[%s14309_s4 + $0x28] sm:$0xf0] }
 0x501   : > { %3707 = vperm.xlu0 %7834, %v9439_v38   ;;  %v10085_v49 = vmul.f32 %v14715_v23, %v14714_v3  ;;  %v14717_v38 = vrot.slane %v10047_v45, 7  ;;  %v14720_v10 = vld [vmem:[#allocation25_spill] sm:$0xff] }
 0x502   : > { %14713 = vst [vmem:[#allocation24_spill] sm:$0xff] %v10081_v63  ;;  %v2555_v0 = vmul.f32 %v9973_v18, %v10081_v63  ;;  %v7101_v18 = vld [vmem:[%s14309_s4 + $0x38] sm:$0xf0]  ;;  %3033 = vmatpush.bf16.msrb.mxu0 %v7112_v43  ;;  %v2265_v43 = vpop.permute.xlu0 %2264 }
 0x503   : > { %14716 = vst [vmem:[#allocation23_spill] sm:$0xff] %v10085_v49  ;;  %v10091_v12 = vsel %vm2122_vm9, %v2096_v33, %v14717_v38  ;;  %v14721_v33 = vld [vmem:[#allocation33_spill] sm:$0xff]  ;;  %v14726_v38 = vld [vmem:[#allocation26_spill] sm:$0xff] }
 0x504   : > { %14718 = vst [vmem:[#allocation7_spill] sm:$0xff] %v10091_v12  ;;  %v2358_v31 = vmul.f32 %v14719_v36, %v10091_v12  ;;  %v2481_v53 = vpop.permute.xlu1 %2480  ;;  %v7597_v36 = vld [vmem:[%s14309_s4 + $0x34] sm:$0xf]  ;;  %v14731_v12 = vld [vmem:[#allocation38_spill] sm:$0xff] }
 0x505   : > { %v2556_v30 = vmul.f32 %v2481_v53, %v10085_v49  ;;  %2711 = vmatmul.bf16.gmra.mxu2 %v2575_v40 }
 0x506   : > { %v10098_v23 = vpack.c.bf16 %v2358_v31, %v2357_v25  ;;  %2800 = vmatmul.bf16.gmra.mxu0 %v2575_v40  ;;  %v7104_v31 = vor.u32 %v7597_v36, %v7101_v18  ;;  %v14722_v40 = vld [vmem:[#allocation6_spill] sm:$0xff]  ;;  %v14725_v25 = vld [vmem:[#allocation8_spill] sm:$0xff]  ;;  %v2550_v18 = vmul.f32 %v9980_v55, %v10047_v45  ;;  %v2549_v55 = vmul.f32 %v9900_v19, %v10037_v50  ;;  %v7171_v19 = vld [vmem:[%s14309_s4 + $0x140] sm:$0xf] }
 0x507   : > { %v10100_v3 = vpack.c.bf16 %v2556_v30, %v2555_v0  ;;  %3241 = vperm.xlu2 %7823, %v14720_v10   ;;  %3237 = vperm.xlu1 %7827, %v14721_v33   ;;  %v10115_v24 = vmul.f32 %v14723_v56, %v14722_v40  ;;  %v7595_v10 = vld [vmem:[%s14309_s4 + $0x24] sm:$0xf]  ;;  %v10127_v53 = vmul.f32 %v14726_v38, %v14725_v25  ;;  %v14728_v40 = vld [vmem:[#allocation40_spill] sm:$0xff]  ;;  %v7593_v25 = vld [vmem:[%s14309_s4 + $0x14] sm:$0xf] }
 0x508   : > { %v10110_v61 = vpop.permute.xlu2 %2508  ;;  %2974 = vmatmul.bf16.gmra.mxu1 %v10098_v23  ;;  %3034 = vmatpush.bf16.msrb.mxu0 %v7104_v31  ;;  %v7096_v30 = vor.u32 %v7595_v10, %v7093_v46  ;;  %v14729_v56 = vld [vmem:[#allocation36_spill] sm:$0xff]  ;;  %v14730_v38 = vld [vmem:[#allocation21_spill] sm:$0xff] }
 0x509   : > { %14724 = vst [vmem:[#allocation34_spill] sm:$0xff] %v10115_v24  ;;  %2820 = vmatmul.bf16.gmra.mxu3 %v10100_v3  ;;  %3727 = vperm.xlu0 %7834, %v9412_v29   ;;  %v2099_v36 = vrot.slane %v10115_v24, 7  ;;  %v2098_v29 = vrot.slane %v10127_v53, 7  ;;  %v7085_v31 = vld [vmem:[%s14309_s4 + $0x18] sm:$0xf0]  ;;  %v10145_v27 = vmul.f32 %v14731_v12, %v14730_v38 }
 0x50a   : > { %14727 = vst [vmem:[#allocation5_spill] sm:$0xff] %v10127_v53  ;;  %v7088_v46 = vor.u32 %v7593_v25, %v7085_v31  ;;  %v7077_v12 = vld [vmem:[%s14309_s4 + $0x8] sm:$0xf0]  ;;  %v14735_v31 = vld [vmem:[#allocation27_spill] sm:$0xff]  ;;  %v10182_v14 = vpop.permute.xlu0 %2269 }
 0x50b   : > { %14732 = vst [vmem:[#allocation37_spill] sm:$0xff] %v10145_v27  ;;  %v14734_v25 = vld [vmem:[#allocation22_spill] sm:$0xff] }
 0x50c   : > { %v2489_v0 = vpop.permute.xlu1 %2488  ;;  %3035 = vmatpush.bf16.msrb.mxu0 %v7096_v30  ;;  %v7591_v30 = vld [vmem:[%s14309_s4 + $0x4] sm:$0xf]  ;;  %v10166_v38 = vmul.f32 %v14735_v31, %v14734_v25  ;;  %v7172_v31 = vor.u32 %v7632_v62, %v7171_v19 }
 0x50d   : > { %v2558_v50 = vmul.f32 %v2489_v0, %v10145_v27  ;;  %v7080_v25 = vor.u32 %v7591_v30, %v7077_v12  ;;  %v14743_v30 = vld [vmem:[#allocation29_spill] sm:$0xff]  ;;  %v2551_v12 = vmul.f32 %v9924_v20, %v10127_v53 }
 0x50e   : > { %14736 = vst [vmem:[#allocation25_spill] sm:$0xff] %v10166_v38  ;;  %3459 = vmatpush.bf16.msra.mxu2 %v7172_v31 }
 0x50f   : > { %3249 = vperm.xlu2 %7823, %v14728_v40   ;;  %3245 = vperm.xlu1 %7827, %v14729_v56   ;;  %v10151_v56 = vsel %vm2122_vm9, %v2098_v29, %v2099_v36 }
 0x510   : > { %v10141_v10 = vpop.permute.xlu2 %2520  ;;  %14733 = vst [vmem:[#allocation46_spill] sm:$0xff] %v10151_v56  ;;  %v2360_v8 = vmul.f32 %v2255_v4, %v10151_v56  ;;  %v2576_v56 = vpack.c.bf16 %v2550_v18, %v2549_v55  ;;  %3036 = vmatpush.bf16.msrb.mxu0 %v7088_v46  ;;  %v14739_v18 = vld [vmem:[#allocation47_spill] sm:$0xff] }
 0x511   : > { %3739 = vperm.xlu0 %7834, %v9545_v15   ;;  %v14737_v15 = vrot.slane %v10047_v45, 7  ;;  %v2557_v45 = vmul.f32 %v9995_v13, %v10166_v38  ;;  %v14740_v55 = vld [vmem:[#allocation43_spill] sm:$0xff]  ;;  %v2101_v13 = vrot.slane %v9938_v11, 7  ;;  %v14787_v11 = vld [vmem:[#allocation52_spill] sm:$0xff] }
 0x513   : > { %v10172_v4 = vsel %vm2122_vm9, %v14737_v15, %v2098_v29  ;;  %v10186_v0 = vpack.c.bf16 %v2558_v50, %v2557_v45  ;;  %v2275_v50 = vpop.permute.xlu0 %2274  ;;  %v14741_v45 = vld [vmem:[#allocation48_spill] sm:$0xff]  ;;  %v14747_v15 = vld [vmem:[#allocation41_spill] sm:$0xff] }
 0x514   : > { %14738 = vst [vmem:[#allocation33_spill] sm:$0xff] %v10172_v4  ;;  %v2359_v41 = vmul.f32 %v9808_v6, %v10172_v4  ;;  %v2497_v32 = vpop.permute.xlu1 %2496  ;;  %3037 = vmatpush.bf16.msrb.mxu0 %v7080_v25 }
 0x515   : > { %2716 = vmatmul.bf16.gmra.mxu2 %v2576_v56 }
 0x516   : > { %v10184_v29 = vpack.c.bf16 %v2360_v8, %v2359_v41  ;;  %2805 = vmatmul.bf16.gmra.mxu0 %v2576_v56  ;;  %v2100_v8 = vrot.slane %v9942_v58, 7  ;;  %v2552_v41 = vmul.f32 %v10006_v37, %v10115_v24  ;;  %v14742_v56 = vld [vmem:[#allocation19_spill] sm:$0xff] }
 0x517   : > { %3261 = vperm.xlu2 %7823, %v14739_v18   ;;  %3253 = vperm.xlu1 %7827, %v14740_v55  }
 0x518   : > { %v10190_v6 = vpop.permute.xlu2 %2524  ;;  %2979 = vmatmul.bf16.gmra.mxu1 %v10184_v29  ;;  %v10212_v37 = vsel %vm2122_vm9, %v2100_v8, %v2101_v13  ;;  %v10222_v31 = vsel %vm2122_vm9, %v2099_v36, %v2100_v8  ;;  %v2577_v55 = vpack.c.bf16 %v2552_v41, %v2551_v12  ;;  %v14750_v12 = vld [vmem:[#allocation51_spill] sm:$0xff] }
 0x519   : > { %2825 = vmatmul.bf16.gmra.mxu3 %v10186_v0  ;;  %3751 = vperm.xlu0 %7834, %v14721_v33   ;;  %v10206_v33 = vmul.f32 %v14743_v30, %v14742_v56  ;;  %14745 = vst [vmem:[#allocation31_spill] sm:$0xff] %v10212_v37  ;;  %v2362_v19 = vmul.f32 %v2265_v43, %v10212_v37  ;;  %v7637_v43 = vld [vmem:[%s14309_s4 + $0x174] sm:$0xf] }
 0x51a   : > { %14749 = vst [vmem:[#allocation26_spill] sm:$0xff] %v10222_v31  ;;  %v2361_v20 = vmul.f32 %v9878_v34, %v10222_v31 }
 0x51b   : > { %14744 = vst [vmem:[#allocation6_spill] sm:$0xff] %v10206_v33  ;;  %v2285_v34 = vpop.permute.xlu0 %2284 }
 0x51c   : > { %v2505_v62 = vpop.permute.xlu1 %2504  ;;  %v10237_v41 = vpack.c.bf16 %v2362_v19, %v2361_v20 }
 0x51f   : > { %3265 = vperm.xlu2 %7823, %v14741_v45   ;;  %7829 = vset.pattern.permute.xlu1 %v14648_v22  ;;  %v14746_v22 = vld [vmem:[#allocation20_spill] sm:$0xff]  ;;  %v2560_v45 = vmul.f32 %v2497_v32, %v10206_v33 }
 0x520   : > { %v10201_v46 = vpop.permute.xlu2 %2532  ;;  %2339 = vperm.xlu1 %7829, %v9858_v5   ;;  %v10218_v25 = vmul.f32 %v14747_v15, %v14746_v22  ;;  %v2102_v22 = vrot.slane %v10081_v63, 7  ;;  %v14752_v15 = vld [vmem:[#allocation44_spill] sm:$0xff] }
 0x521   : > { %3763 = vperm.xlu0 %7834, %v14728_v40   ;;  %v7197_v40 = vld [vmem:[%s14309_s4 + $0x178] sm:$0xf0] }
 0x522   : > { %14748 = vst [vmem:[#allocation8_spill] sm:$0xff] %v10218_v25  ;;  %v2559_v36 = vmul.f32 %v10031_v17, %v10218_v25  ;;  %v7200_v8 = vor.u32 %v7637_v43, %v7197_v40  ;;  %v2103_v17 = vrot.slane %v10085_v49, 7  ;;  %v14755_v43 = vld [vmem:[#allocation18_spill] sm:$0xff]  ;;  %v10504_v49 = vld [vmem:[%s14312_s7 + $0x40] sm:$0xff] }
 0x523   : > { %v14756_v40 = vld [vmem:[#allocation42_spill] sm:$0xff] }
 0x524   : > { %v10227_v56 = vpop.permute.xlu1 %2512  ;;  %v10239_v32 = vpack.c.bf16 %v2560_v45, %v2559_v36  ;;  %3545 = vmatpush.bf16.msra.mxu3 %v7200_v8  ;;  %v10260_v45 = vsel %vm2122_vm9, %v2102_v22, %v2103_v17  ;;  %v10269_v36 = vmul.f32 %v14756_v40, %v14755_v43  ;;  %v10275_v8 = vpop.permute.xlu0 %2289  ;;  %v7635_v43 = vld [vmem:[%s14309_s4 + $0x164] sm:$0xf]  ;;  %v7189_v40 = vld [vmem:[%s14309_s4 + $0x168] sm:$0xf0] }
 0x525   : > { %2721 = vmatmul.bf16.gmra.mxu2 %v2577_v55  ;;  %14754 = vst [vmem:[#allocation36_spill] sm:$0xff] %v10260_v45 }
 0x526   : > { %2810 = vmatmul.bf16.gmra.mxu0 %v2577_v55  ;;  %14757 = vst [vmem:[#allocation21_spill] sm:$0xff] %v10269_v36 }
 0x527   : > { %3273 = vperm.xlu2 %7823, %v9724_v44  }
 0x528   : > { %7830 = vset.pattern.permute.xlu1 %v14688_v42  ;;  %2984 = vmatmul.bf16.gmra.mxu1 %v10237_v41  ;;  %v14751_v42 = vld [vmem:[#allocation17_spill] sm:$0xff] }
 0x529   : > { %v10244_v30 = vpop.permute.xlu2 %3185  ;;  %3269 = vperm.xlu1 %7830, %v14750_v12   ;;  %2830 = vmatmul.bf16.gmra.mxu3 %v10239_v32  ;;  %v10256_v55 = vmul.f32 %v14752_v15, %v14751_v42 }
 0x52a   : > { %3775 = vperm.xlu0 %7834, %v14739_v18   ;;  %v2364_v18 = vmul.f32 %v2275_v50, %v10260_v45  ;;  %v2561_v50 = vmul.f32 %v10062_v9, %v10269_v36 }
 0x52b   : > { %14753 = vst [vmem:[#allocation40_spill] sm:$0xff] %v10256_v55  ;;  %v2562_v12 = vmul.f32 %v2505_v62, %v10256_v55  ;;  %v14759_v62 = vld [vmem:[#allocation58_spill] sm:$0xff] }
 0x52d   : > { %v10250_v19 = vpop.permute.xlu1 %2299 }
 0x52f   : > { %3281 = vperm.xlu2 %7823, %v9751_v2   ;;  %v10273_v2 = vsel %vm2122_vm9, %v2101_v13, %v2102_v22 }
 0x530   : > { %14758 = vst [vmem:[#allocation38_spill] sm:$0xff] %v10273_v2  ;;  %v2363_v42 = vmul.f32 %v10182_v14, %v10273_v2  ;;  %v10300_v2 = vpack.c.bf16 %v2562_v12, %v2561_v50  ;;  %v14761_v50 = vld [vmem:[#allocation45_spill] sm:$0xff] }
 0x531   : > { %v10262_v20 = vpop.permute.xlu2 %3193  ;;  %3277 = vperm.xlu1 %7830, %v9745_v48   ;;  %v7163_v48 = vld [vmem:[%s14309_s4 + $0x130] sm:$0xf] }
 0x532   : > { %3787 = vperm.xlu0 %7834, %v9724_v44   ;;  %v7630_v44 = vld [vmem:[%s14309_s4 + $0x134] sm:$0xf0]  ;;  %v10289_v15 = vpack.c.bf16 %v2364_v18, %v2363_v42  ;;  %v2105_v18 = vrot.slane %v10145_v27, 7  ;;  %v2295_v42 = vpop.permute.xlu0 %2294 }
 0x533   : > { %v7164_v22 = vor.u32 %v7630_v44, %v7163_v48  ;;  %v14760_v44 = vld [vmem:[#allocation15_spill] sm:$0xff] }
 0x535   : > { %2726 = vmatmul.bf16.gmra.mxu2 %v9963_v51  ;;  %v2950_v13 = vpop.f32.mrf.mxu1  ;;  %v7192_v51 = vor.u32 %v7635_v43, %v7189_v40 }
 0x536   : > { %3038 = vmatmul.bf16.vlgmr.msrb.gmra.mxu0 %v14759_v62  ;;  %v10292_v14 = vpop.permute.xlu1 %2528  ;;  %3460 = vmatpush.bf16.msra.mxu2 %v7164_v22  ;;  %v10316_v22 = vmul.f32 %v14761_v50, %v14760_v44 }
 0x537   : > { %3293 = vperm.xlu2 %7823, %v9783_v7   ;;  %3546 = vmatpush.bf16.msra.mxu3 %v7192_v51  ;;  %v2104_v7 = vrot.slane %v10166_v38, 7  ;;  %v14765_v51 = vld [vmem:[#allocation16_spill] sm:$0xff] }
 0x538   : > { %2989 = vmatmul.bf16.gmra.mxu1 %v10289_v15  ;;  %14762 = vst [vmem:[#allocation22_spill] sm:$0xff] %v10316_v22  ;;  %v2564_v50 = vmul.f32 %v10227_v56, %v10316_v22  ;;  %v7181_v56 = vld [vmem:[%s14309_s4 + $0x158] sm:$0xf0] }
 0x539   : > { %v10304_v9 = vpop.permute.xlu2 %3201  ;;  %3285 = vperm.xlu1 %7830, %v9771_v16   ;;  %2835 = vmatmul.bf16.gmra.mxu3 %v10300_v2  ;;  %v10320_v62 = vsel %vm2122_vm9, %v2104_v7, %v2105_v18  ;;  %v10335_v44 = vsel %vm2122_vm9, %v2103_v17, %v2104_v7  ;;  %v7633_v17 = vld [vmem:[%s14309_s4 + $0x154] sm:$0xf] }
 0x53a   : > { %3799 = vperm.xlu0 %7834, %v9771_v16   ;;  %14763 = vst [vmem:[#allocation27_spill] sm:$0xff] %v10320_v62  ;;  %v2366_v43 = vmul.f32 %v2285_v34, %v10320_v62  ;;  %v2365_v37 = vmul.f32 %v10049_v28, %v10335_v44  ;;  %v10357_v7 = vpop.permute.xlu0 %2304 }
 0x53b   : > { %14768 = vst [vmem:[#allocation48_spill] sm:$0xff] %v10335_v44 }
 0x53c   : > { %v10346_v62 = vpack.c.bf16 %v2366_v43, %v2365_v37  ;;  %v7184_v37 = vor.u32 %v7633_v17, %v7181_v56  ;;  %v14421_v56 = vrot.slane %v10206_v33, 7 }
 0x53d   : > { %v2952_v12 = vpop.f32.mrf.mxu1 }
 0x53e   : > { %v10310_v48 = vpop.permute.xlu1 %2536  ;;  %3547 = vmatpush.bf16.msra.mxu3 %v7184_v37 }
 0x53f   : > { %3301 = vperm.xlu2 %7823, %v9846_v1   ;;  %v14766_v1 = vld [vmem:[#allocation32_spill] sm:$0xff] }
 0x540   : > { %v10331_v45 = vmul.f32 %v14766_v1, %v14765_v51 }
 0x541   : > { %v10322_v16 = vpop.permute.xlu2 %3213  ;;  %3297 = vperm.xlu1 %7830, %v9829_v35  }
 0x542   : > { %3811 = vperm.xlu0 %7834, %v9829_v35   ;;  %v10327_v40 = vpop.f32.mrf.mxu0  ;;  %14767 = vst [vmem:[#allocation43_spill] sm:$0xff] %v10331_v45  ;;  %v2563_v34 = vmul.f32 %v10110_v61, %v10331_v45  ;;  %v14769_v61 = vmov 3   ;;  %v10400_v31 = vpop.permute.xlu0 %2309 }
 0x543   : > { %14764 = vst [vmem:[#allocation47_spill] sm:$0xff] %v10327_v40 }
 0x544   : > { %v10355_v28 = vpack.c.bf16 %v2564_v50, %v2563_v34  ;;  %v2106_v34 = vrot.slane %v10218_v25, 7  ;;  %v14422_v25 = vmov 5  }
 0x545   : > { %2731 = vmatmul.bf16.gmra.mxu2 %v10100_v3  ;;  %v10344_v35 = vpop.f32.mrf.mxu1 }
 0x546   : > { %3043 = vmatmul.bf16.gmra.mxu0 %v9864_v39  ;;  %v10365_v39 = vld [vmem:[%s14312_s7] sm:$0xff]  ;;  %v10398_v37 = vsel %vm2122_vm9, %v2106_v34, %v14421_v56 }
 0x547   : > { %7832 = vset.pattern.permute.xlu2 %v14769_v61  ;;  %v10360_v3 = vpop.permute.xlu1 %3189  ;;  %14775 = vst [vmem:[#allocation41_spill] sm:$0xff] %v10398_v37  ;;  %v2368_v27 = vmul.f32 %v2295_v42, %v10398_v37  ;;  %v14778_v56 = vld [vmem:[#allocation49_spill] sm:$0xff]  ;;  %v10423_v42 = vsel %vm2122_vm9, %v2105_v18, %v2106_v34  ;;  %v7628_v34 = vld [vmem:[%s14309_s4 + $0x124] sm:$0xf0] }
 0x548   : > { %3699 = vperm.xlu2 %7832, %v10365_v39   ;;  %v2692_v43 = vpop.f32.mrf.mxu2  ;;  %2994 = vmatmul.bf16.gmra.mxu1 %v10346_v62  ;;  %14780 = vst [vmem:[#allocation44_spill] sm:$0xff] %v10423_v42  ;;  %v2367_v37 = vmul.f32 %v10275_v8, %v10423_v42  ;;  %v7155_v18 = vld [vmem:[%s14309_s4 + $0x120] sm:$0xf] }
 0x549   : > { %v10369_v51 = vadd.f32 %v2950_v13, %v2692_v43  ;;  %v10371_v1 = vpop.permute.xlu2 %3217  ;;  %3305 = vperm.xlu1 %7830, %v9858_v5   ;;  %2840 = vmatmul.bf16.gmra.mxu3 %v10355_v28  ;;  %v10387_v13 = vld [vmem:[%s14312_s7 + $0x18] sm:$0xff]  ;;  %v14773_v43 = vld [vmem:[#allocation35_spill] sm:$0xff]  ;;  %v7156_v8 = vor.u32 %v7628_v34, %v7155_v18 }
 0x54a   : > { %3823 = vperm.xlu0 %7834, %v9883_v54   ;;  %v10376_v50 = vpop.f32.mrf.mxu0  ;;  %v14772_v54 = vld [vmem:[#allocation13_spill] sm:$0xff] }
 0x54b   : > { %14770 = vst [vmem:[#allocation19_spill] sm:$0xff] %v10369_v51  ;;  %v10392_v51 = vmul.f32 %v14773_v43, %v14772_v54  ;;  %v10412_v54 = vld [vmem:[%s14312_s7 + $0x8] sm:$0xff]  ;;  %3461 = vmatpush.bf16.msra.mxu2 %v7156_v8  ;;  %v7629_v8 = vld [vmem:[%s14309_s4 + $0x134] sm:$0xf] }
 0x54c   : > { %14771 = vst [vmem:[#allocation29_spill] sm:$0xff] %v10376_v50  ;;  %v14777_v43 = vld [vmem:[#allocation14_spill] sm:$0xff] }
 0x54d   : > { %v10379_v17 = vpop.f32.mrf.mxu1  ;;  %14774 = vst [vmem:[#allocation20_spill] sm:$0xff] %v10392_v51 }
 0x54f   : > { %v10382_v44 = vpop.permute.xlu1 %3197 }
 0x550   : > { %3711 = vperm.xlu2 %7832, %v10387_v13   ;;  %v2694_v5 = vpop.f32.mrf.mxu2 }
 0x551   : > { %v10402_v4 = vadd.f32 %v2952_v12, %v2694_v5  ;;  %v10404_v50 = vpop.permute.xlu2 %3225  ;;  %7833 = vset.pattern.permute.xlu1 %v14769_v61  ;;  %v10417_v12 = vmul.f32 %v14778_v56, %v14777_v43  ;;  %v2566_v5 = vmul.f32 %v10141_v10, %v10392_v51  ;;  %v10443_v43 = vpack.c.bf16 %v2368_v27, %v2367_v37  ;;  %v10459_v27 = vld [vmem:[%s14312_s7 + $0x28] sm:$0xff] }
 0x552   : > { %7837 = vset.pattern.permute.xlu0 %v14422_v25  ;;  %3703 = vperm.xlu1 %7833, %v10412_v54   ;;  %v8047_v25 = vld [vmem:[%s14312_s7 + $0x10] sm:$0xff] }
 0x553   : > { %14776 = vst [vmem:[#allocation51_spill] sm:$0xff] %v10402_v4  ;;  %v10425_v61 = vpop.f32.mrf.mxu0  ;;  %4575 = vperm.xlu0 %7837, %v8047_v25   ;;  %v2565_v56 = vmul.f32 %v9927_v21, %v10417_v12  ;;  %v7631_v21 = vld [vmem:[%s14309_s4 + $0x144] sm:$0xf] }
 0x554   : > { %14779 = vst [vmem:[#allocation17_spill] sm:$0xff] %v10417_v12 }
 0x555   : > { %14781 = vst [vmem:[#allocation18_spill] sm:$0xff] %v10425_v61  ;;  %2736 = vmatmul.bf16.gmra.mxu2 %v10186_v0  ;;  %v10435_v10 = vpop.f32.mrf.mxu1  ;;  %v7173_v0 = vld [vmem:[%s14309_s4 + $0x148] sm:$0xf0]  ;;  %v10452_v42 = vpack.c.bf16 %v2566_v5, %v2565_v56  ;;  %v10472_v5 = vld [vmem:[%s14312_s7 + $0x20] sm:$0xff]  ;;  %v10475_v56 = vpop.permute.xlu0 %2314 }
 0x556   : > { %3048 = vmatmul.bf16.gmra.mxu0 %v9916_v26  ;;  %v7176_v61 = vor.u32 %v7631_v21, %v7173_v0  ;;  %v7165_v21 = vld [vmem:[%s14309_s4 + $0x138] sm:$0xf0] }
 0x557   : > { %v10454_v4 = vpop.permute.xlu1 %3205 }
 0x558   : > { %3719 = vperm.xlu2 %7832, %v10459_v27   ;;  %v2697_v26 = vpop.f32.mrf.mxu2  ;;  %2999 = vmatmul.bf16.gmra.mxu1 %v10443_v43 }
 0x559   : > { %v10464_v37 = vadd.f32 %v10344_v35, %v2697_v26  ;;  %v10466_v18 = vpop.permute.xlu2 %3233  ;;  %2845 = vmatmul.bf16.gmra.mxu3 %v10452_v42  ;;  %v10482_v35 = vld [vmem:[%s14312_s7 + $0x38] sm:$0xff]  ;;  %v7168_v26 = vor.u32 %v7629_v8, %v7165_v21 }
 0x55a   : > { %14783 = vst [vmem:[#allocation58_spill] sm:$0xff] %v10466_v18  ;;  %3715 = vperm.xlu1 %7833, %v10472_v5   ;;  %3548 = vmatpush.bf16.msra.mxu3 %v7176_v61  ;;  %v2108_v61 = vrot.slane %v10269_v36, 7  ;;  %v14786_v36 = vld [vmem:[#allocation11_spill] sm:$0xff] }
 0x55b   : > { %14782 = vst [vmem:[#allocation42_spill] sm:$0xff] %v10464_v37  ;;  %v10477_v34 = vpop.f32.mrf.mxu0  ;;  %4595 = vperm.xlu0 %7837, %v10482_v35   ;;  %v7627_v37 = vld [vmem:[%s14309_s4 + $0x124] sm:$0xf]  ;;  %v10511_v63 = vmul.f32 %v14787_v11, %v14786_v36  ;;  %v10529_v18 = vld [vmem:[%s14312_s7 + $0x30] sm:$0xff]  ;;  %v14793_v11 = vld [vmem:[#allocation12_spill] sm:$0xff] }
 0x55c   : > { %14784 = vst [vmem:[#allocation15_spill] sm:$0xff] %v10477_v34  ;;  %v7157_v34 = vld [vmem:[%s14309_s4 + $0x128] sm:$0xf0] }
 0x55d   : > { %14785 = vst [vmem:[#allocation45_spill] sm:$0xff] %v10482_v35  ;;  %v10492_v0 = vpop.f32.mrf.mxu1  ;;  %v7160_v38 = vor.u32 %v7627_v37, %v7157_v34  ;;  %v14789_v35 = vrot.slane %v10206_v33, 7  ;;  %v14794_v36 = vld [vmem:[#allocation50_spill] sm:$0xff] }
 0x55e   : > { %3549 = vmatpush.bf16.msra.mxu3 %v7168_v26  ;;  %14788 = vst [vmem:[#allocation16_spill] sm:$0xff] %v10511_v63  ;;  %v10534_v33 = vmul.f32 %v14794_v36, %v14793_v11  ;;  %v7625_v11 = vld [vmem:[%s14309_s4 + $0x114] sm:$0xf]  ;;  %v10557_v36 = vpop.permute.xlu0 %2324 }
 0x55f   : > { %v10517_v26 = vsel %vm2122_vm9, %v14789_v35, %v2108_v61  ;;  %v14796_v35 = vrot.slane %v10256_v55, 7 }
 0x560   : > { %3731 = vperm.xlu2 %7832, %v10504_v49   ;;  %v10507_v8 = vpop.permute.xlu1 %2319  ;;  %v2699_v21 = vpop.f32.mrf.mxu2  ;;  %14790 = vst [vmem:[#allocation32_spill] sm:$0xff] %v10517_v26  ;;  %v2369_v40 = vmul.f32 %v10250_v19, %v10517_v26  ;;  %v2568_v19 = vmul.f32 %v10292_v14, %v10511_v63  ;;  %v14444_v26 = vmov 6   ;;  %v2567_v14 = vmul.f32 %v10190_v6, %v10534_v33 }
 0x561   : > { %v10520_v37 = vadd.f32 %v10379_v17, %v2699_v21  ;;  %v10522_v34 = vpop.permute.xlu2 %3241  ;;  %14795 = vst [vmem:[#allocation14_spill] sm:$0xff] %v10534_v33  ;;  %v10540_v17 = vsel %vm2122_vm9, %v2108_v61, %v14796_v35  ;;  %v7149_v61 = vld [vmem:[%s14309_s4 + $0x118] sm:$0xf0] }
 0x562   : > { %14792 = vst [vmem:[#allocation35_spill] sm:$0xff] %v10522_v34  ;;  %3723 = vperm.xlu1 %7833, %v10529_v18   ;;  %3550 = vmatpush.bf16.msra.mxu3 %v7160_v38  ;;  %v7152_v35 = vor.u32 %v7625_v11, %v7149_v61  ;;  %v10589_v11 = vld [vmem:[%s14312_s7 + $0x48] sm:$0xff]  ;;  %v10627_v34 = vld [vmem:[%s14312_s7 + $0x60] sm:$0xff] }
 0x563   : > { %14791 = vst [vmem:[#allocation13_spill] sm:$0xff] %v10520_v37  ;;  %v10544_v21 = vpop.f32.mrf.mxu0  ;;  %7840 = vset.pattern.permute.xlu0 %v14444_v26  ;;  %v2370_v37 = vmul.f32 %v10357_v7, %v10540_v17  ;;  %v7141_v7 = vld [vmem:[%s14309_s4 + $0x108] sm:$0xf0] }
 0x564   : > { %14797 = vst [vmem:[#allocation49_spill] sm:$0xff] %v10540_v17  ;;  %5089 = vperm.xlu0 %7840, %v8047_v25   ;;  %v7623_v25 = vld [vmem:[%s14309_s4 + $0x104] sm:$0xf]  ;;  %v10569_v17 = vpack.c.bf16 %v2568_v19, %v2567_v14  ;;  %v14803_v14 = vmov 5  }
 0x565   : > { %14798 = vst [vmem:[#allocation11_spill] sm:$0xff] %v10544_v21  ;;  %2741 = vmatmul.bf16.gmra.mxu2 %v10239_v32  ;;  %v2965_v38 = vpop.f32.mrf.mxu1  ;;  %v10560_v26 = vpack.c.bf16 %v2370_v37, %v2369_v40  ;;  %v7144_v6 = vor.u32 %v7623_v25, %v7141_v7  ;;  %v10574_v32 = vld [vmem:[%s14312_s7 + $0x58] sm:$0xff]  ;;  %v2110_v7 = vrot.slane %v10331_v45, 7 }
 0x566   : > { %3053 = vmatmul.bf16.gmra.mxu0 %v9968_v47  ;;  %3551 = vmatpush.bf16.msra.mxu3 %v7152_v35  ;;  %v10599_v35 = vld [vmem:[%s14312_s7 + $0x50] sm:$0xff] }
 0x567   : > { %14799 = vst [vmem:[#allocation52_spill] sm:$0xff] %v10560_v26 }
 0x568   : > { %3743 = vperm.xlu2 %7832, %v10574_v32   ;;  %v2702_v47 = vpop.f32.mrf.mxu2  ;;  %3004 = vmatmul.bf16.gmra.mxu1 %v10560_v26  ;;  %14804 = vst [vmem:[#allocation80_spill] sm:$0xff] %v10599_v35  ;;  %v14809_v26 = vld [vmem:[#allocation39_spill] sm:$0xff] }
 0x569   : > { %v10579_v40 = vadd.f32 %v10435_v10, %v2702_v47  ;;  %v10581_v37 = vpop.permute.xlu2 %3249  ;;  %2850 = vmatmul.bf16.gmra.mxu3 %v10569_v17  ;;  %v10584_v19 = vpop.permute.xlu1 %3221  ;;  %v2111_v10 = vrot.slane %v10316_v22, 7 }
 0x56a   : > { %14801 = vst [vmem:[#allocation50_spill] sm:$0xff] %v10581_v37  ;;  %3735 = vperm.xlu1 %7833, %v10589_v11   ;;  %3552 = vmatpush.bf16.msra.mxu3 %v7144_v6  ;;  %v10603_v47 = vpop.permute.xlu0 %2329  ;;  %v10608_v6 = vld [vmem:[%s14312_s7 + $0x70] sm:$0xff] }
 0x56b   : > { %14800 = vst [vmem:[#allocation12_spill] sm:$0xff] %v10579_v40  ;;  %v10592_v61 = vpop.f32.mrf.mxu0  ;;  %v10613_v22 = vsel %vm2122_vm9, %v2110_v7, %v2111_v10 }
 0x56c   : > { %14802 = vst [vmem:[#allocation79_spill] sm:$0xff] %v10592_v61  ;;  %7841 = vset.pattern.permute.xlu0 %v14803_v14  ;;  %v2372_v45 = vmul.f32 %v10475_v56, %v10613_v22  ;;  %v14813_v56 = vld [vmem:[#allocation54_spill] sm:$0xff] }
 0x56d   : > { %4607 = vperm.xlu0 %7841, %v10599_v35   ;;  %v2967_v25 = vpop.f32.mrf.mxu1  ;;  %14805 = vst [vmem:[#allocation81_spill] sm:$0xff] %v10613_v22  ;;  %v14808_v35 = vld [vmem:[#allocation10_spill] sm:$0xff]  ;;  %v2570_v22 = vmul.f32 %v10310_v48, %v14813_v56  ;;  %v7147_v48 = vld [vmem:[%s14309_s4 + $0x110] sm:$0xf] }
 0x56e   : > { %v10632_v24 = vmul.f32 %v14809_v26, %v14808_v35  ;;  %v10651_v26 = vld [vmem:[%s14312_s7 + $0x68] sm:$0xff] }
 0x56f   : > { %14815 = vst [vmem:[#allocation85_spill] sm:$0xff] %v10651_v26 }
 0x570   : > { %3755 = vperm.xlu2 %7832, %v10608_v6   ;;  %v2704_v40 = vpop.f32.mrf.mxu2  ;;  %14810 = vst [vmem:[#allocation10_spill] sm:$0xff] %v10632_v24  ;;  %v2569_v58 = vmul.f32 %v10201_v46, %v10632_v24 }
 0x571   : > { %v10616_v61 = vadd.f32 %v10492_v0, %v2704_v40  ;;  %v10618_v21 = vpop.permute.xlu2 %3261  ;;  %v10622_v37 = vpop.permute.xlu1 %3229  ;;  %v14811_v0 = vrot.slane %v10256_v55, 7 }
 0x572   : > { %14807 = vst [vmem:[#allocation83_spill] sm:$0xff] %v10618_v21  ;;  %3747 = vperm.xlu1 %7833, %v10627_v34  }
 0x573   : > { %14806 = vst [vmem:[#allocation82_spill] sm:$0xff] %v10616_v61  ;;  %v10638_v40 = vsel %vm2122_vm9, %v14811_v0, %v2110_v7  ;;  %v10642_v61 = vpop.f32.mrf.mxu0  ;;  %v10664_v0 = vpack.c.bf16 %v2570_v22, %v2569_v58  ;;  %v10680_v58 = vpop.f32.mrf.mxu3  ;;  %v10687_v22 = vld [vmem:[%s14312_s7 + $0x78] sm:$0xff] }
 0x574   : > { %14812 = vst [vmem:[#allocation39_spill] sm:$0xff] %v10638_v40  ;;  %v2371_v21 = vmul.f32 %v10400_v31, %v10638_v40  ;;  %v7626_v31 = vld [vmem:[%s14309_s4 + $0x114] sm:$0xf0] }
 0x575   : > { %14814 = vst [vmem:[#allocation84_spill] sm:$0xff] %v10642_v61  ;;  %4619 = vperm.xlu0 %7841, %v10651_v26   ;;  %2746 = vmatmul.bf16.gmra.mxu2 %v10300_v2  ;;  %v2970_v35 = vpop.f32.mrf.mxu1  ;;  %v7148_v46 = vor.u32 %v7626_v31, %v7147_v48  ;;  %v10669_v2 = vld [vmem:[%s14312_s7 + $0x88] sm:$0xff]  ;;  %v10673_v61 = vpop.permute.xlu0 %2334  ;;  %v14824_v48 = vld [vmem:[#allocation53_spill] sm:$0xff] }
 0x576   : > { %v10661_v7 = vpack.c.bf16 %v2372_v45, %v2371_v21  ;;  %3058 = vmatmul.bf16.gmra.mxu0 %v10020_v57  ;;  %14819 = vst [vmem:[#allocation89_spill] sm:$0xff] %v10680_v58  ;;  %v3150_v31 = vrot.slane %v14824_v48, 1  ;;  %v10702_v26 = vld [vmem:[%s14312_s7 + $0xa0] sm:$0xff] }
 0x577   : > { %3462 = vmatpush.bf16.msra.mxu2 %v7148_v46  ;;  %14821 = vst [vmem:[#allocation91_spill] sm:$0xff] %v10687_v22  ;;  %v14825_v46 = vld [vmem:[#allocation55_spill] sm:$0xff] }
 0x578   : > { %14816 = vst [vmem:[#allocation86_spill] sm:$0xff] %v10661_v7  ;;  %3767 = vperm.xlu2 %7832, %v10669_v2   ;;  %v2707_v40 = vpop.f32.mrf.mxu2  ;;  %3009 = vmatmul.bf16.gmra.mxu1 %v10661_v7 }
 0x579   : > { %v10675_v55 = vadd.f32 %v2965_v38, %v2707_v40  ;;  %v10677_v45 = vpop.permute.xlu2 %3265  ;;  %2855 = vmatmul.bf16.gmra.mxu3 %v10664_v0  ;;  %v10682_v57 = vpop.permute.xlu1 %3237  ;;  %v2112_v38 = vrot.slane %v10417_v12, 7  ;;  %v14475_v12 = vrot.slane %v10392_v51, 7 }
 0x57a   : > { %14818 = vst [vmem:[#allocation88_spill] sm:$0xff] %v10677_v45  ;;  %3759 = vperm.xlu1 %7833, %v10687_v22  }
 0x57b   : > { %14817 = vst [vmem:[#allocation87_spill] sm:$0xff] %v10675_v55  ;;  %v10690_v21 = vpop.f32.mrf.mxu0  ;;  %v14826_v55 = vld [vmem:[#allocation59_spill] sm:$0xff] }
 0x57c   : > { %14820 = vst [vmem:[#allocation90_spill] sm:$0xff] %v10682_v57  ;;  %v14470_v45 = vrot.slane %v14826_v55, 1 }
 0x57d   : > { %14822 = vst [vmem:[#allocation92_spill] sm:$0xff] %v10690_v21  ;;  %4627 = vperm.xlu0 %7841, %v10687_v22   ;;  %v10694_v40 = vpop.f32.mrf.mxu1 }
 0x57e   : > { %14823 = vst [vmem:[#allocation93_spill] sm:$0xff] %v10694_v40  ;;  %v10709_v40 = vsel %vm2122_vm9, %v2111_v10, %v2112_v38  ;;  %v10719_v22 = vsel %vm3151_vm10, %v3150_v31, %v14470_v45  ;;  %v10728_v10 = vld [vmem:[%s14312_s7 + $0x90] sm:$0xff] }
 0x57f   : > { %14827 = vst [vmem:[#allocation94_spill] sm:$0xff] %v10709_v40  ;;  %v2373_v7 = vmul.f32 %v10507_v8, %v10709_v40  ;;  %v14834_v8 = vrot.slane %v14825_v46, 1  ;;  %v7251_v46 = vld [vmem:[%s14309_s4 + $0x1e0] sm:$0xf] }
 0x580   : > { %3779 = vperm.xlu2 %7832, %v10702_v26   ;;  %v2709_v21 = vpop.f32.mrf.mxu2  ;;  %14830 = vst [vmem:[#allocation97_spill] sm:$0xff] %v10719_v22 }
 0x581   : > { %v10711_v48 = vadd.f32 %v2967_v25, %v2709_v21  ;;  %v10713_v58 = vpop.permute.xlu2 %3273  ;;  %v10723_v57 = vpop.permute.xlu1 %3245  ;;  %14831 = vst [vmem:[#allocation98_spill] sm:$0xff] %v10728_v10  ;;  %v10735_v25 = vsel %vm2122_vm9, %v2112_v38, %v14475_v12  ;;  %v3313_v21 = vmul.f32 %v10360_v3, %v10719_v22  ;;  %v10745_v40 = vsel %vm3151_vm10, %v14834_v8, %v3150_v31  ;;  %v10758_v3 = vld [vmem:[%s14312_s7 + $0x80] sm:$0xff] }
 0x582   : > { %14829 = vst [vmem:[#allocation96_spill] sm:$0xff] %v10713_v58  ;;  %3771 = vperm.xlu1 %7833, %v10728_v10   ;;  %v10749_v58 = vpop.permute.xlu0 %2344  ;;  %v10751_v10 = vpop.f32.mrf.mxu3  ;;  %v3312_v38 = vmul.f32 %v10244_v30, %v10745_v40  ;;  %v10772_v30 = vld [vmem:[%s14312_s7 + $0xb8] sm:$0xff] }
 0x583   : > { %14828 = vst [vmem:[#allocation95_spill] sm:$0xff] %v10711_v48  ;;  %v10739_v45 = vpop.f32.mrf.mxu0  ;;  %v2374_v48 = vmul.f32 %v10557_v36, %v10735_v25 }
 0x584   : > { %14832 = vst [vmem:[#allocation99_spill] sm:$0xff] %v10735_v25  ;;  %v10767_v36 = vpack.c.bf16 %v3313_v21, %v3312_v38  ;;  %v10792_v21 = vld [vmem:[%s14312_s7 + $0xa8] sm:$0xff] }
 0x585   : > { %14833 = vst [vmem:[#allocation100_spill] sm:$0xff] %v10739_v45  ;;  %4631 = vperm.xlu0 %7841, %v10758_v3   ;;  %2751 = vmatmul.bf16.gmra.mxu2 %v10355_v28  ;;  %v10762_v31 = vpop.f32.mrf.mxu1  ;;  %v10764_v8 = vpack.c.bf16 %v2374_v48, %v2373_v7  ;;  %v7654_v7 = vld [vmem:[%s14309_s4 + $0x1f4] sm:$0xf0] }
 0x586   : > { %14835 = vst [vmem:[#allocation101_spill] sm:$0xff] %v10745_v40  ;;  %3063 = vmatmul.bf16.gmra.mxu0 %v10098_v23  ;;  %v7259_v23 = vld [vmem:[%s14309_s4 + $0x1f0] sm:$0xf]  ;;  %v3120_v40 = vrot.slane %v9821_v60, 1 }
 0x587   : > { %14836 = vst [vmem:[#allocation102_spill] sm:$0xff] %v10751_v10 }
 0x588   : > { %3791 = vperm.xlu2 %7832, %v10772_v30   ;;  %v2712_v12 = vpop.f32.mrf.mxu2  ;;  %3014 = vmatmul.bf16.gmra.mxu1 %v10764_v8  ;;  %14839 = vst [vmem:[#allocation105_spill] sm:$0xff] %v10792_v21 }
 0x589   : > { %v10776_v22 = vadd.f32 %v2970_v35, %v2712_v12  ;;  %v10778_v28 = vpop.permute.xlu2 %3281  ;;  %3553 = vmatmul.bf16.vlgmr.msra.gmra.mxu3 %v10767_v36  ;;  %v10787_v48 = vpop.permute.xlu1 %3253  ;;  %v7260_v12 = vor.u32 %v7654_v7, %v7259_v23  ;;  %v7652_v23 = vld [vmem:[%s14309_s4 + $0x1e4] sm:$0xf0]  ;;  %v2114_v7 = vrot.slane %v10534_v33, 7 }
 0x58a   : > { %14838 = vst [vmem:[#allocation104_spill] sm:$0xff] %v10778_v28  ;;  %3783 = vperm.xlu1 %7833, %v10792_v21   ;;  %v10804_v10 = vpop.permute.xlu0 %3289 }
 0x58b   : > { %14837 = vst [vmem:[#allocation103_spill] sm:$0xff] %v10776_v22  ;;  %v10795_v35 = vpop.f32.mrf.mxu0  ;;  %3970 = vmatpush.bf16.msra.mxu1 %v7260_v12  ;;  %v7252_v12 = vor.u32 %v7652_v23, %v7251_v46  ;;  %v7243_v46 = vld [vmem:[%s14309_s4 + $0x1d0] sm:$0xf]  ;;  %v7650_v23 = vld [vmem:[%s14309_s4 + $0x1d4] sm:$0xf0] }
 0x58c   : > { %14840 = vst [vmem:[#allocation106_spill] sm:$0xff] %v10795_v35  ;;  %v10797_v38 = vpop.f32.mrf.mxu3 }
 0x58d   : > { %14841 = vst [vmem:[#allocation107_spill] sm:$0xff] %v10797_v38  ;;  %4635 = vperm.xlu0 %7841, %v10669_v2   ;;  %v10801_v22 = vpop.f32.mrf.mxu1  ;;  %v14845_v38 = vrot.slane %v10511_v63, 7 }
 0x58e   : > { %14842 = vst [vmem:[#allocation108_spill] sm:$0xff] %v10801_v22  ;;  %v8066_v22 = vld [vmem:[%s14312_s7 + $0xd0] sm:$0xff] }
 0x58f   : > { %14843 = vst [vmem:[#allocation109_spill] sm:$0xff] %v10804_v10  ;;  %v10823_v10 = vsel %vm2122_vm9, %v2114_v7, %v14845_v38  ;;  %3971 = vmatpush.bf16.msra.mxu1 %v7252_v12  ;;  %v10844_v12 = vld [vmem:[%s14312_s7 + $0xc0] sm:$0xff] }
 0x590   : > { %3803 = vperm.xlu2 %7832, %v8066_v22   ;;  %v10817_v25 = vpop.f32.mrf.mxu2  ;;  %14846 = vst [vmem:[#allocation111_spill] sm:$0xff] %v10823_v10  ;;  %v14848_v22 = vrot.slane %v9868_v59, 1  ;;  %v2376_v38 = vmul.f32 %v10673_v61, %v10823_v10  ;;  %v7244_v61 = vor.u32 %v7650_v23, %v7243_v46  ;;  %v14853_v10 = vrot.slane %v14826_v55, 1  ;;  %v7235_v23 = vld [vmem:[%s14309_s4 + $0x1c0] sm:$0xf] }
 0x591   : > { %14844 = vst [vmem:[#allocation110_spill] sm:$0xff] %v10817_v25  ;;  %v10825_v35 = vpop.permute.xlu2 %3293  ;;  %v14856_v46 = vmov 6  }
 0x592   : > { %14847 = vst [vmem:[#allocation112_spill] sm:$0xff] %v10825_v35  ;;  %v10837_v25 = vsel %vm3151_vm10, %v3120_v40, %v14848_v22  ;;  %3795 = vperm.xlu1 %7833, %v10844_v12   ;;  %v2340_v60 = vpop.permute.xlu1 %2339  ;;  %v14850_v35 = vrot.slane %v10392_v51, 7  ;;  %v10861_v28 = vsel %vm3151_vm10, %v14853_v10, %v3120_v40 }
 0x593   : > { %14849 = vst [vmem:[#allocation113_spill] sm:$0xff] %v10837_v25  ;;  %v3315_v22 = vmul.f32 %v10382_v44, %v10837_v25  ;;  %v10855_v45 = vpop.f32.mrf.mxu0  ;;  %v7624_v44 = vld [vmem:[%s14309_s4 + $0x104] sm:$0xf0]  ;;  %3972 = vmatpush.bf16.msra.mxu1 %v7244_v61  ;;  %v7227_v61 = vld [vmem:[%s14309_s4 + $0x1b0] sm:$0xf] }
 0x594   : > { %v10851_v33 = vsel %vm2122_vm9, %v14850_v35, %v2114_v7  ;;  %14852 = vst [vmem:[#allocation115_spill] sm:$0xff] %v10855_v45  ;;  %v10865_v51 = vpop.f32.mrf.mxu3  ;;  %v7139_v35 = vld [vmem:[%s14309_s4 + $0x100] sm:$0xf]  ;;  %v3314_v7 = vmul.f32 %v10262_v20, %v10861_v28  ;;  %v7648_v20 = vld [vmem:[%s14309_s4 + $0x1c4] sm:$0xf0] }
 0x595   : > { %14851 = vst [vmem:[#allocation114_spill] sm:$0xff] %v10851_v33  ;;  %v2375_v21 = vmul.f32 %v10603_v47, %v10851_v33  ;;  %7844 = vset.pattern.permute.xlu0 %v14856_v46  ;;  %2756 = vmatmul.bf16.gmra.mxu2 %v10452_v42  ;;  %v10877_v40 = vpop.f32.mrf.mxu1  ;;  %v7140_v47 = vor.u32 %v7624_v44, %v7139_v35  ;;  %v10891_v35 = vpop.permute.xlu0 %3309  ;;  %v7644_v33 = vld [vmem:[%s14309_s4 + $0x1a4] sm:$0xf0] }
 0x596   : > { %14854 = vst [vmem:[#allocation116_spill] sm:$0xff] %v10861_v28  ;;  %3068 = vmatmul.bf16.gmra.mxu0 %v10184_v29  ;;  %5137 = vperm.xlu0 %7844, %v10608_v6   ;;  %v10889_v28 = vpack.c.bf16 %v3315_v22, %v3314_v7  ;;  %v7236_v42 = vor.u32 %v7648_v20, %v7235_v23  ;;  %v8068_v29 = vld [vmem:[%s14312_s7 + $0xe8] sm:$0xff]  ;;  %v10906_v22 = vld [vmem:[%s14312_s7 + $0xd8] sm:$0xff] }
 0x597   : > { %14855 = vst [vmem:[#allocation117_spill] sm:$0xff] %v10865_v51  ;;  %v10879_v10 = vpack.c.bf16 %v2376_v38, %v2375_v21  ;;  %3463 = vmatpush.bf16.msra.mxu2 %v7140_v47  ;;  %v2116_v51 = vrot.slane %v10632_v24, 7  ;;  %v14871_v24 = vrot.slane %v14813_v56, 7 }
 0x598   : > { %14857 = vst [vmem:[#allocation118_spill] sm:$0xff] %v10891_v35  ;;  %3815 = vperm.xlu2 %7832, %v8068_v29   ;;  %v2717_v21 = vpop.f32.mrf.mxu2  ;;  %3973 = vmatpush.bf16.msra.mxu1 %v7236_v42  ;;  %v10935_v42 = vld [vmem:[%s14312_s7 + $0x98] sm:$0xff]  ;;  %v7211_v35 = vld [vmem:[%s14309_s4 + $0x190] sm:$0xf] }
 0x599   : > { %3019 = vmatmul.bf16.gmra.mxu1 %v10879_v10  ;;  %v10898_v38 = vadd.f32 %v10762_v31, %v2717_v21  ;;  %v10900_v44 = vpop.permute.xlu2 %3301  ;;  %3558 = vmatmul.bf16.gmra.mxu3 %v10889_v28  ;;  %14860 = vst [vmem:[#allocation121_spill] sm:$0xff] %v10906_v22  ;;  %v7646_v31 = vld [vmem:[%s14309_s4 + $0x1b4] sm:$0xf0]  ;;  %v14864_v21 = vld [vmem:[#allocation67_spill] sm:$0xff] }
 0x59a   : > { %14859 = vst [vmem:[#allocation120_spill] sm:$0xff] %v10900_v44  ;;  %3807 = vperm.xlu1 %7833, %v10906_v22   ;;  %v7228_v23 = vor.u32 %v7646_v31, %v7227_v61  ;;  %v14865_v31 = vld [vmem:[#allocation64_spill] sm:$0xff]  ;;  %v8071_v44 = vld [vmem:[%s14312_s7 + $0xf0] sm:$0xff] }
 0x59b   : > { %14858 = vst [vmem:[#allocation119_spill] sm:$0xff] %v10898_v38  ;;  %v10915_v7 = vpop.f32.mrf.mxu0  ;;  %v10917_v47 = vpop.permute.xlu1 %3269  ;;  %v7219_v38 = vld [vmem:[%s14309_s4 + $0x1a0] sm:$0xf]  ;;  %v3122_v25 = vrot.slane %v14865_v31, 1 }
 0x59c   : > { %14861 = vst [vmem:[#allocation122_spill] sm:$0xff] %v10915_v7  ;;  %v10919_v20 = vpop.f32.mrf.mxu3  ;;  %3974 = vmatpush.bf16.msra.mxu1 %v7228_v23  ;;  %v7220_v61 = vor.u32 %v7644_v33, %v7219_v38  ;;  %v7642_v33 = vld [vmem:[%s14309_s4 + $0x194] sm:$0xf0]  ;;  %v14869_v38 = vrot.slane %v14864_v21, 1 }
 0x59d   : > { %14862 = vst [vmem:[#allocation123_spill] sm:$0xff] %v10919_v20  ;;  %v10921_v29 = vpop.f32.mrf.mxu1  ;;  %v14867_v20 = vrot.slane %v10511_v63, 7 }
 0x59e   : > { %14863 = vst [vmem:[#allocation124_spill] sm:$0xff] %v10921_v29  ;;  %7847 = vset.pattern.permute.xlu0 %v14803_v14  ;;  %v10959_v23 = vsel %vm3151_vm10, %v3122_v25, %v14869_v38  ;;  %v10975_v38 = vsel %vm2122_vm9, %v2116_v51, %v14871_v24 }
 0x59f   : > { %4643 = vperm.xlu0 %7847, %v10935_v42   ;;  %v10946_v55 = vsel %vm2122_vm9, %v14867_v20, %v2116_v51  ;;  %14870 = vst [vmem:[#allocation127_spill] sm:$0xff] %v10959_v23  ;;  %v3317_v7 = vmul.f32 %v10454_v4, %v10959_v23  ;;  %v2378_v4 = vmul.f32 %v10749_v58, %v10975_v38 }
 0x5a0   : > { %7835 = vset.pattern.permute.xlu2 %v14803_v14  ;;  %v10940_v29 = vpop.f32.mrf.mxu2  ;;  %14868 = vst [vmem:[#allocation126_spill] sm:$0xff] %v10946_v55  ;;  %v2377_v20 = vmul.f32 %v2340_v60, %v10946_v55  ;;  %3975 = vmatpush.bf16.msra.mxu1 %v7220_v61  ;;  %v7212_v60 = vor.u32 %v7642_v33, %v7211_v35  ;;  %v14874_v55 = vrot.slane %v9868_v59, 1  ;;  %v7261_v59 = vld [vmem:[%s14309_s4 + $0x1f8] sm:$0xf0] }
 0x5a1   : > { %14866 = vst [vmem:[#allocation125_spill] sm:$0xff] %v10940_v29  ;;  %4567 = vperm.xlu2 %7835, %v10365_v39   ;;  %v10961_v29 = vpop.permute.xlu0 %3707 }
 0x5a2   : > { %v10964_v31 = vpop.permute.xlu2 %3699  ;;  %3819 = vperm.xlu1 %7833, %v8071_v44   ;;  %14872 = vst [vmem:[#allocation128_spill] sm:$0xff] %v10975_v38  ;;  %v10985_v44 = vsel %vm3151_vm10, %v14874_v55, %v3122_v25  ;;  %v10994_v56 = vpack.c.bf16 %v2378_v4, %v2377_v20  ;;  %v7203_v55 = vld [vmem:[%s14309_s4 + $0x180] sm:$0xf]  ;;  %v7670_v38 = vld [vmem:[%s14309_s4 + $0x274] sm:$0xf0] }
 0x5a3   : > { %v10977_v63 = vpop.f32.mrf.mxu0  ;;  %v10979_v45 = vpop.permute.xlu1 %3277  ;;  %14875 = vst [vmem:[#allocation130_spill] sm:$0xff] %v10985_v44  ;;  %v3316_v24 = vmul.f32 %v10304_v9, %v10985_v44  ;;  %v7640_v9 = vld [vmem:[%s14309_s4 + $0x184] sm:$0xf0] }
 0x5a4   : > { %14873 = vst [vmem:[#allocation129_spill] sm:$0xff] %v10977_v63  ;;  %v10989_v23 = vpop.f32.mrf.mxu3  ;;  %3976 = vmatpush.bf16.msra.mxu1 %v7212_v60  ;;  %v14882_v60 = vld [vmem:[#allocation74_spill] sm:$0xff] }
 0x5a5   : > { %14876 = vst [vmem:[#allocation131_spill] sm:$0xff] %v10989_v23  ;;  %2761 = vmatmul.bf16.gmra.mxu2 %v10569_v17  ;;  %v2985_v51 = vpop.f32.mrf.mxu1  ;;  %v10997_v35 = vpack.c.bf16 %v3317_v7, %v3316_v24  ;;  %v7204_v17 = vor.u32 %v7640_v9, %v7203_v55  ;;  %v3125_v4 = vrot.slane %v14882_v60, 1  ;;  %v14884_v55 = vld [vmem:[#allocation68_spill] sm:$0xff]  ;;  %v7653_v23 = vld [vmem:[%s14309_s4 + $0x1f4] sm:$0xf]  ;;  %v14902_v63 = vld [vmem:[#allocation62_spill] sm:$0xff] }
 0x5a6   : > { %3073 = vmatmul.bf16.gmra.mxu0 %v10237_v41  ;;  %v3124_v9 = vrot.slane %v14884_v55, 1  ;;  %v7323_v55 = vld [vmem:[%s14309_s4 + $0x270] sm:$0xf] }
 0x5a7   : > { %4647 = vperm.xlu0 %7847, %v10702_v26  }
 0x5a8   : > { %v2722_v58 = vpop.f32.mrf.mxu2  ;;  %3977 = vmatpush.bf16.msra.mxu1 %v7204_v17  ;;  %v11037_v17 = vsel %vm3151_vm10, %v3124_v9, %v3125_v4 }
 0x5a9   : > { %3024 = vmatmul.bf16.gmra.mxu1 %v10994_v56  ;;  %v11008_v25 = vadd.f32 %v10877_v40, %v2722_v58  ;;  %4579 = vperm.xlu2 %7835, %v10387_v13   ;;  %v11022_v20 = vpop.permute.xlu0 %3727  ;;  %14885 = vst [vmem:[#allocation138_spill] sm:$0xff] %v11037_v17 }
 0x5aa   : > { %3563 = vmatmul.bf16.gmra.mxu3 %v10997_v35  ;;  %v11012_v41 = vpop.permute.xlu2 %3711  ;;  %7836 = vset.pattern.permute.xlu1 %v14803_v14 }
 0x5ab   : > { %14877 = vst [vmem:[#allocation132_spill] sm:$0xff] %v11008_v25  ;;  %v11015_v7 = vpop.f32.mrf.mxu0  ;;  %4571 = vperm.xlu1 %7836, %v10412_v54   ;;  %v11018_v61 = vpop.permute.xlu1 %3285 }
 0x5ac   : > { %14878 = vst [vmem:[#allocation133_spill] sm:$0xff] %v11015_v7  ;;  %v11020_v33 = vpop.f32.mrf.mxu3 }
 0x5ad   : > { %14879 = vst [vmem:[#allocation134_spill] sm:$0xff] %v11018_v61  ;;  %v11024_v40 = vpop.f32.mrf.mxu1 }
 0x5ae   : > { %14880 = vst [vmem:[#allocation135_spill] sm:$0xff] %v11020_v33 }
 0x5af   : > { %14881 = vst [vmem:[#allocation136_spill] sm:$0xff] %v11024_v40  ;;  %7849 = vset.pattern.permute.xlu0 %v14856_v46 }
 0x5b0   : > { %5173 = vperm.xlu0 %7849, %v10772_v30   ;;  %v11029_v24 = vpop.f32.mrf.mxu2  ;;  %v3319_v30 = vmul.f32 %v10322_v16, %v11037_v17  ;;  %v7669_v16 = vld [vmem:[%s14309_s4 + $0x274] sm:$0xf]  ;;  %v14890_v17 = vld [vmem:[#allocation73_spill] sm:$0xff] }
 0x5b1   : > { %14883 = vst [vmem:[#allocation137_spill] sm:$0xff] %v11029_v24  ;;  %4587 = vperm.xlu2 %7835, %v10459_v27   ;;  %v14888_v24 = vrot.slane %v14864_v21, 1 }
 0x5b2   : > { %v11033_v58 = vpop.permute.xlu2 %3719 }
 0x5b3   : > { %v11039_v44 = vpop.f32.mrf.mxu0  ;;  %4583 = vperm.xlu1 %7836, %v10472_v5   ;;  %v11042_v40 = vpop.permute.xlu1 %3297  ;;  %v11052_v33 = vsel %vm3151_vm10, %v14888_v24, %v3124_v9  ;;  %v7324_v24 = vor.u32 %v7670_v38, %v7323_v55  ;;  %v7264_v38 = vor.u32 %v7653_v23, %v7261_v59  ;;  %v14895_v23 = vld [vmem:[#allocation28_spill] sm:$0xff] }
 0x5b4   : > { %14886 = vst [vmem:[#allocation139_spill] sm:$0xff] %v11042_v40  ;;  %v11046_v60 = vpop.f32.mrf.mxu3  ;;  %v11070_v9 = vpop.permute.xlu0 %3739 }
 0x5b5   : > { %14887 = vst [vmem:[#allocation140_spill] sm:$0xff] %v11046_v60  ;;  %2766 = vmatmul.bf16.gmra.mxu2 %v10664_v0  ;;  %v2990_v25 = vpop.f32.mrf.mxu1  ;;  %v3318_v60 = vmul.f32 %v14890_v17, %v11052_v33  ;;  %v7325_v0 = vld [vmem:[%s14309_s4 + $0x278] sm:$0xf0]  ;;  %4059 = vmatpush.bf16.msra.mxu0 %v7264_v38 }
 0x5b6   : > { %14889 = vst [vmem:[#allocation141_spill] sm:$0xff] %v11052_v33  ;;  %3078 = vmatmul.bf16.gmra.mxu0 %v10289_v15  ;;  %v7328_v21 = vor.u32 %v7669_v16, %v7325_v0  ;;  %4324 = vmatpush.bf16.msrb.mxu2 %v7324_v24  ;;  %v14897_v0 = vld [vmem:[#allocation75_spill] sm:$0xff] }
 0x5b7   : > { %v11078_v7 = vpack.c.bf16 %v3319_v30, %v3318_v60 }
 0x5b8   : > { %7853 = vset.pattern.permute.xlu0 %v14803_v14  ;;  %v2727_v15 = vpop.f32.mrf.mxu2  ;;  %4413 = vmatpush.bf16.msrb.mxu3 %v7328_v21 }
 0x5b9   : > { %v11081_v55 = vadd.f32 %v2985_v51, %v2727_v15  ;;  %4599 = vperm.xlu2 %7835, %v10504_v49   ;;  %4663 = vperm.xlu0 %7853, %v10844_v12   ;;  %v3127_v51 = vrot.slane %v14895_v23, 1  ;;  %v3126_v15 = vrot.slane %v14897_v0, 1  ;;  %v14901_v0 = vld [vmem:[#allocation61_spill] sm:$0xff] }
 0x5ba   : > { %3568 = vmatmul.bf16.gmra.mxu3 %v11078_v7  ;;  %v11086_v17 = vpop.permute.xlu2 %3731 }
 0x5bb   : > { %14891 = vst [vmem:[#allocation73_spill] sm:$0xff] %v11081_v55  ;;  %v11088_v16 = vpop.f32.mrf.mxu0  ;;  %4591 = vperm.xlu1 %7836, %v10529_v18   ;;  %v11091_v60 = vpop.permute.xlu1 %3305  ;;  %v11109_v21 = vsel %vm3151_vm10, %v3126_v15, %v3127_v51  ;;  %v11120_v55 = vsel %vm3151_vm10, %v3125_v4, %v3126_v15 }
 0x5bc   : > { %14892 = vst [vmem:[#allocation142_spill] sm:$0xff] %v11091_v60  ;;  %v11093_v30 = vpop.f32.mrf.mxu3  ;;  %v11101_v33 = vpop.permute.xlu0 %3751  ;;  %v3826_v60 = vmul.f32 %v10964_v31, %v14901_v0  ;;  %v3320_v61 = vmul.f32 %v10371_v1, %v11120_v55  ;;  %v11139_v31 = vld [vmem:[%s14312_s7 + $0xe0] sm:$0xff] }
 0x5bd   : > { %14893 = vst [vmem:[#allocation143_spill] sm:$0xff] %v11093_v30  ;;  %v11095_v59 = vpop.f32.mrf.mxu1 }
 0x5be   : > { %14894 = vst [vmem:[#allocation144_spill] sm:$0xff] %v11095_v59  ;;  %v3321_v59 = vmul.f32 %v10584_v19, %v11109_v21 }
 0x5bf   : > { %14898 = vst [vmem:[#allocation146_spill] sm:$0xff] %v11109_v21 }
 0x5c0   : > { %v11098_v24 = vpop.f32.mrf.mxu2  ;;  %14900 = vst [vmem:[#allocation148_spill] sm:$0xff] %v11120_v55  ;;  %v11131_v21 = vpack.c.bf16 %v3321_v59, %v3320_v61  ;;  %v11168_v55 = vld [vmem:[%s14312_s7 + $0xf8] sm:$0xff] }
 0x5c1   : > { %14896 = vst [vmem:[#allocation145_spill] sm:$0xff] %v11098_v24  ;;  %4611 = vperm.xlu2 %7835, %v10574_v32   ;;  %4675 = vperm.xlu0 %7853, %v10906_v22  }
 0x5c2   : > { %v11105_v38 = vpop.permute.xlu2 %3743  ;;  %14904 = vst [vmem:[#allocation150_spill] sm:$0xff] %v11139_v31 }
 0x5c3   : > { %v11111_v30 = vpop.f32.mrf.mxu0  ;;  %4603 = vperm.xlu1 %7836, %v10589_v11   ;;  %14910 = vst [vmem:[#allocation155_spill] sm:$0xff] %v11168_v55 }
 0x5c4   : > { %v3704_v23 = vpop.permute.xlu1 %3703  ;;  %v11116_v24 = vpop.f32.mrf.mxu3 }
 0x5c5   : > { %14899 = vst [vmem:[#allocation147_spill] sm:$0xff] %v11116_v24  ;;  %v3827_v40 = vmul.f32 %v3704_v23, %v14902_v63  ;;  %3464 = vmatmul.bf16.vlgmr.msra.gmra.mxu2 %v10767_v36  ;;  %v2995_v22 = vpop.f32.mrf.mxu1  ;;  %v11146_v1 = vpop.permute.xlu0 %3763 }
 0x5c6   : > { %3083 = vmatmul.bf16.gmra.mxu0 %v10346_v62  ;;  %14905 = vst [vmem:[#allocation151_spill] sm:$0xff] %v11146_v1  ;;  %v7253_v1 = vld [vmem:[%s14309_s4 + $0x1e8] sm:$0xf0] }
 0x5c7   : > { %v11129_v19 = vpack.c.bf16 %v3827_v40, %v3826_v60  ;;  %v14908_v60 = vld [vmem:[#allocation9_spill] sm:$0xff] }
 0x5c8   : > { %v2732_v24 = vpop.f32.mrf.mxu2  ;;  %v3128_v59 = vrot.slane %v14908_v60, 1 }
 0x5c9   : > { %v11133_v4 = vadd.f32 %v2990_v25, %v2732_v24  ;;  %7838 = vset.pattern.permute.xlu2 %v14856_v46  ;;  %4679 = vperm.xlu0 %7853, %v11139_v31   ;;  %v14526_v24 = vrot.slane %v10127_v53, 1 }
 0x5ca   : > { %3573 = vmatmul.bf16.gmra.mxu3 %v11131_v21  ;;  %3978 = vmatmul.bf16.vlgmr.msra.gmra.mxu1 %v11129_v19  ;;  %v11144_v62 = vpop.permute.xlu2 %3755 }
 0x5cb   : > { %14903 = vst [vmem:[#allocation149_spill] sm:$0xff] %v11133_v4  ;;  %5081 = vperm.xlu2 %7838, %v10365_v39   ;;  %v11149_v36 = vpop.f32.mrf.mxu0  ;;  %4615 = vperm.xlu1 %7836, %v10627_v34  }
 0x5cc   : > { %v11152_v25 = vpop.permute.xlu1 %3715  ;;  %v11154_v61 = vpop.f32.mrf.mxu3 }
 0x5cd   : > { %14906 = vst [vmem:[#allocation152_spill] sm:$0xff] %v11154_v61  ;;  %v11156_v40 = vpop.f32.mrf.mxu1 }
 0x5ce   : > { %14907 = vst [vmem:[#allocation153_spill] sm:$0xff] %v11156_v40  ;;  %v11175_v40 = vsel %vm3151_vm10, %v3128_v59, %v14526_v24  ;;  %v11192_v24 = vsel %vm3151_vm10, %v3127_v51, %v3128_v59  ;;  %v14916_v59 = vld [vmem:[#allocation66_spill] sm:$0xff] }
 0x5cf   : > { %14911 = vst [vmem:[#allocation156_spill] sm:$0xff] %v11175_v40  ;;  %v3323_v63 = vmul.f32 %v10622_v37, %v11175_v40  ;;  %v7315_v37 = vld [vmem:[%s14309_s4 + $0x260] sm:$0xf]  ;;  %v3322_v51 = vmul.f32 %v10404_v50, %v11192_v24  ;;  %v3828_v40 = vmul.f32 %v10961_v29, %v14916_v59 }
 0x5d0   : > { %v11159_v23 = vpop.f32.mrf.mxu2  ;;  %14914 = vst [vmem:[#allocation158_spill] sm:$0xff] %v11192_v24 }
 0x5d1   : > { %14909 = vst [vmem:[#allocation154_spill] sm:$0xff] %v11159_v23  ;;  %7859 = vset.pattern.permute.xlu0 %v14856_v46  ;;  %v14912_v23 = vld [vmem:[#allocation65_spill] sm:$0xff]  ;;  %v11220_v50 = vpack.c.bf16 %v3323_v63, %v3322_v51  ;;  %v14924_v51 = vld [vmem:[#allocation34_spill] sm:$0xff] }
 0x5d2   : > { %v11163_v15 = vpop.permute.xlu2 %3767  ;;  %5205 = vperm.xlu0 %7859, %v11168_v55   ;;  %v3829_v61 = vmul.f32 %v11012_v41, %v14912_v23  ;;  %v11194_v55 = vpop.permute.xlu0 %3775  ;;  %v7667_v41 = vld [vmem:[%s14309_s4 + $0x264] sm:$0xf] }
 0x5d3   : > { %5093 = vperm.xlu2 %7838, %v10387_v13   ;;  %v11178_v0 = vpop.f32.mrf.mxu0  ;;  %7839 = vset.pattern.permute.xlu1 %v14856_v46  ;;  %14915 = vst [vmem:[#allocation159_spill] sm:$0xff] %v11194_v55  ;;  %v7651_v23 = vld [vmem:[%s14309_s4 + $0x1e4] sm:$0xf] }
 0x5d4   : > { %5085 = vperm.xlu1 %7839, %v10412_v54   ;;  %v11186_v4 = vpop.permute.xlu1 %3723  ;;  %v11188_v60 = vpop.f32.mrf.mxu3  ;;  %v7668_v54 = vld [vmem:[%s14309_s4 + $0x264] sm:$0xf0]  ;;  %v11222_v24 = vpack.c.bf16 %v3829_v61, %v3828_v40 }
 0x5d5   : > { %14913 = vst [vmem:[#allocation157_spill] sm:$0xff] %v11188_v60  ;;  %3469 = vmatmul.bf16.gmra.mxu2 %v10889_v28  ;;  %v3000_v31 = vpop.f32.mrf.mxu1  ;;  %v7316_v28 = vor.u32 %v7668_v54, %v7315_v37  ;;  %v7317_v60 = vld [vmem:[%s14309_s4 + $0x268] sm:$0xf0]  ;;  %v7256_v37 = vor.u32 %v7651_v23, %v7253_v1  ;;  %v14535_v54 = vmov 7  }
 0x5d6   : > { %3088 = vmatmul.bf16.gmra.mxu0 %v10443_v43  ;;  %v7320_v55 = vor.u32 %v7667_v41, %v7317_v60  ;;  %v14921_v61 = vld [vmem:[#allocation70_spill] sm:$0xff] }
 0x5d7   : > { %4325 = vmatpush.bf16.msrb.mxu2 %v7316_v28  ;;  %4060 = vmatpush.bf16.msra.mxu0 %v7256_v37  ;;  %v3131_v40 = vrot.slane %v14921_v61, 1  ;;  %v3130_v28 = vrot.slane %v14924_v51, 1  ;;  %v14927_v37 = vld [vmem:[#allocation90_spill] sm:$0xff] }
 0x5d8   : > { %v2737_v29 = vpop.f32.mrf.mxu2  ;;  %4414 = vmatpush.bf16.msrb.mxu3 %v7320_v55 }
 0x5d9   : > { %v11224_v43 = vadd.f32 %v2995_v22, %v2737_v29  ;;  %v11253_v29 = vsel %vm3151_vm10, %v3130_v28, %v3131_v40 }
 0x5da   : > { %3578 = vmatmul.bf16.gmra.mxu3 %v11220_v50  ;;  %3983 = vmatmul.bf16.gmra.mxu1 %v11222_v24  ;;  %v11228_v60 = vpop.permute.xlu2 %3779  ;;  %v11244_v23 = vpop.permute.xlu0 %3787  ;;  %14926 = vst [vmem:[#allocation166_spill] sm:$0xff] %v11253_v29 }
 0x5db   : > { %14917 = vst [vmem:[#allocation66_spill] sm:$0xff] %v11224_v43  ;;  %5097 = vperm.xlu2 %7838, %v10472_v5   ;;  %7863 = vset.pattern.permute.xlu0 %v14535_v54  ;;  %v11232_v63 = vpop.f32.mrf.mxu0  ;;  %v3325_v54 = vmul.f32 %v14927_v37, %v11253_v29  ;;  %v14930_v43 = vrot.slane %v10127_v53, 1  ;;  %v14932_v37 = vld [vmem:[#allocation58_spill] sm:$0xff]  ;;  %v14933_v29 = vld [vmem:[#allocation71_spill] sm:$0xff] }
 0x5dc   : > { %14918 = vst [vmem:[#allocation160_spill] sm:$0xff] %v11228_v60  ;;  %5595 = vperm.xlu0 %7863, %v10365_v39   ;;  %7842 = vset.pattern.permute.xlu1 %v14803_v14  ;;  %v11236_v22 = vpop.permute.xlu1 %3735  ;;  %v11238_v55 = vpop.f32.mrf.mxu3 }
 0x5dd   : > { %14919 = vst [vmem:[#allocation161_spill] sm:$0xff] %v11238_v55  ;;  %4623 = vperm.xlu1 %7842, %v10608_v6   ;;  %v11241_v1 = vpop.f32.mrf.mxu1  ;;  %v11271_v51 = vsel %vm3151_vm10, %v14930_v43, %v3130_v28 }
 0x5de   : > { %14920 = vst [vmem:[#allocation162_spill] sm:$0xff] %v11241_v1  ;;  %v14928_v1 = vld [vmem:[#allocation72_spill] sm:$0xff] }
 0x5df   : > { %14922 = vst [vmem:[#allocation163_spill] sm:$0xff] %v11244_v23  ;;  %v3830_v61 = vmul.f32 %v11152_v25, %v14928_v1  ;;  %v3324_v25 = vmul.f32 %v14932_v37, %v11271_v51  ;;  %v14934_v23 = vld [vmem:[#allocation52_spill] sm:$0xff] }
 0x5e0   : > { %v11246_v41 = vpop.f32.mrf.mxu2  ;;  %14931 = vst [vmem:[#allocation72_spill] sm:$0xff] %v11271_v51 }
 0x5e1   : > { %14923 = vst [vmem:[#allocation164_spill] sm:$0xff] %v11246_v41 }
 0x5e2   : > { %v11249_v39 = vpop.permute.xlu2 %3791  ;;  %v11285_v28 = vpop.permute.xlu0 %3799 }
 0x5e3   : > { %14925 = vst [vmem:[#allocation165_spill] sm:$0xff] %v11249_v39  ;;  %5105 = vperm.xlu2 %7838, %v10529_v18   ;;  %v11256_v6 = vpop.f32.mrf.mxu0 }
 0x5e4   : > { %5607 = vperm.xlu0 %7863, %v10387_v13   ;;  %v11263_v41 = vpop.permute.xlu1 %3747  ;;  %v11265_v55 = vpop.f32.mrf.mxu3  ;;  %v3831_v13 = vmul.f32 %v11033_v58, %v14933_v29  ;;  %14936 = vst [vmem:[#allocation71_spill] sm:$0xff] %v11285_v28  ;;  %v14544_v28 = vmov 8  }
 0x5e5   : > { %14929 = vst [vmem:[#allocation90_spill] sm:$0xff] %v11265_v55  ;;  %7843 = vset.pattern.permute.xlu1 %v14856_v46  ;;  %3474 = vmatmul.bf16.gmra.mxu2 %v10997_v35  ;;  %v3005_v18 = vpop.f32.mrf.mxu1  ;;  %v11281_v55 = vpack.c.bf16 %v3325_v54, %v3324_v25 }
 0x5e6   : > { %3093 = vmatmul.bf16.gmra.mxu0 %v14934_v23  ;;  %5101 = vperm.xlu1 %7843, %v10459_v27   ;;  %v11283_v53 = vpack.c.bf16 %v3831_v13, %v3830_v61  ;;  %v14942_v23 = vld [vmem:[#allocation24_spill] sm:$0xff]  ;;  %v14944_v13 = vld [vmem:[#allocation69_spill] sm:$0xff] }
 0x5e7   : > { %v14543_v37 = vrot.slane %v14942_v23, 1 }
 0x5e8   : > { %14935 = vst [vmem:[#allocation58_spill] sm:$0xff] %v11283_v53  ;;  %v2742_v43 = vpop.f32.mrf.mxu2 }
 0x5e9   : > { %v11287_v39 = vadd.f32 %v3000_v31, %v2742_v43  ;;  %v14941_v31 = vld [vmem:[#allocation45_spill] sm:$0xff]  ;;  %v3132_v43 = vrot.slane %v14944_v13, 1 }
 0x5ea   : > { %3583 = vmatmul.bf16.gmra.mxu3 %v11281_v55  ;;  %3988 = vmatmul.bf16.gmra.mxu1 %v11283_v53  ;;  %v11291_v35 = vpop.permute.xlu2 %3803 }
 0x5eb   : > { %14937 = vst [vmem:[#allocation52_spill] sm:$0xff] %v11287_v39  ;;  %5113 = vperm.xlu2 %7838, %v10504_v49   ;;  %v11294_v58 = vpop.f32.mrf.mxu0  ;;  %v11316_v39 = vpop.permute.xlu0 %3811 }
 0x5ec   : > { %14938 = vst [vmem:[#allocation167_spill] sm:$0xff] %v11291_v35  ;;  %5611 = vperm.xlu0 %7863, %v10472_v5   ;;  %v11297_v27 = vpop.permute.xlu1 %3759  ;;  %v11299_v54 = vpop.f32.mrf.mxu3  ;;  %v11314_v5 = vsel %vm3151_vm10, %v3132_v43, %v14543_v37  ;;  %v7307_v37 = vld [vmem:[%s14309_s4 + $0x250] sm:$0xf] }
 0x5ed   : > { %14939 = vst [vmem:[#allocation168_spill] sm:$0xff] %v11299_v54  ;;  %v11301_v61 = vpop.f32.mrf.mxu1  ;;  %v14948_v54 = vld [vmem:[#allocation80_spill] sm:$0xff]  ;;  %v3327_v35 = vmul.f32 %v10723_v57, %v11314_v5  ;;  %v7665_v57 = vld [vmem:[%s14309_s4 + $0x254] sm:$0xf] }
 0x5ee   : > { %14940 = vst [vmem:[#allocation169_spill] sm:$0xff] %v11301_v61  ;;  %5109 = vperm.xlu1 %7843, %v14941_v31  }
 0x5ef   : > { %14946 = vst [vmem:[#allocation171_spill] sm:$0xff] %v11314_v5  ;;  %v7309_v5 = vld [vmem:[%s14309_s4 + $0x258] sm:$0xf0] }
 0x5f0   : > { %v11305_v25 = vpop.f32.mrf.mxu2  ;;  %14947 = vst [vmem:[#allocation172_spill] sm:$0xff] %v11316_v39 }
 0x5f1   : > { %14943 = vst [vmem:[#allocation45_spill] sm:$0xff] %v11305_v25  ;;  %v14949_v25 = vld [vmem:[#allocation78_spill] sm:$0xff] }
 0x5f2   : > { %v11308_v51 = vpop.permute.xlu2 %3815  ;;  %v3832_v13 = vmul.f32 %v11186_v4, %v14949_v25  ;;  %v11341_v4 = vsel %vm3151_vm10, %v3131_v40, %v3132_v43  ;;  %v14954_v25 = vld [vmem:[#allocation77_spill] sm:$0xff]  ;;  %v7312_v43 = vor.u32 %v7665_v57, %v7309_v5  ;;  %v14962_v5 = vld [vmem:[#allocation23_spill] sm:$0xff] }
 0x5f3   : > { %14945 = vst [vmem:[#allocation170_spill] sm:$0xff] %v11308_v51  ;;  %5121 = vperm.xlu2 %7838, %v14948_v54   ;;  %v11319_v61 = vpop.f32.mrf.mxu0  ;;  %v7666_v54 = vld [vmem:[%s14309_s4 + $0x254] sm:$0xf0]  ;;  %v3833_v53 = vmul.f32 %v11022_v20, %v14954_v25  ;;  %v7245_v20 = vld [vmem:[%s14309_s4 + $0x1d8] sm:$0xf0] }
 0x5f4   : > { %7869 = vset.pattern.permute.xlu0 %v14544_v28  ;;  %v11326_v51 = vpop.permute.xlu1 %3771  ;;  %v11328_v60 = vpop.f32.mrf.mxu3  ;;  %14952 = vst [vmem:[#allocation174_spill] sm:$0xff] %v11341_v4  ;;  %v7308_v28 = vor.u32 %v7666_v54, %v7307_v37  ;;  %4415 = vmatpush.bf16.msrb.mxu3 %v7312_v43  ;;  %v3134_v54 = vrot.slane %v14962_v5, 1 }
 0x5f5   : > { %14950 = vst [vmem:[#allocation80_spill] sm:$0xff] %v11326_v51  ;;  %6137 = vperm.xlu0 %7869, %v14941_v31   ;;  %3479 = vmatmul.bf16.gmra.mxu2 %v11078_v7  ;;  %v14955_v51 = vld [vmem:[#allocation86_spill] sm:$0xff]  ;;  %v3010_v40 = vpop.f32.mrf.mxu1  ;;  %v11356_v7 = vpack.c.bf16 %v3833_v53, %v3832_v13  ;;  %v14960_v13 = vmov 7  }
 0x5f6   : > { %14951 = vst [vmem:[#allocation173_spill] sm:$0xff] %v11328_v60  ;;  %v14953_v60 = vld [vmem:[#allocation35_spill] sm:$0xff]  ;;  %3098 = vmatmul.bf16.gmra.mxu0 %v14955_v51  ;;  %5117 = vperm.xlu1 %7843, %v10589_v11  }
 0x5f7   : > { %v3326_v39 = vmul.f32 %v14953_v60, %v11341_v4  ;;  %4326 = vmatpush.bf16.msrb.mxu2 %v7308_v28  ;;  %14956 = vst [vmem:[#allocation35_spill] sm:$0xff] %v11356_v7  ;;  %v7649_v60 = vld [vmem:[%s14309_s4 + $0x1d4] sm:$0xf] }
 0x5f8   : > { %v2747_v37 = vpop.f32.mrf.mxu2  ;;  %v7248_v11 = vor.u32 %v7649_v60, %v7245_v20 }
 0x5f9   : > { %v11354_v31 = vpack.c.bf16 %v3327_v35, %v3326_v39  ;;  %v11364_v51 = vadd.f32 %v3005_v18, %v2747_v37  ;;  %v11378_v18 = vpop.permute.xlu0 %3823  ;;  %v14965_v37 = vld [vmem:[#allocation25_spill] sm:$0xff] }
 0x5fa   : > { %3993 = vmatmul.bf16.gmra.mxu1 %v11356_v7  ;;  %4061 = vmatpush.bf16.msra.mxu0 %v7248_v11  ;;  %14961 = vst [vmem:[#allocation176_spill] sm:$0xff] %v11378_v18  ;;  %v3135_v60 = vrot.slane %v14965_v37, 1  ;;  %v14967_v11 = vld [vmem:[#allocation91_spill] sm:$0xff]  ;;  %v7647_v37 = vld [vmem:[%s14309_s4 + $0x1c4] sm:$0xf]  ;;  %v14975_v18 = vld [vmem:[#allocation30_spill] sm:$0xff] }
 0x5fb   : > { %14957 = vst [vmem:[#allocation77_spill] sm:$0xff] %v11364_v51  ;;  %3588 = vmatmul.bf16.gmra.mxu3 %v11354_v31  ;;  %5129 = vperm.xlu2 %7838, %v10627_v34   ;;  %v11369_v53 = vpop.f32.mrf.mxu0  ;;  %v11371_v39 = vpop.permute.xlu2 %4567  ;;  %v14969_v51 = vld [vmem:[#allocation7_spill] sm:$0xff]  ;;  %v14976_v7 = vld [vmem:[#allocation85_spill] sm:$0xff] }
 0x5fc   : > { %14958 = vst [vmem:[#allocation86_spill] sm:$0xff] %v11371_v39  ;;  %v11373_v28 = vpop.permute.xlu1 %3783  ;;  %v11375_v35 = vpop.f32.mrf.mxu3  ;;  %v11390_v20 = vsel %vm3151_vm10, %v3134_v54, %v3135_v60  ;;  %v7237_v39 = vld [vmem:[%s14309_s4 + $0x1c8] sm:$0xf0] }
 0x5fd   : > { %14959 = vst [vmem:[#allocation175_spill] sm:$0xff] %v11375_v35  ;;  %7873 = vset.pattern.permute.xlu0 %v14960_v13  ;;  %v11383_v57 = vpop.f32.mrf.mxu1 }
 0x5fe   : > { %5627 = vperm.xlu0 %7873, %v10504_v49   ;;  %5125 = vperm.xlu1 %7843, %v10574_v32   ;;  %14963 = vst [vmem:[#allocation177_spill] sm:$0xff] %v11383_v57  ;;  %v3329_v49 = vmul.f32 %v10787_v48, %v11390_v20  ;;  %v3835_v57 = vmul.f32 %v11236_v22, %v14969_v51 }
 0x5ff   : > { %14966 = vst [vmem:[#allocation179_spill] sm:$0xff] %v11390_v20  ;;  %v7240_v22 = vor.u32 %v7647_v37, %v7237_v39  ;;  %v14974_v20 = vld [vmem:[#allocation50_spill] sm:$0xff]  ;;  %v7645_v39 = vld [vmem:[%s14309_s4 + $0x1b4] sm:$0xf] }
 0x600   : > { %v11385_v43 = vpop.f32.mrf.mxu2 }
 0x601   : > { %14964 = vst [vmem:[#allocation178_spill] sm:$0xff] %v11385_v43  ;;  %4062 = vmatpush.bf16.msra.mxu0 %v7240_v22  ;;  %v7221_v22 = vld [vmem:[%s14309_s4 + $0x1a8] sm:$0xf0] }
 0x603   : > { %5141 = vperm.xlu2 %7838, %v14967_v11   ;;  %v11393_v4 = vpop.f32.mrf.mxu0  ;;  %v11395_v35 = vpop.permute.xlu2 %4579 }
 0x604   : > { %14968 = vst [vmem:[#allocation91_spill] sm:$0xff] %v11395_v35  ;;  %v11401_v5 = vpop.permute.xlu1 %3795  ;;  %v11403_v43 = vpop.f32.mrf.mxu3  ;;  %v14972_v35 = vrot.slane %v14942_v23, 1 }
 0x605   : > { %14970 = vst [vmem:[#allocation7_spill] sm:$0xff] %v11401_v5  ;;  %3484 = vmatmul.bf16.gmra.mxu2 %v11131_v21  ;;  %v3834_v5 = vmul.f32 %v11086_v17, %v14975_v18 }
 0x606   : > { %14971 = vst [vmem:[#allocation180_spill] sm:$0xff] %v11403_v43  ;;  %v11415_v48 = vsel %vm3151_vm10, %v14972_v35, %v3134_v54  ;;  %5639 = vperm.xlu0 %7873, %v10574_v32   ;;  %3103 = vmatmul.bf16.gmra.mxu0 %v10764_v8  ;;  %v11427_v35 = vpop.permute.xlu0 %4575  ;;  %v7229_v32 = vld [vmem:[%s14309_s4 + $0x1b8] sm:$0xf0] }
 0x607   : > { %14973 = vst [vmem:[#allocation181_spill] sm:$0xff] %v11415_v48  ;;  %v3328_v43 = vmul.f32 %v14974_v20, %v11415_v48  ;;  %5133 = vperm.xlu1 %7843, %v14976_v7   ;;  %v11429_v54 = vpack.c.bf16 %v3835_v57, %v3834_v5  ;;  %v7232_v8 = vor.u32 %v7645_v39, %v7229_v32  ;;  %v3015_v7 = vpop.f32.mrf.mxu1  ;;  %v14983_v39 = vld [vmem:[#allocation8_spill] sm:$0xff]  ;;  %v14985_v48 = vld [vmem:[#allocation98_spill] sm:$0xff] }
 0x608   : > { %14977 = vst [vmem:[#allocation50_spill] sm:$0xff] %v11427_v35  ;;  %v2752_v21 = vpop.f32.mrf.mxu2  ;;  %v14557_v32 = vrot.slane %v14983_v39, 1  ;;  %v14993_v35 = vld [vmem:[#allocation46_spill] sm:$0xff] }
 0x609   : > { %v11425_v23 = vpack.c.bf16 %v3329_v49, %v3328_v43  ;;  %v11437_v17 = vadd.f32 %v3010_v40, %v2752_v21  ;;  %v14979_v43 = vld [vmem:[#allocation47_spill] sm:$0xff]  ;;  %4063 = vmatpush.bf16.msra.mxu0 %v7232_v8  ;;  %v7643_v49 = vld [vmem:[%s14309_s4 + $0x1a4] sm:$0xf] }
 0x60a   : > { %3998 = vmatmul.bf16.gmra.mxu1 %v11429_v54  ;;  %v3040_v5 = vadd.f32 %v11039_v44, %v14979_v43  ;;  %v7224_v44 = vor.u32 %v7643_v49, %v7221_v22  ;;  %v14984_v8 = vld [vmem:[#allocation37_spill] sm:$0xff] }
 0x60b   : > { %14978 = vst [vmem:[#allocation30_spill] sm:$0xff] %v11437_v17  ;;  %3593 = vmatmul.bf16.gmra.mxu3 %v11425_v23  ;;  %5145 = vperm.xlu2 %7838, %v10758_v3   ;;  %v11444_v57 = vpop.f32.mrf.mxu0  ;;  %v11446_v37 = vpop.permute.xlu2 %4587  ;;  %v3136_v43 = vrot.slane %v14984_v8, 1  ;;  %v14989_v22 = vld [vmem:[#allocation29_spill] sm:$0xff] }
 0x60c   : > { %14980 = vst [vmem:[#allocation85_spill] sm:$0xff] %v11446_v37  ;;  %v11448_v20 = vpop.permute.xlu1 %3807  ;;  %v3554_v40 = vpop.f32.mrf.mxu3  ;;  %v7641_v37 = vld [vmem:[%s14309_s4 + $0x194] sm:$0xf] }
 0x60d   : > { %14981 = vst [vmem:[#allocation47_spill] sm:$0xff] %v11448_v20  ;;  %v11456_v21 = vadd.f32 %v3554_v40, %v3040_v5  ;;  %4064 = vmatpush.bf16.msra.mxu0 %v7224_v44  ;;  %v7213_v5 = vld [vmem:[%s14309_s4 + $0x198] sm:$0xf0]  ;;  %v11477_v49 = vsel %vm3151_vm10, %v3136_v43, %v14557_v32  ;;  %v3042_v44 = vadd.f32 %v11088_v16, %v14989_v22  ;;  %v14997_v20 = vld [vmem:[#allocation33_spill] sm:$0xff] }
 0x60e   : > { %5643 = vperm.xlu0 %7873, %v10627_v34   ;;  %v7216_v34 = vor.u32 %v7641_v37, %v7213_v5  ;;  %v11471_v40 = vpop.permute.xlu0 %4595  ;;  %14988 = vst [vmem:[#allocation184_spill] sm:$0xff] %v11477_v49  ;;  %v11488_v37 = vsel %vm3151_vm10, %v3135_v60, %v3136_v43  ;;  %v14992_v5 = vld [vmem:[#allocation83_spill] sm:$0xff]  ;;  %v3837_v32 = vmul.f32 %v11105_v38, %v14993_v35  ;;  %v7299_v60 = vld [vmem:[%s14309_s4 + $0x240] sm:$0xf]  ;;  %v14995_v43 = vld [vmem:[#allocation76_spill] sm:$0xff] }
 0x60f   : > { %14982 = vst [vmem:[#allocation182_spill] sm:$0xff] %v11456_v21  ;;  %7845 = vset.pattern.permute.xlu1 %v14803_v14  ;;  %v3330_v22 = vmul.f32 %v14995_v43, %v11488_v37  ;;  %v3836_v43 = vmul.f32 %v11070_v9, %v14997_v20 }
 0x610   : > { %4639 = vperm.xlu1 %7845, %v14985_v48   ;;  %v11463_v17 = vpop.f32.mrf.mxu2  ;;  %14987 = vst [vmem:[#allocation183_spill] sm:$0xff] %v11471_v40  ;;  %v3331_v40 = vmul.f32 %v14992_v5, %v11477_v49  ;;  %v7664_v49 = vld [vmem:[%s14309_s4 + $0x244] sm:$0xf0] }
 0x611   : > { %14986 = vst [vmem:[#allocation98_spill] sm:$0xff] %v11463_v17  ;;  %4065 = vmatpush.bf16.msra.mxu0 %v7216_v34  ;;  %v7205_v34 = vld [vmem:[%s14309_s4 + $0x188] sm:$0xf0] }
 0x612   : > { %14991 = vst [vmem:[#allocation185_spill] sm:$0xff] %v11488_v37  ;;  %v11528_v37 = vpack.c.bf16 %v3837_v32, %v3836_v43  ;;  %v15008_v43 = vld [vmem:[#allocation15_spill] sm:$0xff] }
 0x613   : > { %5153 = vperm.xlu2 %7838, %v14985_v48   ;;  %v11482_v17 = vpop.f32.mrf.mxu0  ;;  %v11484_v8 = vpop.permute.xlu2 %4599  ;;  %v7639_v48 = vld [vmem:[%s14309_s4 + $0x184] sm:$0xf] }
 0x614   : > { %14990 = vst [vmem:[#allocation29_spill] sm:$0xff] %v11484_v8  ;;  %v11494_v21 = vpop.permute.xlu1 %3819  ;;  %v3556_v16 = vpop.f32.mrf.mxu3  ;;  %v7208_v38 = vor.u32 %v7639_v48, %v7205_v34  ;;  %v7663_v8 = vld [vmem:[%s14309_s4 + $0x244] sm:$0xf]  ;;  %v11526_v34 = vpack.c.bf16 %v3331_v40, %v3330_v22 }
 0x615   : > { %14994 = vst [vmem:[#allocation83_spill] sm:$0xff] %v11494_v21  ;;  %v11507_v5 = vadd.f32 %v3556_v16, %v3042_v44  ;;  %3489 = vmatmul.bf16.gmra.mxu2 %v11220_v50  ;;  %v7301_v21 = vld [vmem:[%s14309_s4 + $0x248] sm:$0xf0]  ;;  %v11521_v44 = vpop.f32.mrf.mxu1  ;;  %v14999_v16 = vmov 8   ;;  %v7300_v50 = vor.u32 %v7664_v49, %v7299_v60  ;;  %v15004_v49 = vld [vmem:[#allocation21_spill] sm:$0xff] }
 0x616   : > { %14998 = vst [vmem:[#allocation76_spill] sm:$0xff] %v11521_v44  ;;  %7879 = vset.pattern.permute.xlu0 %v14999_v16  ;;  %3108 = vmatmul.bf16.gmra.mxu0 %v10879_v10  ;;  %v7304_v48 = vor.u32 %v7663_v8, %v7301_v21  ;;  %v15001_v10 = vld [vmem:[#allocation18_spill] sm:$0xff]  ;;  %v3139_v60 = vrot.slane %v15004_v49, 1  ;;  %v15011_v44 = vrot.slane %v14983_v39, 1 }
 0x617   : > { %14996 = vst [vmem:[#allocation46_spill] sm:$0xff] %v11507_v5  ;;  %6169 = vperm.xlu0 %7879, %v14967_v11   ;;  %4066 = vmatpush.bf16.msra.mxu0 %v7208_v38  ;;  %v3045_v11 = vadd.f32 %v11111_v30, %v15001_v10  ;;  %v15009_v10 = vld [vmem:[#allocation26_spill] sm:$0xff] }
 0x618   : > { %7846 = vset.pattern.permute.xlu1 %v14856_v46  ;;  %v2757_v5 = vpop.f32.mrf.mxu2  ;;  %4327 = vmatpush.bf16.msrb.mxu2 %v7300_v50  ;;  %v3047_v50 = vadd.f32 %v11149_v36, %v15008_v43 }
 0x619   : > { %5149 = vperm.xlu1 %7846, %v10669_v2   ;;  %v11532_v9 = vadd.f32 %v3015_v7, %v2757_v5  ;;  %4416 = vmatpush.bf16.msrb.mxu3 %v7304_v48  ;;  %v5090_v7 = vpop.permute.xlu0 %5089 }
 0x61a   : > { %4003 = vmatmul.bf16.gmra.mxu1 %v11528_v37 }
 0x61b   : > { %15000 = vst [vmem:[#allocation33_spill] sm:$0xff] %v11532_v9  ;;  %3598 = vmatmul.bf16.gmra.mxu3 %v11526_v34  ;;  %5161 = vperm.xlu2 %7838, %v10702_v26   ;;  %v11539_v21 = vpop.f32.mrf.mxu0  ;;  %v11541_v32 = vpop.permute.xlu2 %4611  ;;  %v15006_v26 = vld [vmem:[#allocation6_spill] sm:$0xff] }
 0x61c   : > { %15002 = vst [vmem:[#allocation18_spill] sm:$0xff] %v11541_v32  ;;  %v3559_v8 = vpop.f32.mrf.mxu3  ;;  %v3138_v5 = vrot.slane %v15006_v26, 1 }
 0x61d   : > { %v11543_v40 = vadd.f32 %v3559_v8, %v3045_v11  ;;  %v11545_v2 = vpop.permute.xlu1 %4571  ;;  %v3020_v22 = vpop.f32.mrf.mxu1  ;;  %v3838_v11 = vmul.f32 %v11263_v41, %v15009_v10  ;;  %v15010_v8 = vld [vmem:[#allocation105_spill] sm:$0xff] }
 0x61e   : > { %15003 = vst [vmem:[#allocation186_spill] sm:$0xff] %v11545_v2  ;;  %v11556_v38 = vsel %vm3151_vm10, %v3138_v5, %v3139_v60 }
 0x61f   : > { %7883 = vset.pattern.permute.xlu0 %v14960_v13  ;;  %15007 = vst [vmem:[#allocation188_spill] sm:$0xff] %v11556_v38 }
 0x620   : > { %5659 = vperm.xlu0 %7883, %v10758_v3   ;;  %v11550_v30 = vpop.f32.mrf.mxu2  ;;  %v3333_v3 = vmul.f32 %v10917_v47, %v11556_v38  ;;  %v15015_v47 = vld [vmem:[#allocation88_spill] sm:$0xff]  ;;  %v15016_v38 = vld [vmem:[#allocation31_spill] sm:$0xff] }
 0x621   : > { %15005 = vst [vmem:[#allocation187_spill] sm:$0xff] %v11550_v30  ;;  %5157 = vperm.xlu1 %7846, %v10935_v42   ;;  %v11572_v30 = vsel %vm3151_vm10, %v15011_v44, %v3138_v5  ;;  %v3839_v26 = vmul.f32 %v11101_v33, %v15016_v38  ;;  %v11588_v44 = vpop.permute.xlu0 %4607 }
 0x622   : > { %15012 = vst [vmem:[#allocation15_spill] sm:$0xff] %v11572_v30  ;;  %v3332_v41 = vmul.f32 %v15015_v47, %v11572_v30  ;;  %v5210_v47 = vmul.f32 %v5090_v7, %v14928_v1 }
 0x623   : > { %7848 = vset.pattern.permute.xlu2 %v14803_v14  ;;  %v11561_v48 = vpop.f32.mrf.mxu0  ;;  %15017 = vst [vmem:[#allocation88_spill] sm:$0xff] %v11588_v44  ;;  %v11590_v5 = vpack.c.bf16 %v3839_v26, %v3838_v11 }
 0x624   : > { %4651 = vperm.xlu2 %7848, %v15010_v8   ;;  %v3561_v49 = vpop.f32.mrf.mxu3  ;;  %v11586_v39 = vpack.c.bf16 %v3333_v3, %v3332_v41 }
 0x625   : > { %v11574_v36 = vpop.permute.xlu2 %5081  ;;  %v11576_v43 = vadd.f32 %v3561_v49, %v3047_v50  ;;  %v11578_v9 = vpop.permute.xlu1 %4583  ;;  %3494 = vmatmul.bf16.gmra.mxu2 %v11281_v55 }
 0x626   : > { %15014 = vst [vmem:[#allocation105_spill] sm:$0xff] %v11578_v9  ;;  %3113 = vmatmul.bf16.gmra.mxu0 %v10994_v56  ;;  %v11596_v50 = vpop.f32.mrf.mxu1  ;;  %v15020_v56 = vld [vmem:[#allocation11_spill] sm:$0xff] }
 0x627   : > { %15013 = vst [vmem:[#allocation26_spill] sm:$0xff] %v11576_v43  ;;  %v3050_v33 = vadd.f32 %v11178_v0, %v15020_v56  ;;  %v8075_v56 = vld [vmem:[%s14312_s7 + $0xa0] sm:$0xff] }
 0x628   : > { %5671 = vperm.xlu0 %7883, %v10935_v42   ;;  %v2762_v49 = vpop.f32.mrf.mxu2  ;;  %15019 = vst [vmem:[#allocation189_spill] sm:$0xff] %v11596_v50  ;;  %v8074_v42 = vld [vmem:[%s14312_s7 + $0xb0] sm:$0xff] }
 0x629   : > { %5165 = vperm.xlu1 %7846, %v15010_v8   ;;  %v11594_v55 = vadd.f32 %v3020_v22, %v2762_v49  ;;  %v15023_v49 = vld [vmem:[#allocation40_spill] sm:$0xff] }
 0x62a   : > { %4008 = vmatmul.bf16.gmra.mxu1 %v11590_v5  ;;  %v3140_v30 = vrot.slane %v15023_v49, 1  ;;  %v7293_v49 = vld [vmem:[%s14309_s4 + $0x238] sm:$0xf0] }
 0x62b   : > { %15018 = vst [vmem:[#allocation31_spill] sm:$0xff] %v11594_v55  ;;  %3603 = vmatmul.bf16.gmra.mxu3 %v11586_v39  ;;  %v11602_v3 = vpop.f32.mrf.mxu0  ;;  %v15026_v55 = vld [vmem:[#allocation43_spill] sm:$0xff] }
 0x62c   : > { %4655 = vperm.xlu2 %7848, %v8074_v42  }
 0x62d   : > { %v3564_v26 = vpop.f32.mrf.mxu3  ;;  %v5094_v11 = vpop.permute.xlu2 %5093 }
 0x62e   : > { %v11607_v22 = vadd.f32 %v3564_v26, %v3050_v33  ;;  %v11609_v8 = vpop.permute.xlu1 %4591  ;;  %v5211_v41 = vmul.f32 %v5094_v11, %v14933_v29  ;;  %v14567_v33 = vrot.slane %v15026_v55, 1  ;;  %v11622_v26 = vpop.permute.xlu0 %4619  ;;  %v15029_v29 = vld [vmem:[#allocation79_spill] sm:$0xff] }
 0x62f   : > { %15022 = vst [vmem:[#allocation190_spill] sm:$0xff] %v11609_v8  ;;  %v3052_v7 = vadd.f32 %v11232_v63, %v15029_v29  ;;  %v7662_v63 = vld [vmem:[%s14309_s4 + $0x234] sm:$0xf0]  ;;  %v15055_v8 = vld [vmem:[#allocation121_spill] sm:$0xff] }
 0x630   : > { %15021 = vst [vmem:[#allocation11_spill] sm:$0xff] %v11607_v22  ;;  %v11614_v0 = vpack.c.bf16 %v5211_v41, %v5210_v47  ;;  %5675 = vperm.xlu0 %7883, %v8075_v56   ;;  %v11619_v50 = vpop.f32.mrf.mxu2  ;;  %v11628_v1 = vsel %vm3151_vm10, %v3140_v30, %v14567_v33  ;;  %v11636_v47 = vsel %vm3151_vm10, %v3139_v60, %v3140_v30  ;;  %v3025_v41 = vpop.f32.mrf.mxu1  ;;  %v7291_v33 = vld [vmem:[%s14309_s4 + $0x230] sm:$0xf]  ;;  %v7661_v60 = vld [vmem:[%s14309_s4 + $0x234] sm:$0xf]  ;;  %v15031_v30 = vld [vmem:[#allocation36_spill] sm:$0xff] }
 0x631   : > { %15025 = vst [vmem:[#allocation192_spill] sm:$0xff] %v11619_v50  ;;  %5169 = vperm.xlu1 %7846, %v8074_v42   ;;  %v3335_v42 = vmul.f32 %v10979_v45, %v11628_v1  ;;  %v3841_v29 = vmul.f32 %v11297_v27, %v15031_v30  ;;  %v7292_v50 = vor.u32 %v7662_v63, %v7291_v33  ;;  %v15078_v22 = vld [vmem:[#allocation41_spill] sm:$0xff] }
 0x632   : > { %15024 = vst [vmem:[#allocation191_spill] sm:$0xff] %v11614_v0  ;;  %v7296_v27 = vor.u32 %v7661_v60, %v7293_v49  ;;  %v15041_v60 = vld [vmem:[#allocation17_spill] sm:$0xff] }
 0x633   : > { %15027 = vst [vmem:[#allocation193_spill] sm:$0xff] %v11622_v26  ;;  %v11632_v11 = vpop.f32.mrf.mxu0  ;;  %v15034_v26 = vld [vmem:[#allocation96_spill] sm:$0xff]  ;;  %4328 = vmatpush.bf16.msrb.mxu2 %v7292_v50 }
 0x634   : > { %15028 = vst [vmem:[#allocation194_spill] sm:$0xff] %v11628_v1  ;;  %7851 = vset.pattern.permute.xlu2 %v14856_v46  ;;  %v3334_v44 = vmul.f32 %v15034_v26, %v11636_v47  ;;  %4417 = vmatpush.bf16.msrb.mxu3 %v7296_v27 }
 0x635   : > { %15030 = vst [vmem:[#allocation79_spill] sm:$0xff] %v11636_v47  ;;  %v3566_v56 = vpop.f32.mrf.mxu3  ;;  %5177 = vperm.xlu2 %7851, %v10844_v12   ;;  %v11653_v45 = vpop.permute.xlu2 %5097  ;;  %3499 = vmatmul.bf16.gmra.mxu2 %v11354_v31  ;;  %v15035_v12 = vld [vmem:[#allocation38_spill] sm:$0xff] }
 0x636   : > { %v11655_v0 = vadd.f32 %v3566_v56, %v3052_v7  ;;  %v11657_v1 = vpop.permute.xlu1 %4603  ;;  %4067 = vmatmul.bf16.vlgmr.msra.gmra.mxu0 %v11129_v19  ;;  %v3840_v32 = vmul.f32 %v11144_v62, %v15035_v12  ;;  %v11668_v7 = vpack.c.bf16 %v3335_v42, %v3334_v44  ;;  %v8076_v19 = vld [vmem:[%s14312_s7 + $0xb8] sm:$0xff]  ;;  %v11685_v50 = vpop.permute.xlu0 %4627 }
 0x637   : > { %15033 = vst [vmem:[#allocation195_spill] sm:$0xff] %v11657_v1  ;;  %v15037_v44 = vld [vmem:[#allocation84_spill] sm:$0xff] }
 0x638   : > { %15032 = vst [vmem:[#allocation36_spill] sm:$0xff] %v11655_v0  ;;  %7889 = vset.pattern.permute.xlu0 %v14999_v16  ;;  %v2767_v31 = vpop.f32.mrf.mxu2  ;;  %v11671_v33 = vpack.c.bf16 %v3841_v29, %v3840_v32  ;;  %v3055_v32 = vadd.f32 %v11256_v6, %v15037_v44  ;;  %v14573_v29 = vrot.slane %v15041_v60, 1  ;;  %v3027_v27 = vpop.f32.mrf.mxu1  ;;  %v15050_v1 = vld [vmem:[#allocation104_spill] sm:$0xff] }
 0x639   : > { %7850 = vset.pattern.permute.xlu1 %v14803_v14  ;;  %v11674_v56 = vadd.f32 %v3025_v41, %v2767_v31  ;;  %6201 = vperm.xlu0 %7889, %v8076_v19   ;;  %15038 = vst [vmem:[#allocation38_spill] sm:$0xff] %v11685_v50  ;;  %v8077_v41 = vld [vmem:[%s14312_s7 + $0xc8] sm:$0xff]  ;;  %v15049_v50 = vld [vmem:[#allocation27_spill] sm:$0xff] }
 0x63a   : > { %4659 = vperm.xlu1 %7850, %v8076_v19   ;;  %4013 = vmatmul.bf16.gmra.mxu1 %v11671_v33  ;;  %v15042_v31 = vld [vmem:[#allocation22_spill] sm:$0xff] }
 0x63b   : > { %15036 = vst [vmem:[#allocation96_spill] sm:$0xff] %v11674_v56  ;;  %3608 = vmatmul.bf16.gmra.mxu3 %v11668_v7  ;;  %v11681_v62 = vpop.f32.mrf.mxu0  ;;  %v3142_v19 = vrot.slane %v15042_v31, 1  ;;  %v15047_v31 = vrot.slane %v15026_v55, 1 }
 0x63d   : > { %7854 = vset.pattern.permute.xlu2 %v14803_v14  ;;  %v11688_v49 = vpop.permute.xlu2 %5105  ;;  %v3569_v26 = vpop.f32.mrf.mxu3 }
 0x63e   : > { %v11690_v42 = vadd.f32 %v3569_v26, %v3055_v32  ;;  %4667 = vperm.xlu2 %7854, %v8077_v41   ;;  %v11695_v63 = vpop.permute.xlu1 %4615  ;;  %v8078_v32 = vld [vmem:[%s14312_s7 + $0xc0] sm:$0xff]  ;;  %v11710_v26 = vsel %vm3151_vm10, %v3142_v19, %v14573_v29  ;;  %v11737_v55 = vpop.permute.xlu0 %4631 }
 0x63f   : > { %15040 = vst [vmem:[#allocation196_spill] sm:$0xff] %v11695_v63  ;;  %v3843_v63 = vmul.f32 %v11163_v15, %v15049_v50  ;;  %v5208_v15 = vmul.f32 %v11574_v36, %v14916_v59  ;;  %v8079_v59 = vld [vmem:[%s14312_s7 + $0xd0] sm:$0xff] }
 0x640   : > { %15039 = vst [vmem:[#allocation84_spill] sm:$0xff] %v11690_v42  ;;  %v2769_v6 = vpop.f32.mrf.mxu2 }
 0x641   : > { %v11699_v44 = vadd.f32 %v3027_v27, %v2769_v6  ;;  %7893 = vset.pattern.permute.xlu0 %v14960_v13  ;;  %15044 = vst [vmem:[#allocation198_spill] sm:$0xff] %v11710_v26  ;;  %v15045_v27 = vld [vmem:[#allocation134_spill] sm:$0xff] }
 0x642   : > { %7852 = vset.pattern.permute.xlu1 %v14856_v46  ;;  %5691 = vperm.xlu0 %7893, %v8078_v32   ;;  %v3337_v6 = vmul.f32 %v15045_v27, %v11710_v26  ;;  %v11722_v32 = vsel %vm3151_vm10, %v15047_v31, %v3142_v19  ;;  %v15052_v31 = vld [vmem:[#allocation48_spill] sm:$0xff]  ;;  %v15053_v19 = vld [vmem:[#allocation151_spill] sm:$0xff]  ;;  %15054 = vst [vmem:[#allocation27_spill] sm:$0xff] %v11737_v55 }
 0x643   : > { %15043 = vst [vmem:[#allocation197_spill] sm:$0xff] %v11699_v44  ;;  %5181 = vperm.xlu1 %7852, %v8077_v41   ;;  %v11712_v47 = vpop.f32.mrf.mxu0  ;;  %v15046_v44 = vld [vmem:[#allocation92_spill] sm:$0xff]  ;;  %v3336_v27 = vmul.f32 %v15050_v1, %v11722_v32 }
 0x644   : > { %v3057_v56 = vadd.f32 %v11294_v58, %v15046_v44  ;;  %15048 = vst [vmem:[#allocation134_spill] sm:$0xff] %v11722_v32  ;;  %v3842_v44 = vmul.f32 %v15053_v19, %v15052_v31 }
 0x645   : > { %v11726_v29 = vpop.permute.xlu2 %5113  ;;  %v3571_v41 = vpop.f32.mrf.mxu3  ;;  %3504 = vmatmul.bf16.gmra.mxu2 %v11425_v23  ;;  %v15056_v23 = vld [vmem:[#allocation65_spill] sm:$0xff] }
 0x646   : > { %v11731_v26 = vadd.f32 %v3571_v41, %v3057_v56  ;;  %7855 = vset.pattern.permute.xlu2 %v14856_v46  ;;  %4072 = vmatmul.bf16.gmra.mxu0 %v11222_v24  ;;  %v5086_v58 = vpop.permute.xlu1 %5085  ;;  %v11743_v56 = vpack.c.bf16 %v3337_v6, %v3336_v27  ;;  %v11745_v32 = vpack.c.bf16 %v3843_v63, %v3842_v44  ;;  %v15060_v63 = vld [vmem:[#allocation100_spill] sm:$0xff]  ;;  %v15063_v44 = vld [vmem:[#allocation150_spill] sm:$0xff] }
 0x647   : > { %5189 = vperm.xlu2 %7855, %v15055_v8   ;;  %v5209_v9 = vmul.f32 %v5086_v58, %v15056_v23  ;;  %v3979_v1 = vpop.f32.mrf.mxu1 }
 0x648   : > { %15051 = vst [vmem:[#allocation92_spill] sm:$0xff] %v11731_v26  ;;  %v3465_v41 = vpop.f32.mrf.mxu2  ;;  %v15058_v26 = vld [vmem:[#allocation19_spill] sm:$0xff] }
 0x649   : > { %v11747_v24 = vpack.c.bf16 %v5209_v9, %v5208_v15  ;;  %v3634_v42 = vadd.f32 %v3465_v41, %v15058_v26  ;;  %v3060_v9 = vadd.f32 %v11319_v61, %v15060_v63 }
 0x64a   : > { %5703 = vperm.xlu0 %7893, %v15055_v8   ;;  %4018 = vmatmul.bf16.gmra.mxu1 %v11745_v32  ;;  %v15062_v8 = vld [vmem:[#allocation14_spill] sm:$0xff] }
 0x64b   : > { %15057 = vst [vmem:[#allocation104_spill] sm:$0xff] %v11747_v24  ;;  %3613 = vmatmul.bf16.gmra.mxu3 %v11743_v56  ;;  %5185 = vperm.xlu1 %7852, %v8079_v59   ;;  %v11756_v36 = vpop.f32.mrf.mxu0  ;;  %v11758_v6 = vadd.f32 %v3979_v1, %v3634_v42  ;;  %v14580_v19 = vrot.slane %v15062_v8, 1  ;;  %v15065_v24 = vld [vmem:[#allocation20_spill] sm:$0xff]  ;;  %v11771_v42 = vpop.permute.xlu0 %4635  ;;  %v15067_v1 = vld [vmem:[#allocation51_spill] sm:$0xff] }
 0x64c   : > { %v3144_v55 = vrot.slane %v15065_v24, 1  ;;  %15066 = vst [vmem:[#allocation65_spill] sm:$0xff] %v11771_v42  ;;  %v15071_v42 = vld [vmem:[#allocation106_spill] sm:$0xff] }
 0x64d   : > { %15059 = vst [vmem:[#allocation48_spill] sm:$0xff] %v11758_v6  ;;  %v11762_v27 = vpop.permute.xlu2 %5121  ;;  %v3574_v26 = vpop.f32.mrf.mxu3 }
 0x64e   : > { %v11764_v58 = vadd.f32 %v3574_v26, %v3060_v9  ;;  %v11779_v61 = vsel %vm3151_vm10, %v3144_v55, %v14580_v19  ;;  %v15070_v26 = vld [vmem:[#allocation112_spill] sm:$0xff] }
 0x64f   : > { %5193 = vperm.xlu2 %7855, %v15063_v44   ;;  %v3981_v15 = vpop.f32.mrf.mxu1  ;;  %v11768_v23 = vpop.permute.xlu1 %4623  ;;  %15068 = vst [vmem:[#allocation19_spill] sm:$0xff] %v11779_v61  ;;  %v3339_v24 = vmul.f32 %v15070_v26, %v11779_v61 }
 0x650   : > { %15061 = vst [vmem:[#allocation151_spill] sm:$0xff] %v11764_v58  ;;  %v3467_v41 = vpop.f32.mrf.mxu2  ;;  %v15076_v58 = vld [vmem:[#allocation109_spill] sm:$0xff] }
 0x651   : > { %15064 = vst [vmem:[#allocation121_spill] sm:$0xff] %v11768_v23  ;;  %v3636_v6 = vadd.f32 %v3467_v41, %v15067_v1  ;;  %v3062_v41 = vadd.f32 %v11369_v53, %v15071_v42  ;;  %v7660_v1 = vld [vmem:[%s14309_s4 + $0x224] sm:$0xf0]  ;;  %v15074_v53 = vld [vmem:[#allocation44_spill] sm:$0xff]  ;;  %v7285_v23 = vld [vmem:[%s14309_s4 + $0x228] sm:$0xf0] }
 0x652   : > { %5707 = vperm.xlu0 %7893, %v15063_v44   ;;  %v7283_v44 = vld [vmem:[%s14309_s4 + $0x220] sm:$0xf] }
 0x653   : > { %7856 = vset.pattern.permute.xlu1 %v14803_v14  ;;  %v11782_v63 = vpop.f32.mrf.mxu0  ;;  %v11784_v9 = vadd.f32 %v3981_v15, %v3636_v6  ;;  %v7659_v6 = vld [vmem:[%s14309_s4 + $0x224] sm:$0xf]  ;;  %v15072_v15 = vrot.slane %v15041_v60, 1 }
 0x654   : > { %4671 = vperm.xlu1 %7856, %v8079_v59   ;;  %v15075_v59 = vld [vmem:[#allocation80_spill] sm:$0xff] }
 0x655   : > { %15069 = vst [vmem:[#allocation100_spill] sm:$0xff] %v11784_v9  ;;  %v11803_v26 = vsel %vm3151_vm10, %v15072_v15, %v3144_v55  ;;  %v3844_v42 = vmul.f32 %v15075_v59, %v15074_v53  ;;  %v11807_v19 = vpop.permute.xlu2 %5129  ;;  %v3576_v61 = vpop.f32.mrf.mxu3  ;;  %3509 = vmatmul.bf16.gmra.mxu2 %v11526_v34  ;;  %v7284_v9 = vor.u32 %v7660_v1, %v7283_v44  ;;  %v15077_v55 = vld [vmem:[#allocation58_spill] sm:$0xff]  ;;  %v15079_v59 = vld [vmem:[#allocation159_spill] sm:$0xff] }
 0x656   : > { %15073 = vst [vmem:[#allocation150_spill] sm:$0xff] %v11803_v26  ;;  %v3338_v60 = vmul.f32 %v15076_v58, %v11803_v26  ;;  %v11815_v0 = vadd.f32 %v3576_v61, %v3062_v41  ;;  %4077 = vmatmul.bf16.gmra.mxu0 %v15077_v55  ;;  %v7288_v15 = vor.u32 %v7659_v6, %v7285_v23  ;;  %v8080_v44 = vld [vmem:[%s14312_s7 + $0xe8] sm:$0xff] }
 0x657   : > { %v3845_v43 = vmul.f32 %v15079_v59, %v15078_v22  ;;  %7858 = vset.pattern.permute.xlu2 %v14803_v14  ;;  %v3984_v2 = vpop.f32.mrf.mxu1  ;;  %4329 = vmatpush.bf16.msrb.mxu2 %v7284_v9  ;;  %v15080_v23 = vld [vmem:[#allocation78_spill] sm:$0xff] }
 0x658   : > { %v11821_v34 = vpack.c.bf16 %v3339_v24, %v3338_v60  ;;  %4683 = vperm.xlu2 %7858, %v8080_v44   ;;  %v5102_v58 = vpop.permute.xlu1 %5101  ;;  %v3470_v61 = vpop.f32.mrf.mxu2  ;;  %4418 = vmatpush.bf16.msrb.mxu3 %v7288_v15  ;;  %v5212_v1 = vmul.f32 %v11653_v45, %v15080_v23  ;;  %v15081_v55 = vld [vmem:[#allocation42_spill] sm:$0xff]  ;;  %v15085_v45 = vld [vmem:[#allocation115_spill] sm:$0xff] }
 0x659   : > { %v11826_v41 = vpack.c.bf16 %v3845_v43, %v3844_v42  ;;  %v5213_v6 = vmul.f32 %v5102_v58, %v14954_v25  ;;  %v3638_v59 = vadd.f32 %v3470_v61, %v15081_v55  ;;  %v5138_v60 = vpop.permute.xlu0 %5137  ;;  %v15083_v43 = vld [vmem:[#allocation155_spill] sm:$0xff]  ;;  %v3065_v25 = vadd.f32 %v11393_v4, %v15085_v45 }
 0x65a   : > { %7899 = vset.pattern.permute.xlu0 %v14999_v16  ;;  %v5222_v61 = vmul.f32 %v5138_v60, %v15052_v31  ;;  %v8081_v4 = vld [vmem:[%s14312_s7 + $0xf0] sm:$0xff]  ;;  %v15089_v60 = vld [vmem:[#allocation10_spill] sm:$0xff] }
 0x65b   : > { %3618 = vmatmul.bf16.gmra.mxu3 %v11821_v34  ;;  %v11834_v24 = vpack.c.bf16 %v5213_v6, %v5212_v1  ;;  %4023 = vmatmul.bf16.gmra.mxu1 %v11826_v41  ;;  %v11837_v9 = vpop.f32.mrf.mxu0  ;;  %v11840_v42 = vadd.f32 %v3984_v2, %v3638_v59  ;;  %v15086_v6 = vld [vmem:[#allocation16_spill] sm:$0xff]  ;;  %v3147_v45 = vrot.slane %v15089_v60, 1 }
 0x65c   : > { %6233 = vperm.xlu0 %7899, %v15083_v43   ;;  %7857 = vset.pattern.permute.xlu1 %v14856_v46  ;;  %v3146_v55 = vrot.slane %v15086_v6, 1 }
 0x65d   : > { %15082 = vst [vmem:[#allocation51_spill] sm:$0xff] %v11834_v24  ;;  %v5142_v15 = vpop.permute.xlu2 %5141  ;;  %5197 = vperm.xlu1 %7857, %v8080_v44   ;;  %v3579_v58 = vpop.f32.mrf.mxu3  ;;  %v5214_v44 = vmul.f32 %v11688_v49, %v14975_v18  ;;  %v15094_v18 = vld [vmem:[#allocation139_spill] sm:$0xff] }
 0x65e   : > { %15084 = vst [vmem:[#allocation112_spill] sm:$0xff] %v11840_v42  ;;  %v5223_v23 = vmul.f32 %v5142_v15, %v15049_v50  ;;  %v11847_v1 = vadd.f32 %v3579_v58, %v3065_v25  ;;  %v15088_v50 = vld [vmem:[#allocation13_spill] sm:$0xff]  ;;  %v15090_v25 = vrot.slane %v15062_v8, 1  ;;  %v15182_v8 = vld [vmem:[#allocation176_spill] sm:$0xff] }
 0x65f   : > { %v3986_v24 = vpop.f32.mrf.mxu1 }
 0x660   : > { %v11850_v26 = vpack.c.bf16 %v5223_v23, %v5222_v61  ;;  %4687 = vperm.xlu2 %7858, %v8081_v4   ;;  %v5110_v46 = vpop.permute.xlu1 %5109  ;;  %v3472_v2 = vpop.f32.mrf.mxu2  ;;  %v11864_v15 = vsel %vm3151_vm10, %v15090_v25, %v3146_v55 }
 0x661   : > { %v5215_v31 = vmul.f32 %v5110_v46, %v14969_v51  ;;  %v3640_v59 = vadd.f32 %v3472_v2, %v15088_v50  ;;  %15091 = vst [vmem:[#allocation44_spill] sm:$0xff] %v11864_v15  ;;  %v3340_v49 = vmul.f32 %v15094_v18, %v11864_v15  ;;  %v15095_v51 = vld [vmem:[#allocation122_spill] sm:$0xff]  ;;  %v7657_v2 = vld [vmem:[%s14309_s4 + $0x214] sm:$0xf]  ;;  %v7277_v50 = vld [vmem:[%s14309_s4 + $0x218] sm:$0xf0] }
 0x662   : > { %15087 = vst [vmem:[#allocation106_spill] sm:$0xff] %v11850_v26  ;;  %v3067_v46 = vadd.f32 %v11444_v57, %v15095_v51  ;;  %v7280_v57 = vor.u32 %v7657_v2, %v7277_v50  ;;  %v15098_v18 = vld [vmem:[#allocation120_spill] sm:$0xff] }
 0x663   : > { %v11866_v58 = vpack.c.bf16 %v5215_v31, %v5214_v44  ;;  %v11868_v61 = vpop.f32.mrf.mxu0  ;;  %v11870_v23 = vadd.f32 %v3986_v24, %v3640_v59  ;;  %v11884_v44 = vsel %vm3151_vm10, %v3146_v55, %v3147_v45  ;;  %v15097_v24 = vld [vmem:[#allocation49_spill] sm:$0xff]  ;;  %v15100_v15 = vld [vmem:[#allocation32_spill] sm:$0xff] }
 0x664   : > { %15096 = vst [vmem:[#allocation58_spill] sm:$0xff] %v11884_v44  ;;  %v3847_v31 = vmul.f32 %v11373_v28, %v15097_v24  ;;  %v3341_v51 = vmul.f32 %v15098_v18, %v11884_v44  ;;  %v15101_v55 = vld [vmem:[#allocation160_spill] sm:$0xff]  ;;  %4419 = vmatpush.bf16.msrb.mxu3 %v7280_v57  ;;  %v7655_v28 = vld [vmem:[%s14309_s4 + $0x204] sm:$0xf]  ;;  %v15121_v44 = vld [vmem:[#allocation87_spill] sm:$0xff] }
 0x665   : > { %15092 = vst [vmem:[#allocation80_spill] sm:$0xff] %v11866_v58  ;;  %v11888_v59 = vpop.permute.xlu2 %5145  ;;  %5201 = vperm.xlu1 %7857, %v8081_v4   ;;  %v3581_v25 = vpop.f32.mrf.mxu3  ;;  %3514 = vmatmul.bf16.gmra.mxu2 %v11586_v39  ;;  %v15099_v58 = vld [vmem:[#allocation35_spill] sm:$0xff]  ;;  %v3846_v60 = vmul.f32 %v15101_v55, %v15100_v15  ;;  %v7269_v39 = vld [vmem:[%s14309_s4 + $0x208] sm:$0xf0]  ;;  %v8082_v57 = vld [vmem:[%s14312_s7] sm:$0xff] }
 0x666   : > { %15093 = vst [vmem:[#allocation109_spill] sm:$0xff] %v11870_v23  ;;  %v11893_v26 = vadd.f32 %v3581_v25, %v3067_v46  ;;  %4082 = vmatmul.bf16.gmra.mxu0 %v15099_v58  ;;  %v11904_v4 = vpack.c.bf16 %v3341_v51, %v3340_v49  ;;  %v7272_v58 = vor.u32 %v7655_v28, %v7269_v39  ;;  %v15102_v55 = vld [vmem:[#allocation12_spill] sm:$0xff] }
 0x667   : > { %v3989_v23 = vpop.f32.mrf.mxu1  ;;  %v11907_v50 = vpack.c.bf16 %v3847_v31, %v3846_v60  ;;  %v5216_v25 = vmul.f32 %v11726_v29, %v14997_v20  ;;  %v15105_v20 = vld [vmem:[#allocation129_spill] sm:$0xff] }
 0x668   : > { %7861 = vset.pattern.permute.xlu2 %v14999_v16  ;;  %v5118_v46 = vpop.permute.xlu1 %5117  ;;  %v3475_v2 = vpop.f32.mrf.mxu2  ;;  %4420 = vmatpush.bf16.msrb.mxu3 %v7272_v58  ;;  %v3070_v29 = vadd.f32 %v11482_v17, %v15105_v20 }
 0x669   : > { %6109 = vperm.xlu2 %7861, %v8082_v57   ;;  %v5217_v18 = vmul.f32 %v5118_v46, %v14993_v35  ;;  %v3642_v49 = vadd.f32 %v3475_v2, %v15102_v55  ;;  %v15106_v46 = vld [vmem:[#allocation54_spill] sm:$0xff] }
 0x66a   : > { %v3148_v2 = vrot.slane %v15106_v46, 1 }
 0x66b   : > { %3623 = vmatmul.bf16.gmra.mxu3 %v11904_v4  ;;  %v11917_v51 = vpack.c.bf16 %v5217_v18, %v5216_v25  ;;  %4028 = vmatmul.bf16.gmra.mxu1 %v11907_v50  ;;  %v11920_v60 = vpop.f32.mrf.mxu0  ;;  %v11922_v31 = vadd.f32 %v3989_v23, %v3642_v49  ;;  %v5218_v23 = vmul.f32 %v11762_v27, %v15009_v10  ;;  %v15107_v18 = vld [vmem:[#allocation82_spill] sm:$0xff] }
 0x66c   : > { %v15110_v10 = vld [vmem:[#allocation142_spill] sm:$0xff] }
 0x66d   : > { %15103 = vst [vmem:[#allocation41_spill] sm:$0xff] %v11917_v51  ;;  %v11926_v28 = vpop.permute.xlu2 %5153  ;;  %7860 = vset.pattern.permute.xlu1 %v14803_v14  ;;  %v3584_v35 = vpop.f32.mrf.mxu3  ;;  %v8083_v14 = vld [vmem:[%s14312_s7 + $0x8] sm:$0xff]  ;;  %v15117_v51 = vld [vmem:[#allocation165_spill] sm:$0xff] }
 0x66e   : > { %15104 = vst [vmem:[#allocation159_spill] sm:$0xff] %v11922_v31  ;;  %v11929_v39 = vadd.f32 %v3584_v35, %v3070_v29  ;;  %4691 = vperm.xlu1 %7860, %v15083_v43   ;;  %v11943_v43 = vsel %vm3151_vm10, %v3147_v45, %v3148_v2  ;;  %v15116_v45 = vld [vmem:[#allocation81_spill] sm:$0xff]  ;;  %v7684_v31 = vld [vmem:[%s14309_s4 + $0x2e4] sm:$0xf0] }
 0x66f   : > { %v3991_v25 = vpop.f32.mrf.mxu1  ;;  %15108 = vst [vmem:[#allocation78_spill] sm:$0xff] %v11943_v43  ;;  %v3342_v27 = vmul.f32 %v15110_v10, %v11943_v43  ;;  %v15118_v10 = vld [vmem:[#allocation118_spill] sm:$0xff] }
 0x670   : > { %v5126_v57 = vpop.permute.xlu1 %5125  ;;  %v3477_v58 = vpop.f32.mrf.mxu2 }
 0x671   : > { %7864 = vset.pattern.permute.xlu2 %v14960_v13  ;;  %v5219_v17 = vmul.f32 %v5126_v57, %v15016_v38  ;;  %v3644_v55 = vadd.f32 %v3477_v58, %v15107_v18  ;;  %v15111_v38 = vld [vmem:[#allocation133_spill] sm:$0xff]  ;;  %v15113_v57 = vld [vmem:[#allocation55_spill] sm:$0xff] }
 0x672   : > { %5599 = vperm.xlu2 %7864, %v8083_v14   ;;  %v3072_v29 = vadd.f32 %v11539_v21, %v15111_v38  ;;  %v15114_v58 = vrot.slane %v15113_v57, 1 }
 0x673   : > { %v11945_v49 = vpack.c.bf16 %v5219_v17, %v5218_v23  ;;  %v11947_v20 = vpop.f32.mrf.mxu0  ;;  %v11953_v35 = vadd.f32 %v3991_v25, %v3644_v55  ;;  %v3849_v23 = vmul.f32 %v15117_v51, %v15116_v45  ;;  %v7658_v51 = vld [vmem:[%s14309_s4 + $0x214] sm:$0xf0]  ;;  %v15120_v25 = vld [vmem:[#allocation163_spill] sm:$0xff] }
 0x674   : > { %v11959_v18 = vsel %vm3151_vm10, %v3148_v2, %v15114_v58  ;;  %v15119_v2 = vld [vmem:[#allocation39_spill] sm:$0xff]  ;;  %v7276_v38 = vor.u32 %v7658_v51, %v7275_v52 }
 0x675   : > { %15109 = vst [vmem:[#allocation42_spill] sm:$0xff] %v11945_v49  ;;  %v11963_v17 = vpop.permute.xlu2 %5161  ;;  %v3586_v49 = vpop.f32.mrf.mxu3  ;;  %3519 = vmatmul.bf16.gmra.mxu2 %v11668_v7  ;;  %v3343_v43 = vmul.f32 %v15118_v10, %v11959_v18  ;;  %v3848_v7 = vmul.f32 %v15120_v25, %v15119_v2  ;;  %v5220_v10 = vmul.f32 %v11807_v19, %v15035_v12  ;;  %v8085_v51 = vld [vmem:[%s14312_s7 + $0x10] sm:$0xff] }
 0x676   : > { %15112 = vst [vmem:[#allocation155_spill] sm:$0xff] %v11953_v35  ;;  %v11968_v21 = vadd.f32 %v3586_v49, %v3072_v29  ;;  %7862 = vset.pattern.permute.xlu1 %v14999_v16  ;;  %4087 = vmatmul.bf16.gmra.mxu0 %v11429_v54  ;;  %v7379_v35 = vld [vmem:[%s14309_s4 + $0x2e0] sm:$0xf] }
 0x677   : > { %15115 = vst [vmem:[#allocation115_spill] sm:$0xff] %v11959_v18  ;;  %6113 = vperm.xlu1 %7862, %v8083_v14   ;;  %v3994_v55 = vpop.f32.mrf.mxu1  ;;  %v11980_v49 = vpack.c.bf16 %v3343_v43, %v3342_v27  ;;  %v11982_v29 = vpack.c.bf16 %v3849_v23, %v3848_v7  ;;  %4330 = vmatpush.bf16.msrb.mxu2 %v7276_v38  ;;  %v8084_v14 = vld [vmem:[%s14312_s7 + $0x18] sm:$0xff]  ;;  %v15122_v27 = vld [vmem:[#allocation89_spill] sm:$0xff]  ;;  %v15126_v38 = vld [vmem:[#allocation95_spill] sm:$0xff] }
 0x678   : > { %v3480_v54 = vpop.f32.mrf.mxu2  ;;  %v3075_v12 = vadd.f32 %v11561_v48, %v15122_v27  ;;  %v8086_v48 = vld [vmem:[%s14312_s7 + $0x20] sm:$0xff]  ;;  %v15130_v27 = vld [vmem:[#allocation7_spill] sm:$0xff] }
 0x679   : > { %v5134_v58 = vpop.permute.xlu1 %5133  ;;  %v3646_v57 = vadd.f32 %v3480_v54, %v15121_v44 }
 0x67a   : > { %v5221_v18 = vmul.f32 %v5134_v58, %v15031_v30  ;;  %7865 = vset.pattern.permute.xlu2 %v14999_v16 }
 0x67b   : > { %3628 = vmatmul.bf16.gmra.mxu3 %v11980_v49  ;;  %4033 = vmatmul.bf16.gmra.mxu1 %v11982_v29  ;;  %v11994_v43 = vpop.f32.mrf.mxu0  ;;  %v12000_v30 = vadd.f32 %v3994_v55, %v3646_v57 }
 0x67c   : > { %6121 = vperm.xlu2 %7865, %v8084_v14   ;;  %v11998_v19 = vpack.c.bf16 %v5221_v18, %v5220_v10  ;;  %v15127_v18 = vld [vmem:[#allocation102_spill] sm:$0xff] }
 0x67d   : > { %15124 = vst [vmem:[#allocation139_spill] sm:$0xff] %v12000_v30  ;;  %v3077_v55 = vadd.f32 %v11602_v3, %v15127_v18  ;;  %v15129_v14 = vld [vmem:[#allocation94_spill] sm:$0xff] }
 0x67e   : > { %15123 = vst [vmem:[#allocation13_spill] sm:$0xff] %v11998_v19  ;;  %v3589_v44 = vpop.f32.mrf.mxu3  ;;  %v12004_v52 = vpop.permute.xlu2 %4651  ;;  %v15133_v19 = vld [vmem:[#allocation71_spill] sm:$0xff] }
 0x67f   : > { %v12002_v23 = vadd.f32 %v3589_v44, %v3075_v12  ;;  %15125 = vst [vmem:[#allocation122_spill] sm:$0xff] %v12004_v52  ;;  %6117 = vperm.xlu1 %7862, %v8085_v51   ;;  %v3996_v25 = vpop.f32.mrf.mxu1  ;;  %v3850_v12 = vmul.f32 %v15130_v27, %v15129_v14  ;;  %v15152_v52 = vld [vmem:[#allocation64_spill] sm:$0xff] }
 0x680   : > { %v3482_v7 = vpop.f32.mrf.mxu2 }
 0x681   : > { %v3648_v58 = vadd.f32 %v3482_v7, %v15126_v38 }
 0x682   : > { %v12010_v54 = vpop.permute.xlu1 %4639 }
 0x683   : > { %v12015_v57 = vpop.f32.mrf.mxu0  ;;  %v12019_v10 = vadd.f32 %v3996_v25, %v3648_v58  ;;  %v15134_v25 = vld [vmem:[#allocation59_spill] sm:$0xff]  ;;  %v15135_v58 = vld [vmem:[#allocation60_spill] sm:$0xff] }
 0x684   : > { %6125 = vperm.xlu2 %7865, %v8086_v48   ;;  %v15132_v48 = vld [vmem:[#allocation99_spill] sm:$0xff]  ;;  %v12034_v18 = vpack.c.bf16 %v15135_v58, %v15134_v25  ;;  %v7686_v58 = vld [vmem:[%s14309_s4 + $0x2f4] sm:$0xf0] }
 0x685   : > { %15128 = vst [vmem:[#allocation49_spill] sm:$0xff] %v12019_v10  ;;  %3524 = vmatmul.bf16.gmra.mxu2 %v11743_v56  ;;  %v3851_v30 = vmul.f32 %v15133_v19, %v15132_v48  ;;  %v12044_v10 = vpop.permute.xlu0 %4643 }
 0x686   : > { %v3591_v44 = vpop.f32.mrf.mxu3  ;;  %v12026_v38 = vpop.permute.xlu2 %4655  ;;  %4092 = vmatmul.bf16.gmra.mxu0 %v11528_v37 }
 0x687   : > { %v12024_v7 = vadd.f32 %v3591_v44, %v3077_v55  ;;  %15131 = vst [vmem:[#allocation120_spill] sm:$0xff] %v12026_v38  ;;  %7866 = vset.pattern.permute.xlu1 %v14960_v13  ;;  %v3999_v3 = vpop.f32.mrf.mxu1  ;;  %v12036_v27 = vpack.c.bf16 %v3851_v30, %v3850_v12  ;;  %v15136_v55 = vld [vmem:[#allocation103_spill] sm:$0xff]  ;;  %v5224_v30 = vmul.f32 %v11888_v59, %v15074_v53 }
 0x688   : > { %5603 = vperm.xlu1 %7866, %v8085_v51   ;;  %v3485_v56 = vpop.f32.mrf.mxu2  ;;  %v15137_v51 = vld [vmem:[#allocation107_spill] sm:$0xff] }
 0x689   : > { %v3650_v44 = vadd.f32 %v3485_v56, %v15136_v55  ;;  %v3080_v25 = vadd.f32 %v11632_v11, %v15137_v51  ;;  %v8087_v56 = vld [vmem:[%s14312_s7 + $0x28] sm:$0xff]  ;;  %v7387_v55 = vld [vmem:[%s14309_s4 + $0x2f0] sm:$0xf] }
 0x68a   : > { %v7388_v51 = vor.u32 %v7686_v58, %v7387_v55  ;;  %v7380_v58 = vor.u32 %v7684_v31, %v7379_v35  ;;  %v7371_v31 = vld [vmem:[%s14309_s4 + $0x2d0] sm:$0xf]  ;;  %v7682_v35 = vld [vmem:[%s14309_s4 + $0x2d4] sm:$0xf0] }
 0x68b   : > { %4421 = vmatmul.bf16.vlgmr.msrb.gmra.mxu3 %v12034_v18  ;;  %4038 = vmatmul.bf16.gmra.mxu1 %v12036_v27  ;;  %v5150_v37 = vpop.permute.xlu1 %5149  ;;  %v12042_v19 = vpop.f32.mrf.mxu0  ;;  %v12060_v38 = vadd.f32 %v3999_v3, %v3650_v44  ;;  %v15140_v3 = vld [vmem:[#allocation110_spill] sm:$0xff]  ;;  %v15141_v44 = vld [vmem:[#allocation93_spill] sm:$0xff] }
 0x68c   : > { %7868 = vset.pattern.permute.xlu2 %v14960_v13  ;;  %v5225_v12 = vmul.f32 %v5150_v37, %v15078_v22  ;;  %4838 = vmatpush.bf16.msrb.mxu1 %v7388_v51 }
 0x68d   : > { %5615 = vperm.xlu2 %7868, %v8087_v56   ;;  %15138 = vst [vmem:[#allocation35_spill] sm:$0xff] %v12060_v38  ;;  %v2973_v38 = vadd.f32 %v15141_v44, %v15140_v3  ;;  %v8088_v3 = vld [vmem:[%s14312_s7 + $0x30] sm:$0xff]  ;;  %v7267_v44 = vld [vmem:[%s14309_s4 + $0x200] sm:$0xf] }
 0x68e   : > { %v3594_v11 = vpop.f32.mrf.mxu3  ;;  %v12062_v53 = vpack.c.bf16 %v5225_v12, %v5224_v30 }
 0x68f   : > { %v12064_v22 = vadd.f32 %v3594_v11, %v3080_v25  ;;  %v12066_v59 = vpop.permute.xlu2 %5177  ;;  %v4001_v37 = vpop.f32.mrf.mxu1  ;;  %v15142_v11 = vld [vmem:[#allocation117_spill] sm:$0xff] }
 0x690   : > { %15139 = vst [vmem:[#allocation32_spill] sm:$0xff] %v12062_v53  ;;  %7867 = vset.pattern.permute.xlu1 %v14999_v16  ;;  %v3487_v25 = vpop.f32.mrf.mxu2  ;;  %4839 = vmatpush.bf16.msrb.mxu1 %v7380_v58  ;;  %v3082_v51 = vadd.f32 %v11681_v62, %v15142_v11  ;;  %v5226_v53 = vmul.f32 %v11926_v28, %v15100_v15  ;;  %v15144_v62 = vld [vmem:[#allocation111_spill] sm:$0xff]  ;;  %v7656_v58 = vld [vmem:[%s14309_s4 + $0x204] sm:$0xf0] }
 0x691   : > { %6129 = vperm.xlu1 %7867, %v8087_v56   ;;  %v3652_v30 = vadd.f32 %v3487_v25, %v2973_v38  ;;  %v15145_v56 = vld [vmem:[#allocation47_spill] sm:$0xff]  ;;  %v12104_v25 = vpop.permute.xlu0 %4647  ;;  %v15148_v11 = vld [vmem:[#allocation114_spill] sm:$0xff] }
 0x692   : > { %v3853_v15 = vmul.f32 %v15145_v56, %v15144_v62  ;;  %15146 = vst [vmem:[#allocation12_spill] sm:$0xff] %v12104_v25  ;;  %v5232_v6 = vmul.f32 %v12066_v59, %v15148_v11  ;;  %v15184_v59 = vld [vmem:[#allocation74_spill] sm:$0xff] }
 0x693   : > { %v5158_v12 = vpop.permute.xlu1 %5157  ;;  %v12077_v55 = vpop.f32.mrf.mxu0  ;;  %v12093_v38 = vadd.f32 %v4001_v37, %v3652_v30  ;;  %v7268_v30 = vor.u32 %v7656_v58, %v7267_v44  ;;  %v15154_v58 = vld [vmem:[#allocation123_spill] sm:$0xff] }
 0x694   : > { %v5227_v46 = vmul.f32 %v5158_v12, %v15097_v24  ;;  %v7372_v24 = vor.u32 %v7682_v35, %v7371_v31 }
 0x695   : > { %5619 = vperm.xlu2 %7868, %v8088_v3   ;;  %15143 = vst [vmem:[#allocation160_spill] sm:$0xff] %v12093_v38  ;;  %3529 = vmatmul.bf16.gmra.mxu2 %v11821_v34  ;;  %v15149_v34 = vld [vmem:[#allocation167_spill] sm:$0xff] }
 0x696   : > { %v3596_v28 = vpop.f32.mrf.mxu3  ;;  %v12106_v12 = vpack.c.bf16 %v5227_v46, %v5226_v53  ;;  %4097 = vmatmul.bf16.gmra.mxu0 %v11590_v5  ;;  %v3852_v31 = vmul.f32 %v15149_v34, %v15148_v11  ;;  %4840 = vmatpush.bf16.msrb.mxu1 %v7372_v24  ;;  %v15151_v38 = vld [vmem:[#allocation63_spill] sm:$0xff]  ;;  %v7363_v46 = vld [vmem:[%s14309_s4 + $0x2c0] sm:$0xf]  ;;  %v7680_v5 = vld [vmem:[%s14309_s4 + $0x2c4] sm:$0xf0] }
 0x697   : > { %v12108_v37 = vadd.f32 %v3596_v28, %v3082_v51  ;;  %v4004_v35 = vpop.f32.mrf.mxu1  ;;  %v12117_v42 = vpack.c.bf16 %v15152_v52, %v15151_v38  ;;  %4331 = vmatpush.bf16.msrb.mxu2 %v7268_v30  ;;  %v7364_v28 = vor.u32 %v7680_v5, %v7363_v46  ;;  %v15153_v24 = vld [vmem:[#allocation119_spill] sm:$0xff]  ;;  %v3085_v30 = vadd.f32 %v11712_v47, %v15154_v58  ;;  %v7678_v47 = vld [vmem:[%s14309_s4 + $0x2b4] sm:$0xf0]  ;;  %v8089_v46 = vld [vmem:[%s14312_s7 + $0x40] sm:$0xff] }
 0x698   : > { %15147 = vst [vmem:[#allocation129_spill] sm:$0xff] %v12106_v12  ;;  %v12113_v56 = vpop.permute.xlu2 %4667  ;;  %v12125_v53 = vpack.c.bf16 %v3853_v15, %v3852_v31  ;;  %v3490_v51 = vpop.f32.mrf.mxu2  ;;  %v5228_v38 = vmul.f32 %v11963_v17, %v15119_v2  ;;  %v15185_v11 = vld [vmem:[#allocation75_spill] sm:$0xff] }
 0x699   : > { %15150 = vst [vmem:[#allocation82_spill] sm:$0xff] %v12113_v56  ;;  %6133 = vperm.xlu1 %7867, %v8088_v3   ;;  %v3654_v44 = vadd.f32 %v3490_v51, %v15153_v24  ;;  %v7355_v3 = vld [vmem:[%s14309_s4 + $0x2b0] sm:$0xf]  ;;  %v15158_v24 = vld [vmem:[#allocation108_spill] sm:$0xff] }
 0x69a   : > { %4841 = vmatpush.bf16.msrb.mxu1 %v7364_v28  ;;  %v15157_v28 = vld [vmem:[#allocation125_spill] sm:$0xff] }
 0x69b   : > { %4426 = vmatmul.bf16.gmra.mxu3 %v12117_v42  ;;  %4043 = vmatmul.bf16.gmra.mxu1 %v12125_v53  ;;  %v5166_v34 = vpop.permute.xlu1 %5165  ;;  %v12132_v12 = vpop.f32.mrf.mxu0  ;;  %v12144_v31 = vadd.f32 %v4004_v35, %v3654_v44  ;;  %v2978_v58 = vadd.f32 %v15158_v24, %v15157_v28  ;;  %v7347_v35 = vld [vmem:[%s14309_s4 + $0x2a0] sm:$0xf]  ;;  %v7676_v44 = vld [vmem:[%s14309_s4 + $0x2a4] sm:$0xf0]  ;;  %v15159_v28 = vld [vmem:[#allocation131_spill] sm:$0xff] }
 0x69c   : > { %v5229_v15 = vmul.f32 %v5166_v34, %v15116_v45  ;;  %v7356_v45 = vor.u32 %v7678_v47, %v7355_v3  ;;  %v5174_v34 = vpop.permute.xlu0 %5173  ;;  %v8090_v3 = vld [vmem:[%s14312_s7 + $0x38] sm:$0xff]  ;;  %v3087_v24 = vadd.f32 %v11756_v36, %v15159_v28 }
 0x69d   : > { %7871 = vset.pattern.permute.xlu2 %v14999_v16  ;;  %15155 = vst [vmem:[#allocation142_spill] sm:$0xff] %v12144_v31 }
 0x69e   : > { %6141 = vperm.xlu2 %7871, %v8089_v46   ;;  %v3599_v17 = vpop.f32.mrf.mxu3  ;;  %v12149_v2 = vpack.c.bf16 %v5229_v15, %v5228_v38  ;;  %4842 = vmatpush.bf16.msrb.mxu1 %v7356_v45  ;;  %v5231_v45 = vmul.f32 %v5174_v34, %v15132_v48 }
 0x69f   : > { %v12151_v5 = vadd.f32 %v3599_v17, %v3085_v30  ;;  %v4006_v51 = vpop.f32.mrf.mxu1  ;;  %v7348_v30 = vor.u32 %v7676_v44, %v7347_v35  ;;  %v7674_v35 = vld [vmem:[%s14309_s4 + $0x294] sm:$0xf0] }
 0x6a0   : > { %15156 = vst [vmem:[#allocation133_spill] sm:$0xff] %v12149_v2  ;;  %v3492_v38 = vpop.f32.mrf.mxu2 }
 0x6a1   : > { %v12161_v46 = vpop.permute.xlu2 %5189  ;;  %7870 = vset.pattern.permute.xlu1 %v14960_v13  ;;  %v3656_v15 = vadd.f32 %v3492_v38, %v2978_v58  ;;  %v7339_v58 = vld [vmem:[%s14309_s4 + $0x290] sm:$0xf]  ;;  %v15161_v38 = vld [vmem:[#allocation128_spill] sm:$0xff] }
 0x6a2   : > { %5623 = vperm.xlu1 %7870, %v8090_v3   ;;  %4843 = vmatpush.bf16.msrb.mxu1 %v7348_v30  ;;  %v15162_v3 = vld [vmem:[#allocation170_spill] sm:$0xff]  ;;  %v7340_v36 = vor.u32 %v7674_v35, %v7339_v58  ;;  %v15168_v35 = vld [vmem:[#allocation132_spill] sm:$0xff] }
 0x6a3   : > { %v5170_v47 = vpop.permute.xlu1 %5169  ;;  %v12167_v17 = vpop.f32.mrf.mxu0  ;;  %v12179_v44 = vadd.f32 %v4006_v51, %v3656_v15  ;;  %v3855_v52 = vmul.f32 %v15162_v3, %v15161_v38  ;;  %v8091_v30 = vld [vmem:[%s14312_s7 + $0x48] sm:$0xff]  ;;  %v15165_v15 = vld [vmem:[#allocation172_spill] sm:$0xff]  ;;  %v15166_v3 = vld [vmem:[#allocation67_spill] sm:$0xff] }
 0x6a4   : > { %v5230_v2 = vmul.f32 %v5170_v47, %v15129_v14  ;;  %v15164_v51 = vld [vmem:[#allocation126_spill] sm:$0xff]  ;;  %v12256_v25 = vpop.permute.xlu0 %4663 }
 0x6a5   : > { %15160 = vst [vmem:[#allocation81_spill] sm:$0xff] %v12179_v44  ;;  %3534 = vmatmul.bf16.gmra.mxu2 %v11904_v4  ;;  %v3854_v47 = vmul.f32 %v15165_v15, %v15164_v51  ;;  %v15167_v44 = vld [vmem:[#allocation68_spill] sm:$0xff]  ;;  %v7331_v4 = vld [vmem:[%s14309_s4 + $0x280] sm:$0xf]  ;;  %v15169_v15 = vld [vmem:[#allocation135_spill] sm:$0xff] }
 0x6a6   : > { %7874 = vset.pattern.permute.xlu2 %v14960_v13  ;;  %v3601_v48 = vpop.f32.mrf.mxu3  ;;  %v12185_v14 = vpack.c.bf16 %v5231_v45, %v5230_v2  ;;  %4102 = vmatmul.bf16.gmra.mxu0 %v11671_v33  ;;  %v12197_v31 = vpack.c.bf16 %v15167_v44, %v15166_v3  ;;  %v7672_v2 = vld [vmem:[%s14309_s4 + $0x284] sm:$0xf0]  ;;  %v15173_v44 = vld [vmem:[#allocation124_spill] sm:$0xff]  ;;  %15180 = vst [vmem:[#allocation89_spill] sm:$0xff] %v12256_v25 }
 0x6a7   : > { %v12187_v34 = vadd.f32 %v3601_v48, %v3087_v24  ;;  %5631 = vperm.xlu2 %7874, %v8091_v30   ;;  %v4009_v28 = vpop.f32.mrf.mxu1  ;;  %4844 = vmatpush.bf16.msrb.mxu1 %v7340_v36  ;;  %v12205_v45 = vpack.c.bf16 %v3855_v52, %v3854_v47  ;;  %v7332_v58 = vor.u32 %v7672_v2, %v7331_v4 }
 0x6a8   : > { %15163 = vst [vmem:[#allocation165_spill] sm:$0xff] %v12185_v14  ;;  %v3495_v24 = vpop.f32.mrf.mxu2  ;;  %v3090_v14 = vadd.f32 %v11782_v63, %v15169_v15 }
 0x6a9   : > { %v12207_v33 = vpop.permute.xlu2 %5193  ;;  %v3658_v48 = vadd.f32 %v3495_v24, %v15168_v35  ;;  %v8092_v24 = vld [vmem:[%s14312_s7 + $0x58] sm:$0xff]  ;;  %v15172_v35 = vld [vmem:[#allocation137_spill] sm:$0xff] }
 0x6aa   : > { %7872 = vset.pattern.permute.xlu1 %v14999_v16  ;;  %v2983_v3 = vadd.f32 %v15173_v44, %v15172_v35  ;;  %v7451_v44 = vld [vmem:[%s14309_s4 + $0x370] sm:$0xf] }
 0x6ab   : > { %4431 = vmatmul.bf16.gmra.mxu3 %v12197_v31  ;;  %4048 = vmatmul.bf16.gmra.mxu1 %v12205_v45  ;;  %v12213_v36 = vpop.f32.mrf.mxu0  ;;  %v12219_v47 = vadd.f32 %v4009_v28, %v3658_v48 }
 0x6ac   : > { %6145 = vperm.xlu1 %7872, %v8091_v30   ;;  %v12217_v52 = vpop.permute.xlu1 %4659  ;;  %4845 = vmatpush.bf16.msrb.mxu1 %v7332_v58  ;;  %v15175_v58 = vld [vmem:[#allocation140_spill] sm:$0xff] }
 0x6ad   : > { %15170 = vst [vmem:[#allocation118_spill] sm:$0xff] %v12217_v52  ;;  %v3092_v48 = vadd.f32 %v11837_v9, %v15175_v58  ;;  %v7453_v52 = vld [vmem:[%s14309_s4 + $0x378] sm:$0xf0] }
 0x6ae   : > { %15171 = vst [vmem:[#allocation39_spill] sm:$0xff] %v12219_v47  ;;  %v3604_v4 = vpop.f32.mrf.mxu3 }
 0x6af   : > { %v12221_v2 = vadd.f32 %v3604_v4, %v3090_v14  ;;  %7875 = vset.pattern.permute.xlu2 %v14999_v16  ;;  %v4011_v30 = vpop.f32.mrf.mxu1  ;;  %v8093_v14 = vld [vmem:[%s14312_s7 + $0x50] sm:$0xff]  ;;  %v15176_v4 = vld [vmem:[#allocation182_spill] sm:$0xff] }
 0x6b0   : > { %6153 = vperm.xlu2 %7875, %v8092_v24   ;;  %v3497_v63 = vpop.f32.mrf.mxu2  ;;  %v7701_v24 = vld [vmem:[%s14309_s4 + $0x374] sm:$0xf] }
 0x6b1   : > { %v3660_v15 = vadd.f32 %v3497_v63, %v2983_v3  ;;  %v7702_v3 = vld [vmem:[%s14309_s4 + $0x374] sm:$0xf0]  ;;  %v15178_v63 = vld [vmem:[#allocation57_spill] sm:$0xff] }
 0x6b2   : > { %v12229_v56 = vpop.permute.xlu2 %4683 }
 0x6b3   : > { %15174 = vst [vmem:[#allocation163_spill] sm:$0xff] %v12229_v56  ;;  %v4068_v28 = vpop.f32.mrf.mxu0  ;;  %v12248_v35 = vadd.f32 %v4011_v30, %v3660_v15  ;;  %v15179_v56 = vld [vmem:[#allocation83_spill] sm:$0xff] }
 0x6b4   : > { %6149 = vperm.xlu1 %7872, %v8093_v14   ;;  %v12237_v47 = vadd.f32 %v4068_v28, %v15176_v4  ;;  %v3856_v9 = vmul.f32 %v15179_v56, %v15178_v63  ;;  %v7452_v4 = vor.u32 %v7702_v3, %v7451_v44  ;;  %v7456_v56 = vor.u32 %v7701_v24, %v7453_v52  ;;  %v8094_v44 = vld [vmem:[%s14312_s7 + $0x60] sm:$0xff] }
 0x6b5   : > { %15177 = vst [vmem:[#allocation87_spill] sm:$0xff] %v12248_v35  ;;  %v5182_v58 = vpop.permute.xlu1 %5181  ;;  %3539 = vmatmul.bf16.gmra.mxu2 %v11980_v49  ;;  %v15181_v35 = vld [vmem:[#allocation56_spill] sm:$0xff]  ;;  %v15186_v52 = vld [vmem:[#allocation73_spill] sm:$0xff] }
 0x6b6   : > { %v3606_v28 = vpop.f32.mrf.mxu3  ;;  %v5233_v30 = vmul.f32 %v5182_v58, %v15144_v62  ;;  %4107 = vmatmul.bf16.gmra.mxu0 %v11745_v32  ;;  %v3857_v49 = vmul.f32 %v15182_v8, %v15181_v35  ;;  %5352 = vmatpush.bf16.msra.mxu2 %v7452_v4  ;;  %v12273_v62 = vpack.c.bf16 %v15185_v11, %v15184_v59  ;;  %v7389_v58 = vld [vmem:[%s14309_s4 + $0x2f8] sm:$0xf0]  ;;  %v15188_v4 = vld [vmem:[#allocation143_spill] sm:$0xff] }
 0x6b7   : > { %v12261_v15 = vadd.f32 %v3606_v28, %v3092_v48  ;;  %v4014_v25 = vpop.f32.mrf.mxu1  ;;  %5441 = vmatpush.bf16.msra.mxu3 %v7456_v56  ;;  %v15189_v56 = vld [vmem:[#allocation46_spill] sm:$0xff] }
 0x6b8   : > { %6157 = vperm.xlu2 %7875, %v8094_v44   ;;  %v12269_v3 = vpack.c.bf16 %v5233_v30, %v5232_v6  ;;  %v12275_v48 = vpack.c.bf16 %v3857_v49, %v3856_v9  ;;  %v3500_v32 = vpop.f32.mrf.mxu2  ;;  %v7685_v6 = vld [vmem:[%s14309_s4 + $0x2f4] sm:$0xf]  ;;  %v3095_v30 = vadd.f32 %v11868_v61, %v15188_v4  ;;  %v15192_v61 = vld [vmem:[#allocation136_spill] sm:$0xff] }
 0x6b9   : > { %v3662_v24 = vadd.f32 %v3500_v32, %v15186_v52  ;;  %v7392_v28 = vor.u32 %v7685_v6, %v7389_v58  ;;  %v15191_v6 = vld [vmem:[#allocation145_spill] sm:$0xff]  ;;  %v15195_v4 = vld [vmem:[#allocation147_spill] sm:$0xff] }
 0x6ba   : > { %15183 = vst [vmem:[#allocation95_spill] sm:$0xff] %v12269_v3  ;;  %v12278_v8 = vpop.permute.xlu2 %4687  ;;  %v5235_v3 = vmul.f32 %v12161_v46, %v15161_v38  ;;  %v2988_v58 = vadd.f32 %v15192_v61, %v15191_v6 }
 0x6bb   : > { %15187 = vst [vmem:[#allocation102_spill] sm:$0xff] %v12278_v8  ;;  %4436 = vmatmul.bf16.gmra.mxu3 %v12273_v62  ;;  %4053 = vmatmul.bf16.gmra.mxu1 %v12275_v48  ;;  %v4070_v9 = vpop.f32.mrf.mxu0  ;;  %v12294_v44 = vadd.f32 %v4014_v25, %v3662_v24  ;;  %v8095_v24 = vld [vmem:[%s14312_s7 + $0x68] sm:$0xff] }
 0x6bc   : > { %7876 = vset.pattern.permute.xlu1 %v14960_v13  ;;  %v12292_v49 = vadd.f32 %v4070_v9, %v15189_v56  ;;  %4927 = vmatpush.bf16.msrb.mxu0 %v7392_v28  ;;  %v12304_v9 = vpop.permute.xlu0 %4675 }
 0x6bd   : > { %5635 = vperm.xlu1 %7876, %v8093_v14   ;;  %15190 = vst [vmem:[#allocation94_spill] sm:$0xff] %v12294_v44  ;;  %v5186_v32 = vpop.permute.xlu1 %5185  ;;  %v15213_v44 = vld [vmem:[#allocation144_spill] sm:$0xff] }
 0x6be   : > { %v3609_v52 = vpop.f32.mrf.mxu3  ;;  %v5234_v59 = vmul.f32 %v5186_v32, %v15164_v51  ;;  %15193 = vst [vmem:[#allocation7_spill] sm:$0xff] %v12304_v9  ;;  %v15198_v32 = vld [vmem:[#allocation186_spill] sm:$0xff] }
 0x6bf   : > { %v12299_v11 = vadd.f32 %v3609_v52, %v3095_v30  ;;  %v4016_v25 = vpop.f32.mrf.mxu1  ;;  %v3097_v30 = vadd.f32 %v11920_v60, %v15195_v4  ;;  %v15201_v60 = vld [vmem:[#allocation116_spill] sm:$0xff] }
 0x6c0   : > { %7878 = vset.pattern.permute.xlu2 %v14960_v13  ;;  %v12306_v14 = vpack.c.bf16 %v5235_v3, %v5234_v59  ;;  %v3502_v46 = vpop.f32.mrf.mxu2  ;;  %v15197_v59 = vld [vmem:[#allocation113_spill] sm:$0xff] }
 0x6c1   : > { %5647 = vperm.xlu2 %7878, %v8095_v24   ;;  %v3664_v38 = vadd.f32 %v3502_v46, %v2988_v58  ;;  %v4695_v52 = vmul.f32 %v15198_v32, %v15197_v59  ;;  %v15207_v59 = vld [vmem:[#allocation152_spill] sm:$0xff] }
 0x6c2   : > { %15194 = vst [vmem:[#allocation99_spill] sm:$0xff] %v12306_v14  ;;  %v15208_v14 = vld [vmem:[#allocation26_spill] sm:$0xff] }
 0x6c3   : > { %v12311_v51 = vpop.permute.xlu2 %6109  ;;  %v4073_v28 = vpop.f32.mrf.mxu0  ;;  %v12319_v3 = vadd.f32 %v4016_v25, %v3664_v38  ;;  %v8096_v25 = vld [vmem:[%s14312_s7 + $0x70] sm:$0xff]  ;;  %v15203_v38 = vld [vmem:[#allocation28_spill] sm:$0xff] }
 0x6c4   : > { %v12316_v56 = vadd.f32 %v4073_v28, %v11543_v40  ;;  %v15202_v40 = vld [vmem:[#allocation86_spill] sm:$0xff]  ;;  %v12340_v32 = vpop.permute.xlu0 %4679 }
 0x6c5   : > { %7877 = vset.pattern.permute.xlu1 %v14999_v16  ;;  %15196 = vst [vmem:[#allocation71_spill] sm:$0xff] %v12319_v3  ;;  %4332 = vmatmul.bf16.vlgmr.msrb.gmra.mxu2 %v12034_v18  ;;  %v4694_v46 = vmul.f32 %v15202_v40, %v15201_v60  ;;  %v3100_v60 = vadd.f32 %v11947_v20, %v15207_v59 }
 0x6c6   : > { %6161 = vperm.xlu1 %7877, %v8095_v24   ;;  %v3611_v6 = vpop.f32.mrf.mxu3  ;;  %v12326_v58 = vpop.permute.xlu1 %4671  ;;  %4112 = vmatmul.bf16.gmra.mxu0 %v11826_v41  ;;  %v15204_v24 = vld [vmem:[#allocation9_spill] sm:$0xff]  ;;  %15205 = vst [vmem:[#allocation110_spill] sm:$0xff] %v12340_v32  ;;  %v5236_v32 = vmul.f32 %v12207_v33, %v15178_v63  ;;  %v15216_v33 = vld [vmem:[#allocation11_spill] sm:$0xff] }
 0x6c7   : > { %v12324_v61 = vadd.f32 %v3611_v6, %v3097_v30  ;;  %15200 = vst [vmem:[#allocation107_spill] sm:$0xff] %v12326_v58  ;;  %v4019_v28 = vpop.f32.mrf.mxu1  ;;  %v12336_v4 = vpack.c.bf16 %v15204_v24, %v15203_v38  ;;  %v12338_v18 = vpack.c.bf16 %v4695_v52, %v4694_v46  ;;  %v15206_v6 = vld [vmem:[#allocation149_spill] sm:$0xff] }
 0x6c8   : > { %v3505_v30 = vpop.f32.mrf.mxu2 }
 0x6c9   : > { %15199 = vst [vmem:[#allocation103_spill] sm:$0xff] %v12324_v61  ;;  %5651 = vperm.xlu2 %7878, %v8096_v25   ;;  %v3666_v41 = vadd.f32 %v3505_v30, %v15206_v6  ;;  %v15212_v6 = vld [vmem:[#allocation154_spill] sm:$0xff] }
 0x6ca   : > { %v2993_v8 = vadd.f32 %v15213_v44, %v15212_v6  ;;  %v15215_v44 = vld [vmem:[#allocation157_spill] sm:$0xff]  ;;  %v15218_v6 = vld [vmem:[#allocation127_spill] sm:$0xff] }
 0x6cb   : > { %4441 = vmatmul.bf16.gmra.mxu3 %v12336_v4  ;;  %4846 = vmatmul.bf16.vlgmr.msrb.gmra.mxu1 %v12338_v18  ;;  %v4075_v40 = vpop.f32.mrf.mxu0  ;;  %v12352_v52 = vadd.f32 %v4019_v28, %v3666_v41 }
 0x6cc   : > { %v12348_v3 = vadd.f32 %v4075_v40, %v15208_v14  ;;  %v12350_v38 = vpop.permute.xlu2 %5599  ;;  %v8097_v14 = vld [vmem:[%s14312_s7 + $0x80] sm:$0xff]  ;;  %v5206_v40 = vpop.permute.xlu0 %5205 }
 0x6cd   : > { %15209 = vst [vmem:[#allocation93_spill] sm:$0xff] %v12350_v38 }
 0x6ce   : > { %15210 = vst [vmem:[#allocation117_spill] sm:$0xff] %v12352_v52  ;;  %6165 = vperm.xlu1 %7877, %v8096_v25   ;;  %v3614_v46 = vpop.f32.mrf.mxu3 }
 0x6cf   : > { %v12354_v24 = vadd.f32 %v3614_v46, %v3100_v60  ;;  %v5198_v30 = vpop.permute.xlu1 %5197  ;;  %v4021_v59 = vpop.f32.mrf.mxu1  ;;  %v3102_v46 = vadd.f32 %v11994_v43, %v15215_v44  ;;  %v7445_v44 = vld [vmem:[%s14309_s4 + $0x368] sm:$0xf0] }
 0x6d0   : > { %v5237_v20 = vmul.f32 %v5198_v30, %v15181_v35  ;;  %v3507_v28 = vpop.f32.mrf.mxu2  ;;  %v7443_v35 = vld [vmem:[%s14309_s4 + $0x360] sm:$0xf]  ;;  %v7700_v30 = vld [vmem:[%s14309_s4 + $0x364] sm:$0xf0] }
 0x6d1   : > { %15211 = vst [vmem:[#allocation111_spill] sm:$0xff] %v12354_v24  ;;  %7881 = vset.pattern.permute.xlu2 %v14999_v16  ;;  %v3668_v25 = vadd.f32 %v3507_v28, %v2993_v8  ;;  %v7699_v8 = vld [vmem:[%s14309_s4 + $0x364] sm:$0xf] }
 0x6d2   : > { %6173 = vperm.xlu2 %7881, %v8097_v14   ;;  %v12365_v60 = vpack.c.bf16 %v5237_v20, %v5236_v32  ;;  %v15219_v20 = vld [vmem:[#allocation91_spill] sm:$0xff] }
 0x6d3   : > { %v4078_v41 = vpop.f32.mrf.mxu0  ;;  %v12381_v32 = vadd.f32 %v4021_v59, %v3668_v25  ;;  %v4697_v43 = vmul.f32 %v15219_v20, %v15218_v6  ;;  %v8098_v59 = vld [vmem:[%s14312_s7 + $0x78] sm:$0xff]  ;;  %v7448_v25 = vor.u32 %v7699_v8, %v7445_v44  ;;  %v15221_v20 = vld [vmem:[#allocation130_spill] sm:$0xff] }
 0x6d4   : > { %15214 = vst [vmem:[#allocation47_spill] sm:$0xff] %v12365_v60  ;;  %v12370_v63 = vadd.f32 %v4078_v41, %v15216_v33  ;;  %v7444_v41 = vor.u32 %v7700_v30, %v7443_v35  ;;  %v15222_v60 = vld [vmem:[#allocation50_spill] sm:$0xff]  ;;  %v15224_v30 = vld [vmem:[#allocation61_spill] sm:$0xff] }
 0x6d5   : > { %15217 = vst [vmem:[#allocation114_spill] sm:$0xff] %v12381_v32  ;;  %4337 = vmatmul.bf16.gmra.mxu2 %v12117_v42  ;;  %v4696_v32 = vmul.f32 %v15222_v60, %v15221_v20  ;;  %v15223_v42 = vld [vmem:[#allocation62_spill] sm:$0xff]  ;;  %5442 = vmatpush.bf16.msra.mxu3 %v7448_v25 }
 0x6d6   : > { %v12385_v14 = vpop.permute.xlu2 %6121  ;;  %7880 = vset.pattern.permute.xlu1 %v14960_v13  ;;  %v3616_v28 = vpop.f32.mrf.mxu3  ;;  %4117 = vmatmul.bf16.gmra.mxu0 %v11907_v50  ;;  %v5239_v35 = vmul.f32 %v5206_v40, %v15223_v42  ;;  %v7683_v50 = vld [vmem:[%s14309_s4 + $0x2e4] sm:$0xf]  ;;  %v7381_v60 = vld [vmem:[%s14309_s4 + $0x2e8] sm:$0xf0] }
 0x6d7   : > { %v12392_v33 = vadd.f32 %v3616_v28, %v3102_v46  ;;  %5655 = vperm.xlu1 %7880, %v8098_v59   ;;  %v5202_v52 = vpop.permute.xlu1 %5201  ;;  %5353 = vmatpush.bf16.msra.mxu2 %v7444_v41  ;;  %v15225_v46 = vld [vmem:[#allocation5_spill] sm:$0xff]  ;;  %v15226_v28 = vld [vmem:[#allocation34_spill] sm:$0xff]  ;;  %v12412_v8 = vpack.c.bf16 %v4697_v43, %v4696_v32 }
 0x6d8   : > { %v5238_v38 = vmul.f32 %v5202_v52, %v15224_v30  ;;  %v4024_v9 = vpop.f32.mrf.mxu1  ;;  %v12404_v58 = vpack.c.bf16 %v15226_v28, %v15225_v46  ;;  %v3510_v40 = vpop.f32.mrf.mxu2  ;;  %v7384_v52 = vor.u32 %v7683_v50, %v7381_v60  ;;  %v15228_v44 = vld [vmem:[#allocation66_spill] sm:$0xff]  ;;  %v15229_v32 = vld [vmem:[#allocation161_spill] sm:$0xff]  ;;  %v15230_v30 = vld [vmem:[#allocation36_spill] sm:$0xff] }
 0x6d9   : > { %15220 = vst [vmem:[#allocation167_spill] sm:$0xff] %v12392_v33  ;;  %v3670_v59 = vadd.f32 %v3510_v40, %v15228_v44  ;;  %v8099_v25 = vld [vmem:[%s14312_s7 + $0x88] sm:$0xff]  ;;  %v3105_v43 = vadd.f32 %v12015_v57, %v15229_v32  ;;  %v15233_v44 = vld [vmem:[#allocation164_spill] sm:$0xff] }
 0x6da   : > { %7884 = vset.pattern.permute.xlu2 %v14960_v13  ;;  %v12415_v41 = vpack.c.bf16 %v5239_v35, %v5238_v38  ;;  %4928 = vmatpush.bf16.msrb.mxu0 %v7384_v52 }
 0x6db   : > { %5663 = vperm.xlu2 %7884, %v8099_v25   ;;  %4446 = vmatmul.bf16.gmra.mxu3 %v12404_v58  ;;  %v4080_v42 = vpop.f32.mrf.mxu0  ;;  %v12428_v38 = vadd.f32 %v4024_v9, %v3670_v59  ;;  %v8100_v9 = vld [vmem:[%s14312_s7 + $0x98] sm:$0xff] }
 0x6dc   : > { %15227 = vst [vmem:[#allocation119_spill] sm:$0xff] %v12415_v41  ;;  %4851 = vmatmul.bf16.gmra.mxu1 %v12412_v8  ;;  %v12426_v50 = vadd.f32 %v4080_v42, %v15230_v30  ;;  %v15234_v41 = vld [vmem:[#allocation153_spill] sm:$0xff]  ;;  %v15236_v42 = vld [vmem:[#allocation90_spill] sm:$0xff] }
 0x6dd   : > { %15231 = vst [vmem:[#allocation123_spill] sm:$0xff] %v12428_v38  ;;  %v2998_v46 = vadd.f32 %v15234_v41, %v15233_v44  ;;  %v15240_v44 = vld [vmem:[#allocation105_spill] sm:$0xff] }
 0x6de   : > { %v3619_v35 = vpop.f32.mrf.mxu3  ;;  %v12433_v40 = vpop.permute.xlu2 %6125 }
 0x6df   : > { %v12430_v60 = vadd.f32 %v3619_v35, %v3105_v43  ;;  %7882 = vset.pattern.permute.xlu1 %v14999_v16  ;;  %v3107_v43 = vadd.f32 %v12042_v19, %v15236_v42  ;;  %v15239_v35 = vld [vmem:[#allocation141_spill] sm:$0xff]  ;;  %v8101_v19 = vld [vmem:[%s14312_s7 + $0x90] sm:$0xff] }
 0x6e0   : > { %6177 = vperm.xlu1 %7882, %v8099_v25   ;;  %v4026_v52 = vpop.f32.mrf.mxu1  ;;  %v12437_v28 = vpop.permute.xlu1 %4691  ;;  %v15237_v25 = vld [vmem:[#allocation84_spill] sm:$0xff]  ;;  %v4698_v38 = vmul.f32 %v15240_v44, %v15239_v35 }
 0x6e1   : > { %15232 = vst [vmem:[#allocation125_spill] sm:$0xff] %v12430_v60  ;;  %v3512_v57 = vpop.f32.mrf.mxu2 }
 0x6e2   : > { %15235 = vst [vmem:[#allocation108_spill] sm:$0xff] %v12437_v28  ;;  %v3672_v32 = vadd.f32 %v3512_v57, %v2998_v46  ;;  %v15243_v28 = vld [vmem:[#allocation85_spill] sm:$0xff] }
 0x6e3   : > { %7885 = vset.pattern.permute.xlu2 %v14999_v16  ;;  %v4083_v59 = vpop.f32.mrf.mxu0 }
 0x6e4   : > { %6185 = vperm.xlu2 %7885, %v8100_v9   ;;  %v12446_v30 = vadd.f32 %v4083_v59, %v15237_v25  ;;  %v12448_v41 = vadd.f32 %v4026_v52, %v3672_v32  ;;  %v15242_v9 = vld [vmem:[#allocation138_spill] sm:$0xff]  ;;  %v15245_v59 = vld [vmem:[#allocation69_spill] sm:$0xff] }
 0x6e5   : > { %4342 = vmatmul.bf16.gmra.mxu2 %v12197_v31  ;;  %v4699_v60 = vmul.f32 %v15243_v28, %v15242_v9  ;;  %v15244_v32 = vld [vmem:[#allocation70_spill] sm:$0xff] }
 0x6e6   : > { %15238 = vst [vmem:[#allocation131_spill] sm:$0xff] %v12448_v41  ;;  %v3621_v46 = vpop.f32.mrf.mxu3  ;;  %4122 = vmatmul.bf16.gmra.mxu0 %v11982_v29  ;;  %v12463_v42 = vpack.c.bf16 %v15245_v59, %v15244_v32  ;;  %v6236_v29 = vmul.f32 %v12311_v51, %v15221_v20  ;;  %v15249_v59 = vld [vmem:[#allocation168_spill] sm:$0xff] }
 0x6e7   : > { %v12453_v57 = vadd.f32 %v3621_v46, %v3107_v43  ;;  %v12465_v25 = vpack.c.bf16 %v4699_v60, %v4698_v38  ;;  %v12469_v44 = vpop.permute.xlu2 %5615  ;;  %v15247_v46 = vld [vmem:[#allocation52_spill] sm:$0xff]  ;;  %v8102_v38 = vld [vmem:[%s14312_s7 + $0xa0] sm:$0xff]  ;;  %v3110_v51 = vadd.f32 %v12077_v55, %v15249_v59  ;;  %v6239_v55 = vmul.f32 %v12385_v14, %v15242_v9  ;;  %v8103_v14 = vld [vmem:[%s14312_s7 + $0xa8] sm:$0xff] }
 0x6e8   : > { %6181 = vperm.xlu1 %7882, %v8101_v19   ;;  %v4029_v52 = vpop.f32.mrf.mxu1  ;;  %15246 = vst [vmem:[#allocation170_spill] sm:$0xff] %v12469_v44  ;;  %v15253_v44 = vld [vmem:[#allocation45_spill] sm:$0xff] }
 0x6e9   : > { %15241 = vst [vmem:[#allocation128_spill] sm:$0xff] %v12453_v57  ;;  %v6114_v31 = vpop.permute.xlu1 %6113  ;;  %v3515_v43 = vpop.f32.mrf.mxu2 }
 0x6ea   : > { %v6237_v28 = vmul.f32 %v6114_v31, %v15218_v6  ;;  %v3674_v41 = vadd.f32 %v3515_v43, %v15247_v46  ;;  %v12474_v57 = vpop.permute.xlu0 %5595  ;;  %v15251_v6 = vld [vmem:[#allocation92_spill] sm:$0xff] }
 0x6eb   : > { %4451 = vmatmul.bf16.gmra.mxu3 %v12463_v42  ;;  %15248 = vst [vmem:[#allocation126_spill] sm:$0xff] %v12474_v57  ;;  %v4085_v60 = vpop.f32.mrf.mxu0  ;;  %v15254_v57 = vld [vmem:[#allocation162_spill] sm:$0xff] }
 0x6ec   : > { %4856 = vmatmul.bf16.gmra.mxu1 %v12465_v25  ;;  %6189 = vperm.xlu2 %7885, %v8102_v38   ;;  %v12482_v20 = vpack.c.bf16 %v6237_v28, %v6236_v29  ;;  %v12485_v31 = vadd.f32 %v4085_v60, %v15251_v6  ;;  %v12487_v43 = vadd.f32 %v4029_v52, %v3674_v41  ;;  %v15255_v52 = vld [vmem:[#allocation173_spill] sm:$0xff]  ;;  %v15262_v6 = vld [vmem:[#allocation146_spill] sm:$0xff] }
 0x6ed   : > { %v3003_v33 = vadd.f32 %v15254_v57, %v15253_v44  ;;  %v3112_v28 = vadd.f32 %v12132_v12, %v15255_v52  ;;  %v15258_v57 = vld [vmem:[#allocation151_spill] sm:$0xff] }
 0x6ee   : > { %15250 = vst [vmem:[#allocation172_spill] sm:$0xff] %v12482_v20  ;;  %v3624_v46 = vpop.f32.mrf.mxu3 }
 0x6ef   : > { %15252 = vst [vmem:[#allocation132_spill] sm:$0xff] %v12487_v43  ;;  %v12489_v32 = vadd.f32 %v3624_v46, %v3110_v51  ;;  %v12500_v60 = vpop.permute.xlu2 %5619  ;;  %v15263_v46 = vld [vmem:[#allocation183_spill] sm:$0xff] }
 0x6f0   : > { %7886 = vset.pattern.permute.xlu1 %v14960_v13  ;;  %v4031_v38 = vpop.f32.mrf.mxu1  ;;  %15256 = vst [vmem:[#allocation135_spill] sm:$0xff] %v12500_v60 }
 0x6f1   : > { %5667 = vperm.xlu1 %7886, %v8101_v19   ;;  %v6118_v24 = vpop.permute.xlu1 %6117  ;;  %v3517_v61 = vpop.f32.mrf.mxu2 }
 0x6f2   : > { %v6238_v59 = vmul.f32 %v6118_v24, %v15239_v35  ;;  %v3676_v29 = vadd.f32 %v3517_v61, %v3003_v33  ;;  %v15260_v61 = vld [vmem:[#allocation148_spill] sm:$0xff]  ;;  %v15261_v33 = vld [vmem:[#allocation190_spill] sm:$0xff]  ;;  %v12514_v9 = vpop.permute.xlu0 %5607 }
 0x6f3   : > { %v4088_v41 = vpop.f32.mrf.mxu0  ;;  %v4700_v35 = vmul.f32 %v15261_v33, %v15260_v61  ;;  %v7681_v33 = vld [vmem:[%s14309_s4 + $0x2d4] sm:$0xf] }
 0x6f4   : > { %7888 = vset.pattern.permute.xlu2 %v14960_v13  ;;  %v12502_v51 = vpack.c.bf16 %v6239_v55, %v6238_v59  ;;  %v12505_v19 = vadd.f32 %v4088_v41, %v15258_v57  ;;  %v12510_v24 = vadd.f32 %v4031_v38, %v3676_v29  ;;  %v4701_v55 = vmul.f32 %v15263_v46, %v15262_v6  ;;  %v7435_v38 = vld [vmem:[%s14309_s4 + $0x350] sm:$0xf]  ;;  %v7698_v59 = vld [vmem:[%s14309_s4 + $0x354] sm:$0xf0]  ;;  %v7697_v29 = vld [vmem:[%s14309_s4 + $0x354] sm:$0xf] }
 0x6f5   : > { %5679 = vperm.xlu2 %7888, %v8103_v14   ;;  %4347 = vmatmul.bf16.gmra.mxu2 %v12273_v62  ;;  %v15264_v41 = vld [vmem:[#allocation24_spill] sm:$0xff] }
 0x6f6   : > { %15257 = vst [vmem:[#allocation137_spill] sm:$0xff] %v12502_v51  ;;  %v3626_v12 = vpop.f32.mrf.mxu3  ;;  %4127 = vmatmul.bf16.gmra.mxu0 %v12036_v27  ;;  %v15265_v27 = vld [vmem:[#allocation23_spill] sm:$0xff]  ;;  %v7437_v57 = vld [vmem:[%s14309_s4 + $0x358] sm:$0xf0]  ;;  %v12545_v46 = vpack.c.bf16 %v4701_v55, %v4700_v35 }
 0x6f7   : > { %15259 = vst [vmem:[#allocation124_spill] sm:$0xff] %v12510_v24  ;;  %v12517_v44 = vadd.f32 %v3626_v12, %v3112_v28  ;;  %v12534_v52 = vpack.c.bf16 %v15265_v27, %v15264_v41  ;;  %v7436_v28 = vor.u32 %v7698_v59, %v7435_v38  ;;  %v7373_v12 = vld [vmem:[%s14309_s4 + $0x2d8] sm:$0xf0]  ;;  %v7440_v20 = vor.u32 %v7697_v29, %v7437_v57  ;;  %v15266_v27 = vld [vmem:[#allocation77_spill] sm:$0xff]  ;;  %v15267_v24 = vld [vmem:[#allocation175_spill] sm:$0xff] }
 0x6f8   : > { %v4034_v62 = vpop.f32.mrf.mxu1  ;;  %v7376_v41 = vor.u32 %v7681_v33, %v7373_v12  ;;  %v3115_v43 = vadd.f32 %v12167_v17, %v15267_v24  ;;  %v12562_v29 = vpop.permute.xlu2 %6141  ;;  %v15271_v17 = vld [vmem:[#allocation169_spill] sm:$0xff]  ;;  %v15272_v33 = vld [vmem:[#allocation180_spill] sm:$0xff] }
 0x6f9   : > { %7887 = vset.pattern.permute.xlu1 %v14999_v16  ;;  %v3520_v51 = vpop.f32.mrf.mxu2  ;;  %5354 = vmatpush.bf16.msra.mxu2 %v7436_v28  ;;  %v15270_v28 = vld [vmem:[#allocation178_spill] sm:$0xff]  ;;  %v3117_v12 = vadd.f32 %v12213_v36, %v15272_v33 }
 0x6fa   : > { %6193 = vperm.xlu1 %7887, %v8103_v14   ;;  %v3678_v38 = vadd.f32 %v3520_v51, %v15266_v27  ;;  %v12548_v59 = vpop.permute.xlu1 %5603  ;;  %5443 = vmatpush.bf16.msra.mxu3 %v7440_v20  ;;  %v8104_v14 = vld [vmem:[%s14312_s7 + $0xb0] sm:$0xff]  ;;  %v12566_v20 = vpop.permute.xlu0 %5611  ;;  %v3008_v24 = vadd.f32 %v15271_v17, %v15270_v28  ;;  %v7365_v36 = vld [vmem:[%s14309_s4 + $0x2c8] sm:$0xf0]  ;;  %v15274_v17 = vld [vmem:[#allocation156_spill] sm:$0xff] }
 0x6fb   : > { %4456 = vmatmul.bf16.gmra.mxu3 %v12534_v52  ;;  %v4090_v60 = vpop.f32.mrf.mxu0  ;;  %4929 = vmatpush.bf16.msrb.mxu0 %v7376_v41  ;;  %15269 = vst [vmem:[#allocation182_spill] sm:$0xff] %v12566_v20 }
 0x6fc   : > { %4861 = vmatmul.bf16.gmra.mxu1 %v12545_v46  ;;  %v12555_v35 = vadd.f32 %v4090_v60, %v11815_v0  ;;  %v12560_v51 = vadd.f32 %v4034_v62, %v3678_v38  ;;  %v6240_v38 = vmul.f32 %v12433_v40, %v15260_v61 }
 0x6fd   : > { %5683 = vperm.xlu2 %7888, %v8104_v14  }
 0x6fe   : > { %15268 = vst [vmem:[#allocation140_spill] sm:$0xff] %v12560_v51  ;;  %v3629_v55 = vpop.f32.mrf.mxu3  ;;  %v15281_v51 = vld [vmem:[#allocation37_spill] sm:$0xff] }
 0x6ff   : > { %v12564_v27 = vadd.f32 %v3629_v55, %v3115_v43 }
 0x700   : > { %v4036_v0 = vpop.f32.mrf.mxu1 }
 0x701   : > { %v3522_v60 = vpop.f32.mrf.mxu2 }
 0x702   : > { %6197 = vperm.xlu1 %7887, %v8104_v14   ;;  %v3680_v57 = vadd.f32 %v3522_v60, %v3008_v24  ;;  %v7679_v14 = vld [vmem:[%s14309_s4 + $0x2c4] sm:$0xf]  ;;  %v15275_v24 = vld [vmem:[#allocation195_spill] sm:$0xff] }
 0x703   : > { %v6130_v41 = vpop.permute.xlu1 %6129  ;;  %v4093_v62 = vpop.f32.mrf.mxu0  ;;  %v4703_v40 = vmul.f32 %v15275_v24, %v15274_v17 }
 0x704   : > { %v6241_v43 = vmul.f32 %v6130_v41, %v15262_v6  ;;  %v12576_v55 = vadd.f32 %v4093_v62, %v11847_v1  ;;  %v12585_v28 = vadd.f32 %v4036_v0, %v3680_v57  ;;  %v8105_v1 = vld [vmem:[%s14312_s7 + $0xc0] sm:$0xff]  ;;  %v7368_v6 = vor.u32 %v7679_v14, %v7365_v36  ;;  %v15277_v0 = vld [vmem:[#allocation158_spill] sm:$0xff]  ;;  %v12600_v62 = vpop.permute.xlu2 %5631 }
 0x705   : > { %7891 = vset.pattern.permute.xlu2 %v14999_v16  ;;  %4352 = vmatmul.bf16.gmra.mxu2 %v12336_v4  ;;  %v15278_v57 = vld [vmem:[#allocation29_spill] sm:$0xff]  ;;  %15279 = vst [vmem:[#allocation56_spill] sm:$0xff] %v12600_v62  ;;  %v7677_v4 = vld [vmem:[%s14309_s4 + $0x2b4] sm:$0xf]  ;;  %v15282_v36 = vld [vmem:[#allocation30_spill] sm:$0xff] }
 0x706   : > { %15273 = vst [vmem:[#allocation57_spill] sm:$0xff] %v12585_v28  ;;  %6205 = vperm.xlu2 %7891, %v8105_v1   ;;  %v3631_v61 = vpop.f32.mrf.mxu3  ;;  %v12593_v60 = vpack.c.bf16 %v6241_v43, %v6240_v38  ;;  %4132 = vmatmul.bf16.gmra.mxu0 %v12125_v53  ;;  %v4702_v41 = vmul.f32 %v15278_v57, %v15277_v0  ;;  %v15280_v28 = vld [vmem:[#allocation25_spill] sm:$0xff]  ;;  %v6138_v38 = vpop.permute.xlu0 %6137 }
 0x707   : > { %v12595_v33 = vadd.f32 %v3631_v61, %v3117_v12  ;;  %4930 = vmatpush.bf16.msrb.mxu0 %v7368_v6  ;;  %v12604_v1 = vpack.c.bf16 %v15281_v51, %v15280_v28  ;;  %v7357_v12 = vld [vmem:[%s14309_s4 + $0x2b8] sm:$0xf0] }
 0x708   : > { %15276 = vst [vmem:[#allocation83_spill] sm:$0xff] %v12593_v60  ;;  %v4039_v24 = vpop.f32.mrf.mxu1  ;;  %v12612_v53 = vpack.c.bf16 %v4703_v40, %v4702_v41  ;;  %v7360_v14 = vor.u32 %v7677_v4, %v7357_v12  ;;  %v8106_v6 = vld [vmem:[%s14312_s7 + $0xb8] sm:$0xff]  ;;  %v6243_v40 = vmul.f32 %v6138_v38, %v15274_v17  ;;  %v7675_v12 = vld [vmem:[%s14309_s4 + $0x2a4] sm:$0xf] }
 0x709   : > { %v3525_v43 = vpop.f32.mrf.mxu2  ;;  %v15286_v38 = vld [vmem:[#allocation177_spill] sm:$0xff]  ;;  %v15292_v28 = vld [vmem:[#allocation88_spill] sm:$0xff] }
 0x70a   : > { %7890 = vset.pattern.permute.xlu1 %v14960_v13  ;;  %v3682_v61 = vadd.f32 %v3525_v43, %v15282_v36  ;;  %v7349_v43 = vld [vmem:[%s14309_s4 + $0x2a8] sm:$0xf0] }
 0x70b   : > { %5687 = vperm.xlu1 %7890, %v8106_v6   ;;  %4461 = vmatmul.bf16.gmra.mxu3 %v12604_v1  ;;  %v6134_v57 = vpop.permute.xlu1 %6133  ;;  %v4095_v60 = vpop.f32.mrf.mxu0  ;;  %v7352_v6 = vor.u32 %v7675_v12, %v7349_v43 }
 0x70c   : > { %4866 = vmatmul.bf16.gmra.mxu1 %v12612_v53  ;;  %4931 = vmatpush.bf16.msrb.mxu0 %v7360_v14  ;;  %v6242_v41 = vmul.f32 %v6134_v57, %v15277_v0  ;;  %v12624_v4 = vadd.f32 %v4095_v60, %v11893_v26  ;;  %v12632_v36 = vadd.f32 %v4039_v24, %v3682_v61  ;;  %v8107_v26 = vld [vmem:[%s14312_s7 + $0xc8] sm:$0xff]  ;;  %v7673_v61 = vld [vmem:[%s14309_s4 + $0x294] sm:$0xf]  ;;  %v12651_v12 = vpop.permute.xlu2 %6153 }
 0x70d   : > { %v15285_v60 = vld [vmem:[#allocation98_spill] sm:$0xff] }
 0x70e   : > { %15283 = vst [vmem:[#allocation176_spill] sm:$0xff] %v12632_v36  ;;  %7894 = vset.pattern.permute.xlu2 %v14960_v13  ;;  %v4422_v14 = vpop.f32.mrf.mxu3  ;;  %v12635_v17 = vpack.c.bf16 %v6243_v40, %v6242_v41  ;;  %v3013_v57 = vadd.f32 %v15286_v38, %v15285_v60  ;;  %v7341_v40 = vld [vmem:[%s14309_s4 + $0x298] sm:$0xf0]  ;;  %v7671_v38 = vld [vmem:[%s14309_s4 + $0x284] sm:$0xf] }
 0x70f   : > { %v12638_v0 = vadd.f32 %v4422_v14, %v12237_v47  ;;  %5695 = vperm.xlu2 %7894, %v8107_v26   ;;  %v7344_v41 = vor.u32 %v7673_v61, %v7341_v40  ;;  %v7333_v61 = vld [vmem:[%s14309_s4 + $0x288] sm:$0xf0]  ;;  %v15295_v36 = vld [vmem:[#allocation33_spill] sm:$0xff] }
 0x710   : > { %15284 = vst [vmem:[#allocation73_spill] sm:$0xff] %v12635_v17  ;;  %4932 = vmatpush.bf16.msrb.mxu0 %v7352_v6  ;;  %v4041_v24 = vpop.f32.mrf.mxu1 }
 0x711   : > { %v3527_v47 = vpop.f32.mrf.mxu2 }
 0x712   : > { %v3684_v43 = vadd.f32 %v3527_v47, %v3013_v57  ;;  %v15289_v57 = vld [vmem:[#allocation166_spill] sm:$0xff] }
 0x713   : > { %7892 = vset.pattern.permute.xlu1 %v14999_v16  ;;  %v4098_v14 = vpop.f32.mrf.mxu0  ;;  %v15290_v47 = vld [vmem:[#allocation18_spill] sm:$0xff] }
 0x714   : > { %6209 = vperm.xlu1 %7892, %v8107_v26   ;;  %4933 = vmatpush.bf16.msrb.mxu0 %v7344_v41  ;;  %v12655_v6 = vadd.f32 %v4098_v14, %v11929_v39  ;;  %v12657_v60 = vpop.permute.xlu1 %5623  ;;  %v12665_v40 = vadd.f32 %v4041_v24, %v3684_v43  ;;  %v4705_v26 = vmul.f32 %v15290_v47, %v15289_v57  ;;  %v15291_v14 = vld [vmem:[#allocation72_spill] sm:$0xff]  ;;  %v15294_v43 = vld [vmem:[#allocation6_spill] sm:$0xff] }
 0x715   : > { %15287 = vst [vmem:[#allocation143_spill] sm:$0xff] %v12657_v60  ;;  %4357 = vmatmul.bf16.gmra.mxu2 %v12404_v58  ;;  %v7336_v39 = vor.u32 %v7671_v38, %v7333_v61  ;;  %v4704_v51 = vmul.f32 %v15292_v28, %v15291_v14  ;;  %v8108_v24 = vld [vmem:[%s14312_s7 + $0xd8] sm:$0xff]  ;;  %v7427_v58 = vld [vmem:[%s14309_s4 + $0x340] sm:$0xf]  ;;  %v7429_v47 = vld [vmem:[%s14309_s4 + $0x348] sm:$0xf0] }
 0x716   : > { %15288 = vst [vmem:[#allocation46_spill] sm:$0xff] %v12665_v40  ;;  %v4424_v17 = vpop.f32.mrf.mxu3  ;;  %4137 = vmatmul.bf16.gmra.mxu0 %v12205_v45  ;;  %v7695_v45 = vld [vmem:[%s14309_s4 + $0x344] sm:$0xf]  ;;  %v15293_v28 = vld [vmem:[#allocation8_spill] sm:$0xff] }
 0x717   : > { %v12671_v41 = vadd.f32 %v4424_v17, %v12292_v49  ;;  %7895 = vset.pattern.permute.xlu2 %v14999_v16  ;;  %v7696_v49 = vld [vmem:[%s14309_s4 + $0x344] sm:$0xf0]  ;;  %v12691_v38 = vpack.c.bf16 %v15294_v43, %v15293_v28  ;;  %v7432_v40 = vor.u32 %v7695_v45, %v7429_v47  ;;  %v8109_v28 = vld [vmem:[%s14312_s7 + $0xd0] sm:$0xff]  ;;  %v12717_v43 = vpop.permute.xlu0 %5627 }
 0x718   : > { %6217 = vperm.xlu2 %7895, %v8108_v24   ;;  %4934 = vmatpush.bf16.msrb.mxu0 %v7336_v39  ;;  %v4044_v17 = vpop.f32.mrf.mxu1  ;;  %v7428_v61 = vor.u32 %v7696_v49, %v7427_v58  ;;  %v12696_v39 = vpack.c.bf16 %v4705_v26, %v4704_v51  ;;  %v12704_v49 = vpop.permute.xlu2 %6157  ;;  %15297 = vst [vmem:[#allocation136_spill] sm:$0xff] %v12717_v43 }
 0x719   : > { %v3530_v24 = vpop.f32.mrf.mxu2  ;;  %5444 = vmatpush.bf16.msra.mxu3 %v7432_v40  ;;  %v15298_v40 = vld [vmem:[#allocation187_spill] sm:$0xff] }
 0x71a   : > { %v3686_v62 = vadd.f32 %v3530_v24, %v15295_v36  ;;  %5355 = vmatpush.bf16.msra.mxu2 %v7428_v61  ;;  %v6244_v61 = vmul.f32 %v12562_v29, %v15291_v14 }
 0x71b   : > { %4466 = vmatmul.bf16.gmra.mxu3 %v12691_v38  ;;  %v4100_v58 = vpop.f32.mrf.mxu0 }
 0x71c   : > { %4871 = vmatmul.bf16.gmra.mxu1 %v12696_v39  ;;  %6213 = vperm.xlu1 %7892, %v8109_v28   ;;  %v12707_v51 = vadd.f32 %v4100_v58, %v11968_v21  ;;  %v12709_v26 = vadd.f32 %v4044_v17, %v3686_v62  ;;  %v8110_v21 = vld [vmem:[%s14312_s7 + $0xe0] sm:$0xff]  ;;  %v15299_v62 = vld [vmem:[#allocation76_spill] sm:$0xff] }
 0x71d   : > { %v3018_v17 = vadd.f32 %v15299_v62, %v15298_v40 }
 0x71e   : > { %15296 = vst [vmem:[#allocation145_spill] sm:$0xff] %v12709_v26  ;;  %v6146_v36 = vpop.permute.xlu1 %6145  ;;  %v4427_v45 = vpop.f32.mrf.mxu3 }
 0x71f   : > { %v6245_v47 = vmul.f32 %v6146_v36, %v15289_v57  ;;  %v12715_v24 = vadd.f32 %v4427_v45, %v12316_v56  ;;  %v15302_v36 = vld [vmem:[#allocation174_spill] sm:$0xff]  ;;  %v15303_v45 = vld [vmem:[#allocation196_spill] sm:$0xff] }
 0x720   : > { %6221 = vperm.xlu2 %7895, %v8110_v21   ;;  %v4046_v26 = vpop.f32.mrf.mxu1  ;;  %v4706_v21 = vmul.f32 %v15303_v45, %v15302_v36 }
 0x721   : > { %v12724_v58 = vpack.c.bf16 %v6245_v47, %v6244_v61  ;;  %v3532_v60 = vpop.f32.mrf.mxu2  ;;  %v15304_v61 = vld [vmem:[#allocation171_spill] sm:$0xff] }
 0x722   : > { %v3688_v29 = vadd.f32 %v3532_v60, %v3018_v17  ;;  %v6247_v47 = vmul.f32 %v12651_v12, %v15304_v61  ;;  %v12737_v60 = vpop.permute.xlu2 %5647  ;;  %v8111_v12 = vld [vmem:[%s14312_s7 + $0xe8] sm:$0xff]  ;;  %v15308_v17 = vld [vmem:[#allocation21_spill] sm:$0xff] }
 0x723   : > { %15300 = vst [vmem:[#allocation147_spill] sm:$0xff] %v12724_v58  ;;  %v4103_v57 = vpop.f32.mrf.mxu0 }
 0x724   : > { %7896 = vset.pattern.permute.xlu1 %v14960_v13  ;;  %v12728_v56 = vadd.f32 %v4103_v57, %v12002_v23  ;;  %v12730_v14 = vadd.f32 %v4046_v26, %v3688_v29  ;;  %15305 = vst [vmem:[#allocation86_spill] sm:$0xff] %v12737_v60  ;;  %v15310_v57 = vld [vmem:[#allocation31_spill] sm:$0xff] }
 0x725   : > { %5699 = vperm.xlu1 %7896, %v8109_v28   ;;  %4362 = vmatmul.bf16.gmra.mxu2 %v12463_v42  ;;  %v15306_v28 = vld [vmem:[#allocation193_spill] sm:$0xff] }
 0x726   : > { %15301 = vst [vmem:[#allocation186_spill] sm:$0xff] %v12730_v14  ;;  %v6150_v43 = vpop.permute.xlu1 %6149  ;;  %v4429_v20 = vpop.f32.mrf.mxu3  ;;  %4142 = vmatmul.bf16.gmra.mxu0 %v12275_v48  ;;  %v4707_v26 = vmul.f32 %v15306_v28, %v15304_v61  ;;  %v15370_v14 = vld [vmem:[#allocation19_spill] sm:$0xff] }
 0x727   : > { %v6246_v40 = vmul.f32 %v6150_v43, %v15302_v36  ;;  %v12741_v23 = vadd.f32 %v4429_v20, %v12348_v3  ;;  %v15309_v43 = vld [vmem:[#allocation40_spill] sm:$0xff]  ;;  %v12758_v48 = vpop.permute.xlu0 %5639 }
 0x728   : > { %7898 = vset.pattern.permute.xlu2 %v14960_v13  ;;  %v4049_v42 = vpop.f32.mrf.mxu1  ;;  %v12754_v29 = vpack.c.bf16 %v15309_v43, %v15308_v17  ;;  %v12756_v3 = vpack.c.bf16 %v4707_v26, %v4706_v21  ;;  %v15312_v26 = vld [vmem:[#allocation192_spill] sm:$0xff] }
 0x729   : > { %v12747_v62 = vpack.c.bf16 %v6247_v47, %v6246_v40  ;;  %5711 = vperm.xlu2 %7898, %v8111_v12   ;;  %v3535_v20 = vpop.f32.mrf.mxu2  ;;  %v7421_v17 = vld [vmem:[%s14309_s4 + $0x338] sm:$0xf0] }
 0x72a   : > { %v3690_v36 = vadd.f32 %v3535_v20, %v15310_v57  ;;  %v15313_v20 = vld [vmem:[#allocation189_spill] sm:$0xff] }
 0x72b   : > { %15307 = vst [vmem:[#allocation149_spill] sm:$0xff] %v12747_v62  ;;  %4471 = vmatmul.bf16.gmra.mxu3 %v12754_v29  ;;  %v4105_v45 = vpop.f32.mrf.mxu0  ;;  %v3023_v57 = vadd.f32 %v15313_v20, %v15312_v26  ;;  %v12776_v62 = vpop.permute.xlu2 %5651  ;;  %v7693_v26 = vld [vmem:[%s14309_s4 + $0x334] sm:$0xf] }
 0x72c   : > { %4876 = vmatmul.bf16.gmra.mxu1 %v12756_v3  ;;  %v12764_v61 = vadd.f32 %v4105_v45, %v12024_v7  ;;  %v12767_v47 = vadd.f32 %v4049_v42, %v3690_v36  ;;  %15314 = vst [vmem:[#allocation26_spill] sm:$0xff] %v12776_v62  ;;  %v8112_v7 = vld [vmem:[%s14312_s7 + $0xf0] sm:$0xff] }
 0x72d   : > { %7897 = vset.pattern.permute.xlu1 %v14999_v16  ;;  %v7419_v45 = vld [vmem:[%s14309_s4 + $0x330] sm:$0xf] }
 0x72e   : > { %15311 = vst [vmem:[#allocation152_spill] sm:$0xff] %v12767_v47  ;;  %6225 = vperm.xlu1 %7897, %v8111_v12   ;;  %v4432_v21 = vpop.f32.mrf.mxu3  ;;  %v7424_v47 = vor.u32 %v7693_v26, %v7421_v17 }
 0x72f   : > { %v12770_v40 = vadd.f32 %v4432_v21, %v12370_v63  ;;  %v12772_v28 = vpop.permute.xlu1 %5635  ;;  %v12781_v12 = vpop.permute.xlu0 %5643  ;;  %v7694_v21 = vld [vmem:[%s14309_s4 + $0x334] sm:$0xf0] }
 0x730   : > { %v4051_v58 = vpop.f32.mrf.mxu1  ;;  %15315 = vst [vmem:[#allocation154_spill] sm:$0xff] %v12781_v12  ;;  %5445 = vmatpush.bf16.msra.mxu3 %v7424_v47 }
 0x731   : > { %5715 = vperm.xlu2 %7898, %v8112_v7   ;;  %v3537_v16 = vpop.f32.mrf.mxu2 }
 0x732   : > { %v3692_v42 = vadd.f32 %v3537_v16, %v3023_v57  ;;  %v15317_v57 = vld [vmem:[#allocation181_spill] sm:$0xff] }
 0x733   : > { %v4108_v36 = vpop.f32.mrf.mxu0  ;;  %v15318_v16 = vld [vmem:[#allocation121_spill] sm:$0xff]  ;;  %v6174_v17 = vpop.permute.xlu2 %6173 }
 0x734   : > { %v12784_v63 = vadd.f32 %v4108_v36, %v12064_v22  ;;  %v12795_v20 = vadd.f32 %v4051_v58, %v3692_v42  ;;  %v4708_v43 = vmul.f32 %v15318_v16, %v15317_v57  ;;  %v7420_v36 = vor.u32 %v7694_v21, %v7419_v45  ;;  %v15319_v58 = vld [vmem:[#allocation179_spill] sm:$0xff]  ;;  %v15320_v42 = vld [vmem:[#allocation38_spill] sm:$0xff] }
 0x735   : > { %4367 = vmatmul.bf16.gmra.mxu2 %v12534_v52  ;;  %v15321_v21 = vld [vmem:[#allocation43_spill] sm:$0xff]  ;;  %v15322_v16 = vld [vmem:[#allocation22_spill] sm:$0xff] }
 0x736   : > { %15316 = vst [vmem:[#allocation144_spill] sm:$0xff] %v12795_v20  ;;  %6229 = vperm.xlu1 %7897, %v8112_v7   ;;  %v4434_v22 = vpop.f32.mrf.mxu3  ;;  %4935 = vmatmul.bf16.vlgmr.msrb.gmra.mxu0 %v12338_v18  ;;  %v4709_v20 = vmul.f32 %v15320_v42, %v15319_v58  ;;  %v6248_v7 = vmul.f32 %v12704_v49, %v15317_v57 }
 0x737   : > { %v12804_v62 = vadd.f32 %v4434_v22, %v12426_v50  ;;  %5356 = vmatpush.bf16.msra.mxu2 %v7420_v36  ;;  %v12814_v60 = vpack.c.bf16 %v15322_v16, %v15321_v21  ;;  %v15324_v22 = vld [vmem:[#allocation96_spill] sm:$0xff]  ;;  %v6170_v36 = vpop.permute.xlu0 %6169 }
 0x738   : > { %v6162_v12 = vpop.permute.xlu1 %6161  ;;  %v4054_v45 = vpop.f32.mrf.mxu1  ;;  %v12816_v50 = vpack.c.bf16 %v4709_v20, %v4708_v43  ;;  %v8113_v20 = vld [vmem:[%s14312_s7 + $0xf8] sm:$0xff] }
 0x739   : > { %v6249_v52 = vmul.f32 %v6162_v12, %v15319_v58  ;;  %v3540_v18 = vpop.f32.mrf.mxu2 }
 0x73a   : > { %v3694_v42 = vadd.f32 %v3540_v18, %v15324_v22  ;;  %v15327_v18 = vld [vmem:[#allocation185_spill] sm:$0xff] }
 0x73b   : > { %v12818_v26 = vpack.c.bf16 %v6249_v52, %v6248_v7  ;;  %4476 = vmatmul.bf16.gmra.mxu3 %v12814_v60  ;;  %v4110_v49 = vpop.f32.mrf.mxu0  ;;  %v15326_v7 = vld [vmem:[#allocation184_spill] sm:$0xff]  ;;  %v12840_v21 = vpop.permute.xlu2 %5663 }
 0x73c   : > { %4881 = vmatmul.bf16.gmra.mxu1 %v12816_v50  ;;  %v12824_v12 = vadd.f32 %v4110_v49, %v12108_v37  ;;  %v12826_v57 = vadd.f32 %v4054_v45, %v3694_v42  ;;  %v6251_v52 = vmul.f32 %v6170_v36, %v15326_v7  ;;  %v15329_v49 = vld [vmem:[#allocation197_spill] sm:$0xff]  ;;  %15330 = vst [vmem:[#allocation91_spill] sm:$0xff] %v12840_v21 }
 0x73d   : > { %15323 = vst [vmem:[#allocation157_spill] sm:$0xff] %v12818_v26 }
 0x73e   : > { %15325 = vst [vmem:[#allocation11_spill] sm:$0xff] %v12826_v57  ;;  %7900 = vset.pattern.permute.xlu1 %v14960_v13  ;;  %v4437_v43 = vpop.f32.mrf.mxu3 }
 0x73f   : > { %v12830_v47 = vadd.f32 %v4437_v43, %v12446_v30  ;;  %5719 = vperm.xlu1 %7900, %v8113_v20   ;;  %v15332_v20 = vld [vmem:[#allocation65_spill] sm:$0xff] }
 0x740   : > { %v6166_v58 = vpop.permute.xlu1 %6165  ;;  %v4056_v22 = vpop.f32.mrf.mxu1  ;;  %v4711_v16 = vmul.f32 %v15332_v20, %v15326_v7  ;;  %v15337_v20 = vld [vmem:[#allocation48_spill] sm:$0xff] }
 0x741   : > { %v6250_v37 = vmul.f32 %v6166_v58, %v15327_v18  ;;  %v3542_v45 = vpop.f32.mrf.mxu2 }
 0x742   : > { %v3696_v13 = vadd.f32 %v3542_v45, %v15329_v49 }
 0x743   : > { %v12837_v42 = vpack.c.bf16 %v6251_v52, %v6250_v37  ;;  %v4113_v26 = vpop.f32.mrf.mxu0  ;;  %v15333_v52 = vld [vmem:[#allocation27_spill] sm:$0xff] }
 0x744   : > { %v12843_v30 = vadd.f32 %v4113_v26, %v12151_v5  ;;  %v12845_v43 = vadd.f32 %v4056_v22, %v3696_v13  ;;  %v4710_v37 = vmul.f32 %v15333_v52, %v15327_v18  ;;  %v15335_v5 = vld [vmem:[#allocation17_spill] sm:$0xff]  ;;  %v15336_v26 = vld [vmem:[#allocation20_spill] sm:$0xff]  ;;  %v6186_v52 = vpop.permute.xlu2 %6185 }
 0x745   : > { %15328 = vst [vmem:[#allocation127_spill] sm:$0xff] %v12837_v42  ;;  %4372 = vmatmul.bf16.gmra.mxu2 %v12604_v1  ;;  %v12860_v22 = vpack.c.bf16 %v15336_v26, %v15335_v5  ;;  %v15339_v26 = vld [vmem:[#allocation15_spill] sm:$0xff] }
 0x746   : > { %15331 = vst [vmem:[#allocation130_spill] sm:$0xff] %v12845_v43  ;;  %v4439_v36 = vpop.f32.mrf.mxu3  ;;  %4940 = vmatmul.bf16.gmra.mxu0 %v12412_v8  ;;  %v12862_v13 = vpack.c.bf16 %v4711_v16, %v4710_v37  ;;  %v15341_v43 = vld [vmem:[#allocation100_spill] sm:$0xff] }
 0x747   : > { %v12851_v58 = vadd.f32 %v4439_v36, %v12485_v31 }
 0x748   : > { %v4847_v45 = vpop.f32.mrf.mxu1 }
 0x749   : > { %v12856_v49 = vpop.permute.xlu1 %5655  ;;  %v4333_v7 = vpop.f32.mrf.mxu2 }
 0x74a   : > { %15334 = vst [vmem:[#allocation50_spill] sm:$0xff] %v12856_v49  ;;  %v4502_v1 = vadd.f32 %v4333_v7, %v15337_v20  ;;  %v6252_v7 = vmul.f32 %v6174_v17, %v15339_v26  ;;  %v15340_v20 = vld [vmem:[#allocation188_spill] sm:$0xff]  ;;  %v12878_v49 = vpop.permute.xlu0 %5659 }
 0x74b   : > { %4481 = vmatmul.bf16.gmra.mxu3 %v12860_v22  ;;  %v4115_v8 = vpop.f32.mrf.mxu0  ;;  %15342 = vst [vmem:[#allocation61_spill] sm:$0xff] %v12878_v49 }
 0x74c   : > { %4886 = vmatmul.bf16.gmra.mxu1 %v12862_v13  ;;  %v12868_v31 = vadd.f32 %v4115_v8, %v12187_v34  ;;  %v12870_v18 = vadd.f32 %v4847_v45, %v4502_v1 }
 0x74e   : > { %15338 = vst [vmem:[#allocation62_spill] sm:$0xff] %v12870_v18  ;;  %v4442_v36 = vpop.f32.mrf.mxu3 }
 0x74f   : > { %v12873_v42 = vadd.f32 %v4442_v36, %v12505_v19  ;;  %v4712_v19 = vmul.f32 %v12010_v54, %v15339_v26  ;;  %v7691_v54 = vld [vmem:[%s14309_s4 + $0x324] sm:$0xf]  ;;  %v15346_v26 = vld [vmem:[#allocation16_spill] sm:$0xff] }
 0x750   : > { %v4849_v16 = vpop.f32.mrf.mxu1 }
 0x751   : > { %v4335_v5 = vpop.f32.mrf.mxu2 }
 0x752   : > { %v6178_v37 = vpop.permute.xlu1 %6177  ;;  %v4504_v57 = vadd.f32 %v4335_v5, %v15341_v43  ;;  %v15345_v5 = vld [vmem:[#allocation14_spill] sm:$0xff] }
 0x753   : > { %v6253_v21 = vmul.f32 %v6178_v37, %v15340_v20  ;;  %v4118_v34 = vpop.f32.mrf.mxu0 }
 0x754   : > { %v12883_v45 = vadd.f32 %v4118_v34, %v12221_v2  ;;  %v12885_v1 = vadd.f32 %v4849_v16, %v4504_v57  ;;  %v7692_v2 = vld [vmem:[%s14309_s4 + $0x324] sm:$0xf0]  ;;  %v12910_v16 = vpack.c.bf16 %v15346_v26, %v15345_v5 }
 0x755   : > { %v12880_v8 = vpack.c.bf16 %v6253_v21, %v6252_v7  ;;  %4377 = vmatmul.bf16.gmra.mxu2 %v12691_v38  ;;  %v7411_v21 = vld [vmem:[%s14309_s4 + $0x320] sm:$0xf]  ;;  %v4713_v38 = vmul.f32 %v12044_v10, %v15340_v20  ;;  %v15348_v10 = vld [vmem:[#allocation79_spill] sm:$0xff] }
 0x756   : > { %15344 = vst [vmem:[#allocation161_spill] sm:$0xff] %v12885_v1  ;;  %v4444_v36 = vpop.f32.mrf.mxu3  ;;  %4945 = vmatmul.bf16.gmra.mxu0 %v12465_v25  ;;  %v7412_v57 = vor.u32 %v7692_v2, %v7411_v21  ;;  %v7413_v25 = vld [vmem:[%s14309_s4 + $0x328] sm:$0xf0]  ;;  %v15349_v21 = vld [vmem:[#allocation112_spill] sm:$0xff] }
 0x757   : > { %15343 = vst [vmem:[#allocation66_spill] sm:$0xff] %v12880_v8  ;;  %v12891_v17 = vadd.f32 %v4444_v36, %v12555_v35  ;;  %v6190_v35 = vpop.permute.xlu2 %6189  ;;  %v7416_v37 = vor.u32 %v7691_v54, %v7413_v25  ;;  %v12912_v7 = vpack.c.bf16 %v4713_v38, %v4712_v19  ;;  %v15347_v8 = vld [vmem:[#allocation194_spill] sm:$0xff]  ;;  %v12926_v38 = vpop.permute.xlu0 %5671 }
 0x758   : > { %5357 = vmatpush.bf16.msra.mxu2 %v7412_v57  ;;  %v6255_v1 = vmul.f32 %v6186_v52, %v15347_v8  ;;  %15352 = vst [vmem:[#allocation153_spill] sm:$0xff] %v12926_v38 }
 0x759   : > { %v4852_v43 = vpop.f32.mrf.mxu1  ;;  %v4338_v36 = vpop.f32.mrf.mxu2  ;;  %5446 = vmatpush.bf16.msra.mxu3 %v7416_v37 }
 0x75a   : > { %v6182_v34 = vpop.permute.xlu1 %6181  ;;  %v4506_v2 = vadd.f32 %v4338_v36, %v15349_v21  ;;  %v15353_v36 = vld [vmem:[#allocation109_spill] sm:$0xff] }
 0x75b   : > { %v6254_v20 = vmul.f32 %v6182_v34, %v15348_v10  ;;  %4486 = vmatmul.bf16.gmra.mxu3 %v12910_v16  ;;  %v4120_v18 = vpop.f32.mrf.mxu0 }
 0x75c   : > { %4891 = vmatmul.bf16.gmra.mxu1 %v12912_v7  ;;  %v12922_v19 = vadd.f32 %v4120_v18, %v12261_v15  ;;  %v12924_v54 = vadd.f32 %v4852_v43, %v4506_v2  ;;  %v7689_v18 = vld [vmem:[%s14309_s4 + $0x314] sm:$0xf] }
 0x75d   : > { %v12919_v5 = vpack.c.bf16 %v6255_v1, %v6254_v20  ;;  %v15357_v20 = vld [vmem:[#allocation122_spill] sm:$0xff] }
 0x75e   : > { %15351 = vst [vmem:[#allocation164_spill] sm:$0xff] %v12924_v54  ;;  %v4447_v52 = vpop.f32.mrf.mxu3  ;;  %v4715_v2 = vmul.f32 %v15357_v20, %v15347_v8 }
 0x75f   : > { %15350 = vst [vmem:[#allocation36_spill] sm:$0xff] %v12919_v5  ;;  %v12929_v57 = vadd.f32 %v4447_v52, %v12576_v55  ;;  %v12934_v37 = vpop.permute.xlu2 %5679  ;;  %v7405_v55 = vld [vmem:[%s14309_s4 + $0x318] sm:$0xf0]  ;;  %v12956_v5 = vpop.permute.xlu0 %5675 }
 0x760   : > { %15355 = vst [vmem:[#allocation84_spill] sm:$0xff] %v12934_v37  ;;  %v15361_v37 = vld [vmem:[#allocation54_spill] sm:$0xff] }
 0x761   : > { %v4854_v25 = vpop.f32.mrf.mxu1  ;;  %v4340_v34 = vpop.f32.mrf.mxu2  ;;  %15359 = vst [vmem:[#allocation105_spill] sm:$0xff] %v12956_v5  ;;  %v15365_v5 = vld [vmem:[#allocation103_spill] sm:$0xff] }
 0x762   : > { %v4508_v21 = vadd.f32 %v4340_v34, %v15353_v36  ;;  %v7408_v34 = vor.u32 %v7689_v18, %v7405_v55  ;;  %v15358_v36 = vld [vmem:[#allocation12_spill] sm:$0xff]  ;;  %v15362_v18 = vld [vmem:[#allocation159_spill] sm:$0xff] }
 0x763   : > { %v12932_v26 = vpop.permute.xlu1 %5667  ;;  %v4123_v1 = vpop.f32.mrf.mxu0 }
 0x764   : > { %15354 = vst [vmem:[#allocation90_spill] sm:$0xff] %v12932_v26  ;;  %v12937_v15 = vadd.f32 %v4123_v1, %v12299_v11  ;;  %v12945_v43 = vadd.f32 %v4854_v25, %v4508_v21  ;;  %v4714_v1 = vmul.f32 %v15358_v36, %v15348_v10  ;;  %5447 = vmatpush.bf16.msra.mxu3 %v7408_v34  ;;  %v15360_v21 = vld [vmem:[#allocation10_spill] sm:$0xff]  ;;  %v15369_v26 = vld [vmem:[#allocation155_spill] sm:$0xff] }
 0x765   : > { %4382 = vmatmul.bf16.gmra.mxu2 %v12754_v29  ;;  %v7687_v29 = vld [vmem:[%s14309_s4 + $0x304] sm:$0xf]  ;;  %v15363_v34 = vld [vmem:[#allocation134_spill] sm:$0xff] }
 0x766   : > { %15356 = vst [vmem:[#allocation141_spill] sm:$0xff] %v12945_v43  ;;  %v4449_v52 = vpop.f32.mrf.mxu3  ;;  %4950 = vmatmul.bf16.gmra.mxu0 %v12545_v46  ;;  %v12960_v43 = vpack.c.bf16 %v15361_v37, %v15360_v21  ;;  %v12968_v46 = vpack.c.bf16 %v4715_v2, %v4714_v1  ;;  %v6256_v36 = vmul.f32 %v6190_v35, %v15363_v34  ;;  %v15364_v37 = vld [vmem:[#allocation198_spill] sm:$0xff] }
 0x767   : > { %v12951_v11 = vadd.f32 %v4449_v52, %v12624_v4  ;;  %v7397_v4 = vld [vmem:[%s14309_s4 + $0x308] sm:$0xf0]  ;;  %v12980_v1 = vpop.permute.xlu2 %5683  ;;  %v6202_v38 = vpop.permute.xlu0 %6201 }
 0x768   : > { %v7400_v10 = vor.u32 %v7687_v29, %v7397_v4  ;;  %15367 = vst [vmem:[#allocation85_spill] sm:$0xff] %v12980_v1 }
 0x769   : > { %v4857_v25 = vpop.f32.mrf.mxu1  ;;  %v4343_v8 = vpop.f32.mrf.mxu2 }
 0x76a   : > { %v4510_v55 = vadd.f32 %v4343_v8, %v15362_v18  ;;  %5448 = vmatpush.bf16.msra.mxu3 %v7400_v10 }
 0x76b   : > { %4491 = vmatmul.bf16.gmra.mxu3 %v12960_v43  ;;  %v4125_v52 = vpop.f32.mrf.mxu0 }
 0x76c   : > { %4896 = vmatmul.bf16.gmra.mxu1 %v12968_v46  ;;  %v6194_v20 = vpop.permute.xlu1 %6193  ;;  %v12976_v54 = vadd.f32 %v4125_v52, %v15365_v5  ;;  %v12978_v2 = vadd.f32 %v4857_v25, %v4510_v55  ;;  %v6259_v5 = vmul.f32 %v6202_v38, %v15370_v14  ;;  %v15371_v52 = vld [vmem:[#allocation150_spill] sm:$0xff]  ;;  %v15372_v55 = vld [vmem:[#allocation111_spill] sm:$0xff] }
 0x76d   : > { %v6257_v21 = vmul.f32 %v6194_v20, %v15364_v37 }
 0x76e   : > { %15366 = vst [vmem:[#allocation138_spill] sm:$0xff] %v12978_v2  ;;  %v4452_v29 = vpop.f32.mrf.mxu3 }
 0x76f   : > { %v12982_v4 = vpack.c.bf16 %v6257_v21, %v6256_v36  ;;  %v12985_v8 = vadd.f32 %v4452_v29, %v12655_v6  ;;  %v7403_v21 = vld [vmem:[%s14309_s4 + $0x310] sm:$0xf]  ;;  %v7690_v6 = vld [vmem:[%s14309_s4 + $0x314] sm:$0xf0]  ;;  %v6206_v1 = vpop.permute.xlu2 %6205 }
 0x771   : > { %15368 = vst [vmem:[#allocation52_spill] sm:$0xff] %v12982_v4  ;;  %v4859_v18 = vpop.f32.mrf.mxu1  ;;  %v4345_v10 = vpop.f32.mrf.mxu2 }
 0x772   : > { %v4512_v35 = vadd.f32 %v4345_v10, %v15369_v26  ;;  %v15374_v26 = vld [vmem:[#allocation118_spill] sm:$0xff] }
 0x773   : > { %v4128_v20 = vpop.f32.mrf.mxu0  ;;  %v4717_v29 = vmul.f32 %v15374_v26, %v15364_v37 }
 0x774   : > { %v6198_v49 = vpop.permute.xlu1 %6197  ;;  %v12991_v2 = vadd.f32 %v4128_v20, %v15372_v55  ;;  %v12999_v36 = vadd.f32 %v4859_v18, %v4512_v35  ;;  %v15376_v55 = vld [vmem:[#allocation120_spill] sm:$0xff]  ;;  %v15377_v35 = vld [vmem:[#allocation55_spill] sm:$0xff] }
 0x775   : > { %v6258_v25 = vmul.f32 %v6198_v49, %v15371_v52  ;;  %4387 = vmatmul.bf16.gmra.mxu2 %v12814_v60  ;;  %v7404_v49 = vor.u32 %v7690_v6, %v7403_v21  ;;  %v4716_v4 = vmul.f32 %v15376_v55, %v15363_v34 }
 0x776   : > { %15373 = vst [vmem:[#allocation168_spill] sm:$0xff] %v12999_v36  ;;  %v4454_v10 = vpop.f32.mrf.mxu3  ;;  %4955 = vmatmul.bf16.gmra.mxu0 %v12612_v53  ;;  %v15378_v36 = vld [vmem:[#allocation53_spill] sm:$0xff] }
 0x777   : > { %v13004_v38 = vpack.c.bf16 %v6259_v5, %v6258_v25  ;;  %v13007_v20 = vadd.f32 %v4454_v10, %v12707_v51  ;;  %5358 = vmatpush.bf16.msra.mxu2 %v7404_v49  ;;  %v13014_v37 = vpack.c.bf16 %v15378_v36, %v15377_v35  ;;  %v13016_v26 = vpack.c.bf16 %v4717_v29, %v4716_v4  ;;  %v15379_v5 = vld [vmem:[#allocation139_spill] sm:$0xff]  ;;  %v13031_v29 = vpop.permute.xlu2 %5695  ;;  %v15386_v35 = vld [vmem:[#allocation125_spill] sm:$0xff] }
 0x778   : > { %v15380_v51 = vld [vmem:[#allocation167_spill] sm:$0xff]  ;;  %15384 = vst [vmem:[#allocation151_spill] sm:$0xff] %v13031_v29 }
 0x779   : > { %15375 = vst [vmem:[#allocation92_spill] sm:$0xff] %v13004_v38  ;;  %v4862_v18 = vpop.f32.mrf.mxu1  ;;  %v4348_v60 = vpop.f32.mrf.mxu2 }
 0x77a   : > { %v4514_v25 = vadd.f32 %v4348_v60, %v15379_v5  ;;  %v15385_v60 = vld [vmem:[#allocation49_spill] sm:$0xff] }
 0x77b   : > { %4496 = vmatmul.bf16.gmra.mxu3 %v13014_v37  ;;  %v4130_v53 = vpop.f32.mrf.mxu0 }
 0x77c   : > { %4901 = vmatmul.bf16.gmra.mxu1 %v13016_v26  ;;  %v13022_v21 = vadd.f32 %v4130_v53, %v15380_v51  ;;  %v13026_v6 = vadd.f32 %v4862_v18, %v4514_v25  ;;  %v15388_v51 = vld [vmem:[#allocation82_spill] sm:$0xff] }
 0x77d   : > { %v13024_v34 = vpop.permute.xlu1 %5687  ;;  %v4719_v18 = vmul.f32 %v15388_v51, %v15370_v14  ;;  %v15395_v51 = vld [vmem:[#allocation104_spill] sm:$0xff] }
 0x77e   : > { %15381 = vst [vmem:[#allocation45_spill] sm:$0xff] %v13024_v34  ;;  %v4457_v10 = vpop.f32.mrf.mxu3  ;;  %v15390_v34 = vld [vmem:[#allocation58_spill] sm:$0xff] }
 0x77f   : > { %15382 = vst [vmem:[#allocation162_spill] sm:$0xff] %v13026_v6  ;;  %v13029_v49 = vadd.f32 %v4457_v10, %v12728_v56  ;;  %v15389_v56 = vld [vmem:[#allocation44_spill] sm:$0xff] }
 0x780   : > { %v6260_v10 = vmul.f32 %v6206_v1, %v15389_v56  ;;  %v6218_v1 = vpop.permute.xlu2 %6217 }
 0x781   : > { %15383 = vst [vmem:[#allocation173_spill] sm:$0xff] %v13029_v49  ;;  %v4864_v4 = vpop.f32.mrf.mxu1  ;;  %v4350_v55 = vpop.f32.mrf.mxu2 }
 0x782   : > { %v4516_v5 = vadd.f32 %v4350_v55, %v15385_v60 }
 0x783   : > { %v4133_v38 = vpop.f32.mrf.mxu0 }
 0x784   : > { %v13035_v36 = vadd.f32 %v4133_v38, %v15386_v35  ;;  %v13037_v53 = vadd.f32 %v4864_v4, %v4516_v5  ;;  %v15392_v38 = vld [vmem:[#allocation89_spill] sm:$0xff]  ;;  %v15394_v5 = vld [vmem:[#allocation35_spill] sm:$0xff] }
 0x785   : > { %4392 = vmatmul.bf16.gmra.mxu2 %v12860_v22  ;;  %v4718_v35 = vmul.f32 %v15392_v38, %v15371_v52  ;;  %v7718_v52 = vld [vmem:[%s14309_s4 + $0x3f4] sm:$0xf0] }
 0x786   : > { %15387 = vst [vmem:[#allocation148_spill] sm:$0xff] %v13037_v53  ;;  %v6210_v25 = vpop.permute.xlu1 %6209  ;;  %v4459_v6 = vpop.f32.mrf.mxu3  ;;  %4960 = vmatmul.bf16.gmra.mxu0 %v12696_v39  ;;  %v7515_v39 = vld [vmem:[%s14309_s4 + $0x3f0] sm:$0xf] }
 0x787   : > { %v6261_v29 = vmul.f32 %v6210_v25, %v15390_v34  ;;  %v13045_v49 = vadd.f32 %v4459_v6, %v12764_v61  ;;  %v13052_v14 = vpack.c.bf16 %v4719_v18, %v4718_v35  ;;  %v15396_v6 = vld [vmem:[#allocation128_spill] sm:$0xff]  ;;  %v7516_v38 = vor.u32 %v7718_v52, %v7515_v39  ;;  %v15398_v35 = vld [vmem:[#allocation115_spill] sm:$0xff] }
 0x789   : > { %15391 = vst [vmem:[#allocation190_spill] sm:$0xff] %v13045_v49  ;;  %v13050_v4 = vpack.c.bf16 %v6261_v29, %v6260_v10  ;;  %v4867_v55 = vpop.f32.mrf.mxu1  ;;  %v4353_v60 = vpop.f32.mrf.mxu2  ;;  %5866 = vmatpush.bf16.msra.mxu1 %v7516_v38  ;;  %v7507_v49 = vld [vmem:[%s14309_s4 + $0x3e0] sm:$0xf] }
 0x78a   : > { %v4518_v22 = vadd.f32 %v4353_v60, %v15394_v5  ;;  %v6263_v60 = vmul.f32 %v6218_v1, %v15398_v35  ;;  %v15399_v5 = vld [vmem:[#allocation78_spill] sm:$0xff]  ;;  %v15401_v1 = vld [vmem:[#allocation160_spill] sm:$0xff]  ;;  %v7395_v38 = vld [vmem:[%s14309_s4 + $0x300] sm:$0xf] }
 0x78b   : > { %15393 = vst [vmem:[#allocation146_spill] sm:$0xff] %v13050_v4  ;;  %5449 = vmatmul.bf16.vlgmr.msra.gmra.mxu3 %v15395_v51  ;;  %v4135_v61 = vpop.f32.mrf.mxu0 }
 0x78c   : > { %4906 = vmatmul.bf16.gmra.mxu1 %v13052_v14  ;;  %v13058_v25 = vadd.f32 %v4135_v61, %v15396_v6  ;;  %v13066_v29 = vadd.f32 %v4867_v55, %v4518_v22  ;;  %v7716_v55 = vld [vmem:[%s14309_s4 + $0x3e4] sm:$0xf0] }
 0x78d   : > { %v7508_v39 = vor.u32 %v7716_v55, %v7507_v49 }
 0x78e   : > { %15397 = vst [vmem:[#allocation183_spill] sm:$0xff] %v13066_v29  ;;  %v6214_v18 = vpop.permute.xlu1 %6213  ;;  %v4462_v10 = vpop.f32.mrf.mxu3 }
 0x78f   : > { %v6262_v4 = vmul.f32 %v6214_v18, %v15399_v5  ;;  %v13071_v61 = vadd.f32 %v4462_v10, %v12784_v63  ;;  %5867 = vmatpush.bf16.msra.mxu1 %v7508_v39  ;;  %v7714_v10 = vld [vmem:[%s14309_s4 + $0x3d4] sm:$0xf0]  ;;  %v7688_v39 = vld [vmem:[%s14309_s4 + $0x304] sm:$0xf0] }
 0x791   : > { %v13073_v6 = vpack.c.bf16 %v6263_v60, %v6262_v4  ;;  %v4869_v53 = vpop.f32.mrf.mxu1  ;;  %v4355_v22 = vpop.f32.mrf.mxu2  ;;  %v7499_v4 = vld [vmem:[%s14309_s4 + $0x3d0] sm:$0xf] }
 0x792   : > { %v4520_v52 = vadd.f32 %v4355_v22, %v15401_v1  ;;  %v15403_v60 = vld [vmem:[#allocation107_spill] sm:$0xff] }
 0x793   : > { %15400 = vst [vmem:[#allocation77_spill] sm:$0xff] %v13073_v6  ;;  %v4138_v18 = vpop.f32.mrf.mxu0  ;;  %v4720_v55 = vmul.f32 %v15403_v60, %v15389_v56 }
 0x794   : > { %v13083_v63 = vadd.f32 %v4138_v18, %v12489_v32  ;;  %v13094_v49 = vadd.f32 %v4869_v53, %v4520_v52  ;;  %v7500_v32 = vor.u32 %v7714_v10, %v7499_v4  ;;  %v7396_v53 = vor.u32 %v7688_v39, %v7395_v38  ;;  %v15405_v52 = vld [vmem:[#allocation7_spill] sm:$0xff] }
 0x795   : > { %4397 = vmatmul.bf16.gmra.mxu2 %v12910_v16  ;;  %v4721_v6 = vmul.f32 %v15405_v52, %v15390_v34  ;;  %v7491_v16 = vld [vmem:[%s14309_s4 + $0x3c0] sm:$0xf]  ;;  %v7483_v39 = vld [vmem:[%s14309_s4 + $0x3b0] sm:$0xf] }
 0x796   : > { %15402 = vst [vmem:[#allocation175_spill] sm:$0xff] %v13094_v49  ;;  %v4464_v22 = vpop.f32.mrf.mxu3  ;;  %4965 = vmatmul.bf16.gmra.mxu0 %v12756_v3  ;;  %5868 = vmatpush.bf16.msra.mxu1 %v7500_v32  ;;  %v15406_v3 = vld [vmem:[#allocation142_spill] sm:$0xff]  ;;  %v7475_v49 = vld [vmem:[%s14309_s4 + $0x3a0] sm:$0xf] }
 0x797   : > { %v13103_v1 = vadd.f32 %v4464_v22, %v12824_v12  ;;  %v13105_v18 = vpop.permute.xlu1 %5699  ;;  %5359 = vmatpush.bf16.msra.mxu2 %v7396_v53  ;;  %v7712_v12 = vld [vmem:[%s14309_s4 + $0x3c4] sm:$0xf0]  ;;  %v13116_v4 = vpack.c.bf16 %v4721_v6, %v4720_v55  ;;  %v15407_v22 = vld [vmem:[#allocation191_spill] sm:$0xff]  ;;  %v7710_v6 = vld [vmem:[%s14309_s4 + $0x3b4] sm:$0xf0]  ;;  %v6222_v53 = vpop.permute.xlu2 %6221 }
 0x798   : > { %15404 = vst [vmem:[#allocation178_spill] sm:$0xff] %v13105_v18  ;;  %v7492_v60 = vor.u32 %v7712_v12, %v7491_v16  ;;  %v7484_v16 = vor.u32 %v7710_v6, %v7483_v39 }
 0x799   : > { %v4872_v56 = vpop.f32.mrf.mxu1  ;;  %v4358_v10 = vpop.f32.mrf.mxu2 }
 0x79a   : > { %v4522_v38 = vadd.f32 %v4358_v10, %v15406_v3  ;;  %5869 = vmatpush.bf16.msra.mxu1 %v7492_v60  ;;  %v15410_v60 = vld [vmem:[#allocation97_spill] sm:$0xff] }
 0x79b   : > { %5454 = vmatmul.bf16.gmra.mxu3 %v15407_v22  ;;  %v4140_v34 = vpop.f32.mrf.mxu0 }
 0x79c   : > { %4911 = vmatmul.bf16.gmra.mxu1 %v13116_v4  ;;  %v13122_v32 = vadd.f32 %v4140_v34, %v12517_v44  ;;  %v13130_v55 = vadd.f32 %v4872_v56, %v4522_v38  ;;  %v15409_v44 = vld [vmem:[#allocation101_spill] sm:$0xff]  ;;  %v7708_v56 = vld [vmem:[%s14309_s4 + $0x3a4] sm:$0xf0] }
 0x79d   : > { %v6264_v3 = vmul.f32 %v6222_v53, %v15409_v44  ;;  %v7476_v39 = vor.u32 %v7708_v56, %v7475_v49  ;;  %v15413_v49 = vld [vmem:[#allocation163_spill] sm:$0xff] }
 0x79e   : > { %15408 = vst [vmem:[#allocation169_spill] sm:$0xff] %v13130_v55  ;;  %v4467_v52 = vpop.f32.mrf.mxu3  ;;  %5870 = vmatpush.bf16.msra.mxu1 %v7484_v16  ;;  %v7467_v16 = vld [vmem:[%s14309_s4 + $0x390] sm:$0xf] }
 0x79f   : > { %v13133_v12 = vadd.f32 %v4467_v52, %v12843_v30  ;;  %v15412_v30 = vld [vmem:[#allocation81_spill] sm:$0xff] }
 0x7a0   : > { %v6226_v10 = vpop.permute.xlu1 %6225 }
 0x7a1   : > { %v6265_v34 = vmul.f32 %v6226_v10, %v15410_v60  ;;  %v4874_v18 = vpop.f32.mrf.mxu1  ;;  %v4360_v38 = vpop.f32.mrf.mxu2  ;;  %v7706_v10 = vld [vmem:[%s14309_s4 + $0x394] sm:$0xf0] }
 0x7a2   : > { %v4524_v52 = vadd.f32 %v4360_v38, %v15412_v30  ;;  %5871 = vmatpush.bf16.msra.mxu1 %v7476_v39  ;;  %v7468_v56 = vor.u32 %v7706_v10, %v7467_v16 }
 0x7a3   : > { %v13143_v6 = vpack.c.bf16 %v6265_v34, %v6264_v3  ;;  %v4143_v55 = vpop.f32.mrf.mxu0  ;;  %v4723_v3 = vmul.f32 %v15413_v49, %v15398_v35  ;;  %v7704_v35 = vld [vmem:[%s14309_s4 + $0x384] sm:$0xf0] }
 0x7a4   : > { %v13147_v53 = vadd.f32 %v4143_v55, %v12564_v27  ;;  %v13155_v29 = vadd.f32 %v4874_v18, %v4524_v52  ;;  %v15414_v55 = vld [vmem:[#allocation110_spill] sm:$0xff]  ;;  %v7459_v18 = vld [vmem:[%s14309_s4 + $0x380] sm:$0xf]  ;;  %v15415_v52 = vld [vmem:[#allocation39_spill] sm:$0xff] }
 0x7a5   : > { %15411 = vst [vmem:[#allocation180_spill] sm:$0xff] %v13143_v6  ;;  %4402 = vmatmul.bf16.gmra.mxu2 %v12960_v43  ;;  %v4722_v38 = vmul.f32 %v15414_v55, %v15399_v5  ;;  %v15424_v6 = vld [vmem:[#allocation93_spill] sm:$0xff] }
 0x7a6   : > { %v4469_v34 = vpop.f32.mrf.mxu3  ;;  %4970 = vmatmul.bf16.gmra.mxu0 %v12816_v50  ;;  %5872 = vmatpush.bf16.msra.mxu1 %v7468_v56  ;;  %v15416_v50 = vld [vmem:[#allocation51_spill] sm:$0xff] }
 0x7a7   : > { %v13161_v27 = vadd.f32 %v4469_v34, %v12868_v31  ;;  %v13172_v43 = vpack.c.bf16 %v4723_v3, %v4722_v38  ;;  %v7460_v31 = vor.u32 %v7704_v35, %v7459_v18  ;;  %v15417_v38 = vld [vmem:[#allocation87_spill] sm:$0xff] }
 0x7a9   : > { %v4877_v39 = vpop.f32.mrf.mxu1  ;;  %v4363_v30 = vpop.f32.mrf.mxu2 }
 0x7aa   : > { %v4526_v16 = vadd.f32 %v4363_v30, %v15415_v52  ;;  %5873 = vmatpush.bf16.msra.mxu1 %v7460_v31  ;;  %v15418_v52 = vld [vmem:[#allocation108_spill] sm:$0xff] }
 0x7ab   : > { %5459 = vmatmul.bf16.gmra.mxu3 %v15416_v50  ;;  %v4145_v5 = vpop.f32.mrf.mxu0 }
 0x7ac   : > { %4916 = vmatmul.bf16.gmra.mxu1 %v13172_v43  ;;  %v13178_v10 = vadd.f32 %v4145_v5, %v12595_v33  ;;  %v13180_v49 = vadd.f32 %v4877_v39, %v4526_v16  ;;  %v7579_v33 = vld [vmem:[%s14309_s4 + $0x470] sm:$0xf]  ;;  %v7734_v39 = vld [vmem:[%s14309_s4 + $0x474] sm:$0xf0]  ;;  %v4725_v16 = vmul.f32 %v15418_v52, %v15410_v60  ;;  %v7517_v60 = vld [vmem:[%s14309_s4 + $0x3f8] sm:$0xf0] }
 0x7ad   : > { %v15421_v52 = vld [vmem:[#allocation80_spill] sm:$0xff] }
 0x7ae   : > { %v4472_v34 = vpop.f32.mrf.mxu3 }
 0x7af   : > { %v13183_v56 = vadd.f32 %v4472_v34, %v12883_v45  ;;  %v7733_v45 = vld [vmem:[%s14309_s4 + $0x474] sm:$0xf]  ;;  %v7581_v34 = vld [vmem:[%s14309_s4 + $0x478] sm:$0xf0] }
 0x7b1   : > { %v4879_v3 = vpop.f32.mrf.mxu1  ;;  %v4365_v55 = vpop.f32.mrf.mxu2 }
 0x7b2   : > { %v4528_v18 = vadd.f32 %v4365_v55, %v15417_v38  ;;  %v7584_v38 = vor.u32 %v7733_v45, %v7581_v34 }
 0x7b3   : > { %v4936_v35 = vpop.f32.mrf.mxu0 }
 0x7b4   : > { %v13187_v30 = vadd.f32 %v4936_v35, %v12638_v0  ;;  %v13198_v31 = vadd.f32 %v4879_v3, %v4528_v18  ;;  %v7580_v0 = vor.u32 %v7734_v39, %v7579_v33  ;;  %v15419_v3 = vld [vmem:[#allocation102_spill] sm:$0xff]  ;;  %6469 = vmatpush.bf16.msrb.mxu3 %v7584_v38 }
 0x7b5   : > { %4407 = vmatmul.bf16.gmra.mxu2 %v13014_v37  ;;  %v4724_v18 = vmul.f32 %v15419_v3, %v15409_v44  ;;  %v7717_v37 = vld [vmem:[%s14309_s4 + $0x3f4] sm:$0xf] }
 0x7b6   : > { %v4474_v5 = vpop.f32.mrf.mxu3  ;;  %4975 = vmatmul.bf16.gmra.mxu0 %v12862_v13  ;;  %6380 = vmatpush.bf16.msrb.mxu2 %v7580_v0  ;;  %v7520_v39 = vor.u32 %v7717_v37, %v7517_v60  ;;  %v15420_v13 = vld [vmem:[#allocation94_spill] sm:$0xff] }
 0x7b7   : > { %v13207_v55 = vadd.f32 %v4474_v5, %v12922_v19  ;;  %v13218_v33 = vpack.c.bf16 %v4725_v16, %v4724_v18  ;;  %v15422_v18 = vld [vmem:[#allocation71_spill] sm:$0xff] }
 0x7b8   : > { %5955 = vmatpush.bf16.msra.mxu0 %v7520_v39  ;;  %v15423_v39 = vld [vmem:[#allocation64_spill] sm:$0xff] }
 0x7b9   : > { %v4882_v35 = vpop.f32.mrf.mxu1  ;;  %v4368_v19 = vpop.f32.mrf.mxu2 }
 0x7ba   : > { %v4530_v45 = vadd.f32 %v4368_v19, %v15420_v13 }
 0x7bb   : > { %5464 = vmatmul.bf16.gmra.mxu3 %v15421_v52  ;;  %v4938_v44 = vpop.f32.mrf.mxu0 }
 0x7bc   : > { %4921 = vmatmul.bf16.gmra.mxu1 %v13218_v33  ;;  %v13224_v5 = vadd.f32 %v4938_v44, %v12671_v41  ;;  %v13226_v0 = vadd.f32 %v4882_v35, %v4530_v45  ;;  %v5723_v41 = vmul.f32 %v15424_v6, %v15423_v39  ;;  %v15426_v45 = vld [vmem:[#allocation126_spill] sm:$0xff] }
 0x7be   : > { %v4477_v34 = vpop.f32.mrf.mxu3 }
 0x7bf   : > { %v13229_v38 = vadd.f32 %v4477_v34, %v12937_v15  ;;  %v15425_v15 = vld [vmem:[#allocation63_spill] sm:$0xff] }
 0x7c0   : > { %v5722_v34 = vmul.f32 %v15426_v45, %v15425_v15  ;;  %v15430_v15 = vld [vmem:[#allocation114_spill] sm:$0xff] }
 0x7c1   : > { %v4884_v16 = vpop.f32.mrf.mxu1  ;;  %v4370_v3 = vpop.f32.mrf.mxu2 }
 0x7c2   : > { %v4532_v37 = vadd.f32 %v4370_v3, %v15422_v18  ;;  %v13246_v18 = vpack.c.bf16 %v5723_v41, %v5722_v34 }
 0x7c3   : > { %v4941_v60 = vpop.f32.mrf.mxu0 }
 0x7c4   : > { %v13233_v19 = vadd.f32 %v4941_v60, %v12715_v24  ;;  %v13235_v13 = vadd.f32 %v4884_v16, %v4532_v37  ;;  %v15427_v16 = vld [vmem:[#allocation117_spill] sm:$0xff] }
 0x7c5   : > { %5360 = vmatmul.bf16.vlgmr.msra.gmra.mxu2 %v15395_v51  ;;  %v15428_v60 = vld [vmem:[#allocation41_spill] sm:$0xff] }
 0x7c6   : > { %v4479_v44 = vpop.f32.mrf.mxu3  ;;  %4980 = vmatmul.bf16.gmra.mxu0 %v12912_v7 }
 0x7c7   : > { %v13241_v35 = vadd.f32 %v4479_v44, %v12976_v54 }
 0x7c9   : > { %v4887_v3 = vpop.f32.mrf.mxu1  ;;  %v4373_v24 = vpop.f32.mrf.mxu2 }
 0x7ca   : > { %v4534_v37 = vadd.f32 %v4373_v24, %v15427_v16  ;;  %v7571_v16 = vld [vmem:[%s14309_s4 + $0x460] sm:$0xf] }
 0x7cb   : > { %5469 = vmatmul.bf16.gmra.mxu3 %v15428_v60  ;;  %v4943_v6 = vpop.f32.mrf.mxu0 }
 0x7cc   : > { %5874 = vmatmul.bf16.vlgmr.msra.gmra.mxu1 %v13246_v18  ;;  %v13252_v51 = vadd.f32 %v4943_v6, %v12741_v23  ;;  %v13254_v54 = vadd.f32 %v4887_v3, %v4534_v37  ;;  %v7732_v23 = vld [vmem:[%s14309_s4 + $0x464] sm:$0xf0]  ;;  %v15432_v37 = vld [vmem:[#allocation67_spill] sm:$0xff] }
 0x7cd   : > { %v5724_v6 = vmul.f32 %v12548_v59, %v15432_v37  ;;  %v7715_v59 = vld [vmem:[%s14309_s4 + $0x3e4] sm:$0xf]  ;;  %v15435_v37 = vld [vmem:[#allocation42_spill] sm:$0xff] }
 0x7ce   : > { %15429 = vst [vmem:[#allocation156_spill] sm:$0xff] %v13254_v54  ;;  %v4482_v7 = vpop.f32.mrf.mxu3  ;;  %v15433_v54 = vld [vmem:[#allocation68_spill] sm:$0xff] }
 0x7cf   : > { %v13257_v39 = vadd.f32 %v4482_v7, %v12991_v2  ;;  %v7731_v2 = vld [vmem:[%s14309_s4 + $0x464] sm:$0xf] }
 0x7d1   : > { %v4889_v44 = vpop.f32.mrf.mxu1  ;;  %v4375_v41 = vpop.f32.mrf.mxu2 }
 0x7d2   : > { %v4536_v45 = vadd.f32 %v4375_v41, %v15430_v15  ;;  %v7573_v41 = vld [vmem:[%s14309_s4 + $0x468] sm:$0xf0] }
 0x7d3   : > { %v4946_v34 = vpop.f32.mrf.mxu0 }
 0x7d4   : > { %v13261_v24 = vadd.f32 %v4946_v34, %v12770_v40  ;;  %v13272_v3 = vadd.f32 %v4889_v44, %v4536_v45  ;;  %v7572_v40 = vor.u32 %v7732_v23, %v7571_v16  ;;  %v7576_v34 = vor.u32 %v7731_v2, %v7573_v41 }
 0x7d5   : > { %5365 = vmatmul.bf16.gmra.mxu2 %v15407_v22  ;;  %v5725_v44 = vmul.f32 %v12514_v9, %v15433_v54  ;;  %v7509_v22 = vld [vmem:[%s14309_s4 + $0x3e8] sm:$0xf0] }
 0x7d6   : > { %15431 = vst [vmem:[#allocation195_spill] sm:$0xff] %v13272_v3  ;;  %v4484_v7 = vpop.f32.mrf.mxu3  ;;  %4985 = vmatmul.bf16.gmra.mxu0 %v12968_v46  ;;  %6381 = vmatpush.bf16.msrb.mxu2 %v7572_v40  ;;  %v7512_v23 = vor.u32 %v7715_v59, %v7509_v22  ;;  %v15434_v46 = vld [vmem:[#allocation123_spill] sm:$0xff]  ;;  %v15439_v3 = vld [vmem:[#allocation170_spill] sm:$0xff] }
 0x7d7   : > { %v13281_v15 = vadd.f32 %v4484_v7, %v13022_v21  ;;  %6470 = vmatpush.bf16.msrb.mxu3 %v7576_v34  ;;  %v13292_v16 = vpack.c.bf16 %v5725_v44, %v5724_v6  ;;  %v15436_v44 = vld [vmem:[#allocation131_spill] sm:$0xff] }
 0x7d8   : > { %5956 = vmatpush.bf16.msra.mxu0 %v7512_v23  ;;  %v15438_v23 = vld [vmem:[#allocation75_spill] sm:$0xff] }
 0x7d9   : > { %v4892_v45 = vpop.f32.mrf.mxu1  ;;  %v4378_v21 = vpop.f32.mrf.mxu2 }
 0x7da   : > { %v4538_v2 = vadd.f32 %v4378_v21, %v15434_v46 }
 0x7db   : > { %5474 = vmatmul.bf16.gmra.mxu3 %v15435_v37  ;;  %v4948_v9 = vpop.f32.mrf.mxu0 }
 0x7dc   : > { %5879 = vmatmul.bf16.gmra.mxu1 %v13292_v16  ;;  %v13298_v54 = vadd.f32 %v4948_v9, %v12804_v62  ;;  %v13300_v7 = vadd.f32 %v4892_v45, %v4538_v2  ;;  %v5727_v62 = vmul.f32 %v15439_v3, %v15438_v23  ;;  %v15441_v2 = vld [vmem:[#allocation182_spill] sm:$0xff] }
 0x7de   : > { %v4487_v40 = vpop.f32.mrf.mxu3 }
 0x7df   : > { %v13303_v41 = vadd.f32 %v4487_v40, %v13035_v36  ;;  %v15440_v36 = vld [vmem:[#allocation74_spill] sm:$0xff] }
 0x7e0   : > { %v5726_v40 = vmul.f32 %v15441_v2, %v15440_v36  ;;  %v15445_v36 = vld [vmem:[#allocation124_spill] sm:$0xff] }
 0x7e1   : > { %v4894_v6 = vpop.f32.mrf.mxu1  ;;  %v4380_v34 = vpop.f32.mrf.mxu2 }
 0x7e2   : > { %v4540_v59 = vadd.f32 %v4380_v34, %v15436_v44  ;;  %v13320_v44 = vpack.c.bf16 %v5727_v62, %v5726_v40 }
 0x7e3   : > { %v4951_v22 = vpop.f32.mrf.mxu0 }
 0x7e4   : > { %v13307_v21 = vadd.f32 %v4951_v22, %v12830_v47  ;;  %v13309_v46 = vadd.f32 %v4894_v6, %v4540_v59  ;;  %v15442_v6 = vld [vmem:[#allocation132_spill] sm:$0xff]  ;;  %v15443_v22 = vld [vmem:[#allocation13_spill] sm:$0xff] }
 0x7e5   : > { %5370 = vmatmul.bf16.gmra.mxu2 %v15416_v50 }
 0x7e6   : > { %15437 = vst [vmem:[#allocation158_spill] sm:$0xff] %v13309_v46  ;;  %v4489_v9 = vpop.f32.mrf.mxu3  ;;  %4990 = vmatmul.bf16.gmra.mxu0 %v13016_v26  ;;  %v15449_v46 = vld [vmem:[#allocation28_spill] sm:$0xff] }
 0x7e7   : > { %v13315_v45 = vadd.f32 %v4489_v9, %v13058_v25 }
 0x7e9   : > { %v4897_v34 = vpop.f32.mrf.mxu1  ;;  %v4383_v47 = vpop.f32.mrf.mxu2 }
 0x7ea   : > { %v4542_v59 = vadd.f32 %v4383_v47, %v15442_v6  ;;  %v7563_v6 = vld [vmem:[%s14309_s4 + $0x450] sm:$0xf] }
 0x7eb   : > { %5479 = vmatmul.bf16.gmra.mxu3 %v15443_v22  ;;  %v4953_v3 = vpop.f32.mrf.mxu0 }
 0x7ec   : > { %5884 = vmatmul.bf16.gmra.mxu1 %v13320_v44  ;;  %v13326_v50 = vadd.f32 %v4953_v3, %v12851_v58  ;;  %v13328_v25 = vadd.f32 %v4897_v34, %v4542_v59  ;;  %v7730_v58 = vld [vmem:[%s14309_s4 + $0x454] sm:$0xf0]  ;;  %v15447_v59 = vld [vmem:[#allocation9_spill] sm:$0xff]  ;;  %v15448_v3 = vld [vmem:[#allocation143_spill] sm:$0xff] }
 0x7ee   : > { %15444 = vst [vmem:[#allocation29_spill] sm:$0xff] %v13328_v25  ;;  %v4492_v26 = vpop.f32.mrf.mxu3 }
 0x7ef   : > { %v13331_v23 = vadd.f32 %v4492_v26, %v13083_v63  ;;  %v7729_v63 = vld [vmem:[%s14309_s4 + $0x454] sm:$0xf]  ;;  %v5729_v26 = vmul.f32 %v15448_v3, %v15447_v59  ;;  %v15452_v3 = vld [vmem:[#allocation106_spill] sm:$0xff] }
 0x7f1   : > { %v4899_v9 = vpop.f32.mrf.mxu1  ;;  %v4385_v62 = vpop.f32.mrf.mxu2 }
 0x7f2   : > { %v4544_v2 = vadd.f32 %v4385_v62, %v15445_v36  ;;  %v7565_v36 = vld [vmem:[%s14309_s4 + $0x458] sm:$0xf0] }
 0x7f3   : > { %v4956_v40 = vpop.f32.mrf.mxu0  ;;  %v7568_v25 = vor.u32 %v7729_v63, %v7565_v36 }
 0x7f4   : > { %v13335_v47 = vadd.f32 %v4956_v40, %v12873_v42  ;;  %v13346_v34 = vadd.f32 %v4899_v9, %v4544_v2  ;;  %v7564_v42 = vor.u32 %v7730_v58, %v7563_v6  ;;  %v15450_v9 = vld [vmem:[#allocation135_spill] sm:$0xff]  ;;  %v7501_v6 = vld [vmem:[%s14309_s4 + $0x3d8] sm:$0xf0] }
 0x7f5   : > { %5375 = vmatmul.bf16.gmra.mxu2 %v15421_v52  ;;  %v5728_v2 = vmul.f32 %v15450_v9, %v15449_v46  ;;  %6471 = vmatpush.bf16.msrb.mxu3 %v7568_v25  ;;  %v7713_v52 = vld [vmem:[%s14309_s4 + $0x3d4] sm:$0xf] }
 0x7f6   : > { %15446 = vst [vmem:[#allocation30_spill] sm:$0xff] %v13346_v34  ;;  %v4494_v62 = vpop.f32.mrf.mxu3  ;;  %4995 = vmatmul.bf16.gmra.mxu0 %v13052_v14  ;;  %6382 = vmatpush.bf16.msrb.mxu2 %v7564_v42  ;;  %v7504_v59 = vor.u32 %v7713_v52, %v7501_v6  ;;  %v15451_v14 = vld [vmem:[#allocation140_spill] sm:$0xff] }
 0x7f7   : > { %v13355_v40 = vadd.f32 %v4494_v62, %v13122_v32  ;;  %v13366_v58 = vpack.c.bf16 %v5729_v26, %v5728_v2  ;;  %v15454_v2 = vld [vmem:[#allocation57_spill] sm:$0xff] }
 0x7f8   : > { %5957 = vmatpush.bf16.msra.mxu0 %v7504_v59  ;;  %v7711_v59 = vld [vmem:[%s14309_s4 + $0x3c4] sm:$0xf] }
 0x7f9   : > { %v4902_v34 = vpop.f32.mrf.mxu1  ;;  %v4388_v32 = vpop.f32.mrf.mxu2 }
 0x7fa   : > { %v4546_v63 = vadd.f32 %v4388_v32, %v15451_v14  ;;  %v15457_v14 = vld [vmem:[#allocation56_spill] sm:$0xff] }
 0x7fb   : > { %5484 = vmatmul.bf16.gmra.mxu3 %v15452_v3  ;;  %v4958_v46 = vpop.f32.mrf.mxu0 }
 0x7fc   : > { %5889 = vmatmul.bf16.gmra.mxu1 %v13366_v58  ;;  %v13372_v25 = vadd.f32 %v4958_v46, %v12891_v17  ;;  %v13374_v62 = vadd.f32 %v4902_v34, %v4546_v63  ;;  %v7493_v17 = vld [vmem:[%s14309_s4 + $0x3c8] sm:$0xf0] }
 0x7fe   : > { %15453 = vst [vmem:[#allocation98_spill] sm:$0xff] %v13374_v62  ;;  %v4497_v42 = vpop.f32.mrf.mxu3 }
 0x7ff   : > { %v13377_v36 = vadd.f32 %v4497_v42, %v13147_v53  ;;  %v15456_v53 = vld [vmem:[#allocation34_spill] sm:$0xff]  ;;  %v7496_v42 = vor.u32 %v7711_v59, %v7493_v17  ;;  %v15460_v17 = vld [vmem:[#allocation176_spill] sm:$0xff] }
 0x800   : > { %v5731_v63 = vmul.f32 %v15457_v14, %v15456_v53 }
 0x801   : > { %v4904_v26 = vpop.f32.mrf.mxu1  ;;  %v4390_v9 = vpop.f32.mrf.mxu2  ;;  %5958 = vmatpush.bf16.msra.mxu0 %v7496_v42  ;;  %v7707_v42 = vld [vmem:[%s14309_s4 + $0x3a4] sm:$0xf] }
 0x802   : > { %v4548_v52 = vadd.f32 %v4390_v9, %v15454_v2  ;;  %v15458_v9 = vld [vmem:[#allocation5_spill] sm:$0xff]  ;;  %v15459_v2 = vld [vmem:[#allocation136_spill] sm:$0xff] }
 0x803   : > { %v4961_v6 = vpop.f32.mrf.mxu0 }
 0x804   : > { %v13381_v32 = vadd.f32 %v4961_v6, %v12929_v57  ;;  %v13389_v34 = vadd.f32 %v4904_v26, %v4548_v52  ;;  %v5730_v6 = vmul.f32 %v15459_v2, %v15458_v9  ;;  %v7709_v26 = vld [vmem:[%s14309_s4 + $0x3b4] sm:$0xf]  ;;  %v7485_v52 = vld [vmem:[%s14309_s4 + $0x3b8] sm:$0xf0] }
 0x805   : > { %5380 = vmatmul.bf16.gmra.mxu2 %v15428_v60 }
 0x806   : > { %15455 = vst [vmem:[#allocation177_spill] sm:$0xff] %v13389_v34  ;;  %v4499_v46 = vpop.f32.mrf.mxu3  ;;  %5000 = vmatmul.bf16.gmra.mxu0 %v13116_v4  ;;  %v13406_v60 = vpack.c.bf16 %v5731_v63, %v5730_v6  ;;  %v15461_v4 = vld [vmem:[#allocation32_spill] sm:$0xff]  ;;  %v7477_v63 = vld [vmem:[%s14309_s4 + $0x3a8] sm:$0xf0]  ;;  %v15469_v34 = vld [vmem:[#allocation129_spill] sm:$0xff] }
 0x807   : > { %v13395_v57 = vadd.f32 %v4499_v46, %v13178_v10  ;;  %v7488_v10 = vor.u32 %v7709_v26, %v7485_v52  ;;  %v7480_v6 = vor.u32 %v7707_v42, %v7477_v63  ;;  %v7461_v63 = vld [vmem:[%s14309_s4 + $0x388] sm:$0xf0] }
 0x809   : > { %v4907_v62 = vpop.f32.mrf.mxu1  ;;  %v4393_v59 = vpop.f32.mrf.mxu2  ;;  %5959 = vmatpush.bf16.msra.mxu0 %v7488_v10 }
 0x80a   : > { %v4550_v53 = vadd.f32 %v4393_v59, %v15460_v17  ;;  %v7469_v59 = vld [vmem:[%s14309_s4 + $0x398] sm:$0xf0] }
 0x80b   : > { %5489 = vmatmul.bf16.gmra.mxu3 %v15461_v4  ;;  %v4963_v14 = vpop.f32.mrf.mxu0 }
 0x80c   : > { %5894 = vmatmul.bf16.gmra.mxu1 %v13406_v60  ;;  %v13412_v46 = vadd.f32 %v4963_v14, %v12951_v11  ;;  %v13420_v9 = vadd.f32 %v4907_v62, %v4550_v53  ;;  %v7705_v11 = vld [vmem:[%s14309_s4 + $0x394] sm:$0xf]  ;;  %v15464_v14 = vld [vmem:[#allocation46_spill] sm:$0xff] }
 0x80d   : > { %5960 = vmatpush.bf16.msra.mxu0 %v7480_v6  ;;  %v7472_v17 = vor.u32 %v7705_v11, %v7469_v59  ;;  %v15466_v11 = vld [vmem:[#allocation70_spill] sm:$0xff] }
 0x80e   : > { %15462 = vst [vmem:[#allocation166_spill] sm:$0xff] %v13420_v9  ;;  %v5450_v2 = vpop.f32.mrf.mxu3  ;;  %v5732_v59 = vmul.f32 %v12772_v28, %v15466_v11 }
 0x80f   : > { %v13423_v26 = vadd.f32 %v5450_v2, %v13187_v30  ;;  %v7703_v30 = vld [vmem:[%s14309_s4 + $0x384] sm:$0xf]  ;;  %v7555_v2 = vld [vmem:[%s14309_s4 + $0x440] sm:$0xf] }
 0x811   : > { %15463 = vst [vmem:[#allocation18_spill] sm:$0xff] %v13423_v26  ;;  %v4909_v52 = vpop.f32.mrf.mxu1  ;;  %v4395_v10 = vpop.f32.mrf.mxu2  ;;  %5961 = vmatpush.bf16.msra.mxu0 %v7472_v17  ;;  %v7728_v17 = vld [vmem:[%s14309_s4 + $0x444] sm:$0xf0]  ;;  %v15468_v26 = vld [vmem:[#allocation145_spill] sm:$0xff] }
 0x812   : > { %v4552_v62 = vadd.f32 %v4395_v10, %v15464_v14  ;;  %v7727_v14 = vld [vmem:[%s14309_s4 + $0x444] sm:$0xf]  ;;  %v7556_v28 = vor.u32 %v7728_v17, %v7555_v2  ;;  %v15470_v17 = vld [vmem:[#allocation186_spill] sm:$0xff] }
 0x813   : > { %v4966_v53 = vpop.f32.mrf.mxu0 }
 0x814   : > { %v13433_v42 = vadd.f32 %v4966_v53, %v12985_v8  ;;  %v13444_v6 = vadd.f32 %v4909_v52, %v4552_v62  ;;  %v7464_v8 = vor.u32 %v7703_v30, %v7461_v63  ;;  %v7557_v52 = vld [vmem:[%s14309_s4 + $0x448] sm:$0xf0]  ;;  %v15467_v53 = vld [vmem:[#allocation69_spill] sm:$0xff]  ;;  %6383 = vmatpush.bf16.msrb.mxu2 %v7556_v28 }
 0x815   : > { %5385 = vmatmul.bf16.gmra.mxu2 %v15435_v37  ;;  %v7560_v37 = vor.u32 %v7727_v14, %v7557_v52  ;;  %v5733_v30 = vmul.f32 %v12758_v48, %v15467_v53  ;;  %v15473_v53 = vld [vmem:[#allocation86_spill] sm:$0xff] }
 0x816   : > { %15465 = vst [vmem:[#allocation72_spill] sm:$0xff] %v13444_v6  ;;  %v5452_v10 = vpop.f32.mrf.mxu3  ;;  %5005 = vmatmul.bf16.gmra.mxu0 %v13172_v43 }
 0x817   : > { %v13459_v62 = vadd.f32 %v5452_v10, %v13224_v5  ;;  %5962 = vmatpush.bf16.msra.mxu0 %v7464_v8  ;;  %6472 = vmatpush.bf16.msrb.mxu3 %v7560_v37  ;;  %v13464_v11 = vpack.c.bf16 %v5733_v30, %v5732_v59  ;;  %v15472_v37 = vld [vmem:[#allocation23_spill] sm:$0xff] }
 0x819   : > { %v4912_v63 = vpop.f32.mrf.mxu1  ;;  %v4398_v6 = vpop.f32.mrf.mxu2 }
 0x81a   : > { %v4554_v9 = vadd.f32 %v4398_v6, %v15468_v26  ;;  %v15471_v26 = vld [vmem:[#allocation173_spill] sm:$0xff] }
 0x81b   : > { %5494 = vmatmul.bf16.gmra.mxu3 %v15469_v34  ;;  %v4968_v5 = vpop.f32.mrf.mxu0 }
 0x81c   : > { %5899 = vmatmul.bf16.gmra.mxu1 %v13464_v11  ;;  %v13470_v43 = vadd.f32 %v4968_v5, %v13007_v20  ;;  %v13472_v2 = vadd.f32 %v4912_v63, %v4554_v9  ;;  %v5735_v20 = vmul.f32 %v15473_v53, %v15472_v37  ;;  %v15475_v63 = vld [vmem:[#allocation154_spill] sm:$0xff] }
 0x81e   : > { %v5455_v48 = vpop.f32.mrf.mxu3 }
 0x81f   : > { %v13475_v10 = vadd.f32 %v5455_v48, %v13233_v19  ;;  %v15474_v19 = vld [vmem:[#allocation24_spill] sm:$0xff] }
 0x820   : > { %v5734_v5 = vmul.f32 %v15475_v63, %v15474_v19  ;;  %v15481_v19 = vld [vmem:[#allocation144_spill] sm:$0xff] }
 0x821   : > { %v4914_v8 = vpop.f32.mrf.mxu1  ;;  %v4400_v59 = vpop.f32.mrf.mxu2 }
 0x822   : > { %v4556_v14 = vadd.f32 %v4400_v59, %v15470_v17  ;;  %v13492_v59 = vpack.c.bf16 %v5735_v20, %v5734_v5 }
 0x823   : > { %v4971_v52 = vpop.f32.mrf.mxu0 }
 0x824   : > { %v13479_v6 = vadd.f32 %v4971_v52, %v15471_v26  ;;  %v13481_v28 = vadd.f32 %v4914_v8, %v4556_v14  ;;  %v15476_v8 = vld [vmem:[#allocation152_spill] sm:$0xff]  ;;  %v15477_v52 = vld [vmem:[#allocation133_spill] sm:$0xff] }
 0x825   : > { %5390 = vmatmul.bf16.gmra.mxu2 %v15443_v22  ;;  %v15478_v22 = vld [vmem:[#allocation190_spill] sm:$0xff] }
 0x826   : > { %v5457_v30 = vpop.f32.mrf.mxu3  ;;  %5010 = vmatmul.bf16.gmra.mxu0 %v13218_v33 }
 0x827   : > { %v13487_v9 = vadd.f32 %v5457_v30, %v13252_v51 }
 0x829   : > { %v4917_v48 = vpop.f32.mrf.mxu1  ;;  %v4403_v17 = vpop.f32.mrf.mxu2 }
 0x82a   : > { %v4558_v14 = vadd.f32 %v4403_v17, %v15476_v8  ;;  %v7547_v8 = vld [vmem:[%s14309_s4 + $0x430] sm:$0xf] }
 0x82b   : > { %5499 = vmatmul.bf16.gmra.mxu3 %v15477_v52  ;;  %v4973_v26 = vpop.f32.mrf.mxu0 }
 0x82c   : > { %5904 = vmatmul.bf16.gmra.mxu1 %v13492_v59  ;;  %v13498_v37 = vadd.f32 %v4973_v26, %v15478_v22  ;;  %v13500_v51 = vadd.f32 %v4917_v48, %v4558_v14  ;;  %v7726_v48 = vld [vmem:[%s14309_s4 + $0x434] sm:$0xf0]  ;;  %v15483_v26 = vld [vmem:[#allocation37_spill] sm:$0xff]  ;;  %v15484_v22 = vld [vmem:[#allocation50_spill] sm:$0xff] }
 0x82e   : > { %15479 = vst [vmem:[#allocation88_spill] sm:$0xff] %v13500_v51  ;;  %v5460_v33 = vpop.f32.mrf.mxu3  ;;  %v15486_v51 = vld [vmem:[#allocation25_spill] sm:$0xff] }
 0x82f   : > { %v13503_v53 = vadd.f32 %v5460_v33, %v13261_v24  ;;  %v7725_v24 = vld [vmem:[%s14309_s4 + $0x434] sm:$0xf]  ;;  %v5737_v33 = vmul.f32 %v15484_v22, %v15483_v26  ;;  %v15489_v22 = vld [vmem:[#allocation165_spill] sm:$0xff] }
 0x831   : > { %15480 = vst [vmem:[#allocation33_spill] sm:$0xff] %v13503_v53  ;;  %v4919_v30 = vpop.f32.mrf.mxu1  ;;  %v4405_v20 = vpop.f32.mrf.mxu2 }
 0x832   : > { %v4560_v63 = vadd.f32 %v4405_v20, %v15481_v19  ;;  %v7549_v19 = vld [vmem:[%s14309_s4 + $0x438] sm:$0xf0] }
 0x833   : > { %v4976_v5 = vpop.f32.mrf.mxu0  ;;  %v7552_v53 = vor.u32 %v7725_v24, %v7549_v19 }
 0x834   : > { %v13507_v17 = vadd.f32 %v4976_v5, %v13071_v61  ;;  %v13518_v14 = vadd.f32 %v4919_v30, %v4560_v63  ;;  %v7548_v61 = vor.u32 %v7726_v48, %v7547_v8  ;;  %v15487_v30 = vld [vmem:[#allocation26_spill] sm:$0xff]  ;;  %v15488_v8 = vld [vmem:[#allocation11_spill] sm:$0xff] }
 0x835   : > { %5395 = vmatmul.bf16.gmra.mxu2 %v15452_v3  ;;  %v5736_v63 = vmul.f32 %v15487_v30, %v15486_v51  ;;  %6473 = vmatpush.bf16.msrb.mxu3 %v7552_v53 }
 0x836   : > { %15482 = vst [vmem:[#allocation187_spill] sm:$0xff] %v13518_v14  ;;  %v5462_v20 = vpop.f32.mrf.mxu3  ;;  %5963 = vmatmul.bf16.vlgmr.msra.gmra.mxu0 %v13246_v18  ;;  %6384 = vmatpush.bf16.msrb.mxu2 %v7548_v61  ;;  %v15490_v61 = vld [vmem:[#allocation130_spill] sm:$0xff] }
 0x837   : > { %v13527_v5 = vadd.f32 %v5462_v20, %v13298_v54  ;;  %v13532_v26 = vpack.c.bf16 %v5737_v33, %v5736_v63 }
 0x839   : > { %15485 = vst [vmem:[#allocation76_spill] sm:$0xff] %v13527_v5  ;;  %v4922_v14 = vpop.f32.mrf.mxu1  ;;  %v4408_v3 = vpop.f32.mrf.mxu2  ;;  %v15492_v5 = vld [vmem:[#allocation91_spill] sm:$0xff] }
 0x83a   : > { %v4562_v48 = vadd.f32 %v4408_v3, %v15488_v8  ;;  %v15491_v8 = vld [vmem:[#allocation6_spill] sm:$0xff] }
 0x83b   : > { %5504 = vmatmul.bf16.gmra.mxu3 %v15489_v22  ;;  %v4978_v54 = vpop.f32.mrf.mxu0 }
 0x83c   : > { %5909 = vmatmul.bf16.gmra.mxu1 %v13532_v26  ;;  %v13538_v20 = vadd.f32 %v4978_v54, %v13103_v1  ;;  %v13540_v18 = vadd.f32 %v4922_v14, %v4562_v48  ;;  %v5739_v1 = vmul.f32 %v15492_v5, %v15491_v8  ;;  %v15494_v48 = vld [vmem:[#allocation61_spill] sm:$0xff] }
 0x83e   : > { %v5465_v24 = vpop.f32.mrf.mxu3 }
 0x83f   : > { %v13543_v51 = vadd.f32 %v5465_v24, %v13307_v21  ;;  %v15493_v21 = vld [vmem:[#allocation8_spill] sm:$0xff] }
 0x840   : > { %v5738_v24 = vmul.f32 %v15494_v48, %v15493_v21  ;;  %v15499_v21 = vld [vmem:[#allocation161_spill] sm:$0xff] }
 0x841   : > { %v4924_v53 = vpop.f32.mrf.mxu1  ;;  %v4410_v33 = vpop.f32.mrf.mxu2 }
 0x842   : > { %v4564_v19 = vadd.f32 %v4410_v33, %v15490_v61  ;;  %v13560_v61 = vpack.c.bf16 %v5739_v1, %v5738_v24 }
 0x843   : > { %v4981_v30 = vpop.f32.mrf.mxu0 }
 0x844   : > { %v13547_v63 = vadd.f32 %v4981_v30, %v13133_v12  ;;  %v13549_v3 = vadd.f32 %v4924_v53, %v4564_v19  ;;  %v15495_v53 = vld [vmem:[#allocation62_spill] sm:$0xff]  ;;  %v15496_v30 = vld [vmem:[#allocation95_spill] sm:$0xff] }
 0x845   : > { %5400 = vmatmul.bf16.gmra.mxu2 %v15461_v4 }
 0x846   : > { %v5467_v54 = vpop.f32.mrf.mxu3  ;;  %5968 = vmatmul.bf16.gmra.mxu0 %v13292_v16 }
 0x847   : > { %v13555_v14 = vadd.f32 %v5467_v54, %v13326_v50 }
 0x849   : > { %v5875_v33 = vpop.f32.mrf.mxu1  ;;  %v5361_v12 = vpop.f32.mrf.mxu2 }
 0x84a   : > { %v5530_v19 = vadd.f32 %v5361_v12, %v15495_v53  ;;  %v7539_v53 = vld [vmem:[%s14309_s4 + $0x420] sm:$0xf] }
 0x84b   : > { %5509 = vmatmul.bf16.gmra.mxu3 %v15496_v30  ;;  %v4983_v5 = vpop.f32.mrf.mxu0 }
 0x84c   : > { %5914 = vmatmul.bf16.gmra.mxu1 %v13560_v61  ;;  %v13566_v4 = vadd.f32 %v4983_v5, %v13161_v27  ;;  %v13568_v50 = vadd.f32 %v5875_v33, %v5530_v19  ;;  %v7724_v27 = vld [vmem:[%s14309_s4 + $0x424] sm:$0xf0]  ;;  %v15501_v19 = vld [vmem:[#allocation21_spill] sm:$0xff] }
 0x84d   : > { %v15502_v5 = vld [vmem:[#allocation90_spill] sm:$0xff] }
 0x84e   : > { %15497 = vst [vmem:[#allocation174_spill] sm:$0xff] %v13568_v50  ;;  %v5470_v16 = vpop.f32.mrf.mxu3  ;;  %v15503_v50 = vld [vmem:[#allocation40_spill] sm:$0xff] }
 0x84f   : > { %v13571_v8 = vadd.f32 %v5470_v16, %v13335_v47  ;;  %v7723_v47 = vld [vmem:[%s14309_s4 + $0x424] sm:$0xf]  ;;  %v5740_v16 = vmul.f32 %v15502_v5, %v15501_v19  ;;  %v15506_v5 = vld [vmem:[#allocation99_spill] sm:$0xff] }
 0x851   : > { %15498 = vst [vmem:[#allocation196_spill] sm:$0xff] %v13571_v8  ;;  %v5877_v54 = vpop.f32.mrf.mxu1  ;;  %v5363_v1 = vpop.f32.mrf.mxu2 }
 0x852   : > { %v5532_v48 = vadd.f32 %v5363_v1, %v15499_v21  ;;  %v7541_v21 = vld [vmem:[%s14309_s4 + $0x428] sm:$0xf0] }
 0x853   : > { %v4986_v24 = vpop.f32.mrf.mxu0  ;;  %v7544_v8 = vor.u32 %v7723_v47, %v7541_v21 }
 0x854   : > { %v13575_v12 = vadd.f32 %v4986_v24, %v13183_v56  ;;  %v13586_v33 = vadd.f32 %v5877_v54, %v5532_v48  ;;  %v7540_v56 = vor.u32 %v7724_v27, %v7539_v53  ;;  %v15504_v54 = vld [vmem:[#allocation153_spill] sm:$0xff]  ;;  %v15505_v53 = vld [vmem:[#allocation164_spill] sm:$0xff] }
 0x855   : > { %5405 = vmatmul.bf16.gmra.mxu2 %v15469_v34  ;;  %v5741_v48 = vmul.f32 %v15504_v54, %v15503_v50  ;;  %6474 = vmatpush.bf16.msrb.mxu3 %v7544_v8 }
 0x856   : > { %15500 = vst [vmem:[#allocation171_spill] sm:$0xff] %v13586_v33  ;;  %v5472_v1 = vpop.f32.mrf.mxu3  ;;  %5973 = vmatmul.bf16.gmra.mxu0 %v13320_v44  ;;  %6385 = vmatpush.bf16.msrb.mxu2 %v7540_v56  ;;  %v15508_v56 = vld [vmem:[#allocation141_spill] sm:$0xff] }
 0x857   : > { %v13595_v24 = vadd.f32 %v5472_v1, %v13372_v25  ;;  %v13600_v19 = vpack.c.bf16 %v5741_v48, %v5740_v16 }
 0x859   : > { %v5880_v33 = vpop.f32.mrf.mxu1  ;;  %v5366_v34 = vpop.f32.mrf.mxu2 }
 0x85a   : > { %v5534_v27 = vadd.f32 %v5366_v34, %v15505_v53  ;;  %v7721_v34 = vld [vmem:[%s14309_s4 + $0x414] sm:$0xf]  ;;  %v15510_v53 = vld [vmem:[#allocation84_spill] sm:$0xff] }
 0x85b   : > { %5514 = vmatmul.bf16.gmra.mxu3 %v15506_v5  ;;  %v4988_v25 = vpop.f32.mrf.mxu0 }
 0x85c   : > { %5919 = vmatmul.bf16.gmra.mxu1 %v13600_v19  ;;  %v13606_v1 = vadd.f32 %v4988_v25, %v13207_v55  ;;  %v13608_v44 = vadd.f32 %v5880_v33, %v5534_v27  ;;  %v7533_v55 = vld [vmem:[%s14309_s4 + $0x418] sm:$0xf0] }
 0x85e   : > { %v5475_v47 = vpop.f32.mrf.mxu3 }
 0x85f   : > { %v13611_v50 = vadd.f32 %v5475_v47, %v13381_v32  ;;  %v15509_v32 = vld [vmem:[#allocation22_spill] sm:$0xff]  ;;  %v7536_v47 = vor.u32 %v7721_v34, %v7533_v55 }
 0x860   : > { %v5743_v27 = vmul.f32 %v15510_v53, %v15509_v32  ;;  %v15514_v55 = vld [vmem:[#allocation138_spill] sm:$0xff] }
 0x861   : > { %15507 = vst [vmem:[#allocation193_spill] sm:$0xff] %v13611_v50  ;;  %v5882_v8 = vpop.f32.mrf.mxu1  ;;  %v5368_v16 = vpop.f32.mrf.mxu2  ;;  %6475 = vmatpush.bf16.msrb.mxu3 %v7536_v47 }
 0x862   : > { %v5536_v21 = vadd.f32 %v5368_v16, %v15508_v56  ;;  %v15512_v16 = vld [vmem:[#allocation43_spill] sm:$0xff]  ;;  %v15513_v56 = vld [vmem:[#allocation105_spill] sm:$0xff] }
 0x863   : > { %v4991_v54 = vpop.f32.mrf.mxu0 }
 0x864   : > { %v13615_v48 = vadd.f32 %v4991_v54, %v13229_v38  ;;  %v13623_v33 = vadd.f32 %v5882_v8, %v5536_v21  ;;  %v5742_v54 = vmul.f32 %v15513_v56, %v15512_v16  ;;  %v7719_v8 = vld [vmem:[%s14309_s4 + $0x404] sm:$0xf]  ;;  %v7525_v21 = vld [vmem:[%s14309_s4 + $0x408] sm:$0xf0] }
 0x865   : > { %5410 = vmatmul.bf16.gmra.mxu2 %v15477_v52 }
 0x866   : > { %v5477_v25 = vpop.f32.mrf.mxu3  ;;  %5978 = vmatmul.bf16.gmra.mxu0 %v13366_v58  ;;  %v13640_v52 = vpack.c.bf16 %v5743_v27, %v5742_v54  ;;  %v15515_v58 = vld [vmem:[#allocation47_spill] sm:$0xff] }
 0x867   : > { %v13629_v38 = vadd.f32 %v5477_v25, %v13412_v46  ;;  %v7528_v46 = vor.u32 %v7719_v8, %v7525_v21  ;;  %v15518_v8 = vld [vmem:[#allocation168_spill] sm:$0xff] }
 0x869   : > { %15511 = vst [vmem:[#allocation31_spill] sm:$0xff] %v13629_v38  ;;  %v5885_v50 = vpop.f32.mrf.mxu1  ;;  %v5371_v34 = vpop.f32.mrf.mxu2  ;;  %6476 = vmatpush.bf16.msrb.mxu3 %v7528_v46  ;;  %v7531_v46 = vld [vmem:[%s14309_s4 + $0x410] sm:$0xf] }
 0x86a   : > { %v5538_v32 = vadd.f32 %v5371_v34, %v15514_v55 }
 0x86b   : > { %5519 = vmatmul.bf16.gmra.mxu3 %v15515_v58  ;;  %v4993_v53 = vpop.f32.mrf.mxu0 }
 0x86c   : > { %5924 = vmatmul.bf16.gmra.mxu1 %v13640_v52  ;;  %v13646_v25 = vadd.f32 %v4993_v53, %v13241_v35  ;;  %v13648_v47 = vadd.f32 %v5885_v50, %v5538_v32  ;;  %v7722_v35 = vld [vmem:[%s14309_s4 + $0x414] sm:$0xf0]  ;;  %v15521_v32 = vld [vmem:[#allocation45_spill] sm:$0xff] }
 0x86e   : > { %15516 = vst [vmem:[#allocation192_spill] sm:$0xff] %v13648_v47  ;;  %v5480_v16 = vpop.f32.mrf.mxu3 }
 0x86f   : > { %v13651_v56 = vadd.f32 %v5480_v16, %v13433_v42  ;;  %v15520_v42 = vld [vmem:[#allocation20_spill] sm:$0xff] }
 0x870   : > { %v5745_v53 = vmul.f32 %v15521_v32, %v15520_v42  ;;  %v15525_v42 = vld [vmem:[#allocation119_spill] sm:$0xff]  ;;  %v15526_v32 = vld [vmem:[#allocation148_spill] sm:$0xff] }
 0x871   : > { %15517 = vst [vmem:[#allocation189_spill] sm:$0xff] %v13651_v56  ;;  %v5887_v27 = vpop.f32.mrf.mxu1  ;;  %v5373_v54 = vpop.f32.mrf.mxu2 }
 0x872   : > { %v5540_v21 = vadd.f32 %v5373_v54, %v15518_v8  ;;  %v7532_v54 = vor.u32 %v7722_v35, %v7531_v46  ;;  %v15522_v8 = vld [vmem:[#allocation17_spill] sm:$0xff] }
 0x873   : > { %v4996_v34 = vpop.f32.mrf.mxu0 }
 0x874   : > { %v13655_v55 = vadd.f32 %v4996_v34, %v13257_v39  ;;  %v13663_v50 = vadd.f32 %v5887_v27, %v5540_v21  ;;  %v15523_v34 = vld [vmem:[#allocation85_spill] sm:$0xff]  ;;  %6386 = vmatpush.bf16.msrb.mxu2 %v7532_v54 }
 0x875   : > { %5415 = vmatmul.bf16.gmra.mxu2 %v15489_v22  ;;  %v5744_v56 = vmul.f32 %v15523_v34, %v15522_v8 }
 0x876   : > { %15519 = vst [vmem:[#allocation181_spill] sm:$0xff] %v13663_v50  ;;  %v5482_v16 = vpop.f32.mrf.mxu3  ;;  %5983 = vmatmul.bf16.gmra.mxu0 %v13406_v60  ;;  %v15524_v50 = vld [vmem:[#allocation162_spill] sm:$0xff] }
 0x877   : > { %v13669_v39 = vadd.f32 %v5482_v16, %v13470_v43  ;;  %v13674_v47 = vpack.c.bf16 %v5745_v53, %v5744_v56 }
 0x879   : > { %v5890_v27 = vpop.f32.mrf.mxu1  ;;  %v5376_v21 = vpop.f32.mrf.mxu2 }
 0x87a   : > { %v5542_v38 = vadd.f32 %v5376_v21, %v15524_v50  ;;  %v5692_v50 = vpop.permute.xlu0 %5691  ;;  %v15527_v21 = vld [vmem:[#allocation16_spill] sm:$0xff] }
 0x87b   : > { %5524 = vmatmul.bf16.gmra.mxu3 %v15525_v42  ;;  %v4998_v22 = vpop.f32.mrf.mxu0 }
 0x87c   : > { %5929 = vmatmul.bf16.gmra.mxu1 %v13674_v47  ;;  %v13680_v43 = vadd.f32 %v4998_v22, %v13281_v15  ;;  %v13682_v46 = vadd.f32 %v5890_v27, %v5542_v38  ;;  %v15528_v15 = vld [vmem:[#allocation151_spill] sm:$0xff]  ;;  %v15530_v27 = vld [vmem:[#allocation14_spill] sm:$0xff] }
 0x87d   : > { %v5747_v22 = vmul.f32 %v15528_v15, %v15527_v21 }
 0x87e   : > { %v5485_v60 = vpop.f32.mrf.mxu3 }
 0x87f   : > { %v13685_v35 = vadd.f32 %v5485_v60, %v13479_v6  ;;  %v5746_v60 = vmul.f32 %v5692_v50, %v15530_v27  ;;  %v15535_v50 = vld [vmem:[#allocation175_spill] sm:$0xff] }
 0x881   : > { %v5378_v56 = vpop.f32.mrf.mxu2  ;;  %v5892_v16 = vpop.f32.mrf.mxu1 }
 0x882   : > { %v5544_v53 = vadd.f32 %v5378_v56, %v15526_v32  ;;  %v13701_v56 = vpack.c.bf16 %v5747_v22, %v5746_v60  ;;  %v7523_v60 = vld [vmem:[%s14309_s4 + $0x400] sm:$0xf] }
 0x883   : > { %v5001_v54 = vpop.f32.mrf.mxu0 }
 0x884   : > { %v13689_v8 = vadd.f32 %v5001_v54, %v13303_v41  ;;  %v13691_v34 = vadd.f32 %v5892_v16, %v5544_v53  ;;  %v15531_v41 = vld [vmem:[#allocation183_spill] sm:$0xff]  ;;  %v15533_v53 = vld [vmem:[#allocation172_spill] sm:$0xff] }
 0x885   : > { %5420 = vmatmul.bf16.gmra.mxu2 %v15496_v30 }
 0x886   : > { %v5487_v38 = vpop.f32.mrf.mxu3  ;;  %5988 = vmatmul.bf16.gmra.mxu0 %v13464_v11 }
 0x887   : > { %v13697_v6 = vadd.f32 %v5487_v38, %v13498_v37  ;;  %v5704_v38 = vpop.permute.xlu0 %5703 }
 0x889   : > { %15529 = vst [vmem:[#allocation121_spill] sm:$0xff] %v13697_v6  ;;  %v5381_v32 = vpop.f32.mrf.mxu2  ;;  %v15541_v6 = vld [vmem:[#allocation137_spill] sm:$0xff] }
 0x88a   : > { %v13704_v54 = vadd.f32 %v5381_v32, %v15531_v41  ;;  %v15537_v32 = vld [vmem:[#allocation10_spill] sm:$0xff] }
 0x88b   : > { %6477 = vmatmul.bf16.vlgmr.msrb.gmra.mxu3 %v15533_v53  ;;  %v5003_v16 = vpop.f32.mrf.mxu0 }
 0x88c   : > { %15532 = vst [vmem:[#allocation179_spill] sm:$0xff] %v13704_v54  ;;  %5934 = vmatmul.bf16.gmra.mxu1 %v13701_v56  ;;  %v13709_v30 = vadd.f32 %v5003_v16, %v13315_v45  ;;  %v7720_v45 = vld [vmem:[%s14309_s4 + $0x404] sm:$0xf0] }
 0x88e   : > { %v5490_v37 = vpop.f32.mrf.mxu3 }
 0x88f   : > { %v13712_v21 = vadd.f32 %v5490_v37, %v13507_v17  ;;  %v15538_v17 = vld [vmem:[#allocation178_spill] sm:$0xff]  ;;  %v7524_v37 = vor.u32 %v7720_v45, %v7523_v60  ;;  %v5712_v45 = vpop.permute.xlu2 %5711 }
 0x890   : > { %v5748_v41 = vmul.f32 %v15538_v17, %v15537_v32 }
 0x891   : > { %15534 = vst [vmem:[#allocation38_spill] sm:$0xff] %v13712_v21  ;;  %v5383_v11 = vpop.f32.mrf.mxu2  ;;  %6387 = vmatpush.bf16.msrb.mxu2 %v7524_v37  ;;  %v15540_v21 = vld [vmem:[#allocation169_spill] sm:$0xff] }
 0x892   : > { %v13715_v15 = vadd.f32 %v5383_v11, %v15535_v50 }
 0x893   : > { %v5006_v22 = vpop.f32.mrf.mxu0 }
 0x894   : > { %15536 = vst [vmem:[#allocation96_spill] sm:$0xff] %v13715_v15  ;;  %v13718_v27 = vadd.f32 %v5006_v22, %v13331_v23  ;;  %v15539_v23 = vld [vmem:[#allocation54_spill] sm:$0xff] }
 0x895   : > { %5425 = vmatmul.bf16.gmra.mxu2 %v15506_v5  ;;  %v5749_v50 = vmul.f32 %v5704_v38, %v15539_v23 }
 0x896   : > { %v5492_v16 = vpop.f32.mrf.mxu3  ;;  %5993 = vmatmul.bf16.gmra.mxu0 %v13492_v59 }
 0x897   : > { %v13730_v11 = vadd.f32 %v5492_v16, %v13538_v20  ;;  %v13734_v22 = vpack.c.bf16 %v5749_v50, %v5748_v41  ;;  %v15542_v41 = vld [vmem:[#allocation53_spill] sm:$0xff]  ;;  %v13760_v50 = vpop.permute.xlu1 %6229 }
 0x898   : > { %v5751_v16 = vmul.f32 %v5712_v45, %v15542_v41  ;;  %v5716_v41 = vpop.permute.xlu2 %5715 }
 0x899   : > { %v5386_v15 = vpop.f32.mrf.mxu2 }
 0x89a   : > { %v13737_v54 = vadd.f32 %v5386_v15, %v15540_v21  ;;  %v5708_v21 = vpop.permute.xlu0 %5707 }
 0x89b   : > { %6482 = vmatmul.bf16.gmra.mxu3 %v15541_v6  ;;  %v5008_v5 = vpop.f32.mrf.mxu0 }
 0x89c   : > { %5939 = vmatmul.bf16.gmra.mxu1 %v13734_v22  ;;  %v13742_v60 = vadd.f32 %v5008_v5, %v13355_v40 }
 0x89e   : > { %v5495_v20 = vpop.f32.mrf.mxu3 }
 0x89f   : > { %v13745_v59 = vadd.f32 %v5495_v20, %v13547_v63  ;;  %v15543_v63 = vld [vmem:[#allocation55_spill] sm:$0xff] }
 0x8a0   : > { %v5750_v23 = vmul.f32 %v5708_v21, %v15543_v63  ;;  %v15544_v20 = vld [vmem:[#allocation83_spill] sm:$0xff] }
 0x8a1   : > { %v5388_v38 = vpop.f32.mrf.mxu2 }
 0x8a2   : > { %v13748_v32 = vadd.f32 %v5388_v38, %v13155_v29  ;;  %v13762_v29 = vpack.c.bf16 %v5751_v16, %v5750_v23 }
 0x8a3   : > { %v5011_v17 = vpop.f32.mrf.mxu0 }
 0x8a4   : > { %v13751_v15 = vadd.f32 %v5011_v17, %v13377_v36  ;;  %v5720_v17 = vpop.permute.xlu1 %5719 }
 0x8a5   : > { %5430 = vmatmul.bf16.gmra.mxu2 %v15515_v58 }
 0x8a6   : > { %v5497_v37 = vpop.f32.mrf.mxu3  ;;  %5998 = vmatmul.bf16.gmra.mxu0 %v13532_v26 }
 0x8a7   : > { %v13756_v40 = vadd.f32 %v5497_v37, %v13566_v4 }
 0x8a9   : > { %v5391_v5 = vpop.f32.mrf.mxu2 }
 0x8aa   : > { %v13765_v36 = vadd.f32 %v5391_v5, %v13180_v49  ;;  %v15545_v49 = vld [vmem:[#allocation60_spill] sm:$0xff] }
 0x8ab   : > { %6487 = vmatmul.bf16.gmra.mxu3 %v15544_v20  ;;  %v5013_v58 = vpop.f32.mrf.mxu0  ;;  %v5753_v16 = vmul.f32 %v5720_v17, %v15545_v49 }
 0x8ac   : > { %5944 = vmatmul.bf16.gmra.mxu1 %v13762_v29  ;;  %v13770_v4 = vadd.f32 %v5013_v58, %v13395_v57  ;;  %v15546_v57 = vld [vmem:[#allocation59_spill] sm:$0xff] }
 0x8ad   : > { %v5752_v23 = vmul.f32 %v5716_v41, %v15546_v57  ;;  %v15548_v41 = vld [vmem:[#allocation156_spill] sm:$0xff] }
 0x8ae   : > { %v5500_v38 = vpop.f32.mrf.mxu3 }
 0x8af   : > { %v13773_v26 = vadd.f32 %v5500_v38, %v13575_v12  ;;  %v13785_v12 = vpack.c.bf16 %v5753_v16, %v5752_v23  ;;  %v15549_v16 = vld [vmem:[#allocation147_spill] sm:$0xff] }
 0x8b0   : > { %v15550_v23 = vld [vmem:[#allocation195_spill] sm:$0xff] }
 0x8b1   : > { %v5393_v45 = vpop.f32.mrf.mxu2 }
 0x8b2   : > { %v13776_v21 = vadd.f32 %v5393_v45, %v13198_v31  ;;  %v15547_v31 = vld [vmem:[#allocation73_spill] sm:$0xff] }
 0x8b5   : > { %5435 = vmatmul.bf16.gmra.mxu2 %v15525_v42 }
 0x8b6   : > { %v5502_v37 = vpop.f32.mrf.mxu3  ;;  %6003 = vmatmul.bf16.gmra.mxu0 %v13560_v61 }
 0x8b7   : > { %v13781_v63 = vadd.f32 %v5502_v37, %v13606_v1 }
 0x8b9   : > { %v5396_v5 = vpop.f32.mrf.mxu2 }
 0x8ba   : > { %v13788_v58 = vadd.f32 %v5396_v5, %v13226_v0 }
 0x8bb   : > { %6492 = vmatmul.bf16.gmra.mxu3 %v15547_v31 }
 0x8bc   : > { %5949 = vmatmul.bf16.gmra.mxu1 %v13785_v12 }
 0x8be   : > { %v5505_v38 = vpop.f32.mrf.mxu3 }
 0x8bf   : > { %v13793_v42 = vadd.f32 %v5505_v38, %v13615_v48  ;;  %v5964_v48 = vpop.f32.mrf.mxu0 }
 0x8c1   : > { %v5398_v1 = vpop.f32.mrf.mxu2 }
 0x8c2   : > { %v13796_v45 = vadd.f32 %v5398_v1, %v13235_v13 }
 0x8c5   : > { %6388 = vmatmul.bf16.vlgmr.msrb.gmra.mxu2 %v15533_v53 }
 0x8c6   : > { %v5507_v61 = vpop.f32.mrf.mxu3  ;;  %6008 = vmatmul.bf16.gmra.mxu0 %v13600_v19 }
 0x8c7   : > { %v13800_v17 = vadd.f32 %v5507_v61, %v13646_v25  ;;  %v5966_v53 = vpop.f32.mrf.mxu0  ;;  %v15551_v61 = vld [vmem:[#allocation149_spill] sm:$0xff] }
 0x8c9   : > { %v5401_v0 = vpop.f32.mrf.mxu2 }
 0x8ca   : > { %v13804_v49 = vadd.f32 %v5401_v0, %v15548_v41 }
 0x8cb   : > { %6497 = vmatmul.bf16.gmra.mxu3 %v15549_v16 }
 0x8ce   : > { %v5510_v37 = vpop.f32.mrf.mxu3 }
 0x8cf   : > { %v13808_v57 = vadd.f32 %v5510_v37, %v13655_v55  ;;  %v13825_v41 = vpop.f32.mrf.mxu0 }
 0x8d1   : > { %v5403_v13 = vpop.f32.mrf.mxu2 }
 0x8d2   : > { %v13811_v5 = vadd.f32 %v5403_v13, %v15550_v23  ;;  %v15552_v13 = vld [vmem:[#allocation158_spill] sm:$0xff] }
 0x8d5   : > { %6393 = vmatmul.bf16.gmra.mxu2 %v15541_v6 }
 0x8d6   : > { %v5512_v25 = vpop.f32.mrf.mxu3  ;;  %6013 = vmatmul.bf16.gmra.mxu0 %v13640_v52 }
 0x8d7   : > { %v13815_v19 = vadd.f32 %v5512_v25, %v13680_v43  ;;  %v15555_v25 = vld [vmem:[#allocation29_spill] sm:$0xff] }
 0x8d9   : > { %v5406_v38 = vpop.f32.mrf.mxu2 }
 0x8da   : > { %v13819_v1 = vadd.f32 %v5406_v38, %v13300_v7  ;;  %v13835_v7 = vpop.f32.mrf.mxu0  ;;  %v15557_v38 = vld [vmem:[#allocation157_spill] sm:$0xff] }
 0x8db   : > { %6502 = vmatmul.bf16.gmra.mxu3 %v15551_v61 }
 0x8de   : > { %v5515_v55 = vpop.f32.mrf.mxu3 }
 0x8df   : > { %v13823_v0 = vadd.f32 %v5515_v55, %v13689_v8 }
 0x8e1   : > { %v5408_v37 = vpop.f32.mrf.mxu2 }
 0x8e2   : > { %v13828_v6 = vadd.f32 %v5408_v37, %v15552_v13 }
 0x8e4   : > { %15553 = vst [vmem:[#allocation184_spill] sm:$0xff] %v13828_v6  ;;  %v15559_v6 = vld [vmem:[#allocation30_spill] sm:$0xff] }
 0x8e5   : > { %6398 = vmatmul.bf16.gmra.mxu2 %v15544_v20 }
 0x8e6   : > { %v5517_v43 = vpop.f32.mrf.mxu3  ;;  %6018 = vmatmul.bf16.gmra.mxu0 %v13674_v47 }
 0x8e7   : > { %v13832_v52 = vadd.f32 %v5517_v43, %v13709_v30  ;;  %v13847_v30 = vpop.f32.mrf.mxu0 }
 0x8e9   : > { %15554 = vst [vmem:[#allocation185_spill] sm:$0xff] %v13832_v52  ;;  %v5411_v23 = vpop.f32.mrf.mxu2 }
 0x8ea   : > { %v13838_v8 = vadd.f32 %v5411_v23, %v15555_v25  ;;  %v15562_v25 = vld [vmem:[#allocation98_spill] sm:$0xff] }
 0x8eb   : > { %6507 = vmatmul.bf16.gmra.mxu3 %v15557_v38 }
 0x8ec   : > { %15556 = vst [vmem:[#allocation197_spill] sm:$0xff] %v13838_v8 }
 0x8ee   : > { %v5520_v55 = vpop.f32.mrf.mxu3 }
 0x8ef   : > { %v13842_v37 = vadd.f32 %v5520_v55, %v13718_v27  ;;  %v15564_v27 = vld [vmem:[#allocation127_spill] sm:$0xff]  ;;  %v13858_v55 = vpop.f32.mrf.mxu0 }
 0x8f1   : > { %15558 = vst [vmem:[#allocation65_spill] sm:$0xff] %v13842_v37  ;;  %v5413_v13 = vpop.f32.mrf.mxu2 }
 0x8f2   : > { %v13845_v20 = vadd.f32 %v5413_v13, %v15559_v6 }
 0x8f4   : > { %15560 = vst [vmem:[#allocation27_spill] sm:$0xff] %v13845_v20 }
 0x8f5   : > { %6403 = vmatmul.bf16.gmra.mxu2 %v15547_v31  ;;  %v15566_v31 = vld [vmem:[#allocation177_spill] sm:$0xff] }
 0x8f6   : > { %v5522_v43 = vpop.f32.mrf.mxu3  ;;  %6023 = vmatmul.bf16.gmra.mxu0 %v13701_v56 }
 0x8f7   : > { %v13851_v47 = vadd.f32 %v5522_v43, %v13742_v60  ;;  %v13871_v43 = vpop.f32.mrf.mxu0 }
 0x8f9   : > { %15561 = vst [vmem:[#allocation48_spill] sm:$0xff] %v13851_v47  ;;  %v5416_v23 = vpop.f32.mrf.mxu2 }
 0x8fa   : > { %v13855_v8 = vadd.f32 %v5416_v23, %v15562_v25  ;;  %v15569_v25 = vld [vmem:[#allocation166_spill] sm:$0xff] }
 0x8fb   : > { %6512 = vmatmul.bf16.gmra.mxu3 %v15564_v27 }
 0x8fc   : > { %15563 = vst [vmem:[#allocation15_spill] sm:$0xff] %v13855_v8  ;;  %v15573_v8 = vld [vmem:[#allocation72_spill] sm:$0xff] }
 0x8fe   : > { %v5525_v6 = vpop.f32.mrf.mxu3 }
 0x8ff   : > { %v13861_v13 = vadd.f32 %v5525_v6, %v13751_v15  ;;  %v13876_v15 = vld [vmem:[%s14310_s5] sm:$0x3]  ;;  %v15571_v6 = vld [vmem:[#allocation66_spill] sm:$0xff] }
 0x901   : > { %15565 = vst [vmem:[#allocation188_spill] sm:$0xff] %v13861_v13  ;;  %v5418_v20 = vpop.f32.mrf.mxu2 }
 0x902   : > { %v13864_v37 = vadd.f32 %v5418_v20, %v15566_v31  ;;  %v13889_v31 = vperm.slane %v13876_v15, 1 }
 0x904   : > { %15567 = vst [vmem:[#allocation100_spill] sm:$0xff] %v13864_v37 }
 0x905   : > { %6408 = vmatmul.bf16.gmra.mxu2 %v15549_v16  ;;  %v15572_v16 = vld [vmem:[#allocation18_spill] sm:$0xff] }
 0x906   : > { %v5527_v60 = vpop.f32.mrf.mxu3  ;;  %6028 = vmatmul.bf16.gmra.mxu0 %v13734_v22  ;;  %v6045_v22 = vadd.f32 %v5964_v48, %v15572_v16  ;;  %v6047_v16 = vadd.f32 %v5966_v53, %v13459_v62  ;;  %v15574_v62 = vld [vmem:[#allocation36_spill] sm:$0xff] }
 0x907   : > { %v13868_v56 = vadd.f32 %v5527_v60, %v13770_v4  ;;  %v13885_v4 = vld [vmem:[%s14311_s6] sm:$0x3] }
 0x908   : > { %v13893_v37 = vperm.slane %v13885_v4, 1 }
 0x909   : > { %15568 = vst [vmem:[#allocation194_spill] sm:$0xff] %v13868_v56  ;;  %v5421_v23 = vpop.f32.mrf.mxu2 }
 0x90a   : > { %v13879_v20 = vadd.f32 %v5421_v23, %v15569_v25  ;;  %v13898_v25 = vpop.f32.mrf.mxu0 }
 0x90b   : > { %6517 = vmatmul.bf16.gmra.mxu3 %v15571_v6 }
 0x90c   : > { %15570 = vst [vmem:[#allocation79_spill] sm:$0xff] %v13879_v20 }
 0x90e   : > { %v6478_v60 = vpop.f32.mrf.mxu3 }
 0x90f   : > { %v6559_v56 = vadd.f32 %v6478_v60, %v6045_v22 }
 0x911   : > { %v6629_v23 = vmul.f32 %v13889_v31, %v6559_v56  ;;  %v5423_v20 = vpop.f32.mrf.mxu2 }
 0x912   : > { %v13902_v48 = vadd.f32 %v5423_v20, %v15573_v8  ;;  %v13916_v53 = vpop.f32.mrf.mxu0 }
 0x913   : > { %v6699_v13 = vadd.f32 %v13893_v37, %v6629_v23 }
 0x915   : > { %v6763_v47 = vmax.f32 %v6699_v13, 0.0  ;;  %6413 = vmatmul.bf16.gmra.mxu2 %v15551_v61  ;;  %v6049_v61 = vadd.f32 %v13825_v41, %v13475_v10 }
 0x916   : > { %v6480_v52 = vpop.f32.mrf.mxu3  ;;  %6033 = vmatmul.bf16.gmra.mxu0 %v13762_v29 }
 0x917   : > { %6827 = vst [vmem:[%s13906_s21 + $0x8] sm:$0xff] %v6763_v47  ;;  %v6561_v56 = vadd.f32 %v6480_v52, %v6047_v16 }
 0x919   : > { %v6631_v22 = vmul.f32 %v13889_v31, %v6561_v56  ;;  %v5426_v60 = vpop.f32.mrf.mxu2  ;;  %v6051_v56 = vadd.f32 %v13835_v7, %v13487_v9  ;;  %v15576_v9 = vld [vmem:[#allocation52_spill] sm:$0xff]  ;;  %v15577_v7 = vld [vmem:[#allocation33_spill] sm:$0xff] }
 0x91a   : > { %v13913_v20 = vadd.f32 %v5426_v60, %v13472_v2  ;;  %v13928_v60 = vpop.f32.mrf.mxu0 }
 0x91b   : > { %v6701_v8 = vadd.f32 %v13893_v37, %v6631_v22  ;;  %6522 = vmatmul.bf16.gmra.mxu3 %v15574_v62 }
 0x91d   : > { %v6765_v47 = vmax.f32 %v6701_v8, 0.0 }
 0x91e   : > { %v6483_v52 = vpop.f32.mrf.mxu3 }
 0x91f   : > { %6829 = vst [vmem:[%s13906_s21 + $0x18] sm:$0xff] %v6765_v47  ;;  %v6563_v29 = vadd.f32 %v6483_v52, %v6049_v61  ;;  %v15575_v47 = vld [vmem:[#allocation88_spill] sm:$0xff] }
 0x921   : > { %v6633_v13 = vmul.f32 %v13889_v31, %v6563_v29  ;;  %v5428_v23 = vpop.f32.mrf.mxu2  ;;  %v6053_v29 = vadd.f32 %v13847_v30, %v15577_v7 }
 0x922   : > { %v13924_v2 = vadd.f32 %v5428_v23, %v13481_v28 }
 0x923   : > { %v6703_v16 = vadd.f32 %v13893_v37, %v6633_v13 }
 0x925   : > { %v6767_v22 = vmax.f32 %v6703_v16, 0.0  ;;  %6418 = vmatmul.bf16.gmra.mxu2 %v15557_v38  ;;  %v13942_v16 = vpop.f32.mrf.mxu0 }
 0x926   : > { %v6485_v10 = vpop.f32.mrf.mxu3  ;;  %6038 = vmatmul.bf16.gmra.mxu0 %v13785_v12 }
 0x927   : > { %6831 = vst [vmem:[%s13906_s21 + $0x28] sm:$0xff] %v6767_v22  ;;  %v6565_v41 = vadd.f32 %v6485_v10, %v6051_v56  ;;  %v15578_v10 = vld [vmem:[#allocation187_spill] sm:$0xff] }
 0x929   : > { %v6635_v8 = vmul.f32 %v13889_v31, %v6565_v41  ;;  %v5431_v61 = vpop.f32.mrf.mxu2 }
 0x92a   : > { %v13936_v52 = vadd.f32 %v5431_v61, %v15575_v47 }
 0x92b   : > { %v6705_v28 = vadd.f32 %v13893_v37, %v6635_v8  ;;  %6527 = vmatmul.bf16.gmra.mxu3 %v15576_v9  ;;  %v15579_v8 = vld [vmem:[#allocation76_spill] sm:$0xff] }
 0x92c   : > { %v6055_v61 = vadd.f32 %v13858_v55, %v15579_v8  ;;  %v6057_v55 = vadd.f32 %v13871_v43, %v13543_v51 }
 0x92d   : > { %v6769_v13 = vmax.f32 %v6705_v28, 0.0 }
 0x92e   : > { %v6488_v38 = vpop.f32.mrf.mxu3 }
 0x92f   : > { %6833 = vst [vmem:[%s13906_s21 + $0x38] sm:$0xff] %v6769_v13  ;;  %v6567_v23 = vadd.f32 %v6488_v38, %v6053_v29  ;;  %v13954_v29 = vpop.f32.mrf.mxu0 }
 0x931   : > { %v6637_v12 = vmul.f32 %v13889_v31, %v6567_v23  ;;  %v5433_v56 = vpop.f32.mrf.mxu2 }
 0x932   : > { %v13947_v41 = vadd.f32 %v5433_v56, %v15578_v10 }
 0x933   : > { %v6707_v22 = vadd.f32 %v13893_v37, %v6637_v12  ;;  %v15580_v12 = vld [vmem:[#allocation92_spill] sm:$0xff] }
 0x935   : > { %v6771_v47 = vmax.f32 %v6707_v22, 0.0  ;;  %6423 = vmatmul.bf16.gmra.mxu2 %v15564_v27 }
 0x936   : > { %v6490_v30 = vpop.f32.mrf.mxu3 }
 0x937   : > { %6835 = vst [vmem:[%s13906_s21 + $0x48] sm:$0xff] %v6771_v47  ;;  %v6569_v28 = vadd.f32 %v6490_v30, %v6055_v61  ;;  %v6059_v30 = vadd.f32 %v13898_v25, %v13555_v14  ;;  %v13982_v14 = vperm.slane %v13885_v4, 0  ;;  %v15582_v25 = vld [vmem:[#allocation146_spill] sm:$0xff] }
 0x939   : > { %v6639_v7 = vmul.f32 %v13889_v31, %v6569_v28  ;;  %v5436_v13 = vpop.f32.mrf.mxu2 }
 0x93a   : > { %v13958_v23 = vadd.f32 %v5436_v13, %v13540_v18  ;;  %v13969_v18 = vpop.f32.mrf.mxu0  ;;  %v13977_v13 = vperm.slane %v13876_v15, 0 }
 0x93b   : > { %v6709_v38 = vadd.f32 %v13893_v37, %v6639_v7  ;;  %6532 = vmatmul.bf16.gmra.mxu3 %v15580_v12 }
 0x93d   : > { %v6773_v56 = vmax.f32 %v6709_v38, 0.0 }
 0x93e   : > { %v6493_v27 = vpop.f32.mrf.mxu3 }
 0x93f   : > { %6837 = vst [vmem:[%s13906_s21 + $0x58] sm:$0xff] %v6773_v56  ;;  %v6571_v22 = vadd.f32 %v6493_v27, %v6057_v55  ;;  %v15581_v55 = vld [vmem:[#allocation174_spill] sm:$0xff]  ;;  %v15583_v27 = vld [vmem:[#allocation196_spill] sm:$0xff] }
 0x941   : > { %v6641_v10 = vmul.f32 %v13889_v31, %v6571_v22  ;;  %v5438_v8 = vpop.f32.mrf.mxu2 }
 0x942   : > { %v13967_v47 = vadd.f32 %v5438_v8, %v13549_v3  ;;  %v13988_v8 = vpop.f32.mrf.mxu0 }
 0x943   : > { %v6711_v61 = vadd.f32 %v13893_v37, %v6641_v10 }
 0x945   : > { %v6775_v28 = vmax.f32 %v6711_v61, 0.0  ;;  %6428 = vmatmul.bf16.gmra.mxu2 %v15571_v6  ;;  %v6061_v6 = vadd.f32 %v13916_v53, %v15583_v27  ;;  %v15584_v53 = vld [vmem:[#allocation171_spill] sm:$0xff] }
 0x946   : > { %v6495_v7 = vpop.f32.mrf.mxu3 }
 0x947   : > { %6839 = vst [vmem:[%s13906_s21 + $0x68] sm:$0xff] %v6775_v28  ;;  %v6573_v51 = vadd.f32 %v6495_v7, %v6059_v30 }
 0x949   : > { %v6643_v43 = vmul.f32 %v13889_v31, %v6573_v51  ;;  %v6389_v38 = vpop.f32.mrf.mxu2 }
 0x94a   : > { %v6558_v56 = vadd.f32 %v6389_v38, %v15581_v55  ;;  %v6063_v38 = vadd.f32 %v13928_v60, %v13595_v24 }
 0x94b   : > { %v6713_v3 = vadd.f32 %v13893_v37, %v6643_v43  ;;  %6537 = vmatmul.bf16.gmra.mxu3 %v15582_v25 }
 0x94c   : > { %v6628_v10 = vmul.f32 %v13977_v13, %v6558_v56 }
 0x94d   : > { %v6777_v22 = vmax.f32 %v6713_v3, 0.0 }
 0x94e   : > { %v6498_v15 = vpop.f32.mrf.mxu3  ;;  %v6698_v61 = vadd.f32 %v13982_v14, %v6628_v10 }
 0x94f   : > { %6841 = vst [vmem:[%s13906_s21 + $0x78] sm:$0xff] %v6777_v22  ;;  %v6575_v30 = vadd.f32 %v6498_v15, %v6061_v6  ;;  %v14002_v22 = vpop.f32.mrf.mxu0 }
 0x950   : > { %v6762_v28 = vmax.f32 %v6698_v61, 0.0  ;;  %v14005_v61 = vpop.f32.mrf.mxu1 }
 0x951   : > { %v6645_v4 = vmul.f32 %v13889_v31, %v6575_v30  ;;  %v6391_v7 = vpop.f32.mrf.mxu2 }
 0x952   : > { %6826 = vst [vmem:[%s13906_s21] sm:$0xff] %v6762_v28  ;;  %v6560_v43 = vadd.f32 %v6391_v7, %v15584_v53  ;;  %v15586_v28 = vld [vmem:[#allocation193_spill] sm:$0xff] }
 0x953   : > { %v6715_v51 = vadd.f32 %v13893_v37, %v6645_v4  ;;  %v6065_v4 = vadd.f32 %v13942_v16, %v15586_v28 }
 0x954   : > { %v6630_v55 = vmul.f32 %v13977_v13, %v6560_v43 }
 0x955   : > { %v6779_v3 = vmax.f32 %v6715_v51, 0.0  ;;  %6433 = vmatmul.bf16.gmra.mxu2 %v15574_v62  ;;  %v15585_v62 = vld [vmem:[#allocation77_spill] sm:$0xff] }
 0x956   : > { %v6500_v56 = vpop.f32.mrf.mxu3  ;;  %v6700_v27 = vadd.f32 %v13982_v14, %v6630_v55 }
 0x957   : > { %6843 = vst [vmem:[%s13906_s21 + $0x88] sm:$0xff] %v6779_v3  ;;  %v6577_v6 = vadd.f32 %v6500_v56, %v6063_v38  ;;  %v14017_v56 = vpop.f32.mrf.mxu0 }
 0x958   : > { %v6764_v10 = vmax.f32 %v6700_v27, 0.0 }
 0x959   : > { %v6647_v15 = vmul.f32 %v13889_v31, %v6577_v6  ;;  %v6394_v30 = vpop.f32.mrf.mxu2  ;;  %v14022_v6 = vpop.f32.mrf.mxu1 }
 0x95a   : > { %6828 = vst [vmem:[%s13906_s21 + $0x10] sm:$0xff] %v6764_v10  ;;  %v6562_v60 = vadd.f32 %v6394_v30, %v13608_v44  ;;  %v15587_v10 = vld [vmem:[#allocation31_spill] sm:$0xff] }
 0x95b   : > { %v6717_v24 = vadd.f32 %v13893_v37, %v6647_v15  ;;  %6542 = vmatmul.bf16.gmra.mxu3 %v15585_v62  ;;  %v6067_v15 = vadd.f32 %v13954_v29, %v15587_v10  ;;  %v15588_v29 = vld [vmem:[#allocation192_spill] sm:$0xff] }
 0x95c   : > { %v6632_v51 = vmul.f32 %v13977_v13, %v6562_v60 }
 0x95d   : > { %v6781_v7 = vmax.f32 %v6717_v24, 0.0 }
 0x95e   : > { %v6503_v53 = vpop.f32.mrf.mxu3  ;;  %v6702_v43 = vadd.f32 %v13982_v14, %v6632_v51 }
 0x95f   : > { %6845 = vst [vmem:[%s13906_s21 + $0x98] sm:$0xff] %v6781_v7  ;;  %v6579_v38 = vadd.f32 %v6503_v53, %v6065_v4 }
 0x960   : > { %v6766_v3 = vmax.f32 %v6702_v43, 0.0 }
 0x961   : > { %v6649_v55 = vmul.f32 %v13889_v31, %v6579_v38  ;;  %v6396_v44 = vpop.f32.mrf.mxu2  ;;  %v15589_v38 = vld [vmem:[#allocation180_spill] sm:$0xff] }
 0x962   : > { %6830 = vst [vmem:[%s13906_s21 + $0x20] sm:$0xff] %v6766_v3  ;;  %v6564_v16 = vadd.f32 %v6396_v44, %v13623_v33  ;;  %v14035_v3 = vpop.f32.mrf.mxu0 }
 0x963   : > { %v6719_v27 = vadd.f32 %v13893_v37, %v6649_v55 }
 0x964   : > { %v6634_v24 = vmul.f32 %v13977_v13, %v6564_v16  ;;  %v14040_v16 = vpop.f32.mrf.mxu1 }
 0x965   : > { %v6783_v30 = vmax.f32 %v6719_v27, 0.0  ;;  %6438 = vmatmul.bf16.gmra.mxu2 %v15576_v9  ;;  %v15590_v9 = vld [vmem:[#allocation189_spill] sm:$0xff] }
 0x966   : > { %v6505_v60 = vpop.f32.mrf.mxu3  ;;  %v6704_v28 = vadd.f32 %v13982_v14, %v6634_v24  ;;  %v6069_v55 = vadd.f32 %v13969_v18, %v15590_v9 }
 0x967   : > { %6847 = vst [vmem:[%s13906_s21 + $0xa8] sm:$0xff] %v6783_v30  ;;  %v6581_v4 = vadd.f32 %v6505_v60, %v6067_v15 }
 0x968   : > { %v6768_v7 = vmax.f32 %v6704_v28, 0.0 }
 0x969   : > { %v6651_v51 = vmul.f32 %v13889_v31, %v6581_v4  ;;  %v6399_v33 = vpop.f32.mrf.mxu2 }
 0x96a   : > { %6832 = vst [vmem:[%s13906_s21 + $0x30] sm:$0xff] %v6768_v7  ;;  %v6566_v43 = vadd.f32 %v6399_v33, %v15588_v29  ;;  %v15591_v7 = vld [vmem:[#allocation181_spill] sm:$0xff]  ;;  %v15592_v33 = vld [vmem:[#allocation116_spill] sm:$0xff]  ;;  %v6071_v29 = vadd.f32 %v13988_v8, %v13669_v39 }
 0x96b   : > { %v6721_v53 = vadd.f32 %v13893_v37, %v6651_v51  ;;  %6547 = vmatmul.bf16.gmra.mxu3 %v15589_v38  ;;  %v6234_v51 = vpop.permute.xlu0 %6233 }
 0x96c   : > { %v6636_v27 = vmul.f32 %v13977_v13, %v6566_v43 }
 0x96d   : > { %v6785_v44 = vmax.f32 %v6721_v53, 0.0  ;;  %v6266_v53 = vmul.f32 %v13760_v50, %v15592_v33  ;;  %v14059_v50 = vpop.f32.mrf.mxu1 }
 0x96e   : > { %v6508_v10 = vpop.f32.mrf.mxu3  ;;  %v6706_v15 = vadd.f32 %v13982_v14, %v6636_v27  ;;  %v15593_v27 = vld [vmem:[#allocation113_spill] sm:$0xff] }
 0x96f   : > { %6849 = vst [vmem:[%s13906_s21 + $0xb8] sm:$0xff] %v6785_v44  ;;  %v6583_v30 = vadd.f32 %v6508_v10, %v6069_v55  ;;  %v14053_v55 = vpop.f32.mrf.mxu0  ;;  %v6267_v10 = vmul.f32 %v6234_v51, %v15593_v27  ;;  %v15594_v27 = vld [vmem:[#allocation121_spill] sm:$0xff] }
 0x970   : > { %v6770_v24 = vmax.f32 %v6706_v15, 0.0 }
 0x971   : > { %v6653_v60 = vmul.f32 %v13889_v31, %v6583_v30  ;;  %v6401_v28 = vpop.f32.mrf.mxu2 }
 0x972   : > { %6834 = vst [vmem:[%s13906_s21 + $0x40] sm:$0xff] %v6770_v24  ;;  %v6568_v18 = vadd.f32 %v6401_v28, %v15591_v7  ;;  %v14061_v24 = vpack.c.bf16 %v6267_v10, %v6266_v53  ;;  %v6075_v10 = vadd.f32 %v14017_v56, %v15594_v27 }
 0x973   : > { %v6723_v4 = vadd.f32 %v13893_v37, %v6653_v60 }
 0x974   : > { %v6638_v9 = vmul.f32 %v13977_v13, %v6568_v18 }
 0x975   : > { %v6787_v43 = vmax.f32 %v6723_v4, 0.0  ;;  %6443 = vmatmul.bf16.gmra.mxu2 %v15580_v12  ;;  %v6073_v4 = vadd.f32 %v14002_v22, %v13685_v35 }
 0x976   : > { %v6510_v44 = vpop.f32.mrf.mxu3  ;;  %v6708_v15 = vadd.f32 %v13982_v14, %v6638_v9 }
 0x977   : > { %6851 = vst [vmem:[%s13906_s21 + $0xc8] sm:$0xff] %v6787_v43  ;;  %v6585_v30 = vadd.f32 %v6510_v44, %v6071_v29  ;;  %v6009_v29 = vpop.f32.mrf.mxu0  ;;  %v14074_v44 = vpop.f32.mrf.mxu1 }
 0x978   : > { %v6772_v39 = vmax.f32 %v6708_v15, 0.0 }
 0x979   : > { %v6655_v8 = vmul.f32 %v13889_v31, %v6585_v30  ;;  %v6404_v60 = vpop.f32.mrf.mxu2 }
 0x97a   : > { %6836 = vst [vmem:[%s13906_s21 + $0x50] sm:$0xff] %v6772_v39  ;;  %v6570_v12 = vadd.f32 %v6404_v60, %v13682_v46 }
 0x97b   : > { %v6725_v28 = vadd.f32 %v13893_v37, %v6655_v8  ;;  %6552 = vmatmul.bf16.gmra.mxu3 %v14061_v24 }
 0x97c   : > { %v6640_v18 = vmul.f32 %v13977_v13, %v6570_v12 }
 0x97d   : > { %v6789_v7 = vmax.f32 %v6725_v28, 0.0 }
 0x97e   : > { %v6513_v51 = vpop.f32.mrf.mxu3  ;;  %v6710_v33 = vadd.f32 %v13982_v14, %v6640_v18 }
 0x97f   : > { %6853 = vst [vmem:[%s13906_s21 + $0xd8] sm:$0xff] %v6789_v7  ;;  %v6587_v53 = vadd.f32 %v6513_v51, %v6073_v4  ;;  %v15595_v4 = vld [vmem:[#allocation179_spill] sm:$0xff]  ;;  %v6011_v7 = vpop.f32.mrf.mxu0 }
 0x980   : > { %v6774_v43 = vmax.f32 %v6710_v33, 0.0  ;;  %v14090_v33 = vpop.f32.mrf.mxu1 }
 0x981   : > { %v6657_v9 = vmul.f32 %v13889_v31, %v6587_v53  ;;  %v6406_v46 = vpop.f32.mrf.mxu2 }
 0x982   : > { %6838 = vst [vmem:[%s13906_s21 + $0x60] sm:$0xff] %v6774_v43  ;;  %v6572_v22 = vadd.f32 %v6406_v46, %v13691_v34  ;;  %v6060_v34 = vadd.f32 %v14005_v61, %v15595_v4 }
 0x983   : > { %v6727_v35 = vadd.f32 %v13893_v37, %v6657_v9 }
 0x984   : > { %v6642_v30 = vmul.f32 %v13977_v13, %v6572_v22 }
 0x985   : > { %v6791_v15 = vmax.f32 %v6727_v35, 0.0  ;;  %6448 = vmatmul.bf16.gmra.mxu2 %v15582_v25  ;;  %v15596_v25 = vld [vmem:[#allocation38_spill] sm:$0xff] }
 0x986   : > { %v6515_v39 = vpop.f32.mrf.mxu3  ;;  %v6712_v8 = vadd.f32 %v13982_v14, %v6642_v30  ;;  %v6077_v53 = vadd.f32 %v14035_v3, %v15596_v25  ;;  %v6064_v25 = vadd.f32 %v14040_v16, %v13737_v54 }
 0x987   : > { %6855 = vst [vmem:[%s13906_s21 + $0xe8] sm:$0xff] %v6791_v15  ;;  %v6589_v60 = vadd.f32 %v6515_v39, %v6075_v10  ;;  %v15597_v10 = vld [vmem:[#allocation96_spill] sm:$0xff] }
 0x988   : > { %v6776_v28 = vmax.f32 %v6712_v8, 0.0  ;;  %v6062_v15 = vadd.f32 %v14022_v6, %v15597_v10  ;;  %v6014_v8 = vpop.f32.mrf.mxu0  ;;  %v14105_v4 = vpop.f32.mrf.mxu1  ;;  %v6066_v10 = vadd.f32 %v14059_v50, %v13748_v32 }
 0x989   : > { %v6659_v12 = vmul.f32 %v13889_v31, %v6589_v60  ;;  %v6409_v18 = vpop.f32.mrf.mxu2  ;;  %v6079_v60 = vadd.f32 %v14053_v55, %v13730_v11 }
 0x98a   : > { %6840 = vst [vmem:[%s13906_s21 + $0x70] sm:$0xff] %v6776_v28  ;;  %v6574_v51 = vadd.f32 %v6409_v18, %v6060_v34 }
 0x98b   : > { %v6729_v56 = vadd.f32 %v13893_v37, %v6659_v12 }
 0x98c   : > { %v6644_v9 = vmul.f32 %v13977_v13, %v6574_v51 }
 0x98d   : > { %v6793_v43 = vmax.f32 %v6729_v56, 0.0 }
 0x98e   : > { %v6518_v46 = vpop.f32.mrf.mxu3  ;;  %v6714_v35 = vadd.f32 %v13982_v14, %v6644_v9 }
 0x98f   : > { %6857 = vst [vmem:[%s13906_s21 + $0xf8] sm:$0xff] %v6793_v43  ;;  %v6591_v61 = vadd.f32 %v6518_v46, %v6077_v53  ;;  %v6081_v43 = vadd.f32 %v6009_v29, %v13745_v59 }
 0x990   : > { %v6778_v22 = vmax.f32 %v6714_v35, 0.0  ;;  %v6016_v46 = vpop.f32.mrf.mxu0 }
 0x991   : > { %v6661_v27 = vmul.f32 %v13889_v31, %v6591_v61  ;;  %v6411_v30 = vpop.f32.mrf.mxu2 }
 0x992   : > { %6842 = vst [vmem:[%s13906_s21 + $0x80] sm:$0xff] %v6778_v22  ;;  %v6576_v3 = vadd.f32 %v6411_v30, %v6062_v15  ;;  %v6083_v30 = vadd.f32 %v6011_v7, %v13756_v40 }
 0x993   : > { %v6731_v39 = vadd.f32 %v13893_v37, %v6661_v27  ;;  %v14119_v27 = vpop.f32.mrf.mxu1 }
 0x994   : > { %v6646_v12 = vmul.f32 %v13977_v13, %v6576_v3 }
 0x995   : > { %v6795_v28 = vmax.f32 %v6731_v39, 0.0  ;;  %6453 = vmatmul.bf16.gmra.mxu2 %v15585_v62 }
 0x996   : > { %v6520_v34 = vpop.f32.mrf.mxu3  ;;  %v6716_v6 = vadd.f32 %v13982_v14, %v6646_v12 }
 0x997   : > { %6859 = vst [vmem:[%s13906_s21 + $0x108] sm:$0xff] %v6795_v28  ;;  %v6593_v18 = vadd.f32 %v6520_v34, %v6079_v60 }
 0x998   : > { %v6780_v56 = vmax.f32 %v6716_v6, 0.0  ;;  %v6019_v32 = vpop.f32.mrf.mxu0  ;;  %v6068_v6 = vadd.f32 %v14074_v44, %v13765_v36 }
 0x999   : > { %v6663_v51 = vmul.f32 %v13889_v31, %v6593_v18  ;;  %v6414_v11 = vpop.f32.mrf.mxu2 }
 0x99a   : > { %6844 = vst [vmem:[%s13906_s21 + $0x90] sm:$0xff] %v6780_v56  ;;  %v6578_v53 = vadd.f32 %v6414_v11, %v6064_v25  ;;  %v6085_v56 = vadd.f32 %v6014_v8, %v13773_v26 }
 0x99b   : > { %v6733_v55 = vadd.f32 %v13893_v37, %v6663_v51  ;;  %v14134_v18 = vpop.f32.mrf.mxu1 }
 0x99c   : > { %v6648_v9 = vmul.f32 %v13977_v13, %v6578_v53 }
 0x99d   : > { %v6797_v62 = vmax.f32 %v6733_v55, 0.0 }
 0x99e   : > { %v6523_v35 = vpop.f32.mrf.mxu3  ;;  %v6718_v61 = vadd.f32 %v13982_v14, %v6648_v9 }
 0x99f   : > { %6861 = vst [vmem:[%s13906_s21 + $0x118] sm:$0xff] %v6797_v62  ;;  %v6595_v22 = vadd.f32 %v6523_v35, %v6081_v43  ;;  %v6070_v43 = vadd.f32 %v14090_v33, %v13776_v21 }
 0x9a0   : > { %v6782_v54 = vmax.f32 %v6718_v61, 0.0  ;;  %v6021_v62 = vpop.f32.mrf.mxu0  ;;  %v6087_v61 = vadd.f32 %v6016_v46, %v13781_v63 }
 0x9a1   : > { %v6665_v16 = vmul.f32 %v13889_v31, %v6595_v22  ;;  %v6416_v15 = vpop.f32.mrf.mxu2 }
 0x9a2   : > { %6846 = vst [vmem:[%s13906_s21 + $0xa0] sm:$0xff] %v6782_v54  ;;  %v6580_v29 = vadd.f32 %v6416_v15, %v6066_v10 }
 0x9a3   : > { %v6735_v59 = vadd.f32 %v13893_v37, %v6665_v16  ;;  %v5917_v35 = vpop.f32.mrf.mxu1 }
 0x9a4   : > { %v6650_v3 = vmul.f32 %v13977_v13, %v6580_v29 }
 0x9a5   : > { %v6799_v39 = vmax.f32 %v6735_v59, 0.0  ;;  %6458 = vmatmul.bf16.gmra.mxu2 %v15589_v38  ;;  %v6072_v59 = vadd.f32 %v14105_v4, %v13788_v58 }
 0x9a6   : > { %v6525_v60 = vpop.f32.mrf.mxu3  ;;  %v6720_v28 = vadd.f32 %v13982_v14, %v6650_v3 }
 0x9a7   : > { %6863 = vst [vmem:[%s13906_s21 + $0x128] sm:$0xff] %v6799_v39  ;;  %v6597_v12 = vadd.f32 %v6525_v60, %v6083_v30 }
 0x9a8   : > { %v6784_v50 = vmax.f32 %v6720_v28, 0.0  ;;  %v6024_v30 = vpop.f32.mrf.mxu0 }
 0x9a9   : > { %v6667_v34 = vmul.f32 %v13889_v31, %v6597_v12  ;;  %v6419_v40 = vpop.f32.mrf.mxu2 }
 0x9aa   : > { %6848 = vst [vmem:[%s13906_s21 + $0xb0] sm:$0xff] %v6784_v50  ;;  %v6582_v38 = vadd.f32 %v6419_v40, %v6068_v6  ;;  %v6091_v40 = vadd.f32 %v6021_v62, %v13800_v17 }
 0x9ab   : > { %v6737_v7 = vadd.f32 %v13893_v37, %v6667_v34  ;;  %v5920_v60 = vpop.f32.mrf.mxu1  ;;  %v6074_v34 = vadd.f32 %v14119_v27, %v13796_v45 }
 0x9ac   : > { %v6652_v25 = vmul.f32 %v13977_v13, %v6582_v38 }
 0x9ad   : > { %v6801_v51 = vmax.f32 %v6737_v7, 0.0 }
 0x9ae   : > { %v6528_v11 = vpop.f32.mrf.mxu3  ;;  %v6722_v55 = vadd.f32 %v13982_v14, %v6652_v25 }
 0x9af   : > { %6865 = vst [vmem:[%s13906_s21 + $0x138] sm:$0xff] %v6801_v51  ;;  %v6599_v53 = vadd.f32 %v6528_v11, %v6085_v56 }
 0x9b0   : > { %v6786_v36 = vmax.f32 %v6722_v55, 0.0  ;;  %v6026_v56 = vpop.f32.mrf.mxu0 }
 0x9b1   : > { %v6669_v44 = vmul.f32 %v13889_v31, %v6599_v53  ;;  %v6421_v9 = vpop.f32.mrf.mxu2  ;;  %v6076_v53 = vadd.f32 %v14134_v18, %v13804_v49  ;;  %v6078_v18 = vadd.f32 %v5917_v35, %v13811_v5  ;;  %v6080_v35 = vadd.f32 %v5920_v60, %v13819_v1 }
 0x9b2   : > { %6850 = vst [vmem:[%s13906_s21 + $0xc0] sm:$0xff] %v6786_v36  ;;  %v6584_v8 = vadd.f32 %v6421_v9, %v6070_v43  ;;  %v6093_v43 = vadd.f32 %v6024_v30, %v13808_v57 }
 0x9b3   : > { %v6739_v26 = vadd.f32 %v13893_v37, %v6669_v44  ;;  %v5922_v55 = vpop.f32.mrf.mxu1 }
 0x9b4   : > { %v6654_v54 = vmul.f32 %v13977_v13, %v6584_v8 }
 0x9b5   : > { %v6803_v22 = vmax.f32 %v6739_v26, 0.0  ;;  %6463 = vmatmul.bf16.gmra.mxu2 %v14061_v24  ;;  %v6089_v24 = vadd.f32 %v6019_v32, %v13793_v42 }
 0x9b6   : > { %v6530_v16 = vpop.f32.mrf.mxu3  ;;  %v6724_v21 = vadd.f32 %v13982_v14, %v6654_v54 }
 0x9b7   : > { %6867 = vst [vmem:[%s13906_s21 + $0x148] sm:$0xff] %v6803_v22  ;;  %v6601_v33 = vadd.f32 %v6530_v16, %v6087_v61 }
 0x9b8   : > { %v6788_v10 = vmax.f32 %v6724_v21, 0.0  ;;  %v6029_v22 = vpop.f32.mrf.mxu0 }
 0x9b9   : > { %v6671_v15 = vmul.f32 %v13889_v31, %v6601_v33  ;;  %v6424_v29 = vpop.f32.mrf.mxu2 }
 0x9ba   : > { %6852 = vst [vmem:[%s13906_s21 + $0xd0] sm:$0xff] %v6788_v10  ;;  %v6586_v46 = vadd.f32 %v6424_v29, %v6072_v59  ;;  %v6095_v10 = vadd.f32 %v6026_v56, %v13815_v19  ;;  %v15599_v56 = vld [vmem:[#allocation185_spill] sm:$0xff] }
 0x9bb   : > { %v6741_v63 = vadd.f32 %v13893_v37, %v6671_v15  ;;  %v5925_v16 = vpop.f32.mrf.mxu1 }
 0x9bc   : > { %v6656_v3 = vmul.f32 %v13977_v13, %v6586_v46 }
 0x9bd   : > { %v6805_v39 = vmax.f32 %v6741_v63, 0.0 }
 0x9be   : > { %v6533_v28 = vpop.f32.mrf.mxu3  ;;  %v6726_v12 = vadd.f32 %v13982_v14, %v6656_v3 }
 0x9bf   : > { %6869 = vst [vmem:[%s13906_s21 + $0x158] sm:$0xff] %v6805_v39  ;;  %v6603_v50 = vadd.f32 %v6533_v28, %v6089_v24 }
 0x9c0   : > { %v6790_v58 = vmax.f32 %v6726_v12, 0.0  ;;  %v6031_v24 = vpop.f32.mrf.mxu0  ;;  %v6097_v12 = vadd.f32 %v6029_v22, %v13823_v0 }
 0x9c1   : > { %v6673_v4 = vmul.f32 %v13889_v31, %v6603_v50  ;;  %v6426_v6 = vpop.f32.mrf.mxu2 }
 0x9c2   : > { %6854 = vst [vmem:[%s13906_s21 + $0xe0] sm:$0xff] %v6790_v58  ;;  %v6588_v32 = vadd.f32 %v6426_v6, %v6074_v34 }
 0x9c3   : > { %v6743_v42 = vadd.f32 %v13893_v37, %v6673_v4  ;;  %v5927_v28 = vpop.f32.mrf.mxu1 }
 0x9c4   : > { %v6658_v38 = vmul.f32 %v13977_v13, %v6588_v32 }
 0x9c5   : > { %v6807_v7 = vmax.f32 %v6743_v42, 0.0  ;;  %v15598_v42 = vld [vmem:[#allocation184_spill] sm:$0xff] }
 0x9c6   : > { %v6535_v51 = vpop.f32.mrf.mxu3  ;;  %v6728_v25 = vadd.f32 %v13982_v14, %v6658_v38  ;;  %v6082_v32 = vadd.f32 %v5922_v55, %v15598_v42  ;;  %v15605_v42 = vld [vmem:[#allocation188_spill] sm:$0xff] }
 0x9c7   : > { %6871 = vst [vmem:[%s13906_s21 + $0x168] sm:$0xff] %v6807_v7  ;;  %v6605_v11 = vadd.f32 %v6535_v51, %v6091_v40  ;;  %v6099_v51 = vadd.f32 %v6031_v24, %v15599_v56 }
 0x9c8   : > { %v6792_v45 = vmax.f32 %v6728_v25, 0.0  ;;  %v6034_v38 = vpop.f32.mrf.mxu0 }
 0x9c9   : > { %v6675_v27 = vmul.f32 %v13889_v31, %v6605_v11  ;;  %v6429_v36 = vpop.f32.mrf.mxu2 }
 0x9ca   : > { %6856 = vst [vmem:[%s13906_s21 + $0xf0] sm:$0xff] %v6792_v45  ;;  %v6590_v44 = vadd.f32 %v6429_v36, %v6076_v53 }
 0x9cb   : > { %v6745_v17 = vadd.f32 %v13893_v37, %v6675_v27  ;;  %v5930_v45 = vpop.f32.mrf.mxu1 }
 0x9cc   : > { %v6660_v9 = vmul.f32 %v13977_v13, %v6590_v44  ;;  %v15600_v44 = vld [vmem:[#allocation197_spill] sm:$0xff] }
 0x9cd   : > { %v6809_v62 = vmax.f32 %v6745_v17, 0.0 }
 0x9ce   : > { %v6538_v26 = vpop.f32.mrf.mxu3  ;;  %v6730_v8 = vadd.f32 %v13982_v14, %v6660_v9 }
 0x9cf   : > { %6873 = vst [vmem:[%s13906_s21 + $0x178] sm:$0xff] %v6809_v62  ;;  %v6607_v61 = vadd.f32 %v6538_v26, %v6093_v43  ;;  %v6084_v43 = vadd.f32 %v5925_v16, %v15600_v44  ;;  %v15607_v44 = vld [vmem:[#allocation194_spill] sm:$0xff] }
 0x9d0   : > { %v6794_v54 = vmax.f32 %v6730_v8, 0.0  ;;  %v15601_v8 = vld [vmem:[#allocation65_spill] sm:$0xff] }
 0x9d1   : > { %v6677_v49 = vmul.f32 %v13889_v31, %v6607_v61  ;;  %v6431_v21 = vpop.f32.mrf.mxu2  ;;  %v6101_v61 = vadd.f32 %v6034_v38, %v15601_v8 }
 0x9d2   : > { %6858 = vst [vmem:[%s13906_s21 + $0x100] sm:$0xff] %v6794_v54  ;;  %v6592_v33 = vadd.f32 %v6431_v21, %v6078_v18 }
 0x9d3   : > { %v6747_v57 = vadd.f32 %v13893_v37, %v6677_v49  ;;  %v6036_v49 = vpop.f32.mrf.mxu0 }
 0x9d4   : > { %v6662_v59 = vmul.f32 %v13977_v13, %v6592_v33  ;;  %v5932_v33 = vpop.f32.mrf.mxu1 }
 0x9d5   : > { %v6811_v15 = vmax.f32 %v6747_v57, 0.0 }
 0x9d6   : > { %v6540_v29 = vpop.f32.mrf.mxu3  ;;  %v6732_v63 = vadd.f32 %v13982_v14, %v6662_v59 }
 0x9d7   : > { %6875 = vst [vmem:[%s13906_s21 + $0x188] sm:$0xff] %v6811_v15  ;;  %v6609_v46 = vadd.f32 %v6540_v29, %v6095_v10  ;;  %v15602_v15 = vld [vmem:[#allocation27_spill] sm:$0xff] }
 0x9d8   : > { %v6796_v30 = vmax.f32 %v6732_v63, 0.0  ;;  %v6086_v59 = vadd.f32 %v5927_v28, %v15602_v15 }
 0x9d9   : > { %v6679_v5 = vmul.f32 %v13889_v31, %v6609_v46  ;;  %v6434_v39 = vpop.f32.mrf.mxu2 }
 0x9da   : > { %6860 = vst [vmem:[%s13906_s21 + $0x110] sm:$0xff] %v6796_v30  ;;  %v6594_v3 = vadd.f32 %v6434_v39, %v6080_v35  ;;  %v15603_v30 = vld [vmem:[#allocation48_spill] sm:$0xff] }
 0x9db   : > { %v6749_v19 = vadd.f32 %v13893_v37, %v6679_v5  ;;  %v6103_v5 = vadd.f32 %v6036_v49, %v15603_v30  ;;  %v15608_v49 = vld [vmem:[#allocation79_spill] sm:$0xff] }
 0x9dc   : > { %v6664_v58 = vmul.f32 %v13977_v13, %v6594_v3 }
 0x9dd   : > { %v6813_v50 = vmax.f32 %v6749_v19, 0.0 }
 0x9de   : > { %v6543_v4 = vpop.f32.mrf.mxu3  ;;  %v6734_v34 = vadd.f32 %v13982_v14, %v6664_v58  ;;  %v15604_v58 = vld [vmem:[#allocation15_spill] sm:$0xff] }
 0x9df   : > { %6877 = vst [vmem:[%s13906_s21 + $0x198] sm:$0xff] %v6813_v50  ;;  %v6611_v6 = vadd.f32 %v6543_v4, %v6097_v12  ;;  %v6039_v12 = vpop.f32.mrf.mxu0  ;;  %v6088_v4 = vadd.f32 %v5930_v45, %v15604_v58 }
 0x9e0   : > { %v6798_v1 = vmax.f32 %v6734_v34, 0.0  ;;  %v5935_v34 = vpop.f32.mrf.mxu1 }
 0x9e1   : > { %v6681_v60 = vmul.f32 %v13889_v31, %v6611_v6  ;;  %v6436_v40 = vpop.f32.mrf.mxu2 }
 0x9e2   : > { %6862 = vst [vmem:[%s13906_s21 + $0x120] sm:$0xff] %v6798_v1  ;;  %v6596_v0 = vadd.f32 %v6436_v40, %v6082_v32  ;;  %v6105_v32 = vadd.f32 %v6039_v12, %v15605_v42 }
 0x9e3   : > { %v6751_v7 = vadd.f32 %v13893_v37, %v6681_v60 }
 0x9e4   : > { %v6666_v11 = vmul.f32 %v13977_v13, %v6596_v0 }
 0x9e5   : > { %v6815_v25 = vmax.f32 %v6751_v7, 0.0 }
 0x9e6   : > { %v6545_v27 = vpop.f32.mrf.mxu3  ;;  %v6736_v53 = vadd.f32 %v13982_v14, %v6666_v11  ;;  %v15606_v11 = vld [vmem:[#allocation100_spill] sm:$0xff] }
 0x9e7   : > { %6879 = vst [vmem:[%s13906_s21 + $0x1a8] sm:$0xff] %v6815_v25  ;;  %v6613_v36 = vadd.f32 %v6545_v27, %v6099_v51  ;;  %v6090_v45 = vadd.f32 %v5932_v33, %v15606_v11  ;;  %v6041_v27 = vpop.f32.mrf.mxu0 }
 0x9e8   : > { %v6800_v55 = vmax.f32 %v6736_v53, 0.0 }
 0x9e9   : > { %v6683_v17 = vmul.f32 %v13889_v31, %v6613_v36  ;;  %v6439_v62 = vpop.f32.mrf.mxu2 }
 0x9ea   : > { %6864 = vst [vmem:[%s13906_s21 + $0x130] sm:$0xff] %v6800_v55  ;;  %v6598_v26 = vadd.f32 %v6439_v62, %v6084_v43  ;;  %v6107_v43 = vadd.f32 %v6041_v27, %v15607_v44 }
 0x9eb   : > { %v6753_v9 = vadd.f32 %v13893_v37, %v6683_v17  ;;  %v5937_v17 = vpop.f32.mrf.mxu1 }
 0x9ec   : > { %v6668_v54 = vmul.f32 %v13977_v13, %v6598_v26 }
 0x9ed   : > { %v6817_v22 = vmax.f32 %v6753_v9, 0.0 }
 0x9ee   : > { %v6548_v18 = vpop.f32.mrf.mxu3  ;;  %v6738_v21 = vadd.f32 %v13982_v14, %v6668_v54 }
 0x9ef   : > { %6881 = vst [vmem:[%s13906_s21 + $0x1b8] sm:$0xff] %v6817_v22  ;;  %v6615_v57 = vadd.f32 %v6548_v18, %v6101_v61  ;;  %v6092_v18 = vadd.f32 %v5935_v34, %v15608_v49 }
 0x9f0   : > { %v6802_v16 = vmax.f32 %v6738_v21, 0.0 }
 0x9f1   : > { %v6685_v10 = vmul.f32 %v13889_v31, %v6615_v57  ;;  %v6441_v29 = vpop.f32.mrf.mxu2 }
 0x9f2   : > { %6866 = vst [vmem:[%s13906_s21 + $0x140] sm:$0xff] %v6802_v16  ;;  %v6600_v46 = vadd.f32 %v6441_v29, %v6086_v59 }
 0x9f3   : > { %v6755_v63 = vadd.f32 %v13893_v37, %v6685_v10  ;;  %v5940_v15 = vpop.f32.mrf.mxu1 }
 0x9f4   : > { %v6670_v24 = vmul.f32 %v13977_v13, %v6600_v46 }
 0x9f5   : > { %v6819_v35 = vmax.f32 %v6755_v63, 0.0  ;;  %v6094_v63 = vadd.f32 %v5937_v17, %v13902_v48 }
 0x9f6   : > { %v6550_v39 = vpop.f32.mrf.mxu3  ;;  %v6740_v19 = vadd.f32 %v13982_v14, %v6670_v24  ;;  %v6096_v24 = vadd.f32 %v5940_v15, %v13913_v20 }
 0x9f7   : > { %6883 = vst [vmem:[%s13906_s21 + $0x1c8] sm:$0xff] %v6819_v35  ;;  %v6617_v3 = vadd.f32 %v6550_v39, %v6103_v5 }
 0x9f8   : > { %v6804_v50 = vmax.f32 %v6740_v19, 0.0 }
 0x9f9   : > { %v6687_v28 = vmul.f32 %v13889_v31, %v6617_v3  ;;  %v6444_v6 = vpop.f32.mrf.mxu2 }
 0x9fa   : > { %6868 = vst [vmem:[%s13906_s21 + $0x150] sm:$0xff] %v6804_v50  ;;  %v6602_v60 = vadd.f32 %v6444_v6, %v6088_v4 }
 0x9fb   : > { %v6757_v1 = vadd.f32 %v13893_v37, %v6687_v28  ;;  %v5942_v5 = vpop.f32.mrf.mxu1 }
 0x9fc   : > { %v6672_v7 = vmul.f32 %v13977_v13, %v6602_v60  ;;  %v6098_v50 = vadd.f32 %v5942_v5, %v13924_v2 }
 0x9fd   : > { %v6821_v40 = vmax.f32 %v6757_v1, 0.0 }
 0x9fe   : > { %v6553_v0 = vpop.f32.mrf.mxu3  ;;  %v6742_v38 = vadd.f32 %v13982_v14, %v6672_v7 }
 0x9ff   : > { %6885 = vst [vmem:[%s13906_s21 + $0x1d8] sm:$0xff] %v6821_v40  ;;  %v6619_v56 = vadd.f32 %v6553_v0, %v6105_v32 }
 0xa00   : > { %v6806_v51 = vmax.f32 %v6742_v38, 0.0 }
 0xa01   : > { %v6689_v25 = vmul.f32 %v13889_v31, %v6619_v56  ;;  %v6446_v53 = vpop.f32.mrf.mxu2 }
 0xa02   : > { %6870 = vst [vmem:[%s13906_s21 + $0x160] sm:$0xff] %v6806_v51  ;;  %v6604_v55 = vadd.f32 %v6446_v53, %v6090_v45 }
 0xa03   : > { %v6759_v36 = vadd.f32 %v13893_v37, %v6689_v25  ;;  %v5945_v28 = vpop.f32.mrf.mxu1 }
 0xa04   : > { %v6674_v9 = vmul.f32 %v13977_v13, %v6604_v55  ;;  %v6100_v1 = vadd.f32 %v5945_v28, %v13936_v52 }
 0xa05   : > { %v6823_v62 = vmax.f32 %v6759_v36, 0.0 }
 0xa06   : > { %v6555_v26 = vpop.f32.mrf.mxu3  ;;  %v6744_v8 = vadd.f32 %v13982_v14, %v6674_v9 }
 0xa07   : > { %6887 = vst [vmem:[%s13906_s21 + $0x1e8] sm:$0xff] %v6823_v62  ;;  %v6621_v61 = vadd.f32 %v6555_v26, %v6107_v43 }
 0xa08   : > { %v6808_v22 = vmax.f32 %v6744_v8, 0.0 }
 0xa09   : > { %v6691_v54 = vmul.f32 %v13889_v31, %v6621_v61  ;;  %v6449_v21 = vpop.f32.mrf.mxu2 }
 0xa0a   : > { %6872 = vst [vmem:[%s13906_s21 + $0x170] sm:$0xff] %v6808_v22  ;;  %v6606_v33 = vadd.f32 %v6449_v21, %v6092_v18 }
 0xa0b   : > { %v6761_v57 = vadd.f32 %v13893_v37, %v6691_v54  ;;  %v5947_v32 = vpop.f32.mrf.mxu1 }
 0xa0c   : > { %v6676_v10 = vmul.f32 %v13977_v13, %v6606_v33  ;;  %v6102_v0 = vadd.f32 %v5947_v32, %v13947_v41 }
 0xa0d   : > { %v6825_v16 = vmax.f32 %v6761_v57, 0.0 }
 0xa0e   : > { %v6746_v59 = vadd.f32 %v13982_v14, %v6676_v10 }
 0xa0f   : > { %6889 = vst [vmem:[%s13906_s21 + $0x1f8] sm:$0xff] %v6825_v16 }
 0xa10   : > { %v6810_v29 = vmax.f32 %v6746_v59, 0.0 }
 0xa11   : > { %v6451_v46 = vpop.f32.mrf.mxu2 }
 0xa12   : > { %6874 = vst [vmem:[%s13906_s21 + $0x180] sm:$0xff] %v6810_v29  ;;  %v6608_v31 = vadd.f32 %v6451_v46, %v6094_v63 }
 0xa13   : > { %v5950_v52 = vpop.f32.mrf.mxu1 }
 0xa14   : > { %v6678_v30 = vmul.f32 %v13977_v13, %v6608_v31  ;;  %v6104_v45 = vadd.f32 %v5950_v52, %v13958_v23 }
 0xa16   : > { %v6748_v37 = vadd.f32 %v13982_v14, %v6678_v30 }
 0xa18   : > { %v6812_v35 = vmax.f32 %v6748_v37, 0.0 }
 0xa19   : > { %v6454_v39 = vpop.f32.mrf.mxu2 }
 0xa1a   : > { %6876 = vst [vmem:[%s13906_s21 + $0x190] sm:$0xff] %v6812_v35  ;;  %v6610_v19 = vadd.f32 %v6454_v39, %v6096_v24 }
 0xa1b   : > { %v5952_v55 = vpop.f32.mrf.mxu1 }
 0xa1c   : > { %v6680_v3 = vmul.f32 %v13977_v13, %v6610_v19  ;;  %v6106_v44 = vadd.f32 %v5952_v55, %v13967_v47 }
 0xa1e   : > { %v6750_v48 = vadd.f32 %v13982_v14, %v6680_v3 }
 0xa20   : > { %v6814_v12 = vmax.f32 %v6750_v48, 0.0 }
 0xa21   : > { %v6456_v58 = vpop.f32.mrf.mxu2 }
 0xa22   : > { %6878 = vst [vmem:[%s13906_s21 + $0x1a0] sm:$0xff] %v6814_v12  ;;  %v6612_v4 = vadd.f32 %v6456_v58, %v6098_v50 }
 0xa24   : > { %v6682_v34 = vmul.f32 %v13977_v13, %v6612_v4 }
 0xa26   : > { %v6752_v20 = vadd.f32 %v13982_v14, %v6682_v34 }
 0xa28   : > { %v6816_v6 = vmax.f32 %v6752_v20, 0.0 }
 0xa29   : > { %v6459_v60 = vpop.f32.mrf.mxu2 }
 0xa2a   : > { %6880 = vst [vmem:[%s13906_s21 + $0x1b0] sm:$0xff] %v6816_v6  ;;  %v6614_v42 = vadd.f32 %v6459_v60, %v6100_v1 }
 0xa2c   : > { %v6684_v40 = vmul.f32 %v13977_v13, %v6614_v42 }
 0xa2e   : > { %v6754_v2 = vadd.f32 %v13982_v14, %v6684_v40 }
 0xa30   : > { %v6818_v7 = vmax.f32 %v6754_v2, 0.0 }
 0xa31   : > { %v6461_v38 = vpop.f32.mrf.mxu2 }
 0xa32   : > { %6882 = vst [vmem:[%s13906_s21 + $0x1c0] sm:$0xff] %v6818_v7  ;;  %v6616_v56 = vadd.f32 %v6461_v38, %v6102_v0 }
 0xa34   : > { %v6686_v51 = vmul.f32 %v13977_v13, %v6616_v56 }
 0xa36   : > { %v6756_v25 = vadd.f32 %v13982_v14, %v6686_v51 }
 0xa38   : > { %v6820_v11 = vmax.f32 %v6756_v25, 0.0 }
 0xa39   : > { %v6464_v27 = vpop.f32.mrf.mxu2 }
 0xa3a   : > { %6884 = vst [vmem:[%s13906_s21 + $0x1d0] sm:$0xff] %v6820_v11  ;;  %v6618_v53 = vadd.f32 %v6464_v27, %v6104_v45 }
 0xa3c   : > { %v6688_v36 = vmul.f32 %v13977_v13, %v6618_v53 }
 0xa3e   : > { %v6758_v41 = vadd.f32 %v13982_v14, %v6688_v36 }
 0xa40   : > { %v6822_v17 = vmax.f32 %v6758_v41, 0.0 }
 0xa41   : > { %v6466_v43 = vpop.f32.mrf.mxu2 }
 0xa42   : > { %6886 = vst [vmem:[%s13906_s21 + $0x1e0] sm:$0xff] %v6822_v17  ;;  %v6620_v23 = vadd.f32 %v6466_v43, %v6106_v44 }
 0xa44   : > { %v6690_v62 = vmul.f32 %v13977_v13, %v6620_v23 }
 0xa46   : > { %v6760_v9 = vadd.f32 %v13982_v14, %v6690_v62 }
 0xa48   : > { %v6824_v26 = vmax.f32 %v6760_v9, 0.0 }
 0xa4a   : > { %6888 = vst [vmem:[%s13906_s21 + $0x1f0] sm:$0xff] %v6824_v26 }
 0xa4b   : > { %8141 = shalt.err (!%p8138_p3)
}
 0xa4c   : > { %s8188_s19 = smov 256   ;;  %s8189_s21 = smov 16  }
 0xa4d   : > { %7760 = dma.vmem_to_hbm [thread:$0]  (%p8273_p5), %s6904_s26, 8192, %s6906_s10, %s6891_s9, %s8188_s19, %s8188_s19, %s8189_s21  }
 0xa4e PF: > { %p7766_p4 = scmp.ge.s32.totalorder %s8176_s30, 2  ;;  %s6920_s24 = sand.u32 1, %s8164_s27  }
 0xa4f   : > { %s6921_s25 = scalar_lea.sflag [#allocation3], %s6920_s24 }
 0xa50   : > { %p7763_p7 = pnand %p7766_p4, %p8277_p6 }
 0xa52   : > { %p7764_p8 = pneg %p7763_p7 }
 0xa54   : > { %8159 = dma.done.wait (%p7764_p8), %s6921_s25, 8192  }
 0xa55   : > { %8161 = vsyncadd (%p7764_p8), %s6921_s25, 4294959104  ;;  %p18_p9 = scmp.ge.s32.totalorder %s8260_s11, 4   ;;  %s15609_s27 = smov %s8168_s28 }
 0xa56   : > { %s15610_s28 = smov %s8172_s29  ;;  %s15611_s29 = smov %s8271_s14 }
 0xa57   : > { %s15612_s30 = smov %s8260_s11  ;;  %20 = sbr.rel (!%p18_p9) target bundleno = 3 (0x3), region = 87 }
 0xa5c   :  { %6927 = vsyncpa [#allocation3], 1 }
 0xa5d   :  { %6929 = vsyncpa [#allocation3 + $0x1], 1 }

</bundles_post_ra>
